<compile_context>
chip_gen: v6e
topology: v6e:2x2x1
jax: 0.10.0
libtpu: 0.0.40
codegen_flags: <defaults>
</compile_context>

<pallas_src>
import functools

import jax
import jax.numpy as jnp
from jax.experimental import pallas as pl
from jax.experimental.pallas import tpu as pltpu

_VMEM_LIMIT = 32 * 1024 * 1024        # scoped VMEM limit (<= physical on all chips)


# ---------------------------------------------------------------------------
# In-kernel math helpers
# ---------------------------------------------------------------------------
def _gelu(x):
    # tanh-form GELU: tanh runs on the EUP slot (free next to MXU/VPU); max abs
    # deviation from exact erf-GELU ~1e-3, far inside the test tolerance.
    c = 0.7978845608028654            # sqrt(2/pi)
    return 0.5 * x * (1.0 + jnp.tanh(c * (x + 0.044715 * x * x * x)))


# ---------------------------------------------------------------------------
# Tiling / budgeting helpers (layout aware: trailing dim lane-padded to 128)
# ---------------------------------------------------------------------------
def _round_up(x, m):
    return (x + m - 1) // m * m


def _dw_row_bytes(W, C):
    Wq = _round_up(W + 2, 8)
    Cp = _round_up(C, 128)
    return (2 * Wq * Cp * 4           # input main block (f32), double-buffered
            + 2 * W * Cp * 2          # output block (bf16), double-buffered
            + Wq * Cp * 4             # in-kernel halo'd copy (f32)
            + W * Cp * 4)             # accumulator (f32)


def _fused_row_bytes(W, C, hidden):
    Wq = _round_up(W + 2, 8)
    Cp = _round_up(C, 128)
    Hp = _round_up(hidden, 128)
    C3 = _round_up(3 * C, 128)
    return (2 * Wq * Cp * 2           # cat main block (bf16), double-buffered
            + 2 * Wq * Cp * 4         # x   main block (f32),  double-buffered
            + 2 * W * Cp * 4          # out block (f32), double-buffered
            + Wq * Cp * (4 + 4 + 2)   # x halo + y halo (f32) + y halo (bf16)
            + W * C3 * 2              # dx-concatenated taps (bf16)
            + W * Hp * (4 + 4 + 2)    # 3x3 acc, gelu(acc) (f32), hidden (bf16)
            + W * Cp * 2 * 4)         # residual + 1x1 output temporaries (f32)


def _pick_h_tile(H, B, row_bytes, budget):
    """Largest divisor of H whose (tile+2)-row VMEM footprint fits `budget`;
    when B == 1, keep at least two grid steps so both TCs get work on v7x."""
    # TODO(synk): add a W tile dimension (2-D spatial tiling) for very wide
    # maps instead of letting the H tile collapse toward 1 row on v7x.
    best = 1
    for t in range(1, H + 1):
        if H % t:
            continue
        if (t + 2) * row_bytes > budget:
            continue
        if B == 1 and t == H and H > 1:
            continue
        best = t
    return best


def _pad_width(x, Wq):
    B, H, W, C = x.shape
    return jnp.pad(x, ((0, 0), (0, 0), (1, Wq - W - 1), (0, 0)))


def _edge_rows(x_wp, tile, nT):
    """x_wp: (B, H, Wq, C) width-padded NHWC.  Returns (B, nT, 2, Wq, C) = the
    rows directly above / below each H-tile (zeros at the image border), so the
    3x3 halo never needs overlapping (gathered) row tiles of the main stream."""
    B, H, Wq, C = x_wp.shape
    starts = jnp.arange(nT) * tile
    tidx, bidx = starts - 1, starts + tile
    top = jnp.where((tidx >= 0)[None, :, None, None],
                    x_wp[:, jnp.clip(tidx, 0, H - 1)], 0).astype(x_wp.dtype)
    bot = jnp.where((bidx < H)[None, :, None, None],
                    x_wp[:, jnp.clip(bidx, 0, H - 1)], 0).astype(x_wp.dtype)
    return jnp.stack([top, bot], axis=2)


# ---------------------------------------------------------------------------
# Kernel 1: depthwise 3x3 conv (pad=1, no bias), H-tiled, edge-row halo
# ---------------------------------------------------------------------------
def _dwconv3x3_kernel(xm_ref, xe_ref, w_ref, o_ref, *, tile, W):
    # xm_ref: (tile, Wq, C) main rows (width zero-padded)
    # xe_ref: (2, Wq, C) top/bottom halo rows; w_ref: (3,3,C); o_ref: (tile, W, C)
    C = o_ref.shape[-1]
    xh = jnp.concatenate([xe_ref[0:1], xm_ref[...], xe_ref[1:2]],
                         axis=0).astype(jnp.float32)
    acc = jnp.zeros((tile, W, C), jnp.float32)
    for dy in range(3):
        for dx in range(3):
            acc = acc + xh[dy:dy + tile, dx:dx + W, :] * w_ref[dy, dx, :].astype(jnp.float32)
    o_ref[...] = acc.astype(o_ref.dtype)


def pallas_dwconv3x3(x, w, *, budget=8 << 20):
    """x: (B, H, W, C) NHWC f32, w: (3, 3, C). Depthwise 3x3, pad=1, no bias.
    Returns bf16 (the level features only feed bf16 MXU matmuls downstream)."""
    # TODO(synk): a (B*C, H, W) layout with W on lanes would be lane-dense for
    # tiny chunk_dim; kept NHWC so the level features feed the fused matmul
    # kernel without an extra HBM relayout.
    B, H, W, C = x.shape
    Wq = _round_up(W + 2, 8)
    tile = _pick_h_tile(H, B, _dw_row_bytes(W, C), budget)
    nT = H // tile
    x_p = _pad_width(x, Wq)
    x_e = _edge_rows(x_p, tile, nT)
    kern = functools.partial(_dwconv3x3_kernel, tile=tile, W=W)
    return pl.pallas_call(
        kern,
        out_shape=jax.ShapeDtypeStruct((B, H, W, C), jnp.bfloat16),
        grid=(B, nT),
        in_specs=[
            pl.BlockSpec((None, tile, Wq, C), lambda b, t: (b, t, 0, 0)),
            pl.BlockSpec((None, None, 2, Wq, C), lambda b, t: (b, t, 0, 0, 0)),
            pl.BlockSpec((3, 3, C), lambda b, t: (0, 0, 0)),
        ],
        out_specs=pl.BlockSpec((None, tile, W, C), lambda b, t: (b, t, 0, 0)),
        compiler_params=pltpu.CompilerParams(
            dimension_semantics=("parallel", "parallel"),
            vmem_limit_bytes=_VMEM_LIMIT),
    )(x_p, x_e, w)


# ---------------------------------------------------------------------------
# Kernel 2: fused SAFM gate + residual + CCM + residual
#   y = gelu(cat @ Wa) * x + x ;  out = conv1x1(gelu(conv3x3(y))) + y
# ---------------------------------------------------------------------------
def _safm_ccm_kernel(cm_ref, ce_ref, xm_ref, xe_ref, wa_ref, w1_ref, w2_ref,
                     o_ref, *, tile, W):
    # cm_ref/xm_ref: (tile, Wq, C) main rows of cat (bf16) / x (f32), width padded
    # ce_ref/xe_ref: (2, Wq, C)   top & bottom halo rows
    # wa_ref: (C, C) bf16; w1_ref: (3, 3C, hidden) bf16; w2_ref: (hidden, C) bf16
    C = o_ref.shape[-1]
    hidden = w2_ref.shape[0]
    Wq = cm_ref.shape[1]
    M = (tile + 2) * Wq

    # ---- SAFM gate + AttBlock residual (recomputed on the 1-row halo) ------
    cat_h = jnp.concatenate([ce_ref[0:1], cm_ref[...], ce_ref[1:2]], axis=0)
    x_h = jnp.concatenate([xe_ref[0:1], xm_ref[...], xe_ref[1:2]],
                          axis=0).astype(jnp.float32)
    a = jnp.dot(cat_h.reshape(M, C), wa_ref[...],
                preferred_element_type=jnp.float32)
    x2 = x_h.reshape(M, C)
    y2 = _gelu(a) * x2 + x2                        # f32; =0 at all zero padding
    y_h = y2.reshape(tile + 2, Wq, C)

    # ---- CCM: 3x3 conv (3 matmuls, K = 3C), GELU, 1x1 conv, + y residual ----
    res = y_h[1:1 + tile, 1:1 + W, :].reshape(tile * W, C)
    yb = y_h.astype(jnp.bfloat16)
    ycol = jnp.concatenate(                        # dx taps batched along K
        [yb[:, 0:W, :], yb[:, 1:1 + W, :], yb[:, 2:2 + W, :]], axis=-1)
    acc = jnp.zeros((tile * W, hidden), jnp.float32)
    for dy in range(3):
        acc = acc + jnp.dot(ycol[dy:dy + tile].reshape(tile * W, 3 * C),
                            w1_ref[dy], preferred_element_type=jnp.float32)
    hid = _gelu(acc).astype(jnp.bfloat16)          # hidden never leaves VMEM
    out = jnp.dot(hid, w2_ref[...], preferred_element_type=jnp.float32) + res
    o_ref[...] = out.reshape(tile, W, C).astype(o_ref.dtype)


def pallas_safm_ccm(cat, x, wa, w1, w2, *, budget=12 << 20):
    """cat: (B,H,W,C) level features; x: (B,H,W,C) f32; wa: (C,C);
    w1: (3,3,C,hidden) HWIO; w2: (hidden,C).  Returns (B,H,W,C) f32."""
    B, H, W, C = x.shape
    hidden = w2.shape[0]
    Wq = _round_up(W + 2, 8)          # width halo padded to a sublane multiple
    tile = _pick_h_tile(H, B, _fused_row_bytes(W, C, hidden), budget)
    nT = H // tile
    cat_p = _pad_width(cat.astype(jnp.bfloat16), Wq)
    x_p = _pad_width(x, Wq)
    cat_e = _edge_rows(cat_p, tile, nT)
    x_e = _edge_rows(x_p, tile, nT)
    wa_b = wa.astype(jnp.bfloat16)
    w1_b = w1.reshape(3, 3 * C, hidden).astype(jnp.bfloat16)   # [dy][dx*C+c][o]
    w2_b = w2.astype(jnp.bfloat16)
    kern = functools.partial(_safm_ccm_kernel, tile=tile, W=W)
    return pl.pallas_call(
        kern,
        out_shape=jax.ShapeDtypeStruct((B, H, W, C), x.dtype),
        grid=(B, nT),
        in_specs=[
            pl.BlockSpec((None, tile, Wq, C), lambda b, t: (b, t, 0, 0)),
            pl.BlockSpec((None, None, 2, Wq, C), lambda b, t: (b, t, 0, 0, 0)),
            pl.BlockSpec((None, tile, Wq, C), lambda b, t: (b, t, 0, 0)),
            pl.BlockSpec((None, None, 2, Wq, C), lambda b, t: (b, t, 0, 0, 0)),
            pl.BlockSpec((C, C), lambda b, t: (0, 0)),
            pl.BlockSpec((3, 3 * C, hidden), lambda b, t: (0, 0, 0)),
            pl.BlockSpec((hidden, C), lambda b, t: (0, 0)),
        ],
        out_specs=pl.BlockSpec((None, tile, W, C), lambda b, t: (b, t, 0, 0)),
        compiler_params=pltpu.CompilerParams(
            dimension_semantics=("parallel", "parallel"),
            vmem_limit_bytes=_VMEM_LIMIT),
    )(cat_p, cat_e, x_p, x_e, wa_b, w1_b, w2_b)


# ---------------------------------------------------------------------------
# Plain-JAX glue (pure data movement on the small pyramid maps)
# ---------------------------------------------------------------------------
def _adaptive_max_pool(x, ph, pw):
    """adaptive_max_pool2d for the evenly-divisible case."""
    B, H, W, C = x.shape
    ky, kx = H // ph, W // pw
    return x.reshape(B, ph, ky, pw, kx, C).max(axis=(2, 4))


def _upsample_nearest(x, H, W):
    B, h, w, C = x.shape
    x = jnp.repeat(x, H // h, axis=1)
    return jnp.repeat(x, W // w, axis=2)


# ---------------------------------------------------------------------------
# AttBlock forward
# ---------------------------------------------------------------------------
def att_block_forward(x_nchw, params, n_levels=4):
    """x_nchw: (B, C, H, W) float32.  Returns (B, C, H, W)."""
    B, C, H, W = x_nchw.shape
    cc = C // n_levels
    assert C % n_levels == 0
    # evenly-divisible adaptive pooling / upsample (matches PyTorch here)
    assert H % (2 ** n_levels) == 0 and W % (2 ** n_levels) == 0
    xh = jnp.transpose(x_nchw, (0, 2, 3, 1))              # NHWC

    # ---- SAFM multiscale features (bf16) ----
    outs = []
    for i in range(n_levels):
        xi = xh[..., i * cc:(i + 1) * cc]
        if i == 0:
            s = pallas_dwconv3x3(xi, params["mfr"][0])
        else:
            ph, pw = H // (2 ** (i + 1)), W // (2 ** (i + 1))
            s = _adaptive_max_pool(xi, ph, pw)
            s = pallas_dwconv3x3(s, params["mfr"][i])
            s = _upsample_nearest(s, H, W)
        outs.append(s)
    # TODO(synk): pass the 4 level maps straight into the fused kernel (coarse
    # BlockSpecs + in-kernel repeat) to drop the upsampled / concat HBM copies.
    cat = jnp.concatenate(outs, axis=-1)                   # (B, H, W, C) bf16

    # ---- fused SAFM gate + residual + CCM + residual ----
    out = pallas_safm_ccm(cat, xh, params["aggr"], params["ccm1"], params["ccm2"])
    return jnp.transpose(out, (0, 3, 1, 2))                # back to NCHW


# ---------------------------------------------------------------------------
# Pure-JAX f32 reference (lax.conv based) for the correctness check
# ---------------------------------------------------------------------------
def _conv_ref(x, w, pad, groups=1):
    return jax.lax.conv_general_dilated(
        x, w, window_strides=(1, 1), padding=((pad, pad), (pad, pad)),
        dimension_numbers=("NHWC", "HWIO", "NHWC"),
        feature_group_count=groups, precision=jax.lax.Precision.HIGHEST)


def ref_forward(x_nchw, params, n_levels=4):
    B, C, H, W = x_nchw.shape
    cc = C // n_levels
    x = jnp.transpose(x_nchw, (0, 2, 3, 1))
    outs = []
    for i in range(n_levels):
        xi = x[..., i * cc:(i + 1) * cc]
        wi = params["mfr"][i][:, :, None, :]               # HWIO, I=1 (depthwise)
        if i == 0:
            s = _conv_ref(xi, wi, pad=1, groups=cc)
        else:
            ph, pw = H // (2 ** (i + 1)), W // (2 ** (i + 1))
            s = _adaptive_max_pool(xi, ph, pw)
            s = _conv_ref(s, wi, pad=1, groups=cc)
            s = _upsample_nearest(s, H, W)
        outs.append(s)
    cat = jnp.concatenate(outs, axis=-1)
    agg = _conv_ref(cat, params["aggr"][None, None], pad=0)
    y = jax.nn.gelu(agg, approximate=False) * x + x
    h1 = jax.nn.gelu(_conv_ref(y, params["ccm1"], pad=1), approximate=False)
    out = _conv_ref(h1, params["ccm2"][None, None], pad=0) + y
    return jnp.transpose(out, (0, 3, 1, 2))


# ---------------------------------------------------------------------------
if __name__ == "__main__":
    B, C, H, W = 2, 4, 16, 16          # dim=4, n_levels=4 -> chunk_dim=1
    ffn_scale = 2.0
    hidden = int(C * ffn_scale)        # 8
    n_levels = 4
    cc = C // n_levels

    key = jax.random.PRNGKey(0)
    ks = jax.random.split(key, 8)
    params = {
        # depthwise 3x3 filters, stored as (kh, kw, chunk_dim)
        "mfr": [0.3 * jax.random.normal(ks[i], (3, 3, cc), jnp.float32)
                for i in range(n_levels)],
        # 1x1 aggr conv, stored as (Cin, Cout)
        "aggr": (C ** -0.5) * jax.random.normal(ks[4], (C, C), jnp.float32),
        # CCM 3x3 conv, stored HWIO (3, 3, Cin, hidden)
        "ccm1": ((9 * C) ** -0.5) * jax.random.normal(ks[5], (3, 3, C, hidden), jnp.float32),
        # CCM 1x1 conv, stored as (hidden, Cout)
        "ccm2": (hidden ** -0.5) * jax.random.normal(ks[6], (hidden, C), jnp.float32),
    }
    x = jax.random.normal(ks[7], (B, C, H, W), jnp.float32)

    fwd = jax.jit(functools.partial(att_block_forward, n_levels=n_levels))
    out = jax.block_until_ready(fwd(x, params))

    assert out.shape == x.shape and out.dtype == x.dtype
    assert bool(jnp.all(jnp.isfinite(out)))

    ref = ref_forward(x, params, n_levels=n_levels)
    err = float(jnp.max(jnp.abs(out - ref)))
    scale = float(jnp.max(jnp.abs(ref)))
    # MXU operands are explicit bf16 (plus tanh GELU); allow a few % rel error
    # against the f32 / exact-GELU reference.
    tol = 4e-2 * max(1.0, scale)
    if err > tol:
        raise AssertionError(
            f"Pallas output mismatch vs JAX reference: max abs err {err} (tol {tol})")

    print("KERNEL_OK")
</pallas_src>

<mosaic_0001>
module attributes {stable_mosaic.version = 11 : i64} {
  func.func @_dwconv3x3_kernel(%arg0: i32, %arg1: i32, %arg2: memref<1x4x8x1xf32, #tpu.memory_space<vmem>>, %arg3: memref<1x1x2x8x1xf32, #tpu.memory_space<vmem>>, %arg4: memref<3x3x1xf32, #tpu.memory_space<vmem>>, %arg5: memref<1x4x4x1xbf16, #tpu.memory_space<vmem>>) attributes {dimension_semantics = [#tpu.dimension_semantics<parallel>, #tpu.dimension_semantics<parallel>], iteration_bounds = array<i64: 2, 1>, scalar_prefetch = 0 : i64, scratch_operands = 0 : i64, tpu.core_type = #tpu.core_type<tc>, window_params = [{transform_indices = @transform_0, window_bounds = array<i64: 1, 4, 8, 1>}, {transform_indices = @transform_1, window_bounds = array<i64: 1, 1, 2, 8, 1>}, {pipeline_mode = #tpu.pipeline_mode<synchronous>, transform_indices = @transform_2, window_bounds = array<i64: 3, 3, 1>}, {transform_indices = @transform_3, window_bounds = array<i64: 1, 4, 4, 1>}]} {
    %c0 = arith.constant 0 : index
    %c0_0 = arith.constant 0 : index
    %c0_1 = arith.constant 0 : index
    %c0_2 = arith.constant 0 : index
    %c0_3 = arith.constant 0 : index
    %0 = vector.load %arg3[%c0, %c0_0, %c0_1, %c0_2, %c0_3] : memref<1x1x2x8x1xf32, #tpu.memory_space<vmem>>, vector<1x1x1x8x1xf32>
    %1 = vector.shape_cast %0 : vector<1x1x1x8x1xf32> to vector<1x8x1xf32>
    %c0_4 = arith.constant 0 : index
    %c0_5 = arith.constant 0 : index
    %c0_6 = arith.constant 0 : index
    %c0_7 = arith.constant 0 : index
    %2 = vector.load %arg2[%c0_4, %c0_5, %c0_6, %c0_7] : memref<1x4x8x1xf32, #tpu.memory_space<vmem>>, vector<1x4x8x1xf32>
    %3 = vector.shape_cast %2 : vector<1x4x8x1xf32> to vector<4x8x1xf32>
    %c0_8 = arith.constant 0 : index
    %c0_9 = arith.constant 0 : index
    %c1 = arith.constant 1 : index
    %c0_10 = arith.constant 0 : index
    %c0_11 = arith.constant 0 : index
    %4 = vector.load %arg3[%c0_8, %c0_9, %c1, %c0_10, %c0_11] : memref<1x1x2x8x1xf32, #tpu.memory_space<vmem>>, vector<1x1x1x8x1xf32>
    %5 = vector.shape_cast %4 : vector<1x1x1x8x1xf32> to vector<1x8x1xf32>
    %6 = tpu.concatenate %1, %3, %5 in 0 : vector<1x8x1xf32>, vector<4x8x1xf32>, vector<1x8x1xf32> -> vector<6x8x1xf32>
    %cst = arith.constant 0.000000e+00 : f32
    %7 = vector.broadcast %cst : f32 to vector<4x4x1xf32>
    %8 = vector.extract_strided_slice %6 {offsets = [0, 0, 0], sizes = [4, 4, 1], strides = [1, 1, 1]} : vector<6x8x1xf32> to vector<4x4x1xf32>
    %c0_12 = arith.constant 0 : index
    %c0_13 = arith.constant 0 : index
    %c0_14 = arith.constant 0 : index
    %9 = vector.load %arg4[%c0_12, %c0_13, %c0_14] : memref<3x3x1xf32, #tpu.memory_space<vmem>>, vector<1x1x1xf32>
    %10 = vector.shape_cast %9 : vector<1x1x1xf32> to vector<1xf32>
    %11 = vector.shape_cast %10 : vector<1xf32> to vector<1x1x1xf32>
    %12 = vector.broadcast %11 : vector<1x1x1xf32> to vector<4x4x1xf32>
    %13 = arith.mulf %8, %12 : vector<4x4x1xf32>
    %14 = arith.addf %7, %13 : vector<4x4x1xf32>
    %15 = vector.extract_strided_slice %6 {offsets = [0, 1, 0], sizes = [4, 4, 1], strides = [1, 1, 1]} : vector<6x8x1xf32> to vector<4x4x1xf32>
    %c0_15 = arith.constant 0 : index
    %c1_16 = arith.constant 1 : index
    %c0_17 = arith.constant 0 : index
    %16 = vector.load %arg4[%c0_15, %c1_16, %c0_17] : memref<3x3x1xf32, #tpu.memory_space<vmem>>, vector<1x1x1xf32>
    %17 = vector.shape_cast %16 : vector<1x1x1xf32> to vector<1xf32>
    %18 = vector.shape_cast %17 : vector<1xf32> to vector<1x1x1xf32>
    %19 = vector.broadcast %18 : vector<1x1x1xf32> to vector<4x4x1xf32>
    %20 = arith.mulf %15, %19 : vector<4x4x1xf32>
    %21 = arith.addf %14, %20 : vector<4x4x1xf32>
    %22 = vector.extract_strided_slice %6 {offsets = [0, 2, 0], sizes = [4, 4, 1], strides = [1, 1, 1]} : vector<6x8x1xf32> to vector<4x4x1xf32>
    %c0_18 = arith.constant 0 : index
    %c2 = arith.constant 2 : index
    %c0_19 = arith.constant 0 : index
    %23 = vector.load %arg4[%c0_18, %c2, %c0_19] : memref<3x3x1xf32, #tpu.memory_space<vmem>>, vector<1x1x1xf32>
    %24 = vector.shape_cast %23 : vector<1x1x1xf32> to vector<1xf32>
    %25 = vector.shape_cast %24 : vector<1xf32> to vector<1x1x1xf32>
    %26 = vector.broadcast %25 : vector<1x1x1xf32> to vector<4x4x1xf32>
    %27 = arith.mulf %22, %26 : vector<4x4x1xf32>
    %28 = arith.addf %21, %27 : vector<4x4x1xf32>
    %29 = vector.extract_strided_slice %6 {offsets = [1, 0, 0], sizes = [4, 4, 1], strides = [1, 1, 1]} : vector<6x8x1xf32> to vector<4x4x1xf32>
    %c1_20 = arith.constant 1 : index
    %c0_21 = arith.constant 0 : index
    %c0_22 = arith.constant 0 : index
    %30 = vector.load %arg4[%c1_20, %c0_21, %c0_22] : memref<3x3x1xf32, #tpu.memory_space<vmem>>, vector<1x1x1xf32>
    %31 = vector.shape_cast %30 : vector<1x1x1xf32> to vector<1xf32>
    %32 = vector.shape_cast %31 : vector<1xf32> to vector<1x1x1xf32>
    %33 = vector.broadcast %32 : vector<1x1x1xf32> to vector<4x4x1xf32>
    %34 = arith.mulf %29, %33 : vector<4x4x1xf32>
    %35 = arith.addf %28, %34 : vector<4x4x1xf32>
    %36 = vector.extract_strided_slice %6 {offsets = [1, 1, 0], sizes = [4, 4, 1], strides = [1, 1, 1]} : vector<6x8x1xf32> to vector<4x4x1xf32>
    %c1_23 = arith.constant 1 : index
    %c1_24 = arith.constant 1 : index
    %c0_25 = arith.constant 0 : index
    %37 = vector.load %arg4[%c1_23, %c1_24, %c0_25] : memref<3x3x1xf32, #tpu.memory_space<vmem>>, vector<1x1x1xf32>
    %38 = vector.shape_cast %37 : vector<1x1x1xf32> to vector<1xf32>
    %39 = vector.shape_cast %38 : vector<1xf32> to vector<1x1x1xf32>
    %40 = vector.broadcast %39 : vector<1x1x1xf32> to vector<4x4x1xf32>
    %41 = arith.mulf %36, %40 : vector<4x4x1xf32>
    %42 = arith.addf %35, %41 : vector<4x4x1xf32>
    %43 = vector.extract_strided_slice %6 {offsets = [1, 2, 0], sizes = [4, 4, 1], strides = [1, 1, 1]} : vector<6x8x1xf32> to vector<4x4x1xf32>
    %c1_26 = arith.constant 1 : index
    %c2_27 = arith.constant 2 : index
    %c0_28 = arith.constant 0 : index
    %44 = vector.load %arg4[%c1_26, %c2_27, %c0_28] : memref<3x3x1xf32, #tpu.memory_space<vmem>>, vector<1x1x1xf32>
    %45 = vector.shape_cast %44 : vector<1x1x1xf32> to vector<1xf32>
    %46 = vector.shape_cast %45 : vector<1xf32> to vector<1x1x1xf32>
    %47 = vector.broadcast %46 : vector<1x1x1xf32> to vector<4x4x1xf32>
    %48 = arith.mulf %43, %47 : vector<4x4x1xf32>
    %49 = arith.addf %42, %48 : vector<4x4x1xf32>
    %50 = vector.extract_strided_slice %6 {offsets = [2, 0, 0], sizes = [4, 4, 1], strides = [1, 1, 1]} : vector<6x8x1xf32> to vector<4x4x1xf32>
    %c2_29 = arith.constant 2 : index
    %c0_30 = arith.constant 0 : index
    %c0_31 = arith.constant 0 : index
    %51 = vector.load %arg4[%c2_29, %c0_30, %c0_31] : memref<3x3x1xf32, #tpu.memory_space<vmem>>, vector<1x1x1xf32>
    %52 = vector.shape_cast %51 : vector<1x1x1xf32> to vector<1xf32>
    %53 = vector.shape_cast %52 : vector<1xf32> to vector<1x1x1xf32>
    %54 = vector.broadcast %53 : vector<1x1x1xf32> to vector<4x4x1xf32>
    %55 = arith.mulf %50, %54 : vector<4x4x1xf32>
    %56 = arith.addf %49, %55 : vector<4x4x1xf32>
    %57 = vector.extract_strided_slice %6 {offsets = [2, 1, 0], sizes = [4, 4, 1], strides = [1, 1, 1]} : vector<6x8x1xf32> to vector<4x4x1xf32>
    %c2_32 = arith.constant 2 : index
    %c1_33 = arith.constant 1 : index
    %c0_34 = arith.constant 0 : index
    %58 = vector.load %arg4[%c2_32, %c1_33, %c0_34] : memref<3x3x1xf32, #tpu.memory_space<vmem>>, vector<1x1x1xf32>
    %59 = vector.shape_cast %58 : vector<1x1x1xf32> to vector<1xf32>
    %60 = vector.shape_cast %59 : vector<1xf32> to vector<1x1x1xf32>
    %61 = vector.broadcast %60 : vector<1x1x1xf32> to vector<4x4x1xf32>
    %62 = arith.mulf %57, %61 : vector<4x4x1xf32>
    %63 = arith.addf %56, %62 : vector<4x4x1xf32>
    %64 = vector.extract_strided_slice %6 {offsets = [2, 2, 0], sizes = [4, 4, 1], strides = [1, 1, 1]} : vector<6x8x1xf32> to vector<4x4x1xf32>
    %c2_35 = arith.constant 2 : index
    %c2_36 = arith.constant 2 : index
    %c0_37 = arith.constant 0 : index
    %65 = vector.load %arg4[%c2_35, %c2_36, %c0_37] : memref<3x3x1xf32, #tpu.memory_space<vmem>>, vector<1x1x1xf32>
    %66 = vector.shape_cast %65 : vector<1x1x1xf32> to vector<1xf32>
    %67 = vector.shape_cast %66 : vector<1xf32> to vector<1x1x1xf32>
    %68 = vector.broadcast %67 : vector<1x1x1xf32> to vector<4x4x1xf32>
    %69 = arith.mulf %64, %68 : vector<4x4x1xf32>
    %70 = arith.addf %63, %69 : vector<4x4x1xf32>
    %71 = arith.truncf %70 : vector<4x4x1xf32> to vector<4x4x1xbf16>
    %c0_38 = arith.constant 0 : index
    %c0_39 = arith.constant 0 : index
    %c0_40 = arith.constant 0 : index
    %c0_41 = arith.constant 0 : index
    %72 = vector.load %arg5[%c0_38, %c0_39, %c0_40, %c0_41] : memref<1x4x4x1xbf16, #tpu.memory_space<vmem>>, vector<1x4x4x1xbf16>
    %73 = vector.shape_cast %72 : vector<1x4x4x1xbf16> to vector<4x4x1xbf16>
    %74 = vector.shape_cast %71 : vector<4x4x1xbf16> to vector<1x4x4x1xbf16>
    tpu.vector_store %arg5[%c0_38, %c0_39, %c0_40, %c0_41], %74 {strides = array<i32>} : memref<1x4x4x1xbf16, #tpu.memory_space<vmem>>, vector<1x4x4x1xbf16>,
    return
  }
  func.func @transform_0(%arg0: i32, %arg1: i32) -> (i32, i32, i32, i32) {
    %c0_i32 = arith.constant 0 : i32
    %c0_i32_0 = arith.constant 0 : i32
    %c0_i32_1 = arith.constant 0 : i32
    return %arg0, %arg1, %c0_i32, %c0_i32_0 : i32, i32, i32, i32
  }
  func.func @transform_1(%arg0: i32, %arg1: i32) -> (i32, i32, i32, i32, i32) {
    %c0_i32 = arith.constant 0 : i32
    %c0_i32_0 = arith.constant 0 : i32
    %c0_i32_1 = arith.constant 0 : i32
    %c0_i32_2 = arith.constant 0 : i32
    return %arg0, %arg1, %c0_i32, %c0_i32_0, %c0_i32_1 : i32, i32, i32, i32, i32
  }
  func.func @transform_2(%arg0: i32, %arg1: i32) -> (i32, i32, i32) {
    %c0_i32 = arith.constant 0 : i32
    %c0_i32_0 = arith.constant 0 : i32
    %c0_i32_1 = arith.constant 0 : i32
    %c0_i32_2 = arith.constant 0 : i32
    return %c0_i32, %c0_i32_0, %c0_i32_1 : i32, i32, i32
  }
  func.func @transform_3(%arg0: i32, %arg1: i32) -> (i32, i32, i32, i32) {
    %c0_i32 = arith.constant 0 : i32
    %c0_i32_0 = arith.constant 0 : i32
    %c0_i32_1 = arith.constant 0 : i32
    return %arg0, %arg1, %c0_i32, %c0_i32_0 : i32, i32, i32, i32
  }
}

module attributes {stable_mosaic.version = 11 : i64} {
  func.func @_dwconv3x3_kernel(%arg0: i32, %arg1: i32, %arg2: memref<1x2x8x1xf32, #tpu.memory_space<vmem>>, %arg3: memref<1x1x2x8x1xf32, #tpu.memory_space<vmem>>, %arg4: memref<3x3x1xf32, #tpu.memory_space<vmem>>, %arg5: memref<1x2x2x1xbf16, #tpu.memory_space<vmem>>) attributes {dimension_semantics = [#tpu.dimension_semantics<parallel>, #tpu.dimension_semantics<parallel>], iteration_bounds = array<i64: 2, 1>, scalar_prefetch = 0 : i64, scratch_operands = 0 : i64, tpu.core_type = #tpu.core_type<tc>, window_params = [{transform_indices = @transform_0, window_bounds = array<i64: 1, 2, 8, 1>}, {transform_indices = @transform_1, window_bounds = array<i64: 1, 1, 2, 8, 1>}, {pipeline_mode = #tpu.pipeline_mode<synchronous>, transform_indices = @transform_2, window_bounds = array<i64: 3, 3, 1>}, {transform_indices = @transform_3, window_bounds = array<i64: 1, 2, 2, 1>}]} {
    %c0 = arith.constant 0 : index
    %c0_0 = arith.constant 0 : index
    %c0_1 = arith.constant 0 : index
    %c0_2 = arith.constant 0 : index
    %c0_3 = arith.constant 0 : index
    %0 = vector.load %arg3[%c0, %c0_0, %c0_1, %c0_2, %c0_3] : memref<1x1x2x8x1xf32, #tpu.memory_space<vmem>>, vector<1x1x1x8x1xf32>
    %1 = vector.shape_cast %0 : vector<1x1x1x8x1xf32> to vector<1x8x1xf32>
    %c0_4 = arith.constant 0 : index
    %c0_5 = arith.constant 0 : index
    %c0_6 = arith.constant 0 : index
    %c0_7 = arith.constant 0 : index
    %2 = vector.load %arg2[%c0_4, %c0_5, %c0_6, %c0_7] : memref<1x2x8x1xf32, #tpu.memory_space<vmem>>, vector<1x2x8x1xf32>
    %3 = vector.shape_cast %2 : vector<1x2x8x1xf32> to vector<2x8x1xf32>
    %c0_8 = arith.constant 0 : index
    %c0_9 = arith.constant 0 : index
    %c1 = arith.constant 1 : index
    %c0_10 = arith.constant 0 : index
    %c0_11 = arith.constant 0 : index
    %4 = vector.load %arg3[%c0_8, %c0_9, %c1, %c0_10, %c0_11] : memref<1x1x2x8x1xf32, #tpu.memory_space<vmem>>, vector<1x1x1x8x1xf32>
    %5 = vector.shape_cast %4 : vector<1x1x1x8x1xf32> to vector<1x8x1xf32>
    %6 = tpu.concatenate %1, %3, %5 in 0 : vector<1x8x1xf32>, vector<2x8x1xf32>, vector<1x8x1xf32> -> vector<4x8x1xf32>
    %cst = arith.constant 0.000000e+00 : f32
    %7 = vector.broadcast %cst : f32 to vector<2x2x1xf32>
    %8 = vector.extract_strided_slice %6 {offsets = [0, 0, 0], sizes = [2, 2, 1], strides = [1, 1, 1]} : vector<4x8x1xf32> to vector<2x2x1xf32>
    %c0_12 = arith.constant 0 : index
    %c0_13 = arith.constant 0 : index
    %c0_14 = arith.constant 0 : index
    %9 = vector.load %arg4[%c0_12, %c0_13, %c0_14] : memref<3x3x1xf32, #tpu.memory_space<vmem>>, vector<1x1x1xf32>
    %10 = vector.shape_cast %9 : vector<1x1x1xf32> to vector<1xf32>
    %11 = vector.shape_cast %10 : vector<1xf32> to vector<1x1x1xf32>
    %12 = vector.broadcast %11 : vector<1x1x1xf32> to vector<2x2x1xf32>
    %13 = arith.mulf %8, %12 : vector<2x2x1xf32>
    %14 = arith.addf %7, %13 : vector<2x2x1xf32>
    %15 = vector.extract_strided_slice %6 {offsets = [0, 1, 0], sizes = [2, 2, 1], strides = [1, 1, 1]} : vector<4x8x1xf32> to vector<2x2x1xf32>
    %c0_15 = arith.constant 0 : index
    %c1_16 = arith.constant 1 : index
    %c0_17 = arith.constant 0 : index
    %16 = vector.load %arg4[%c0_15, %c1_16, %c0_17] : memref<3x3x1xf32, #tpu.memory_space<vmem>>, vector<1x1x1xf32>
    %17 = vector.shape_cast %16 : vector<1x1x1xf32> to vector<1xf32>
    %18 = vector.shape_cast %17 : vector<1xf32> to vector<1x1x1xf32>
    %19 = vector.broadcast %18 : vector<1x1x1xf32> to vector<2x2x1xf32>
    %20 = arith.mulf %15, %19 : vector<2x2x1xf32>
    %21 = arith.addf %14, %20 : vector<2x2x1xf32>
    %22 = vector.extract_strided_slice %6 {offsets = [0, 2, 0], sizes = [2, 2, 1], strides = [1, 1, 1]} : vector<4x8x1xf32> to vector<2x2x1xf32>
    %c0_18 = arith.constant 0 : index
    %c2 = arith.constant 2 : index
    %c0_19 = arith.constant 0 : index
    %23 = vector.load %arg4[%c0_18, %c2, %c0_19] : memref<3x3x1xf32, #tpu.memory_space<vmem>>, vector<1x1x1xf32>
    %24 = vector.shape_cast %23 : vector<1x1x1xf32> to vector<1xf32>
    %25 = vector.shape_cast %24 : vector<1xf32> to vector<1x1x1xf32>
    %26 = vector.broadcast %25 : vector<1x1x1xf32> to vector<2x2x1xf32>
    %27 = arith.mulf %22, %26 : vector<2x2x1xf32>
    %28 = arith.addf %21, %27 : vector<2x2x1xf32>
    %29 = vector.extract_strided_slice %6 {offsets = [1, 0, 0], sizes = [2, 2, 1], strides = [1, 1, 1]} : vector<4x8x1xf32> to vector<2x2x1xf32>
    %c1_20 = arith.constant 1 : index
    %c0_21 = arith.constant 0 : index
    %c0_22 = arith.constant 0 : index
    %30 = vector.load %arg4[%c1_20, %c0_21, %c0_22] : memref<3x3x1xf32, #tpu.memory_space<vmem>>, vector<1x1x1xf32>
    %31 = vector.shape_cast %30 : vector<1x1x1xf32> to vector<1xf32>
    %32 = vector.shape_cast %31 : vector<1xf32> to vector<1x1x1xf32>
    %33 = vector.broadcast %32 : vector<1x1x1xf32> to vector<2x2x1xf32>
    %34 = arith.mulf %29, %33 : vector<2x2x1xf32>
    %35 = arith.addf %28, %34 : vector<2x2x1xf32>
    %36 = vector.extract_strided_slice %6 {offsets = [1, 1, 0], sizes = [2, 2, 1], strides = [1, 1, 1]} : vector<4x8x1xf32> to vector<2x2x1xf32>
    %c1_23 = arith.constant 1 : index
    %c1_24 = arith.constant 1 : index
    %c0_25 = arith.constant 0 : index
    %37 = vector.load %arg4[%c1_23, %c1_24, %c0_25] : memref<3x3x1xf32, #tpu.memory_space<vmem>>, vector<1x1x1xf32>
    %38 = vector.shape_cast %37 : vector<1x1x1xf32> to vector<1xf32>
    %39 = vector.shape_cast %38 : vector<1xf32> to vector<1x1x1xf32>
    %40 = vector.broadcast %39 : vector<1x1x1xf32> to vector<2x2x1xf32>
    %41 = arith.mulf %36, %40 : vector<2x2x1xf32>
    %42 = arith.addf %35, %41 : vector<2x2x1xf32>
    %43 = vector.extract_strided_slice %6 {offsets = [1, 2, 0], sizes = [2, 2, 1], strides = [1, 1, 1]} : vector<4x8x1xf32> to vector<2x2x1xf32>
    %c1_26 = arith.constant 1 : index
    %c2_27 = arith.constant 2 : index
    %c0_28 = arith.constant 0 : index
    %44 = vector.load %arg4[%c1_26, %c2_27, %c0_28] : memref<3x3x1xf32, #tpu.memory_space<vmem>>, vector<1x1x1xf32>
    %45 = vector.shape_cast %44 : vector<1x1x1xf32> to vector<1xf32>
    %46 = vector.shape_cast %45 : vector<1xf32> to vector<1x1x1xf32>
    %47 = vector.broadcast %46 : vector<1x1x1xf32> to vector<2x2x1xf32>
    %48 = arith.mulf %43, %47 : vector<2x2x1xf32>
    %49 = arith.addf %42, %48 : vector<2x2x1xf32>
    %50 = vector.extract_strided_slice %6 {offsets = [2, 0, 0], sizes = [2, 2, 1], strides = [1, 1, 1]} : vector<4x8x1xf32> to vector<2x2x1xf32>
    %c2_29 = arith.constant 2 : index
    %c0_30 = arith.constant 0 : index
    %c0_31 = arith.constant 0 : index
    %51 = vector.load %arg4[%c2_29, %c0_30, %c0_31] : memref<3x3x1xf32, #tpu.memory_space<vmem>>, vector<1x1x1xf32>
    %52 = vector.shape_cast %51 : vector<1x1x1xf32> to vector<1xf32>
    %53 = vector.shape_cast %52 : vector<1xf32> to vector<1x1x1xf32>
    %54 = vector.broadcast %53 : vector<1x1x1xf32> to vector<2x2x1xf32>
    %55 = arith.mulf %50, %54 : vector<2x2x1xf32>
    %56 = arith.addf %49, %55 : vector<2x2x1xf32>
    %57 = vector.extract_strided_slice %6 {offsets = [2, 1, 0], sizes = [2, 2, 1], strides = [1, 1, 1]} : vector<4x8x1xf32> to vector<2x2x1xf32>
    %c2_32 = arith.constant 2 : index
    %c1_33 = arith.constant 1 : index
    %c0_34 = arith.constant 0 : index
    %58 = vector.load %arg4[%c2_32, %c1_33, %c0_34] : memref<3x3x1xf32, #tpu.memory_space<vmem>>, vector<1x1x1xf32>
    %59 = vector.shape_cast %58 : vector<1x1x1xf32> to vector<1xf32>
    %60 = vector.shape_cast %59 : vector<1xf32> to vector<1x1x1xf32>
    %61 = vector.broadcast %60 : vector<1x1x1xf32> to vector<2x2x1xf32>
    %62 = arith.mulf %57, %61 : vector<2x2x1xf32>
    %63 = arith.addf %56, %62 : vector<2x2x1xf32>
    %64 = vector.extract_strided_slice %6 {offsets = [2, 2, 0], sizes = [2, 2, 1], strides = [1, 1, 1]} : vector<4x8x1xf32> to vector<2x2x1xf32>
    %c2_35 = arith.constant 2 : index
    %c2_36 = arith.constant 2 : index
    %c0_37 = arith.constant 0 : index
    %65 = vector.load %arg4[%c2_35, %c2_36, %c0_37] : memref<3x3x1xf32, #tpu.memory_space<vmem>>, vector<1x1x1xf32>
    %66 = vector.shape_cast %65 : vector<1x1x1xf32> to vector<1xf32>
    %67 = vector.shape_cast %66 : vector<1xf32> to vector<1x1x1xf32>
    %68 = vector.broadcast %67 : vector<1x1x1xf32> to vector<2x2x1xf32>
    %69 = arith.mulf %64, %68 : vector<2x2x1xf32>
    %70 = arith.addf %63, %69 : vector<2x2x1xf32>
    %71 = arith.truncf %70 : vector<2x2x1xf32> to vector<2x2x1xbf16>
    %c0_38 = arith.constant 0 : index
    %c0_39 = arith.constant 0 : index
    %c0_40 = arith.constant 0 : index
    %c0_41 = arith.constant 0 : index
    %72 = vector.load %arg5[%c0_38, %c0_39, %c0_40, %c0_41] : memref<1x2x2x1xbf16, #tpu.memory_space<vmem>>, vector<1x2x2x1xbf16>
    %73 = vector.shape_cast %72 : vector<1x2x2x1xbf16> to vector<2x2x1xbf16>
    %74 = vector.shape_cast %71 : vector<2x2x1xbf16> to vector<1x2x2x1xbf16>
    tpu.vector_store %arg5[%c0_38, %c0_39, %c0_40, %c0_41], %74 {strides = array<i32>} : memref<1x2x2x1xbf16, #tpu.memory_space<vmem>>, vector<1x2x2x1xbf16>,
    return
  }
  func.func @transform_0(%arg0: i32, %arg1: i32) -> (i32, i32, i32, i32) {
    %c0_i32 = arith.constant 0 : i32
    %c0_i32_0 = arith.constant 0 : i32
    %c0_i32_1 = arith.constant 0 : i32
    return %arg0, %arg1, %c0_i32, %c0_i32_0 : i32, i32, i32, i32
  }
  func.func @transform_1(%arg0: i32, %arg1: i32) -> (i32, i32, i32, i32, i32) {
    %c0_i32 = arith.constant 0 : i32
    %c0_i32_0 = arith.constant 0 : i32
    %c0_i32_1 = arith.constant 0 : i32
    %c0_i32_2 = arith.constant 0 : i32
    return %arg0, %arg1, %c0_i32, %c0_i32_0, %c0_i32_1 : i32, i32, i32, i32, i32
  }
  func.func @transform_2(%arg0: i32, %arg1: i32) -> (i32, i32, i32) {
    %c0_i32 = arith.constant 0 : i32
    %c0_i32_0 = arith.constant 0 : i32
    %c0_i32_1 = arith.constant 0 : i32
    %c0_i32_2 = arith.constant 0 : i32
    return %c0_i32, %c0_i32_0, %c0_i32_1 : i32, i32, i32
  }
  func.func @transform_3(%arg0: i32, %arg1: i32) -> (i32, i32, i32, i32) {
    %c0_i32 = arith.constant 0 : i32
    %c0_i32_0 = arith.constant 0 : i32
    %c0_i32_1 = arith.constant 0 : i32
    return %arg0, %arg1, %c0_i32, %c0_i32_0 : i32, i32, i32, i32
  }
}

module attributes {stable_mosaic.version = 11 : i64} {
  func.func @_dwconv3x3_kernel(%arg0: i32, %arg1: i32, %arg2: memref<1x1x8x1xf32, #tpu.memory_space<vmem>>, %arg3: memref<1x1x2x8x1xf32, #tpu.memory_space<vmem>>, %arg4: memref<3x3x1xf32, #tpu.memory_space<vmem>>, %arg5: memref<1x1x1x1xbf16, #tpu.memory_space<vmem>>) attributes {dimension_semantics = [#tpu.dimension_semantics<parallel>, #tpu.dimension_semantics<parallel>], iteration_bounds = array<i64: 2, 1>, scalar_prefetch = 0 : i64, scratch_operands = 0 : i64, tpu.core_type = #tpu.core_type<tc>, window_params = [{transform_indices = @transform_0, window_bounds = array<i64: 1, 1, 8, 1>}, {transform_indices = @transform_1, window_bounds = array<i64: 1, 1, 2, 8, 1>}, {pipeline_mode = #tpu.pipeline_mode<synchronous>, transform_indices = @transform_2, window_bounds = array<i64: 3, 3, 1>}, {transform_indices = @transform_3, window_bounds = array<i64: 1, 1, 1, 1>}]} {
    %c0 = arith.constant 0 : index
    %c0_0 = arith.constant 0 : index
    %c0_1 = arith.constant 0 : index
    %c0_2 = arith.constant 0 : index
    %c0_3 = arith.constant 0 : index
    %0 = vector.load %arg3[%c0, %c0_0, %c0_1, %c0_2, %c0_3] : memref<1x1x2x8x1xf32, #tpu.memory_space<vmem>>, vector<1x1x1x8x1xf32>
    %1 = vector.shape_cast %0 : vector<1x1x1x8x1xf32> to vector<1x8x1xf32>
    %c0_4 = arith.constant 0 : index
    %c0_5 = arith.constant 0 : index
    %c0_6 = arith.constant 0 : index
    %c0_7 = arith.constant 0 : index
    %2 = vector.load %arg2[%c0_4, %c0_5, %c0_6, %c0_7] : memref<1x1x8x1xf32, #tpu.memory_space<vmem>>, vector<1x1x8x1xf32>
    %3 = vector.shape_cast %2 : vector<1x1x8x1xf32> to vector<1x8x1xf32>
    %c0_8 = arith.constant 0 : index
    %c0_9 = arith.constant 0 : index
    %c1 = arith.constant 1 : index
    %c0_10 = arith.constant 0 : index
    %c0_11 = arith.constant 0 : index
    %4 = vector.load %arg3[%c0_8, %c0_9, %c1, %c0_10, %c0_11] : memref<1x1x2x8x1xf32, #tpu.memory_space<vmem>>, vector<1x1x1x8x1xf32>
    %5 = vector.shape_cast %4 : vector<1x1x1x8x1xf32> to vector<1x8x1xf32>
    %6 = tpu.concatenate %1, %3, %5 in 0 : vector<1x8x1xf32>, vector<1x8x1xf32>, vector<1x8x1xf32> -> vector<3x8x1xf32>
    %cst = arith.constant 0.000000e+00 : f32
    %7 = vector.broadcast %cst : f32 to vector<1x1x1xf32>
    %8 = vector.extract_strided_slice %6 {offsets = [0, 0, 0], sizes = [1, 1, 1], strides = [1, 1, 1]} : vector<3x8x1xf32> to vector<1x1x1xf32>
    %c0_12 = arith.constant 0 : index
    %c0_13 = arith.constant 0 : index
    %c0_14 = arith.constant 0 : index
    %9 = vector.load %arg4[%c0_12, %c0_13, %c0_14] : memref<3x3x1xf32, #tpu.memory_space<vmem>>, vector<1x1x1xf32>
    %10 = vector.shape_cast %9 : vector<1x1x1xf32> to vector<1xf32>
    %11 = vector.shape_cast %10 : vector<1xf32> to vector<1x1x1xf32>
    %12 = arith.mulf %8, %11 : vector<1x1x1xf32>
    %13 = arith.addf %7, %12 : vector<1x1x1xf32>
    %14 = vector.extract_strided_slice %6 {offsets = [0, 1, 0], sizes = [1, 1, 1], strides = [1, 1, 1]} : vector<3x8x1xf32> to vector<1x1x1xf32>
    %c0_15 = arith.constant 0 : index
    %c1_16 = arith.constant 1 : index
    %c0_17 = arith.constant 0 : index
    %15 = vector.load %arg4[%c0_15, %c1_16, %c0_17] : memref<3x3x1xf32, #tpu.memory_space<vmem>>, vector<1x1x1xf32>
    %16 = vector.shape_cast %15 : vector<1x1x1xf32> to vector<1xf32>
    %17 = vector.shape_cast %16 : vector<1xf32> to vector<1x1x1xf32>
    %18 = arith.mulf %14, %17 : vector<1x1x1xf32>
    %19 = arith.addf %13, %18 : vector<1x1x1xf32>
    %20 = vector.extract_strided_slice %6 {offsets = [0, 2, 0], sizes = [1, 1, 1], strides = [1, 1, 1]} : vector<3x8x1xf32> to vector<1x1x1xf32>
    %c0_18 = arith.constant 0 : index
    %c2 = arith.constant 2 : index
    %c0_19 = arith.constant 0 : index
    %21 = vector.load %arg4[%c0_18, %c2, %c0_19] : memref<3x3x1xf32, #tpu.memory_space<vmem>>, vector<1x1x1xf32>
    %22 = vector.shape_cast %21 : vector<1x1x1xf32> to vector<1xf32>
    %23 = vector.shape_cast %22 : vector<1xf32> to vector<1x1x1xf32>
    %24 = arith.mulf %20, %23 : vector<1x1x1xf32>
    %25 = arith.addf %19, %24 : vector<1x1x1xf32>
    %26 = vector.extract_strided_slice %6 {offsets = [1, 0, 0], sizes = [1, 1, 1], strides = [1, 1, 1]} : vector<3x8x1xf32> to vector<1x1x1xf32>
    %c1_20 = arith.constant 1 : index
    %c0_21 = arith.constant 0 : index
    %c0_22 = arith.constant 0 : index
    %27 = vector.load %arg4[%c1_20, %c0_21, %c0_22] : memref<3x3x1xf32, #tpu.memory_space<vmem>>, vector<1x1x1xf32>
    %28 = vector.shape_cast %27 : vector<1x1x1xf32> to vector<1xf32>
    %29 = vector.shape_cast %28 : vector<1xf32> to vector<1x1x1xf32>
    %30 = arith.mulf %26, %29 : vector<1x1x1xf32>
    %31 = arith.addf %25, %30 : vector<1x1x1xf32>
    %32 = vector.extract_strided_slice %6 {offsets = [1, 1, 0], sizes = [1, 1, 1], strides = [1, 1, 1]} : vector<3x8x1xf32> to vector<1x1x1xf32>
    %c1_23 = arith.constant 1 : index
    %c1_24 = arith.constant 1 : index
    %c0_25 = arith.constant 0 : index
    %33 = vector.load %arg4[%c1_23, %c1_24, %c0_25] : memref<3x3x1xf32, #tpu.memory_space<vmem>>, vector<1x1x1xf32>
    %34 = vector.shape_cast %33 : vector<1x1x1xf32> to vector<1xf32>
    %35 = vector.shape_cast %34 : vector<1xf32> to vector<1x1x1xf32>
    %36 = arith.mulf %32, %35 : vector<1x1x1xf32>
    %37 = arith.addf %31, %36 : vector<1x1x1xf32>
    %38 = vector.extract_strided_slice %6 {offsets = [1, 2, 0], sizes = [1, 1, 1], strides = [1, 1, 1]} : vector<3x8x1xf32> to vector<1x1x1xf32>
    %c1_26 = arith.constant 1 : index
    %c2_27 = arith.constant 2 : index
    %c0_28 = arith.constant 0 : index
    %39 = vector.load %arg4[%c1_26, %c2_27, %c0_28] : memref<3x3x1xf32, #tpu.memory_space<vmem>>, vector<1x1x1xf32>
    %40 = vector.shape_cast %39 : vector<1x1x1xf32> to vector<1xf32>
    %41 = vector.shape_cast %40 : vector<1xf32> to vector<1x1x1xf32>
    %42 = arith.mulf %38, %41 : vector<1x1x1xf32>
    %43 = arith.addf %37, %42 : vector<1x1x1xf32>
    %44 = vector.extract_strided_slice %6 {offsets = [2, 0, 0], sizes = [1, 1, 1], strides = [1, 1, 1]} : vector<3x8x1xf32> to vector<1x1x1xf32>
    %c2_29 = arith.constant 2 : index
    %c0_30 = arith.constant 0 : index
    %c0_31 = arith.constant 0 : index
    %45 = vector.load %arg4[%c2_29, %c0_30, %c0_31] : memref<3x3x1xf32, #tpu.memory_space<vmem>>, vector<1x1x1xf32>
    %46 = vector.shape_cast %45 : vector<1x1x1xf32> to vector<1xf32>
    %47 = vector.shape_cast %46 : vector<1xf32> to vector<1x1x1xf32>
    %48 = arith.mulf %44, %47 : vector<1x1x1xf32>
    %49 = arith.addf %43, %48 : vector<1x1x1xf32>
    %50 = vector.extract_strided_slice %6 {offsets = [2, 1, 0], sizes = [1, 1, 1], strides = [1, 1, 1]} : vector<3x8x1xf32> to vector<1x1x1xf32>
    %c2_32 = arith.constant 2 : index
    %c1_33 = arith.constant 1 : index
    %c0_34 = arith.constant 0 : index
    %51 = vector.load %arg4[%c2_32, %c1_33, %c0_34] : memref<3x3x1xf32, #tpu.memory_space<vmem>>, vector<1x1x1xf32>
    %52 = vector.shape_cast %51 : vector<1x1x1xf32> to vector<1xf32>
    %53 = vector.shape_cast %52 : vector<1xf32> to vector<1x1x1xf32>
    %54 = arith.mulf %50, %53 : vector<1x1x1xf32>
    %55 = arith.addf %49, %54 : vector<1x1x1xf32>
    %56 = vector.extract_strided_slice %6 {offsets = [2, 2, 0], sizes = [1, 1, 1], strides = [1, 1, 1]} : vector<3x8x1xf32> to vector<1x1x1xf32>
    %c2_35 = arith.constant 2 : index
    %c2_36 = arith.constant 2 : index
    %c0_37 = arith.constant 0 : index
    %57 = vector.load %arg4[%c2_35, %c2_36, %c0_37] : memref<3x3x1xf32, #tpu.memory_space<vmem>>, vector<1x1x1xf32>
    %58 = vector.shape_cast %57 : vector<1x1x1xf32> to vector<1xf32>
    %59 = vector.shape_cast %58 : vector<1xf32> to vector<1x1x1xf32>
    %60 = arith.mulf %56, %59 : vector<1x1x1xf32>
    %61 = arith.addf %55, %60 : vector<1x1x1xf32>
    %62 = arith.truncf %61 : vector<1x1x1xf32> to vector<1x1x1xbf16>
    %c0_38 = arith.constant 0 : index
    %c0_39 = arith.constant 0 : index
    %c0_40 = arith.constant 0 : index
    %c0_41 = arith.constant 0 : index
    %63 = vector.load %arg5[%c0_38, %c0_39, %c0_40, %c0_41] : memref<1x1x1x1xbf16, #tpu.memory_space<vmem>>, vector<1x1x1x1xbf16>
    %64 = vector.shape_cast %63 : vector<1x1x1x1xbf16> to vector<1x1x1xbf16>
    %65 = vector.shape_cast %62 : vector<1x1x1xbf16> to vector<1x1x1x1xbf16>
    tpu.vector_store %arg5[%c0_38, %c0_39, %c0_40, %c0_41], %65 {strides = array<i32>} : memref<1x1x1x1xbf16, #tpu.memory_space<vmem>>, vector<1x1x1x1xbf16>,
    return
  }
  func.func @transform_0(%arg0: i32, %arg1: i32) -> (i32, i32, i32, i32) {
    %c0_i32 = arith.constant 0 : i32
    %c0_i32_0 = arith.constant 0 : i32
    %c0_i32_1 = arith.constant 0 : i32
    return %arg0, %arg1, %c0_i32, %c0_i32_0 : i32, i32, i32, i32
  }
  func.func @transform_1(%arg0: i32, %arg1: i32) -> (i32, i32, i32, i32, i32) {
    %c0_i32 = arith.constant 0 : i32
    %c0_i32_0 = arith.constant 0 : i32
    %c0_i32_1 = arith.constant 0 : i32
    %c0_i32_2 = arith.constant 0 : i32
    return %arg0, %arg1, %c0_i32, %c0_i32_0, %c0_i32_1 : i32, i32, i32, i32, i32
  }
  func.func @transform_2(%arg0: i32, %arg1: i32) -> (i32, i32, i32) {
    %c0_i32 = arith.constant 0 : i32
    %c0_i32_0 = arith.constant 0 : i32
    %c0_i32_1 = arith.constant 0 : i32
    %c0_i32_2 = arith.constant 0 : i32
    return %c0_i32, %c0_i32_0, %c0_i32_1 : i32, i32, i32
  }
  func.func @transform_3(%arg0: i32, %arg1: i32) -> (i32, i32, i32, i32) {
    %c0_i32 = arith.constant 0 : i32
    %c0_i32_0 = arith.constant 0 : i32
    %c0_i32_1 = arith.constant 0 : i32
    return %arg0, %arg1, %c0_i32, %c0_i32_0 : i32, i32, i32, i32
  }
}

module attributes {stable_mosaic.version = 11 : i64} {
  func.func @_dwconv3x3_kernel(%arg0: i32, %arg1: i32, %arg2: memref<1x16x24x1xf32, #tpu.memory_space<vmem>>, %arg3: memref<1x1x2x24x1xf32, #tpu.memory_space<vmem>>, %arg4: memref<3x3x1xf32, #tpu.memory_space<vmem>>, %arg5: memref<1x16x16x1xbf16, #tpu.memory_space<vmem>>) attributes {dimension_semantics = [#tpu.dimension_semantics<parallel>, #tpu.dimension_semantics<parallel>], iteration_bounds = array<i64: 2, 1>, scalar_prefetch = 0 : i64, scratch_operands = 0 : i64, tpu.core_type = #tpu.core_type<tc>, window_params = [{transform_indices = @transform_0, window_bounds = array<i64: 1, 16, 24, 1>}, {transform_indices = @transform_1, window_bounds = array<i64: 1, 1, 2, 24, 1>}, {pipeline_mode = #tpu.pipeline_mode<synchronous>, transform_indices = @transform_2, window_bounds = array<i64: 3, 3, 1>}, {transform_indices = @transform_3, window_bounds = array<i64: 1, 16, 16, 1>}]} {
    %c0 = arith.constant 0 : index
    %c0_0 = arith.constant 0 : index
    %c0_1 = arith.constant 0 : index
    %c0_2 = arith.constant 0 : index
    %c0_3 = arith.constant 0 : index
    %0 = vector.load %arg3[%c0, %c0_0, %c0_1, %c0_2, %c0_3] : memref<1x1x2x24x1xf32, #tpu.memory_space<vmem>>, vector<1x1x1x24x1xf32>
    %1 = vector.shape_cast %0 : vector<1x1x1x24x1xf32> to vector<1x24x1xf32>
    %c0_4 = arith.constant 0 : index
    %c0_5 = arith.constant 0 : index
    %c0_6 = arith.constant 0 : index
    %c0_7 = arith.constant 0 : index
    %2 = vector.load %arg2[%c0_4, %c0_5, %c0_6, %c0_7] : memref<1x16x24x1xf32, #tpu.memory_space<vmem>>, vector<1x16x24x1xf32>
    %3 = vector.shape_cast %2 : vector<1x16x24x1xf32> to vector<16x24x1xf32>
    %c0_8 = arith.constant 0 : index
    %c0_9 = arith.constant 0 : index
    %c1 = arith.constant 1 : index
    %c0_10 = arith.constant 0 : index
    %c0_11 = arith.constant 0 : index
    %4 = vector.load %arg3[%c0_8, %c0_9, %c1, %c0_10, %c0_11] : memref<1x1x2x24x1xf32, #tpu.memory_space<vmem>>, vector<1x1x1x24x1xf32>
    %5 = vector.shape_cast %4 : vector<1x1x1x24x1xf32> to vector<1x24x1xf32>
    %6 = tpu.concatenate %1, %3, %5 in 0 : vector<1x24x1xf32>, vector<16x24x1xf32>, vector<1x24x1xf32> -> vector<18x24x1xf32>
    %cst = arith.constant 0.000000e+00 : f32
    %7 = vector.broadcast %cst : f32 to vector<16x16x1xf32>
    %8 = vector.extract_strided_slice %6 {offsets = [0, 0, 0], sizes = [16, 16, 1], strides = [1, 1, 1]} : vector<18x24x1xf32> to vector<16x16x1xf32>
    %c0_12 = arith.constant 0 : index
    %c0_13 = arith.constant 0 : index
    %c0_14 = arith.constant 0 : index
    %9 = vector.load %arg4[%c0_12, %c0_13, %c0_14] : memref<3x3x1xf32, #tpu.memory_space<vmem>>, vector<1x1x1xf32>
    %10 = vector.shape_cast %9 : vector<1x1x1xf32> to vector<1xf32>
    %11 = vector.shape_cast %10 : vector<1xf32> to vector<1x1x1xf32>
    %12 = vector.broadcast %11 : vector<1x1x1xf32> to vector<16x16x1xf32>
    %13 = arith.mulf %8, %12 : vector<16x16x1xf32>
    %14 = arith.addf %7, %13 : vector<16x16x1xf32>
    %15 = vector.extract_strided_slice %6 {offsets = [0, 1, 0], sizes = [16, 16, 1], strides = [1, 1, 1]} : vector<18x24x1xf32> to vector<16x16x1xf32>
    %c0_15 = arith.constant 0 : index
    %c1_16 = arith.constant 1 : index
    %c0_17 = arith.constant 0 : index
    %16 = vector.load %arg4[%c0_15, %c1_16, %c0_17] : memref<3x3x1xf32, #tpu.memory_space<vmem>>, vector<1x1x1xf32>
    %17 = vector.shape_cast %16 : vector<1x1x1xf32> to vector<1xf32>
    %18 = vector.shape_cast %17 : vector<1xf32> to vector<1x1x1xf32>
    %19 = vector.broadcast %18 : vector<1x1x1xf32> to vector<16x16x1xf32>
    %20 = arith.mulf %15, %19 : vector<16x16x1xf32>
    %21 = arith.addf %14, %20 : vector<16x16x1xf32>
    %22 = vector.extract_strided_slice %6 {offsets = [0, 2, 0], sizes = [16, 16, 1], strides = [1, 1, 1]} : vector<18x24x1xf32> to vector<16x16x1xf32>
    %c0_18 = arith.constant 0 : index
    %c2 = arith.constant 2 : index
    %c0_19 = arith.constant 0 : index
    %23 = vector.load %arg4[%c0_18, %c2, %c0_19] : memref<3x3x1xf32, #tpu.memory_space<vmem>>, vector<1x1x1xf32>
    %24 = vector.shape_cast %23 : vector<1x1x1xf32> to vector<1xf32>
    %25 = vector.shape_cast %24 : vector<1xf32> to vector<1x1x1xf32>
    %26 = vector.broadcast %25 : vector<1x1x1xf32> to vector<16x16x1xf32>
    %27 = arith.mulf %22, %26 : vector<16x16x1xf32>
    %28 = arith.addf %21, %27 : vector<16x16x1xf32>
    %29 = vector.extract_strided_slice %6 {offsets = [1, 0, 0], sizes = [16, 16, 1], strides = [1, 1, 1]} : vector<18x24x1xf32> to vector<16x16x1xf32>
    %c1_20 = arith.constant 1 : index
    %c0_21 = arith.constant 0 : index
    %c0_22 = arith.constant 0 : index
    %30 = vector.load %arg4[%c1_20, %c0_21, %c0_22] : memref<3x3x1xf32, #tpu.memory_space<vmem>>, vector<1x1x1xf32>
    %31 = vector.shape_cast %30 : vector<1x1x1xf32> to vector<1xf32>
    %32 = vector.shape_cast %31 : vector<1xf32> to vector<1x1x1xf32>
    %33 = vector.broadcast %32 : vector<1x1x1xf32> to vector<16x16x1xf32>
    %34 = arith.mulf %29, %33 : vector<16x16x1xf32>
    %35 = arith.addf %28, %34 : vector<16x16x1xf32>
    %36 = vector.extract_strided_slice %6 {offsets = [1, 1, 0], sizes = [16, 16, 1], strides = [1, 1, 1]} : vector<18x24x1xf32> to vector<16x16x1xf32>
    %c1_23 = arith.constant 1 : index
    %c1_24 = arith.constant 1 : index
    %c0_25 = arith.constant 0 : index
    %37 = vector.load %arg4[%c1_23, %c1_24, %c0_25] : memref<3x3x1xf32, #tpu.memory_space<vmem>>, vector<1x1x1xf32>
    %38 = vector.shape_cast %37 : vector<1x1x1xf32> to vector<1xf32>
    %39 = vector.shape_cast %38 : vector<1xf32> to vector<1x1x1xf32>
    %40 = vector.broadcast %39 : vector<1x1x1xf32> to vector<16x16x1xf32>
    %41 = arith.mulf %36, %40 : vector<16x16x1xf32>
    %42 = arith.addf %35, %41 : vector<16x16x1xf32>
    %43 = vector.extract_strided_slice %6 {offsets = [1, 2, 0], sizes = [16, 16, 1], strides = [1, 1, 1]} : vector<18x24x1xf32> to vector<16x16x1xf32>
    %c1_26 = arith.constant 1 : index
    %c2_27 = arith.constant 2 : index
    %c0_28 = arith.constant 0 : index
    %44 = vector.load %arg4[%c1_26, %c2_27, %c0_28] : memref<3x3x1xf32, #tpu.memory_space<vmem>>, vector<1x1x1xf32>
    %45 = vector.shape_cast %44 : vector<1x1x1xf32> to vector<1xf32>
    %46 = vector.shape_cast %45 : vector<1xf32> to vector<1x1x1xf32>
    %47 = vector.broadcast %46 : vector<1x1x1xf32> to vector<16x16x1xf32>
    %48 = arith.mulf %43, %47 : vector<16x16x1xf32>
    %49 = arith.addf %42, %48 : vector<16x16x1xf32>
    %50 = vector.extract_strided_slice %6 {offsets = [2, 0, 0], sizes = [16, 16, 1], strides = [1, 1, 1]} : vector<18x24x1xf32> to vector<16x16x1xf32>
    %c2_29 = arith.constant 2 : index
    %c0_30 = arith.constant 0 : index
    %c0_31 = arith.constant 0 : index
    %51 = vector.load %arg4[%c2_29, %c0_30, %c0_31] : memref<3x3x1xf32, #tpu.memory_space<vmem>>, vector<1x1x1xf32>
    %52 = vector.shape_cast %51 : vector<1x1x1xf32> to vector<1xf32>
    %53 = vector.shape_cast %52 : vector<1xf32> to vector<1x1x1xf32>
    %54 = vector.broadcast %53 : vector<1x1x1xf32> to vector<16x16x1xf32>
    %55 = arith.mulf %50, %54 : vector<16x16x1xf32>
    %56 = arith.addf %49, %55 : vector<16x16x1xf32>
    %57 = vector.extract_strided_slice %6 {offsets = [2, 1, 0], sizes = [16, 16, 1], strides = [1, 1, 1]} : vector<18x24x1xf32> to vector<16x16x1xf32>
    %c2_32 = arith.constant 2 : index
    %c1_33 = arith.constant 1 : index
    %c0_34 = arith.constant 0 : index
    %58 = vector.load %arg4[%c2_32, %c1_33, %c0_34] : memref<3x3x1xf32, #tpu.memory_space<vmem>>, vector<1x1x1xf32>
    %59 = vector.shape_cast %58 : vector<1x1x1xf32> to vector<1xf32>
    %60 = vector.shape_cast %59 : vector<1xf32> to vector<1x1x1xf32>
    %61 = vector.broadcast %60 : vector<1x1x1xf32> to vector<16x16x1xf32>
    %62 = arith.mulf %57, %61 : vector<16x16x1xf32>
    %63 = arith.addf %56, %62 : vector<16x16x1xf32>
    %64 = vector.extract_strided_slice %6 {offsets = [2, 2, 0], sizes = [16, 16, 1], strides = [1, 1, 1]} : vector<18x24x1xf32> to vector<16x16x1xf32>
    %c2_35 = arith.constant 2 : index
    %c2_36 = arith.constant 2 : index
    %c0_37 = arith.constant 0 : index
    %65 = vector.load %arg4[%c2_35, %c2_36, %c0_37] : memref<3x3x1xf32, #tpu.memory_space<vmem>>, vector<1x1x1xf32>
    %66 = vector.shape_cast %65 : vector<1x1x1xf32> to vector<1xf32>
    %67 = vector.shape_cast %66 : vector<1xf32> to vector<1x1x1xf32>
    %68 = vector.broadcast %67 : vector<1x1x1xf32> to vector<16x16x1xf32>
    %69 = arith.mulf %64, %68 : vector<16x16x1xf32>
    %70 = arith.addf %63, %69 : vector<16x16x1xf32>
    %71 = arith.truncf %70 : vector<16x16x1xf32> to vector<16x16x1xbf16>
    %c0_38 = arith.constant 0 : index
    %c0_39 = arith.constant 0 : index
    %c0_40 = arith.constant 0 : index
    %c0_41 = arith.constant 0 : index
    %72 = vector.load %arg5[%c0_38, %c0_39, %c0_40, %c0_41] : memref<1x16x16x1xbf16, #tpu.memory_space<vmem>>, vector<1x16x16x1xbf16>
    %73 = vector.shape_cast %72 : vector<1x16x16x1xbf16> to vector<16x16x1xbf16>
    %74 = vector.shape_cast %71 : vector<16x16x1xbf16> to vector<1x16x16x1xbf16>
    tpu.vector_store %arg5[%c0_38, %c0_39, %c0_40, %c0_41], %74 {strides = array<i32>} : memref<1x16x16x1xbf16, #tpu.memory_space<vmem>>, vector<1x16x16x1xbf16>,
    return
  }
  func.func @transform_0(%arg0: i32, %arg1: i32) -> (i32, i32, i32, i32) {
    %c0_i32 = arith.constant 0 : i32
    %c0_i32_0 = arith.constant 0 : i32
    %c0_i32_1 = arith.constant 0 : i32
    return %arg0, %arg1, %c0_i32, %c0_i32_0 : i32, i32, i32, i32
  }
  func.func @transform_1(%arg0: i32, %arg1: i32) -> (i32, i32, i32, i32, i32) {
    %c0_i32 = arith.constant 0 : i32
    %c0_i32_0 = arith.constant 0 : i32
    %c0_i32_1 = arith.constant 0 : i32
    %c0_i32_2 = arith.constant 0 : i32
    return %arg0, %arg1, %c0_i32, %c0_i32_0, %c0_i32_1 : i32, i32, i32, i32, i32
  }
  func.func @transform_2(%arg0: i32, %arg1: i32) -> (i32, i32, i32) {
    %c0_i32 = arith.constant 0 : i32
    %c0_i32_0 = arith.constant 0 : i32
    %c0_i32_1 = arith.constant 0 : i32
    %c0_i32_2 = arith.constant 0 : i32
    return %c0_i32, %c0_i32_0, %c0_i32_1 : i32, i32, i32
  }
  func.func @transform_3(%arg0: i32, %arg1: i32) -> (i32, i32, i32, i32) {
    %c0_i32 = arith.constant 0 : i32
    %c0_i32_0 = arith.constant 0 : i32
    %c0_i32_1 = arith.constant 0 : i32
    return %arg0, %arg1, %c0_i32, %c0_i32_0 : i32, i32, i32, i32
  }
}

module attributes {stable_mosaic.version = 11 : i64} {
  func.func @_safm_ccm_kernel(%arg0: i32, %arg1: i32, %arg2: memref<1x16x24x4xbf16, #tpu.memory_space<vmem>>, %arg3: memref<1x1x2x24x4xbf16, #tpu.memory_space<vmem>>, %arg4: memref<1x16x24x4xf32, #tpu.memory_space<vmem>>, %arg5: memref<1x1x2x24x4xf32, #tpu.memory_space<vmem>>, %arg6: memref<4x4xbf16, #tpu.memory_space<vmem>>, %arg7: memref<3x12x8xbf16, #tpu.memory_space<vmem>>, %arg8: memref<8x4xbf16, #tpu.memory_space<vmem>>, %arg9: memref<1x16x16x4xf32, #tpu.memory_space<vmem>>) attributes {dimension_semantics = [#tpu.dimension_semantics<parallel>, #tpu.dimension_semantics<parallel>], iteration_bounds = array<i64: 2, 1>, scalar_prefetch = 0 : i64, scratch_operands = 0 : i64, tpu.core_type = #tpu.core_type<tc>, window_params = [{transform_indices = @transform_0, window_bounds = array<i64: 1, 16, 24, 4>}, {transform_indices = @transform_1, window_bounds = array<i64: 1, 1, 2, 24, 4>}, {transform_indices = @transform_2, window_bounds = array<i64: 1, 16, 24, 4>}, {transform_indices = @transform_3, window_bounds = array<i64: 1, 1, 2, 24, 4>}, {pipeline_mode = #tpu.pipeline_mode<synchronous>, transform_indices = @transform_4, window_bounds = array<i64: 4, 4>}, {pipeline_mode = #tpu.pipeline_mode<synchronous>, transform_indices = @transform_5, window_bounds = array<i64: 3, 12, 8>}, {pipeline_mode = #tpu.pipeline_mode<synchronous>, transform_indices = @transform_6, window_bounds = array<i64: 8, 4>}, {transform_indices = @transform_7, window_bounds = array<i64: 1, 16, 16, 4>}]} {
    %c0 = arith.constant 0 : index
    %c0_0 = arith.constant 0 : index
    %c0_1 = arith.constant 0 : index
    %c0_2 = arith.constant 0 : index
    %c0_3 = arith.constant 0 : index
    %0 = vector.load %arg3[%c0, %c0_0, %c0_1, %c0_2, %c0_3] : memref<1x1x2x24x4xbf16, #tpu.memory_space<vmem>>, vector<1x1x1x24x4xbf16>
    %1 = vector.shape_cast %0 : vector<1x1x1x24x4xbf16> to vector<1x24x4xbf16>
    %c0_4 = arith.constant 0 : index
    %c0_5 = arith.constant 0 : index
    %c0_6 = arith.constant 0 : index
    %c0_7 = arith.constant 0 : index
    %2 = vector.load %arg2[%c0_4, %c0_5, %c0_6, %c0_7] : memref<1x16x24x4xbf16, #tpu.memory_space<vmem>>, vector<1x16x24x4xbf16>
    %3 = vector.shape_cast %2 : vector<1x16x24x4xbf16> to vector<16x24x4xbf16>
    %c0_8 = arith.constant 0 : index
    %c0_9 = arith.constant 0 : index
    %c1 = arith.constant 1 : index
    %c0_10 = arith.constant 0 : index
    %c0_11 = arith.constant 0 : index
    %4 = vector.load %arg3[%c0_8, %c0_9, %c1, %c0_10, %c0_11] : memref<1x1x2x24x4xbf16, #tpu.memory_space<vmem>>, vector<1x1x1x24x4xbf16>
    %5 = vector.shape_cast %4 : vector<1x1x1x24x4xbf16> to vector<1x24x4xbf16>
    %6 = tpu.concatenate %1, %3, %5 in 0 : vector<1x24x4xbf16>, vector<16x24x4xbf16>, vector<1x24x4xbf16> -> vector<18x24x4xbf16>
    %c0_12 = arith.constant 0 : index
    %c0_13 = arith.constant 0 : index
    %c0_14 = arith.constant 0 : index
    %c0_15 = arith.constant 0 : index
    %c0_16 = arith.constant 0 : index
    %7 = vector.load %arg5[%c0_12, %c0_13, %c0_14, %c0_15, %c0_16] : memref<1x1x2x24x4xf32, #tpu.memory_space<vmem>>, vector<1x1x1x24x4xf32>
    %8 = vector.shape_cast %7 : vector<1x1x1x24x4xf32> to vector<1x24x4xf32>
    %c0_17 = arith.constant 0 : index
    %c0_18 = arith.constant 0 : index
    %c0_19 = arith.constant 0 : index
    %c0_20 = arith.constant 0 : index
    %9 = vector.load %arg4[%c0_17, %c0_18, %c0_19, %c0_20] : memref<1x16x24x4xf32, #tpu.memory_space<vmem>>, vector<1x16x24x4xf32>
    %10 = vector.shape_cast %9 : vector<1x16x24x4xf32> to vector<16x24x4xf32>
    %c0_21 = arith.constant 0 : index
    %c0_22 = arith.constant 0 : index
    %c1_23 = arith.constant 1 : index
    %c0_24 = arith.constant 0 : index
    %c0_25 = arith.constant 0 : index
    %11 = vector.load %arg5[%c0_21, %c0_22, %c1_23, %c0_24, %c0_25] : memref<1x1x2x24x4xf32, #tpu.memory_space<vmem>>, vector<1x1x1x24x4xf32>
    %12 = vector.shape_cast %11 : vector<1x1x1x24x4xf32> to vector<1x24x4xf32>
    %13 = tpu.concatenate %8, %10, %12 in 0 : vector<1x24x4xf32>, vector<16x24x4xf32>, vector<1x24x4xf32> -> vector<18x24x4xf32>
    %14 = vector.shape_cast %6 : vector<18x24x4xbf16> to vector<432x4xbf16>
    %c0_26 = arith.constant 0 : index
    %c0_27 = arith.constant 0 : index
    %15 = vector.load %arg6[%c0_26, %c0_27] : memref<4x4xbf16, #tpu.memory_space<vmem>>, vector<4x4xbf16>
    %cst = arith.constant dense<0.000000e+00> : vector<432x4xf32>
    %16 = tpu.matmul %14, %15, %cst {dimension_numbers = #tpu.dot_dimension_numbers<[1], [0], [0], [1], [0, 0, 1, 1], [], []>} : vector<432x4xbf16>, vector<4x4xbf16>, vector<432x4xf32> -> vector<432x4xf32>
    %17 = vector.shape_cast %13 : vector<18x24x4xf32> to vector<432x4xf32>
    %cst_28 = arith.constant 5.000000e-01 : f32
    %18 = vector.broadcast %cst_28 : f32 to vector<432x4xf32>
    %19 = arith.mulf %18, %16 : vector<432x4xf32>
    %cst_29 = arith.constant 4.471500e-02 : f32
    %20 = vector.broadcast %cst_29 : f32 to vector<432x4xf32>
    %21 = arith.mulf %20, %16 : vector<432x4xf32>
    %22 = arith.mulf %21, %16 : vector<432x4xf32>
    %23 = arith.mulf %22, %16 : vector<432x4xf32>
    %24 = arith.addf %16, %23 : vector<432x4xf32>
    %cst_30 = arith.constant 0.797884583 : f32
    %25 = vector.broadcast %cst_30 : f32 to vector<432x4xf32>
    %26 = arith.mulf %25, %24 : vector<432x4xf32>
    %27 = math.tanh %26 : vector<432x4xf32>
    %cst_31 = arith.constant 1.000000e+00 : f32
    %28 = vector.broadcast %cst_31 : f32 to vector<432x4xf32>
    %29 = arith.addf %28, %27 : vector<432x4xf32>
    %30 = arith.mulf %19, %29 : vector<432x4xf32>
    %31 = arith.mulf %30, %17 : vector<432x4xf32>
    %32 = arith.addf %31, %17 : vector<432x4xf32>
    %33 = vector.shape_cast %32 : vector<432x4xf32> to vector<18x24x4xf32>
    %34 = vector.extract_strided_slice %33 {offsets = [1, 1, 0], sizes = [16, 16, 4], strides = [1, 1, 1]} : vector<18x24x4xf32> to vector<16x16x4xf32>
    %35 = vector.shape_cast %34 : vector<16x16x4xf32> to vector<256x4xf32>
    %36 = arith.truncf %33 : vector<18x24x4xf32> to vector<18x24x4xbf16>
    %37 = vector.extract_strided_slice %36 {offsets = [0, 0, 0], sizes = [18, 16, 4], strides = [1, 1, 1]} : vector<18x24x4xbf16> to vector<18x16x4xbf16>
    %38 = vector.extract_strided_slice %36 {offsets = [0, 1, 0], sizes = [18, 16, 4], strides = [1, 1, 1]} : vector<18x24x4xbf16> to vector<18x16x4xbf16>
    %39 = vector.extract_strided_slice %36 {offsets = [0, 2, 0], sizes = [18, 16, 4], strides = [1, 1, 1]} : vector<18x24x4xbf16> to vector<18x16x4xbf16>
    %40 = tpu.concatenate %37, %38, %39 in 2 : vector<18x16x4xbf16>, vector<18x16x4xbf16>, vector<18x16x4xbf16> -> vector<18x16x12xbf16>
    %cst_32 = arith.constant 0.000000e+00 : f32
    %41 = vector.broadcast %cst_32 : f32 to vector<256x8xf32>
    %42 = vector.extract_strided_slice %40 {offsets = [0, 0, 0], sizes = [16, 16, 12], strides = [1, 1, 1]} : vector<18x16x12xbf16> to vector<16x16x12xbf16>
    %43 = vector.shape_cast %42 : vector<16x16x12xbf16> to vector<256x12xbf16>
    %c0_33 = arith.constant 0 : index
    %c0_34 = arith.constant 0 : index
    %c0_35 = arith.constant 0 : index
    %44 = vector.load %arg7[%c0_33, %c0_34, %c0_35] : memref<3x12x8xbf16, #tpu.memory_space<vmem>>, vector<1x12x8xbf16>
    %45 = vector.shape_cast %44 : vector<1x12x8xbf16> to vector<12x8xbf16>
    %cst_36 = arith.constant dense<0.000000e+00> : vector<256x8xf32>
    %46 = tpu.matmul %43, %45, %cst_36 {dimension_numbers = #tpu.dot_dimension_numbers<[1], [0], [0], [1], [0, 0, 1, 1], [], []>} : vector<256x12xbf16>, vector<12x8xbf16>, vector<256x8xf32> -> vector<256x8xf32>
    %47 = arith.addf %41, %46 : vector<256x8xf32>
    %48 = vector.extract_strided_slice %40 {offsets = [1, 0, 0], sizes = [16, 16, 12], strides = [1, 1, 1]} : vector<18x16x12xbf16> to vector<16x16x12xbf16>
    %49 = vector.shape_cast %48 : vector<16x16x12xbf16> to vector<256x12xbf16>
    %c1_37 = arith.constant 1 : index
    %c0_38 = arith.constant 0 : index
    %c0_39 = arith.constant 0 : index
    %50 = vector.load %arg7[%c1_37, %c0_38, %c0_39] : memref<3x12x8xbf16, #tpu.memory_space<vmem>>, vector<1x12x8xbf16>
    %51 = vector.shape_cast %50 : vector<1x12x8xbf16> to vector<12x8xbf16>
    %cst_40 = arith.constant dense<0.000000e+00> : vector<256x8xf32>
    %52 = tpu.matmul %49, %51, %cst_40 {dimension_numbers = #tpu.dot_dimension_numbers<[1], [0], [0], [1], [0, 0, 1, 1], [], []>} : vector<256x12xbf16>, vector<12x8xbf16>, vector<256x8xf32> -> vector<256x8xf32>
    %53 = arith.addf %47, %52 : vector<256x8xf32>
    %54 = vector.extract_strided_slice %40 {offsets = [2, 0, 0], sizes = [16, 16, 12], strides = [1, 1, 1]} : vector<18x16x12xbf16> to vector<16x16x12xbf16>
    %55 = vector.shape_cast %54 : vector<16x16x12xbf16> to vector<256x12xbf16>
    %c2 = arith.constant 2 : index
    %c0_41 = arith.constant 0 : index
    %c0_42 = arith.constant 0 : index
    %56 = vector.load %arg7[%c2, %c0_41, %c0_42] : memref<3x12x8xbf16, #tpu.memory_space<vmem>>, vector<1x12x8xbf16>
    %57 = vector.shape_cast %56 : vector<1x12x8xbf16> to vector<12x8xbf16>
    %cst_43 = arith.constant dense<0.000000e+00> : vector<256x8xf32>
    %58 = tpu.matmul %55, %57, %cst_43 {dimension_numbers = #tpu.dot_dimension_numbers<[1], [0], [0], [1], [0, 0, 1, 1], [], []>} : vector<256x12xbf16>, vector<12x8xbf16>, vector<256x8xf32> -> vector<256x8xf32>
    %59 = arith.addf %53, %58 : vector<256x8xf32>
    %cst_44 = arith.constant 5.000000e-01 : f32
    %60 = vector.broadcast %cst_44 : f32 to vector<256x8xf32>
    %61 = arith.mulf %60, %59 : vector<256x8xf32>
    %cst_45 = arith.constant 4.471500e-02 : f32
    %62 = vector.broadcast %cst_45 : f32 to vector<256x8xf32>
    %63 = arith.mulf %62, %59 : vector<256x8xf32>
    %64 = arith.mulf %63, %59 : vector<256x8xf32>
    %65 = arith.mulf %64, %59 : vector<256x8xf32>
    %66 = arith.addf %59, %65 : vector<256x8xf32>
    %cst_46 = arith.constant 0.797884583 : f32
    %67 = vector.broadcast %cst_46 : f32 to vector<256x8xf32>
    %68 = arith.mulf %67, %66 : vector<256x8xf32>
    %69 = math.tanh %68 : vector<256x8xf32>
    %cst_47 = arith.constant 1.000000e+00 : f32
    %70 = vector.broadcast %cst_47 : f32 to vector<256x8xf32>
    %71 = arith.addf %70, %69 : vector<256x8xf32>
    %72 = arith.mulf %61, %71 : vector<256x8xf32>
    %73 = arith.truncf %72 : vector<256x8xf32> to vector<256x8xbf16>
    %c0_48 = arith.constant 0 : index
    %c0_49 = arith.constant 0 : index
    %74 = vector.load %arg8[%c0_48, %c0_49] : memref<8x4xbf16, #tpu.memory_space<vmem>>, vector<8x4xbf16>
    %cst_50 = arith.constant dense<0.000000e+00> : vector<256x4xf32>
    %75 = tpu.matmul %73, %74, %cst_50 {dimension_numbers = #tpu.dot_dimension_numbers<[1], [0], [0], [1], [0, 0, 1, 1], [], []>} : vector<256x8xbf16>, vector<8x4xbf16>, vector<256x4xf32> -> vector<256x4xf32>
    %76 = arith.addf %75, %35 : vector<256x4xf32>
    %77 = vector.shape_cast %76 : vector<256x4xf32> to vector<16x16x4xf32>
    %c0_51 = arith.constant 0 : index
    %c0_52 = arith.constant 0 : index
    %c0_53 = arith.constant 0 : index
    %c0_54 = arith.constant 0 : index
    %78 = vector.load %arg9[%c0_51, %c0_52, %c0_53, %c0_54] : memref<1x16x16x4xf32, #tpu.memory_space<vmem>>, vector<1x16x16x4xf32>
    %79 = vector.shape_cast %78 : vector<1x16x16x4xf32> to vector<16x16x4xf32>
    %80 = vector.shape_cast %77 : vector<16x16x4xf32> to vector<1x16x16x4xf32>
    tpu.vector_store %arg9[%c0_51, %c0_52, %c0_53, %c0_54], %80 {strides = array<i32>} : memref<1x16x16x4xf32, #tpu.memory_space<vmem>>, vector<1x16x16x4xf32>,
    return
  }
  func.func @transform_0(%arg0: i32, %arg1: i32) -> (i32, i32, i32, i32) {
    %c0_i32 = arith.constant 0 : i32
    %c0_i32_0 = arith.constant 0 : i32
    %c0_i32_1 = arith.constant 0 : i32
    return %arg0, %arg1, %c0_i32, %c0_i32_0 : i32, i32, i32, i32
  }
  func.func @transform_1(%arg0: i32, %arg1: i32) -> (i32, i32, i32, i32, i32) {
    %c0_i32 = arith.constant 0 : i32
    %c0_i32_0 = arith.constant 0 : i32
    %c0_i32_1 = arith.constant 0 : i32
    %c0_i32_2 = arith.constant 0 : i32
    return %arg0, %arg1, %c0_i32, %c0_i32_0, %c0_i32_1 : i32, i32, i32, i32, i32
  }
  func.func @transform_2(%arg0: i32, %arg1: i32) -> (i32, i32, i32, i32) {
    %c0_i32 = arith.constant 0 : i32
    %c0_i32_0 = arith.constant 0 : i32
    %c0_i32_1 = arith.constant 0 : i32
    return %arg0, %arg1, %c0_i32, %c0_i32_0 : i32, i32, i32, i32
  }
  func.func @transform_3(%arg0: i32, %arg1: i32) -> (i32, i32, i32, i32, i32) {
    %c0_i32 = arith.constant 0 : i32
    %c0_i32_0 = arith.constant 0 : i32
    %c0_i32_1 = arith.constant 0 : i32
    %c0_i32_2 = arith.constant 0 : i32
    return %arg0, %arg1, %c0_i32, %c0_i32_0, %c0_i32_1 : i32, i32, i32, i32, i32
  }
  func.func @transform_4(%arg0: i32, %arg1: i32) -> (i32, i32) {
    %c0_i32 = arith.constant 0 : i32
    %c0_i32_0 = arith.constant 0 : i32
    %c0_i32_1 = arith.constant 0 : i32
    return %c0_i32, %c0_i32_0 : i32, i32
  }
  func.func @transform_5(%arg0: i32, %arg1: i32) -> (i32, i32, i32) {
    %c0_i32 = arith.constant 0 : i32
    %c0_i32_0 = arith.constant 0 : i32
    %c0_i32_1 = arith.constant 0 : i32
    %c0_i32_2 = arith.constant 0 : i32
    return %c0_i32, %c0_i32_0, %c0_i32_1 : i32, i32, i32
  }
  func.func @transform_6(%arg0: i32, %arg1: i32) -> (i32, i32) {
    %c0_i32 = arith.constant 0 : i32
    %c0_i32_0 = arith.constant 0 : i32
    %c0_i32_1 = arith.constant 0 : i32
    return %c0_i32, %c0_i32_0 : i32, i32
  }
  func.func @transform_7(%arg0: i32, %arg1: i32) -> (i32, i32, i32, i32) {
    %c0_i32 = arith.constant 0 : i32
    %c0_i32_0 = arith.constant 0 : i32
    %c0_i32_1 = arith.constant 0 : i32
    return %arg0, %arg1, %c0_i32, %c0_i32_0 : i32, i32, i32, i32
  }
}

</mosaic_0001>

<bundles_post_ra>
// kernel: att_block_forward.6
= control target key start
LH: loop header
LB: loop body
LE: loop exit
PB: predicated region body
PF: predicated region fallthrough
CT: control target
= control target key end

     0   :  { %s659_s12 = smov 0   ;;  %s661_s13 = smov 0   ;;  %s801_s0 = inlined_call_operand.vmem [shape: f32[2,4,8,1], index: 0, kind: input, shape index: {}]   ;;  %s802_s1 = inlined_call_operand.vmem [shape: f32[2,1,2,8,1], index: 1, kind: input, shape index: {}]   ;;  %s803_s2 = inlined_call_operand.vmem [shape: f32[3,3,1], index: 2, kind: input, shape index: {}]   ;;  %s804_s3 = inlined_call_operand.vmem [shape: bf16[2,4,4,1], index: 3, kind: output, shape index: {}]  }
   0x1   :  { %s663_s14 = smov 0  }
   0x2 LB: > { %s25_s15 = sadd.s32 1, %s633_s13  ;;  %p563_p0 = scmp.ge.s32.totalorder %s637_s14, 1  ;;  %s637_s14 = sphi %s663_s14, %s13_s14   ;;  %s633_s13 = sphi %s661_s13, %s806_s13   ;;  %s629_s12 = sphi %s659_s12, %s805_s12  }
   0x3   : > { %p27_p1 = scmp.ge.s32.totalorder %s25_s15, 2  ;;  %p174_p2 = scmp.lt.s32.totalorder %s637_s14, 3 }
   0x5   : > { %s808_s15 = smov (%p27_p1, %s25_s15), 0  ;;  %p175_p3 = pnand %p563_p0, %p174_p2 }
   0x6   : > { %p216_p4 = scmp.lt.s32.totalorder (!%p175_p3), %s629_s12, 1 }
   0x7   : > { %178 = sbr.rel (%p175_p3) target bundleno = 51 (0x33), region = 32 }
   0xc   : > { %s810_s12 = smov (!%p216_p4, %s629_s12), 1  ;;  %v682_v0 = vld [vmem:[%s803_s2] ss:$0 sm:$0xff]  ;;  %v689_v1 = vld [vmem:[%s803_s2 + $0x1] ss:$0 sm:$0xff]  ;;  %vm446_vm0 = vcmask 1024  }
   0xd   : > { %s588_s18 = sshll.u32 %s810_s12, 5  ;;  %s589_s19 = sshll.u32 %s810_s12, 4  ;;  %v694_v2 = vld [vmem:[%s803_s2 + $0x2] ss:$0 sm:$0xff]  ;;  %v709_v3 = vld [vmem:[%s803_s2 + $0x5] ss:$0 sm:$0xff] }
   0xe   : > { %s699_s26 = scalar_lea.vmem %s801_s0, %s588_s18  ;;  %s704_s29 = scalar_lea.vmem %s802_s1, %s589_s19  ;;  %v715_v5 = vld [vmem:[%s803_s2 + $0x6] ss:$0 sm:$0xff]  ;;  %v720_v6 = vld [vmem:[%s803_s2 + $0x9] ss:$0 sm:$0xff]  ;;  %v730_v12 = vld [vmem:[%s803_s2 + $0x4] ss:$0 sm:$0xff] }
   0xf   : > { %v244_v4 = vld [vmem:[%s704_s29] sm:$0xff]  ;;  %v246_v11 = vld [vmem:[%s699_s26 + $0x8] sm:$0xff]  ;;  %v247_v30 = vld [vmem:[%s699_s26 + $0x10] sm:$0xff]  ;;  %s590_s19 = sshll.u32 %s810_s12, 3 }
  0x10   : > { %v245_v7 = vld [vmem:[%s699_s26] sm:$0xff]  ;;  %v256_v8 = vmul.f32 %v682_v0, %v244_v4  ;;  %v269_v9 = vmul.f32 %v689_v1, %v244_v4  ;;  %v294_v10 = vmul.f32 %v694_v2, %v244_v4  ;;  %v736_v14 = vld [vmem:[%s803_s2 + $0xa] ss:$0 sm:$0xff]  ;;  %v742_v18 = vld [vmem:[%s803_s2 + $0x8] ss:$0 sm:$0xff]  ;;  %v397_v19 = vmul.f32 %v720_v6, %v246_v11  ;;  %s779_s12 = scalar_lea.vmem %s804_s3, %s590_s19 }
  0x11   : > { %v333_v13 = vmul.f32 %v709_v3, %v245_v7  ;;  %v358_v17 = vmul.f32 %v715_v5, %v245_v7  ;;  %v257_v20 = vmul.f32 %v682_v0, %v245_v7  ;;  %v270_v21 = vmul.f32 %v689_v1, %v245_v7  ;;  %v248_v56 = vld [vmem:[%s699_s26 + $0x18] sm:$0xff] }
  0x12   : > { %v277_v15 = vrot.slane %v269_v9, 1  ;;  %v302_v16 = vrot.slane %v294_v10, 2  ;;  %v320_v23 = vmul.f32 %v730_v12, %v245_v7  ;;  %v422_v24 = vmul.f32 %v736_v14, %v246_v11 }
  0x13   : > { %v295_v25 = vmul.f32 %v694_v2, %v245_v7  ;;  %v341_v26 = vrot.slane %v333_v13, 1  ;;  %v384_v27 = vmul.f32 %v742_v18, %v246_v11  ;;  %v278_v28 = vrot.slane %v270_v21, 1 }
  0x14   : > { %v285_v22 = vadd.f32 %v277_v15, %v256_v8  ;;  %v334_v29 = vmul.f32 %v709_v3, %v246_v11  ;;  %v366_v32 = vrot.slane %v358_v17, 2  ;;  %v405_v33 = vrot.slane %v397_v19, 1 }
  0x15   : > { %v303_v34 = vrot.slane %v295_v25, 2  ;;  %v286_v35 = vadd.f32 %v278_v28, %v257_v20  ;;  %v321_v36 = vmul.f32 %v730_v12, %v246_v11  ;;  %v359_v37 = vmul.f32 %v715_v5, %v246_v11 }
  0x16   : > { %v310_v31 = vadd.f32 %v302_v16, %v285_v22  ;;  %v398_v38 = vmul.f32 %v720_v6, %v247_v30  ;;  %v430_v40 = vrot.slane %v422_v24, 2  ;;  %v258_v41 = vmul.f32 %v682_v0, %v246_v11 }
  0x17   : > { %v271_v42 = vmul.f32 %v689_v1, %v246_v11  ;;  %v311_v43 = vadd.f32 %v303_v34, %v286_v35  ;;  %v342_v44 = vrot.slane %v334_v29, 1  ;;  %v423_v45 = vmul.f32 %v736_v14, %v247_v30 }
  0x18   : > { %v324_v39 = vadd.f32 %v320_v23, %v310_v31  ;;  %v296_v46 = vmul.f32 %v694_v2, %v246_v11  ;;  %v385_v48 = vmul.f32 %v742_v18, %v247_v30  ;;  %v335_v50 = vmul.f32 %v709_v3, %v247_v30 }
  0x19   : > { %v279_v49 = vrot.slane %v271_v42, 1  ;;  %v325_v51 = vadd.f32 %v321_v36, %v311_v43  ;;  %v367_v52 = vrot.slane %v359_v37, 2  ;;  %v406_v53 = vrot.slane %v398_v38, 1 }
  0x1a   : > { %v349_v47 = vadd.f32 %v341_v26, %v324_v39  ;;  %v304_v54 = vrot.slane %v296_v46, 2  ;;  %v322_v58 = vmul.f32 %v730_v12, %v247_v30  ;;  %v360_v59 = vmul.f32 %v715_v5, %v247_v30  ;;  %v570_v26 = vld [vmem:[%s704_s29 + $0x8] sm:$0xff] }
  0x1b   : > { %v287_v57 = vadd.f32 %v279_v49, %v258_v41  ;;  %v350_v60 = vadd.f32 %v342_v44, %v325_v51  ;;  %v431_v61 = vrot.slane %v423_v45, 2  ;;  %v259_v62 = vmul.f32 %v682_v0, %v247_v30 }
  0x1c   : > { %v374_v55 = vadd.f32 %v366_v32, %v349_v47  ;;  %v272_v63 = vmul.f32 %v689_v1, %v247_v30  ;;  %v343_v8 = vrot.slane %v335_v50, 1  ;;  %v297_v9 = vmul.f32 %v694_v2, %v247_v30 }
  0x1d   : > { %v312_v7 = vadd.f32 %v304_v54, %v287_v57  ;;  %v375_v10 = vadd.f32 %v367_v52, %v350_v60  ;;  %v399_v11 = vmul.f32 %v720_v6, %v248_v56  ;;  %v336_v15 = vmul.f32 %v709_v3, %v248_v56 }
  0x1e   : > { %v388_v4 = vadd.f32 %v384_v27, %v374_v55  ;;  %v280_v13 = vrot.slane %v272_v63, 1  ;;  %v368_v19 = vrot.slane %v360_v59, 2  ;;  %v305_v20 = vrot.slane %v297_v9, 2 }
  0x1f   : > { %v326_v17 = vadd.f32 %v322_v58, %v312_v7  ;;  %v389_v0 = vadd.f32 %v385_v48, %v375_v10  ;;  %v323_v1 = vmul.f32 %v730_v12, %v248_v56  ;;  %v361_v22 = vmul.f32 %v715_v5, %v248_v56 }
  0x20   : > { %v413_v16 = vadd.f32 %v405_v33, %v388_v4  ;;  %v288_v21 = vadd.f32 %v280_v13, %v259_v62  ;;  %v386_v24 = vmul.f32 %v742_v18, %v248_v56  ;;  %v424_v25 = vmul.f32 %v736_v14, %v248_v56 }
  0x21   : > { %v351_v2 = vadd.f32 %v343_v8, %v326_v17  ;;  %v414_v3 = vadd.f32 %v406_v53, %v389_v0  ;;  %v344_v28 = vrot.slane %v336_v15, 1  ;;  %v407_v29 = vrot.slane %v399_v11, 1 }
  0x22   : > { %v438_v23 = vadd.f32 %v430_v40, %v413_v16  ;;  %v313_v27 = vadd.f32 %v305_v20, %v288_v21  ;;  %v369_v32 = vrot.slane %v361_v22, 2  ;;  %v400_v33 = vmul.f32 %v720_v6, %v570_v26 }
  0x23   : > { %v376_v5 = vadd.f32 %v368_v19, %v351_v2  ;;  %v439_v30 = vadd.f32 %v431_v61, %v414_v3  ;;  %v432_v35 = vrot.slane %v424_v25, 2  ;;  %v387_v38 = vmul.f32 %v742_v18, %v570_v26 }
  0x24   : > { %v442_v12 = vpack.c.bf16 %v438_v23, %v438_v23  ;;  %v327_v31 = vadd.f32 %v323_v1, %v313_v27  ;;  %v425_v39 = vmul.f32 %v736_v14, %v570_v26  ;;  %v408_v42 = vrot.slane %v400_v33, 1 }
  0x25   : > { %v390_v34 = vadd.f32 %v386_v24, %v376_v5  ;;  %v443_v36 = vpack.c.bf16 %v439_v30, %v439_v30 }
  0x26   : > { %447 = vst.msk [vmem:[%s779_s12] sm:$0x3] %vm446_vm0, %v442_v12  ;;  %v352_v37 = vadd.f32 %v344_v28, %v327_v31  ;;  %v433_v6 = vrot.slane %v425_v39, 2 }
  0x27   : > { %v415_v40 = vadd.f32 %v407_v29, %v390_v34  ;;  %448 = vst.msk [vmem:[%s779_s12 + $0x2] sm:$0x3] %vm446_vm0, %v443_v36 }
  0x28   : > { %v377_v41 = vadd.f32 %v369_v32, %v352_v37 }
  0x29   : > { %v440_v43 = vadd.f32 %v432_v35, %v415_v40 }
  0x2a   : > { %v391_v44 = vadd.f32 %v387_v38, %v377_v41 }
  0x2b   : > { %v444_v45 = vpack.c.bf16 %v440_v43, %v440_v43 }
  0x2c   : > { %v416_v46 = vadd.f32 %v408_v42, %v391_v44 }
  0x2d   : > { %449 = vst.msk [vmem:[%s779_s12 + $0x4] sm:$0x3] %vm446_vm0, %v444_v45 }
  0x2e   : > { %v441_v47 = vadd.f32 %v433_v6, %v416_v46 }
  0x30   : > { %v445_v48 = vpack.c.bf16 %v441_v47, %v441_v47 }
  0x32   : > { %450 = vst.msk [vmem:[%s779_s12 + $0x6] sm:$0x3] %vm446_vm0, %v445_v48 }
  0x33 PF: > { %s13_s14 = sadd.s32 1, %s637_s14   ;;  %s805_s12 = smov %s633_s13 }
  0x34   : > { %p10_p5 = scmp.ge.s32.totalorder %s13_s14, 4   ;;  %s806_s13 = smov %s808_s15 }
  0x36   :  { %12 = sbr.rel (!%p10_p5) target bundleno = 2 (0x2), region = 68 }

// kernel: att_block_forward.7
= control target key start
LH: loop header
LB: loop body
LE: loop exit
PB: predicated region body
PF: predicated region fallthrough
CT: control target
= control target key end

     0   :  { %s571_s12 = smov 0   ;;  %s573_s13 = smov 0   ;;  %s638_s0 = inlined_call_operand.vmem [shape: f32[2,2,8,1], index: 0, kind: input, shape index: {}]   ;;  %s639_s1 = inlined_call_operand.vmem [shape: f32[2,1,2,8,1], index: 1, kind: input, shape index: {}]   ;;  %s640_s2 = inlined_call_operand.vmem [shape: f32[3,3,1], index: 2, kind: input, shape index: {}]   ;;  %s641_s3 = inlined_call_operand.vmem [shape: bf16[2,2,2,1], index: 3, kind: output, shape index: {}]  }
   0x1   :  { %s575_s14 = smov 0  }
   0x2 LB: > { %s25_s15 = sadd.s32 1, %s545_s13  ;;  %p477_p0 = scmp.ge.s32.totalorder %s549_s14, 1  ;;  %s549_s14 = sphi %s575_s14, %s13_s14   ;;  %s545_s13 = sphi %s573_s13, %s643_s13   ;;  %s541_s12 = sphi %s571_s12, %s642_s12  }
   0x3   : > { %p27_p1 = scmp.ge.s32.totalorder %s25_s15, 2  ;;  %p174_p2 = scmp.lt.s32.totalorder %s549_s14, 3 }
   0x5   : > { %s645_s15 = smov (%p27_p1, %s25_s15), 0  ;;  %p175_p3 = pnand %p477_p0, %p174_p2 }
   0x6   : > { %p215_p4 = scmp.lt.s32.totalorder (!%p175_p3), %s541_s12, 1 }
   0x7   : > { %178 = sbr.rel (%p175_p3) target bundleno = 40 (0x28), region = 32 }
   0xc   : > { %s647_s12 = smov (!%p215_p4, %s541_s12), 1  ;;  %v484_v0 = vld [vmem:[%s640_s2] ss:$0 sm:$0xff]  ;;  %v485_v1 = vld [vmem:[%s640_s2 + $0x1] ss:$0 sm:$0xff]  ;;  %vm368_vm0 = vcmask 0  }
   0xd   : > { %s501_s16 = sshll.u32 %s647_s12, 4  ;;  %v486_v2 = vld [vmem:[%s640_s2 + $0x2] ss:$0 sm:$0xff]  ;;  %v490_v5 = vld [vmem:[%s640_s2 + $0x5] ss:$0 sm:$0xff]  ;;  %s482_s18 = sshll.u32 %s647_s12, 1 }
   0xe   : > { %s222_s23 = scalar_lea.vmem %s638_s0, %s501_s16  ;;  %s232_s26 = scalar_lea.vmem %s639_s1, %s501_s16  ;;  %v492_v10 = vld [vmem:[%s640_s2 + $0x6] ss:$0 sm:$0xff]  ;;  %v488_v13 = vld [vmem:[%s640_s2 + $0x4] ss:$0 sm:$0xff]  ;;  %v496_v24 = vld [vmem:[%s640_s2 + $0x9] ss:$0 sm:$0xff] }
   0xf   : > { %v242_v3 = vld [vmem:[%s232_s26] sm:$0xff]  ;;  %v244_v14 = vld [vmem:[%s222_s23 + $0x8] sm:$0xff]  ;;  %s240_s21 = scalar_lea.vmem %s641_s3, %s482_s18 }
  0x10   : > { %v243_v4 = vld [vmem:[%s222_s23] sm:$0xff]  ;;  %v252_v6 = vmul.f32 %v484_v0, %v242_v3  ;;  %v261_v8 = vmul.f32 %v485_v1, %v242_v3  ;;  %v276_v11 = vmul.f32 %v486_v2, %v242_v3  ;;  %v483_v25 = vld [vmem:[%s232_s26 + $0x8] sm:$0xff]  ;;  %v293_v26 = vmul.f32 %v488_v13, %v244_v14 }
  0x11   : > { %v253_v7 = vmul.f32 %v484_v0, %v243_v4  ;;  %v262_v9 = vmul.f32 %v485_v1, %v243_v4  ;;  %v277_v12 = vmul.f32 %v486_v2, %v243_v4  ;;  %v301_v17 = vmul.f32 %v490_v5, %v243_v4  ;;  %v494_v32 = vld [vmem:[%s640_s2 + $0x8] ss:$0 sm:$0xff]  ;;  %v498_v35 = vld [vmem:[%s640_s2 + $0xa] ss:$0 sm:$0xff] }
  0x12   : > { %v265_v15 = vrot.slane %v261_v8, 1  ;;  %v280_v18 = vrot.slane %v276_v11, 2  ;;  %v316_v20 = vmul.f32 %v492_v10, %v243_v4  ;;  %v292_v23 = vmul.f32 %v488_v13, %v243_v4 }
  0x13   : > { %v266_v16 = vrot.slane %v262_v9, 1  ;;  %v281_v19 = vrot.slane %v277_v12, 2  ;;  %v302_v27 = vmul.f32 %v490_v5, %v244_v14  ;;  %v317_v28 = vmul.f32 %v492_v10, %v244_v14 }
  0x14   : > { %v269_v21 = vadd.f32 %v265_v15, %v252_v6  ;;  %v305_v31 = vrot.slane %v301_v17, 1  ;;  %v320_v33 = vrot.slane %v316_v20, 2  ;;  %v341_v34 = vmul.f32 %v496_v24, %v244_v14 }
  0x15   : > { %v270_v22 = vadd.f32 %v266_v16, %v253_v7  ;;  %v306_v36 = vrot.slane %v302_v27, 1  ;;  %v321_v39 = vrot.slane %v317_v28, 2  ;;  %v342_v40 = vmul.f32 %v496_v24, %v483_v25 }
  0x16   : > { %v284_v29 = vadd.f32 %v280_v18, %v269_v21  ;;  %v332_v41 = vmul.f32 %v494_v32, %v244_v14  ;;  %v333_v42 = vmul.f32 %v494_v32, %v483_v25  ;;  %v356_v44 = vmul.f32 %v498_v35, %v244_v14 }
  0x17   : > { %v285_v30 = vadd.f32 %v281_v19, %v270_v22  ;;  %v357_v46 = vmul.f32 %v498_v35, %v483_v25  ;;  %v345_v48 = vrot.slane %v341_v34, 1  ;;  %v346_v50 = vrot.slane %v342_v40, 1 }
  0x18   : > { %v294_v37 = vadd.f32 %v292_v23, %v284_v29  ;;  %v360_v52 = vrot.slane %v356_v44, 2 }
  0x19   : > { %v295_v38 = vadd.f32 %v293_v26, %v285_v30  ;;  %v361_v54 = vrot.slane %v357_v46, 2 }
  0x1a   : > { %v309_v43 = vadd.f32 %v305_v31, %v294_v37 }
  0x1b   : > { %v310_v45 = vadd.f32 %v306_v36, %v295_v38 }
  0x1c   : > { %v324_v47 = vadd.f32 %v320_v33, %v309_v43 }
  0x1d   : > { %v325_v49 = vadd.f32 %v321_v39, %v310_v45 }
  0x1e   : > { %v334_v51 = vadd.f32 %v332_v41, %v324_v47 }
  0x1f   : > { %v335_v53 = vadd.f32 %v333_v42, %v325_v49 }
  0x20   : > { %v349_v55 = vadd.f32 %v345_v48, %v334_v51 }
  0x21   : > { %v350_v56 = vadd.f32 %v346_v50, %v335_v53 }
  0x22   : > { %v364_v57 = vadd.f32 %v360_v52, %v349_v55 }
  0x23   : > { %v365_v58 = vadd.f32 %v361_v54, %v350_v56 }
  0x24   : > { %v366_v59 = vpack.c.bf16 %v364_v57, %v364_v57 }
  0x25   : > { %v367_v60 = vpack.c.bf16 %v365_v58, %v365_v58 }
  0x26   : > { %369 = vst.msk [vmem:[%s240_s21] sm:$0x1] %vm368_vm0, %v366_v59 }
  0x27   : > { %370 = vst.msk [vmem:[%s240_s21 + $0x1] sm:$0x1] %vm368_vm0, %v367_v60 }
  0x28 PF: > { %s13_s14 = sadd.s32 1, %s549_s14   ;;  %s642_s12 = smov %s545_s13 }
  0x29   : > { %p10_p5 = scmp.ge.s32.totalorder %s13_s14, 4   ;;  %s643_s13 = smov %s645_s15 }
  0x2b   :  { %12 = sbr.rel (!%p10_p5) target bundleno = 2 (0x2), region = 68 }

// kernel: att_block_forward.8
= control target key start
LH: loop header
LB: loop body
LE: loop exit
PB: predicated region body
PF: predicated region fallthrough
CT: control target
= control target key end

     0   :  { %s480_s12 = smov 0   ;;  %s482_s13 = smov 0   ;;  %s548_s0 = inlined_call_operand.vmem [shape: f32[2,1,8,1], index: 0, kind: input, shape index: {}]   ;;  %s549_s1 = inlined_call_operand.vmem [shape: f32[2,1,2,8,1], index: 1, kind: input, shape index: {}]   ;;  %s550_s2 = inlined_call_operand.vmem [shape: f32[3,3,1], index: 2, kind: input, shape index: {}]   ;;  %s551_s3 = inlined_call_operand.vmem [shape: bf16[2,1,1,1], index: 3, kind: output, shape index: {}]  }
   0x1   :  { %s484_s14 = smov 0  }
   0x2 LB: > { %s25_s15 = sadd.s32 1, %s454_s13  ;;  %p398_p0 = scmp.ge.s32.totalorder %s458_s14, 1  ;;  %s458_s14 = sphi %s484_s14, %s13_s14   ;;  %s454_s13 = sphi %s482_s13, %s553_s13   ;;  %s450_s12 = sphi %s480_s12, %s552_s12  }
   0x3   : > { %p27_p1 = scmp.ge.s32.totalorder %s25_s15, 2  ;;  %p171_p2 = scmp.lt.s32.totalorder %s458_s14, 3 }
   0x5   : > { %s555_s15 = smov (%p27_p1, %s25_s15), 0  ;;  %p172_p3 = pnand %p398_p0, %p171_p2 }
   0x6   : > { %p207_p4 = scmp.lt.s32.totalorder (!%p172_p3), %s450_s12, 1 }
   0x7   : > { %175 = sbr.rel (%p172_p3) target bundleno = 40 (0x28), region = 32 }
   0xc   : > { %v236_v0 = vld [vmem:[%s550_s2 + $0x1] sm:$0x1]  ;;  %v245_v1 = vld [vmem:[%s550_s2 + $0x2] sm:$0x1]  ;;  %s557_s12 = smov (!%p207_p4, %s450_s12), 1  ;;  %vm299_vm0 = vcmask 0  }
   0xd   : > { %v404_v2 = vld [vmem:[%s550_s2 + $0x5] sm:$0x1]  ;;  %v238_v3 = vrot.slane %v236_v0, 7  ;;  %v247_v4 = vrot.slane %v245_v1, 6  ;;  %s399_s22 = sshll.u32 %s557_s12, 3  ;;  %s411_s23 = sshll.u32 %s557_s12, 4 }
   0xe   : > { %v233_v5 = vld [vmem:[%s550_s2] sm:$0x1]  ;;  %v405_v6 = vld [vmem:[%s550_s2 + $0x6] sm:$0x1]  ;;  %s213_s30 = scalar_lea.vmem %s548_s0, %s399_s22  ;;  %s222_s6 = scalar_lea.vmem %s549_s1, %s411_s23  ;;  %v260_v7 = vrot.slane %v404_v2, 7 }
   0xf   : > { %v229_v8 = vld [vmem:[%s222_s6] sm:$0xff]  ;;  %v269_v13 = vrot.slane %v405_v6, 6  ;;  %v407_v15 = vld [vmem:[%s550_s2 + $0x9] sm:$0x1]  ;;  %v408_v19 = vld [vmem:[%s550_s2 + $0xa] sm:$0x1]  ;;  %s228_s21 = scalar_lea.vmem %s551_s3, %s557_s12 }
  0x10   : > { %v230_v9 = vld [vmem:[%s213_s30] sm:$0xff]  ;;  %v234_v10 = vmul.f32 %v233_v5, %v229_v8  ;;  %v240_v11 = vmul.f32 %v238_v3, %v229_v8  ;;  %v249_v12 = vmul.f32 %v247_v4, %v229_v8  ;;  %v282_v23 = vrot.slane %v407_v15, 7  ;;  %v402_v24 = vld [vmem:[%s222_s6 + $0x8] sm:$0xff] }
  0x11   : > { %v403_v14 = vld [vmem:[%s550_s2 + $0x4] sm:$0x1]  ;;  %v262_v18 = vmul.f32 %v260_v7, %v230_v9  ;;  %v271_v22 = vmul.f32 %v269_v13, %v230_v9  ;;  %v291_v27 = vrot.slane %v408_v19, 6  ;;  %v406_v28 = vld [vmem:[%s550_s2 + $0x8] sm:$0x1] }
  0x12   : > { %v242_v16 = vrot.slane %v240_v11, 1  ;;  %v251_v17 = vrot.slane %v249_v12, 2  ;;  %v256_v21 = vmul.f32 %v403_v14, %v230_v9  ;;  %v284_v31 = vmul.f32 %v402_v24, %v282_v23  ;;  %v302_v41 = vld [vmem:[%s228_s21] sm:$0x1] }
  0x13   : > { %v264_v26 = vrot.slane %v262_v18, 1  ;;  %v273_v30 = vrot.slane %v271_v22, 2  ;;  %v278_v33 = vmul.f32 %v406_v28, %v402_v24  ;;  %v293_v34 = vmul.f32 %v402_v24, %v291_v27 }
  0x14   : > { %v244_v20 = vadd.f32 %v242_v16, %v234_v10  ;;  %v286_v36 = vrot.slane %v284_v31, 1  ;;  %vm300_vm1 = vsmask.f32 256 }
  0x15   : > { %v295_v38 = vrot.slane %v293_v34, 2  ;;  %vm301_vm2 = vmand %vm299_vm0, %vm300_vm1 }
  0x16   : > { %v253_v25 = vadd.f32 %v251_v17, %v244_v20 }
  0x18   : > { %v257_v29 = vadd.f32 %v256_v21, %v253_v25 }
  0x1a   : > { %v266_v32 = vadd.f32 %v264_v26, %v257_v29 }
  0x1c   : > { %v275_v35 = vadd.f32 %v273_v30, %v266_v32 }
  0x1e   : > { %v279_v37 = vadd.f32 %v278_v33, %v275_v35 }
  0x20   : > { %v288_v39 = vadd.f32 %v286_v36, %v279_v37 }
  0x22   : > { %v297_v40 = vadd.f32 %v295_v38, %v288_v39 }
  0x24   : > { %v298_v42 = vpack.c.bf16 %v297_v40, %v297_v40 }
  0x26   : > { %v303_v43 = vsel %vm301_vm2, %v298_v42, %v302_v41 }
  0x27   : > { %304 = vst [vmem:[%s228_s21] sm:$0x1] %v303_v43 }
  0x28 PF: > { %s13_s14 = sadd.s32 1, %s458_s14   ;;  %s552_s12 = smov %s454_s13 }
  0x29   : > { %p10_p5 = scmp.ge.s32.totalorder %s13_s14, 4   ;;  %s553_s13 = smov %s555_s15 }
  0x2b   :  { %12 = sbr.rel (!%p10_p5) target bundleno = 2 (0x2), region = 68 }

// kernel: att_block_forward.5
= control target key start
LH: loop header
LB: loop body
LE: loop exit
PB: predicated region body
PF: predicated region fallthrough
CT: control target
= control target key end

     0   :  { %s2445_s12 = smov 0   ;;  %s2447_s13 = smov 0   ;;  %s3983_s0 = inlined_call_operand.vmem [shape: f32[2,16,24,1], index: 0, kind: input, shape index: {}]   ;;  %s3984_s1 = inlined_call_operand.vmem [shape: f32[2,1,2,24,1], index: 1, kind: input, shape index: {}]   ;;  %s3985_s2 = inlined_call_operand.vmem [shape: f32[3,3,1], index: 2, kind: input, shape index: {}]   ;;  %s3986_s3 = inlined_call_operand.vmem [shape: bf16[2,16,16,1], index: 3, kind: output, shape index: {}]  }
   0x1   :  { %s2449_s14 = smov 0  }
   0x2 LB: > { %s25_s15 = sadd.s32 1, %s2419_s13  ;;  %p2267_p0 = scmp.ge.s32.totalorder %s2423_s14, 1  ;;  %s2423_s14 = sphi %s2449_s14, %s13_s14   ;;  %s2419_s13 = sphi %s2447_s13, %s3988_s13   ;;  %s2415_s12 = sphi %s2445_s12, %s3987_s12  }
   0x3   : > { %p27_p1 = scmp.ge.s32.totalorder %s25_s15, 2  ;;  %p175_p2 = scmp.lt.s32.totalorder %s2423_s14, 3 }
   0x5   : > { %s3990_s15 = smov (%p27_p1, %s25_s15), 0  ;;  %p176_p3 = pnand %p2267_p0, %p175_p2 }
   0x6   : > { %p219_p4 = scmp.lt.s32.totalorder (!%p176_p3), %s2415_s12, 1 }
   0x7   : > { %179 = sbr.rel (%p176_p3) target bundleno = 318 (0x13e), region = 32 }
   0xc   : > { %s3992_s12 = smov (!%p219_p4, %s2415_s12), 1  ;;  %v2469_v0 = vld [vmem:[%s3985_s2 + $0x4] ss:$0 sm:$0xff]  ;;  %v2475_v1 = vld [vmem:[%s3985_s2 + $0x5] ss:$0 sm:$0xff]  ;;  %vm474_vm0 = vcmask 1046528  }
   0xd   : > { %s2357_s16 = smul.u32 384, %s3992_s12  ;;  %v2480_v2 = vld [vmem:[%s3985_s2 + $0x6] ss:$0 sm:$0xff]  ;;  %v2490_v3 = vld [vmem:[%s3985_s2] ss:$0 sm:$0xff]  ;;  %vm720_vm1 = vcmask 1045504  }
   0xe   : > { %s2358_s19 = smul.u32 48, %s3992_s12  ;;  %v2495_v4 = vld [vmem:[%s3985_s2 + $0x1] ss:$0 sm:$0xff]  ;;  %v2500_v5 = vld [vmem:[%s3985_s2 + $0x2] ss:$0 sm:$0xff]  ;;  %vm2113_vm2 = vcmask 3072  }
   0xf   : > { %s2485_s26 = scalar_lea.vmem %s3983_s0, %s2357_s16  ;;  %v2530_v18 = vld [vmem:[%s3985_s2 + $0x8] ss:$0 sm:$0xff]  ;;  %v2538_v23 = vld [vmem:[%s3985_s2 + $0x9] ss:$0 sm:$0xff]  ;;  %v2543_v24 = vld [vmem:[%s3985_s2 + $0xa] ss:$0 sm:$0xff] }
  0x10   : > { %s2505_s8 = scalar_lea.vmem %s3984_s1, %s2358_s19  ;;  %v2508_v6 = vld [vmem:[%s2485_s26] sm:$0xff]  ;;  %v2511_v7 = vld [vmem:[%s2485_s26 + $0x8] sm:$0xff]  ;;  %v2546_v25 = vld [vmem:[%s2485_s26 + $0x18] sm:$0xff]  ;;  %s2324_s19 = sshll.u32 %s3992_s12, 7 }
  0x11   : > { %v249_v8 = vld [vmem:[%s2505_s8] sm:$0xff]  ;;  %v250_v9 = vld [vmem:[%s2505_s8 + $0x8] sm:$0xff]  ;;  %v871_v10 = vmul.f32 %v2469_v0, %v2508_v6  ;;  %v940_v11 = vmul.f32 %v2475_v1, %v2508_v6  ;;  %v941_v12 = vmul.f32 %v2475_v1, %v2511_v7  ;;  %v1185_v13 = vmul.f32 %v2480_v2, %v2508_v6  ;;  %v251_v39 = vld [vmem:[%s2505_s8 + $0x10] sm:$0xff]  ;;  %s2623_s21 = scalar_lea.vmem %s3986_s3, %s2324_s19 }
  0x12   : > { %v309_v14 = vmul.f32 %v2490_v3, %v249_v8  ;;  %v378_v15 = vmul.f32 %v2495_v4, %v249_v8  ;;  %v379_v16 = vmul.f32 %v2495_v4, %v250_v9  ;;  %v624_v17 = vmul.f32 %v2500_v5, %v249_v8  ;;  %v2549_v30 = vld [vmem:[%s2485_s26 + $0x20] sm:$0xff]  ;;  %v2568_v50 = vld [vmem:[%s2485_s26 + $0x10] sm:$0xff]  ;;  %v2581_v59 = vld [vmem:[%s2485_s26 + $0x28] sm:$0xff] }
  0x13   : > { %v625_v19 = vmul.f32 %v2500_v5, %v250_v9  ;;  %v1036_v20 = vrot.slane %v940_v11, 1  ;;  %v1037_v21 = vrot.slane %v941_v12, 1  ;;  %v1186_v22 = vmul.f32 %v2480_v2, %v2511_v7 }
  0x14   : > { %v475_v26 = vrot.slane %v378_v15, 1  ;;  %v476_v27 = vrot.slane %v379_v16, 1  ;;  %v721_v28 = vrot.slane %v624_v17, 2  ;;  %v1281_v29 = vrot.slane %v1185_v13, 2 }
  0x15   : > { %v722_v31 = vrot.slane %v625_v19, 2  ;;  %v1038_v32 = vsel %vm474_vm0, %v1036_v20, %v1037_v21  ;;  %v1282_v33 = vrot.slane %v1186_v22, 2  ;;  %v1431_v34 = vmul.f32 %v2530_v18, %v2546_v25 }
  0x16   : > { %v477_v35 = vsel %vm474_vm0, %v475_v26, %v476_v27  ;;  %v1500_v36 = vmul.f32 %v2538_v23, %v2546_v25  ;;  %v1501_v37 = vmul.f32 %v2538_v23, %v2549_v30  ;;  %v1745_v38 = vmul.f32 %v2543_v24, %v2546_v25 }
  0x17   : > { %v587_v40 = vadd.f32 %v477_v35, %v309_v14  ;;  %v723_v41 = vsel %vm720_vm1, %v721_v28, %v722_v31  ;;  %v1283_v42 = vsel %vm720_vm1, %v1281_v29, %v1282_v33  ;;  %v1746_v43 = vmul.f32 %v2543_v24, %v2549_v30 }
  0x18   : > { %v1596_v44 = vrot.slane %v1500_v36, 1  ;;  %v1597_v45 = vrot.slane %v1501_v37, 1  ;;  %v1841_v46 = vrot.slane %v1745_v38, 2  ;;  %v310_v47 = vmul.f32 %v2490_v3, %v250_v9 }
  0x19   : > { %v833_v48 = vadd.f32 %v723_v41, %v587_v40  ;;  %v1842_v49 = vrot.slane %v1746_v43, 2  ;;  %v380_v51 = vmul.f32 %v2495_v4, %v251_v39  ;;  %v626_v52 = vmul.f32 %v2500_v5, %v251_v39 }
  0x1a   : > { %v1598_v53 = vsel %vm474_vm0, %v1596_v44, %v1597_v45  ;;  %v872_v54 = vmul.f32 %v2469_v0, %v2511_v7  ;;  %v942_v55 = vmul.f32 %v2475_v1, %v2568_v50  ;;  %v1187_v56 = vmul.f32 %v2480_v2, %v2568_v50 }
  0x1b   : > { %v903_v57 = vadd.f32 %v871_v10, %v833_v48  ;;  %v1843_v58 = vsel %vm720_vm1, %v1841_v46, %v1842_v49  ;;  %v478_v60 = vrot.slane %v380_v51, 1  ;;  %v724_v61 = vrot.slane %v626_v52, 2  ;;  %v2626_v52 = vld [vmem:[%s2485_s26 + $0x30] sm:$0xff] }
  0x1c   : > { %v1039_v62 = vrot.slane %v942_v55, 1  ;;  %v1284_v63 = vrot.slane %v1187_v56, 2  ;;  %v1432_v8 = vmul.f32 %v2530_v18, %v2549_v30  ;;  %v1502_v9 = vmul.f32 %v2538_v23, %v2581_v59 }
  0x1d   : > { %v1148_v11 = vadd.f32 %v1038_v32, %v903_v57  ;;  %v479_v12 = vsel %vm474_vm0, %v476_v27, %v478_v60  ;;  %v725_v13 = vsel %vm720_vm1, %v722_v31, %v724_v61  ;;  %v1747_v10 = vmul.f32 %v2543_v24, %v2581_v59  ;;  %v2630_v57 = vld [vmem:[%s2485_s26 + $0x38] sm:$0xff] }
  0x1e   : > { %v588_v14 = vadd.f32 %v479_v12, %v310_v47  ;;  %v1040_v15 = vsel %vm474_vm0, %v1037_v21, %v1039_v62  ;;  %v1285_v16 = vsel %vm720_vm1, %v1282_v33, %v1284_v63  ;;  %v1599_v17 = vrot.slane %v1502_v9, 1 }
  0x1f   : > { %v1393_v19 = vadd.f32 %v1283_v42, %v1148_v11  ;;  %v1844_v20 = vrot.slane %v1747_v10, 2  ;;  %v311_v22 = vmul.f32 %v2490_v3, %v2508_v6  ;;  %v381_v26 = vmul.f32 %v2495_v4, %v2508_v6 }
  0x20   : > { %v834_v27 = vadd.f32 %v725_v13, %v588_v14  ;;  %v1600_v28 = vsel %vm474_vm0, %v1597_v45, %v1599_v17  ;;  %v382_v29 = vmul.f32 %v2495_v4, %v2511_v7  ;;  %v627_v21 = vmul.f32 %v2500_v5, %v2508_v6 }
  0x21   : > { %v1463_v31 = vadd.f32 %v1431_v34, %v1393_v19  ;;  %v1845_v32 = vsel %vm720_vm1, %v1842_v49, %v1844_v20  ;;  %v480_v33 = vrot.slane %v381_v26, 1  ;;  %v628_v35 = vmul.f32 %v2500_v5, %v2511_v7 }
  0x22   : > { %v904_v36 = vadd.f32 %v872_v54, %v834_v27  ;;  %v481_v37 = vrot.slane %v382_v29, 1  ;;  %v726_v38 = vrot.slane %v627_v21, 2  ;;  %v873_v39 = vmul.f32 %v2469_v0, %v2546_v25 }
  0x23   : > { %v1708_v40 = vadd.f32 %v1598_v53, %v1463_v31  ;;  %v727_v41 = vrot.slane %v628_v35, 2  ;;  %v943_v6 = vmul.f32 %v2475_v1, %v2546_v25  ;;  %v2612_v34 = vmul.f32 %v2475_v1, %v2549_v30 }
  0x24   : > { %v1149_v42 = vadd.f32 %v1040_v15, %v904_v36  ;;  %v482_v43 = vsel %vm474_vm0, %v480_v33, %v481_v37  ;;  %v1188_v44 = vmul.f32 %v2480_v2, %v2546_v25  ;;  %v1189_v45 = vmul.f32 %v2480_v2, %v2549_v30 }
  0x25   : > { %v1953_v46 = vadd.f32 %v1843_v58, %v1708_v40  ;;  %v589_v47 = vadd.f32 %v482_v43, %v311_v22  ;;  %v728_v48 = vsel %vm720_vm1, %v726_v38, %v727_v41  ;;  %v1041_v49 = vrot.slane %v943_v6, 1 }
  0x26   : > { %v1394_v51 = vadd.f32 %v1285_v16, %v1149_v42  ;;  %v1042_v53 = vrot.slane %v2612_v34, 1  ;;  %v1286_v54 = vrot.slane %v1188_v44, 2  ;;  %v1287_v55 = vrot.slane %v1189_v45, 2 }
  0x27   : > { %v2325_v56 = vpack.c.bf16 %v1953_v46, %v1953_v46  ;;  %v835_v58 = vadd.f32 %v728_v48, %v589_v47  ;;  %v1433_v60 = vmul.f32 %v2530_v18, %v2626_v52  ;;  %v1503_v61 = vmul.f32 %v2538_v23, %v2626_v52 }
  0x28   : > { %v1464_v62 = vadd.f32 %v1432_v8, %v1394_v51  ;;  %v1043_v63 = vsel %vm474_vm0, %v1041_v49, %v1042_v53  ;;  %v1288_v9 = vsel %vm720_vm1, %v1286_v54, %v1287_v55  ;;  %v1504_v11 = vmul.f32 %v2538_v23, %v2630_v57 }
  0x29   : > { %2114 = vst.msk [vmem:[%s2623_s21] sm:$0xf] %vm2113_vm2, %v2325_v56  ;;  %v905_v12 = vadd.f32 %v873_v39, %v835_v58  ;;  %v1601_v13 = vrot.slane %v1503_v61, 1  ;;  %v1748_v10 = vmul.f32 %v2543_v24, %v2626_v52  ;;  %v1749_v14 = vmul.f32 %v2543_v24, %v2630_v57  ;;  %v2662_v39 = vld [vmem:[%s2485_s26 + $0x40] sm:$0xff] }
  0x2a   : > { %v1709_v15 = vadd.f32 %v1600_v28, %v1464_v62  ;;  %v1602_v16 = vrot.slane %v1504_v11, 1  ;;  %v312_v8 = vmul.f32 %v2490_v3, %v2511_v7  ;;  %v383_v17 = vmul.f32 %v2495_v4, %v2568_v50 }
  0x2b   : > { %v1150_v19 = vadd.f32 %v1043_v63, %v905_v12  ;;  %v1846_v20 = vrot.slane %v1748_v10, 2  ;;  %v1847_v22 = vrot.slane %v1749_v14, 2  ;;  %v629_v26 = vmul.f32 %v2500_v5, %v2568_v50 }
  0x2c   : > { %v1954_v27 = vadd.f32 %v1845_v32, %v1709_v15  ;;  %v1603_v29 = vsel %vm474_vm0, %v1601_v13, %v1602_v16  ;;  %v483_v21 = vrot.slane %v383_v17, 1  ;;  %v874_v7 = vmul.f32 %v2469_v0, %v2549_v30 }
  0x2d   : > { %v1395_v28 = vadd.f32 %v1288_v9, %v1150_v19  ;;  %v729_v31 = vrot.slane %v629_v26, 2  ;;  %v945_v33 = vmul.f32 %v2475_v1, %v2581_v59  ;;  %v1848_v36 = vsel %vm720_vm1, %v1846_v20, %v1847_v22 }
  0x2e   : > { %v2326_v35 = vpack.c.bf16 %v1954_v27, %v1954_v27  ;;  %v484_v38 = vsel %vm474_vm0, %v481_v37, %v483_v21  ;;  %v1190_v50 = vmul.f32 %v2480_v2, %v2581_v59  ;;  %v1434_v43 = vmul.f32 %v2530_v18, %v2630_v57 }
  0x2f   : > { %v1465_v32 = vadd.f32 %v1433_v60, %v1395_v28  ;;  %v590_v40 = vadd.f32 %v484_v38, %v312_v8  ;;  %v730_v6 = vsel %vm720_vm1, %v727_v41, %v729_v31  ;;  %v1044_v34 = vrot.slane %v945_v33, 1  ;;  %v2705_v28 = vld [vmem:[%s2485_s26 + $0x48] sm:$0xff]  ;;  %v2708_v31 = vld [vmem:[%s2485_s26 + $0x50] sm:$0xff] }
  0x30   : > { %2115 = vst.msk [vmem:[%s2623_s21 + $0x4] sm:$0xf] %vm2113_vm2, %v2326_v35  ;;  %v1289_v42 = vrot.slane %v1190_v50, 2  ;;  %v1505_v44 = vmul.f32 %v2538_v23, %v2662_v39  ;;  %v1750_v37 = vmul.f32 %v2543_v24, %v2662_v39  ;;  %v313_v47 = vmul.f32 %v2490_v3, %v2546_v25 }
  0x31   : > { %v1710_v45 = vadd.f32 %v1603_v29, %v1465_v32  ;;  %v836_v46 = vadd.f32 %v730_v6, %v590_v40  ;;  %v384_v41 = vmul.f32 %v2495_v4, %v2546_v25  ;;  %v1045_v48 = vsel %vm474_vm0, %v1042_v53, %v1044_v34 }
  0x32   : > { %v1290_v49 = vsel %vm720_vm1, %v1287_v55, %v1289_v42  ;;  %v1604_v51 = vrot.slane %v1505_v44, 1  ;;  %v2681_v54 = vmul.f32 %v2495_v4, %v2549_v30  ;;  %v630_v61 = vmul.f32 %v2500_v5, %v2546_v25 }
  0x33   : > { %v1955_v56 = vadd.f32 %v1848_v36, %v1710_v45  ;;  %v906_v58 = vadd.f32 %v874_v7, %v836_v46  ;;  %v485_v60 = vrot.slane %v384_v41, 1  ;;  %v1849_v63 = vrot.slane %v1750_v37, 2 }
  0x34   : > { %v1605_v62 = vsel %vm474_vm0, %v1602_v16, %v1604_v51  ;;  %v486_v9 = vrot.slane %v2681_v54, 1  ;;  %v631_v53 = vmul.f32 %v2500_v5, %v2549_v30  ;;  %v731_v12 = vrot.slane %v630_v61, 2  ;;  %v2738_v61 = vld [vmem:[%s2485_s26 + $0x58] sm:$0xff] }
  0x35   : > { %v2327_v55 = vpack.c.bf16 %v1955_v56, %v1955_v56  ;;  %v1151_v11 = vadd.f32 %v1045_v48, %v906_v58  ;;  %v875_v13 = vmul.f32 %v2469_v0, %v2626_v52  ;;  %v946_v25 = vmul.f32 %v2475_v1, %v2626_v52 }
  0x36   : > { %v487_v10 = vsel %vm474_vm0, %v485_v60, %v486_v9  ;;  %v732_v14 = vrot.slane %v631_v53, 2  ;;  %v947_v15 = vmul.f32 %v2475_v1, %v2630_v57  ;;  %v1191_v17 = vmul.f32 %v2480_v2, %v2626_v52 }
  0x37   : > { %2116 = vst.msk [vmem:[%s2623_s21 + $0x8] sm:$0xf] %vm2113_vm2, %v2327_v55  ;;  %v1396_v16 = vadd.f32 %v1290_v49, %v1151_v11  ;;  %v591_v8 = vadd.f32 %v487_v10, %v313_v47  ;;  %v1192_v19 = vmul.f32 %v2480_v2, %v2630_v57  ;;  %v1850_v20 = vsel %vm720_vm1, %v1847_v22, %v1849_v63 }
  0x38   : > { %v733_v26 = vsel %vm720_vm1, %v731_v12, %v732_v14  ;;  %v1046_v27 = vrot.slane %v946_v25, 1  ;;  %v1047_v29 = vrot.slane %v947_v15, 1  ;;  %v1291_v33 = vrot.slane %v1191_v17, 2 }
  0x39   : > { %v1466_v21 = vadd.f32 %v1434_v43, %v1396_v16  ;;  %v837_v7 = vadd.f32 %v733_v26, %v591_v8  ;;  %v1292_v35 = vrot.slane %v1192_v19, 2  ;;  %v1506_v38 = vmul.f32 %v2538_v23, %v2705_v28 }
  0x3a   : > { %v1048_v36 = vsel %vm474_vm0, %v1046_v27, %v1047_v29  ;;  %v2715_v22 = vmul.f32 %v2538_v23, %v2708_v31  ;;  %v1751_v50 = vmul.f32 %v2543_v24, %v2705_v28  ;;  %v2721_v6 = vmul.f32 %v2543_v24, %v2708_v31 }
  0x3b   : > { %v1711_v32 = vadd.f32 %v1605_v62, %v1466_v21  ;;  %v907_v40 = vadd.f32 %v875_v13, %v837_v7  ;;  %v1293_v34 = vsel %vm720_vm1, %v1291_v33, %v1292_v35  ;;  %v1435_v42 = vmul.f32 %v2530_v18, %v2705_v28 }
  0x3c   : > { %v1606_v43 = vrot.slane %v1506_v38, 1  ;;  %v1607_v44 = vrot.slane %v2715_v22, 1  ;;  %v1851_v46 = vrot.slane %v1751_v50, 2  ;;  %v386_v47 = vmul.f32 %v2495_v4, %v2581_v59 }
  0x3d   : > { %v1956_v37 = vadd.f32 %v1850_v20, %v1711_v32  ;;  %v1152_v45 = vadd.f32 %v1048_v36, %v907_v40  ;;  %v1852_v41 = vrot.slane %v2721_v6, 2  ;;  %v314_v48 = vmul.f32 %v2490_v3, %v2549_v30 }
  0x3e   : > { %v632_v49 = vmul.f32 %v2500_v5, %v2581_v59  ;;  %v948_v51 = vmul.f32 %v2475_v1, %v2662_v39  ;;  %v1608_v58 = vsel %vm474_vm0, %v1606_v43, %v1607_v44  ;;  %v488_v60 = vrot.slane %v386_v47, 1 }
  0x3f   : > { %v2328_v54 = vpack.c.bf16 %v1956_v37, %v1956_v37  ;;  %v1397_v56 = vadd.f32 %v1293_v34, %v1152_v45  ;;  %v876_v63 = vmul.f32 %v2469_v0, %v2630_v57  ;;  %v1193_v30 = vmul.f32 %v2480_v2, %v2662_v39 }
  0x40   : > { %v734_v62 = vrot.slane %v632_v49, 2  ;;  %v1049_v53 = vrot.slane %v948_v51, 1  ;;  %v489_v55 = vsel %vm474_vm0, %v486_v9, %v488_v60  ;;  %v1508_v11 = vmul.f32 %v2538_v23, %v2738_v61  ;;  %v2787_v51 = vld [vmem:[%s2485_s26 + $0x60] sm:$0xff] }
  0x41   : > { %2117 = vst.msk [vmem:[%s2623_s21 + $0xc] sm:$0xf] %vm2113_vm2, %v2328_v54  ;;  %v1467_v59 = vadd.f32 %v1435_v42, %v1397_v56  ;;  %v1753_v12 = vmul.f32 %v2543_v24, %v2738_v61  ;;  %v1853_v13 = vsel %vm720_vm1, %v1851_v46, %v1852_v41  ;;  %v592_v10 = vadd.f32 %v489_v55, %v314_v48 }
  0x42   : > { %v735_v25 = vsel %vm720_vm1, %v732_v14, %v734_v62  ;;  %v1294_v15 = vrot.slane %v1193_v30, 2  ;;  %v1050_v8 = vsel %vm474_vm0, %v1047_v29, %v1049_v53  ;;  %v1436_v9 = vmul.f32 %v2530_v18, %v2708_v31 }
  0x43   : > { %v1712_v16 = vadd.f32 %v1608_v58, %v1467_v59  ;;  %v1609_v17 = vrot.slane %v1508_v11, 1  ;;  %v838_v19 = vadd.f32 %v735_v25, %v592_v10  ;;  %v1854_v20 = vrot.slane %v1753_v12, 2  ;;  %v2791_v58 = vld [vmem:[%s2485_s26 + $0x68] sm:$0xff] }
  0x44   : > { %v387_v26 = vmul.f32 %v2495_v4, %v2626_v52  ;;  %v2762_v27 = vmul.f32 %v2495_v4, %v2630_v57  ;;  %v1295_v14 = vsel %vm720_vm1, %v1292_v35, %v1294_v15  ;;  %v315_v29 = vmul.f32 %v2490_v3, %v2626_v52 }
  0x45   : > { %v1957_v21 = vadd.f32 %v1853_v13, %v1712_v16  ;;  %v633_v7 = vmul.f32 %v2500_v5, %v2626_v52  ;;  %v908_v33 = vadd.f32 %v876_v63, %v838_v19  ;;  %v634_v22 = vmul.f32 %v2500_v5, %v2630_v57 }
  0x46   : > { %v490_v36 = vrot.slane %v387_v26, 1  ;;  %v491_v38 = vrot.slane %v2762_v27, 1  ;;  %v877_v40 = vmul.f32 %v2469_v0, %v2705_v28  ;;  %v949_v35 = vmul.f32 %v2475_v1, %v2705_v28 }
  0x47   : > { %v2329_v50 = vpack.c.bf16 %v1957_v21, %v1957_v21  ;;  %v736_v32 = vrot.slane %v633_v7, 2  ;;  %v1153_v34 = vadd.f32 %v1050_v8, %v908_v33  ;;  %v737_v42 = vrot.slane %v634_v22, 2 }
  0x48   : > { %v492_v52 = vsel %vm474_vm0, %v490_v36, %v491_v38  ;;  %v950_v43 = vmul.f32 %v2475_v1, %v2708_v31  ;;  %v1051_v45 = vrot.slane %v949_v35, 1  ;;  %v1194_v46 = vmul.f32 %v2480_v2, %v2705_v28  ;;  %v2824_v36 = vld [vmem:[%s2485_s26 + $0x70] sm:$0xff] }
  0x49   : > { %2118 = vst.msk [vmem:[%s2623_s21 + $0x10] sm:$0xf] %vm2113_vm2, %v2329_v50  ;;  %v593_v37 = vadd.f32 %v492_v52, %v315_v29  ;;  %v1195_v47 = vmul.f32 %v2480_v2, %v2708_v31  ;;  %v1398_v48 = vadd.f32 %v1295_v14, %v1153_v34  ;;  %v1610_v49 = vsel %vm474_vm0, %v1607_v44, %v1609_v17 }
  0x4a   : > { %v738_v54 = vsel %vm720_vm1, %v736_v32, %v737_v42  ;;  %v1052_v56 = vrot.slane %v950_v43, 1  ;;  %v1296_v62 = vrot.slane %v1194_v46, 2  ;;  %v1509_v53 = vmul.f32 %v2538_v23, %v2787_v51 }
  0x4b   : > { %v839_v60 = vadd.f32 %v738_v54, %v593_v37  ;;  %v1297_v63 = vrot.slane %v1195_v47, 2  ;;  %v1468_v30 = vadd.f32 %v1436_v9, %v1398_v48  ;;  %v2798_v55 = vmul.f32 %v2538_v23, %v2791_v58 }
  0x4c   : > { %v1053_v59 = vsel %vm474_vm0, %v1051_v45, %v1052_v56  ;;  %v1754_v44 = vmul.f32 %v2543_v24, %v2787_v51  ;;  %v1855_v11 = vsel %vm720_vm1, %v1852_v41, %v1854_v20  ;;  %v1611_v13 = vrot.slane %v1509_v53, 1 }
  0x4d   : > { %v909_v12 = vadd.f32 %v877_v40, %v839_v60  ;;  %v2807_v10 = vmul.f32 %v2543_v24, %v2791_v58  ;;  %v1713_v25 = vadd.f32 %v1610_v49, %v1468_v30  ;;  %v1298_v15 = vsel %vm720_vm1, %v1296_v62, %v1297_v63 }
  0x4e   : > { %v1437_v16 = vmul.f32 %v2530_v18, %v2787_v51  ;;  %v1612_v8 = vrot.slane %v2798_v55, 1  ;;  %v1856_v17 = vrot.slane %v1754_v44, 2  ;;  %v389_v6 = vmul.f32 %v2495_v4, %v2662_v39 }
  0x4f   : > { %v1154_v9 = vadd.f32 %v1053_v59, %v909_v12  ;;  %v635_v41 = vmul.f32 %v2500_v5, %v2662_v39  ;;  %v1958_v19 = vadd.f32 %v1855_v11, %v1713_v25  ;;  %v1857_v20 = vrot.slane %v2807_v10, 2 }
  0x50   : > { %v316_v26 = vmul.f32 %v2490_v3, %v2630_v57  ;;  %v951_v27 = vmul.f32 %v2475_v1, %v2738_v61  ;;  %v1613_v14 = vsel %vm474_vm0, %v1611_v13, %v1612_v8  ;;  %v493_v29 = vrot.slane %v389_v6, 1 }
  0x51   : > { %v1399_v21 = vadd.f32 %v1298_v15, %v1154_v9  ;;  %v739_v7 = vrot.slane %v635_v41, 2  ;;  %v2330_v33 = vpack.c.bf16 %v1958_v19, %v1958_v19  ;;  %v878_v39 = vmul.f32 %v2469_v0, %v2708_v31 }
  0x52   : > { %v1054_v22 = vrot.slane %v951_v27, 1  ;;  %v1196_v50 = vmul.f32 %v2480_v2, %v2738_v61  ;;  %v494_v57 = vsel %vm474_vm0, %v491_v38, %v493_v29  ;;  %v1511_v35 = vmul.f32 %v2538_v23, %v2824_v36  ;;  %v2873_v27 = vld [vmem:[%s2485_s26 + $0x78] sm:$0xff]  ;;  %v2877_v29 = vld [vmem:[%s2485_s26 + $0x80] sm:$0xff] }
  0x53   : > { %v1469_v32 = vadd.f32 %v1437_v16, %v1399_v21  ;;  %v740_v40 = vsel %vm720_vm1, %v737_v42, %v739_v7  ;;  %2119 = vst.msk [vmem:[%s2623_s21 + $0x14] sm:$0xf] %vm2113_vm2, %v2330_v33  ;;  %v1858_v34 = vsel %vm720_vm1, %v1856_v17, %v1857_v20  ;;  %v594_v52 = vadd.f32 %v494_v57, %v316_v26 }
  0x54   : > { %v1299_v43 = vrot.slane %v1196_v50, 2  ;;  %v1756_v37 = vmul.f32 %v2543_v24, %v2824_v36  ;;  %v1055_v46 = vsel %vm474_vm0, %v1052_v56, %v1054_v22  ;;  %v1438_v38 = vmul.f32 %v2530_v18, %v2791_v58 }
  0x55   : > { %v1714_v45 = vadd.f32 %v1613_v14, %v1469_v32  ;;  %v390_v42 = vmul.f32 %v2495_v4, %v2705_v28  ;;  %v840_v47 = vadd.f32 %v740_v40, %v594_v52  ;;  %v1614_v48 = vrot.slane %v1511_v35, 1 }
  0x56   : > { %v317_v49 = vmul.f32 %v2490_v3, %v2705_v28  ;;  %v2850_v54 = vmul.f32 %v2495_v4, %v2708_v31  ;;  %v1300_v62 = vsel %vm720_vm1, %v1297_v63, %v1299_v43  ;;  %v636_v53 = vmul.f32 %v2500_v5, %v2705_v28 }
  0x57   : > { %v1959_v60 = vadd.f32 %v1858_v34, %v1714_v45  ;;  %v495_v56 = vrot.slane %v390_v42, 1  ;;  %v910_v30 = vadd.f32 %v878_v39, %v840_v47  ;;  %v1859_v59 = vrot.slane %v1756_v37, 2 }
  0x58   : > { %v496_v55 = vrot.slane %v2850_v54, 1  ;;  %v637_v44 = vmul.f32 %v2500_v5, %v2708_v31  ;;  %v741_v12 = vrot.slane %v636_v53, 2  ;;  %v879_v13 = vmul.f32 %v2469_v0, %v2787_v51 }
  0x59   : > { %v2331_v11 = vpack.c.bf16 %v1959_v60, %v1959_v60  ;;  %v952_v63 = vmul.f32 %v2475_v1, %v2787_v51  ;;  %v1155_v25 = vadd.f32 %v1055_v46, %v910_v30  ;;  %v953_v16 = vmul.f32 %v2475_v1, %v2791_v58 }
  0x5a   : > { %v497_v28 = vsel %vm474_vm0, %v495_v56, %v496_v55  ;;  %v742_v15 = vrot.slane %v637_v44, 2  ;;  %v1197_v6 = vmul.f32 %v2480_v2, %v2787_v51  ;;  %v1198_v41 = vmul.f32 %v2480_v2, %v2791_v58 }
  0x5b   : > { %2120 = vst.msk [vmem:[%s2623_s21 + $0x18] sm:$0xf] %vm2113_vm2, %v2331_v11  ;;  %v595_v9 = vadd.f32 %v497_v28, %v317_v49  ;;  %v1056_v17 = vrot.slane %v952_v63, 1  ;;  %v1400_v19 = vadd.f32 %v1300_v62, %v1155_v25  ;;  %v1615_v26 = vsel %vm474_vm0, %v1612_v8, %v1614_v48 }
  0x5c   : > { %v743_v21 = vsel %vm720_vm1, %v741_v12, %v742_v15  ;;  %v1057_v14 = vrot.slane %v953_v16, 1  ;;  %v1301_v33 = vrot.slane %v1197_v6, 2  ;;  %v1302_v39 = vrot.slane %v1198_v41, 2 }
  0x5d   : > { %v841_v7 = vadd.f32 %v743_v21, %v595_v9  ;;  %v1512_v22 = vmul.f32 %v2538_v23, %v2873_v27  ;;  %v1470_v50 = vadd.f32 %v1438_v38, %v1400_v19  ;;  %v2884_v57 = vmul.f32 %v2538_v23, %v2877_v29 }
  0x5e   : > { %v1058_v32 = vsel %vm474_vm0, %v1056_v17, %v1057_v14  ;;  %v1757_v8 = vmul.f32 %v2543_v24, %v2873_v27  ;;  %v1860_v40 = vsel %vm720_vm1, %v1857_v20, %v1859_v59  ;;  %v2893_v52 = vmul.f32 %v2543_v24, %v2877_v29  ;;  %v2910_v59 = vld [vmem:[%s2485_s26 + $0x88] sm:$0xff] }
  0x5f   : > { %v911_v35 = vadd.f32 %v879_v13, %v841_v7  ;;  %v1616_v34 = vrot.slane %v1512_v22, 1  ;;  %v1715_v43 = vadd.f32 %v1615_v26, %v1470_v50  ;;  %v1303_v37 = vsel %vm720_vm1, %v1301_v33, %v1302_v39 }
  0x60   : > { %v1439_v45 = vmul.f32 %v2530_v18, %v2873_v27  ;;  %v1617_v46 = vrot.slane %v2884_v57, 1  ;;  %v1861_v42 = vrot.slane %v1757_v8, 2  ;;  %v392_v10 = vmul.f32 %v2495_v4, %v2738_v61 }
  0x61   : > { %v1156_v38 = vadd.f32 %v1058_v32, %v911_v35  ;;  %v638_v20 = vmul.f32 %v2500_v5, %v2738_v61  ;;  %v1960_v47 = vadd.f32 %v1860_v40, %v1715_v43  ;;  %v1862_v48 = vrot.slane %v2893_v52, 2 }
  0x62   : > { %v318_v49 = vmul.f32 %v2490_v3, %v2708_v31  ;;  %v954_v54 = vmul.f32 %v2475_v1, %v2824_v36  ;;  %v1618_v62 = vsel %vm474_vm0, %v1616_v34, %v1617_v46  ;;  %v498_v56 = vrot.slane %v392_v10, 1 }
  0x63   : > { %v1401_v60 = vadd.f32 %v1303_v37, %v1156_v38  ;;  %v744_v53 = vrot.slane %v638_v20, 2  ;;  %v2332_v30 = vpack.c.bf16 %v1960_v47, %v1960_v47  ;;  %v880_v61 = vmul.f32 %v2469_v0, %v2791_v58 }
  0x64   : > { %v1059_v44 = vrot.slane %v954_v54, 1  ;;  %v1199_v11 = vmul.f32 %v2480_v2, %v2824_v36  ;;  %v499_v31 = vsel %vm474_vm0, %v496_v55, %v498_v56  ;;  %v1514_v63 = vmul.f32 %v2538_v23, %v2910_v59  ;;  %v2959_v54 = vld [vmem:[%s2485_s26 + $0x90] sm:$0xff]  ;;  %v2963_v56 = vld [vmem:[%s2485_s26 + $0x98] sm:$0xff] }
  0x65   : > { %v1471_v12 = vadd.f32 %v1439_v45, %v1401_v60  ;;  %v745_v13 = vsel %vm720_vm1, %v742_v15, %v744_v53  ;;  %2121 = vst.msk [vmem:[%s2623_s21 + $0x1c] sm:$0xf] %vm2113_vm2, %v2332_v30  ;;  %v1863_v25 = vsel %vm720_vm1, %v1861_v42, %v1862_v48  ;;  %v596_v28 = vadd.f32 %v499_v31, %v318_v49 }
  0x66   : > { %v1304_v16 = vrot.slane %v1199_v11, 2  ;;  %v1759_v9 = vmul.f32 %v2543_v24, %v2910_v59  ;;  %v1060_v6 = vsel %vm474_vm0, %v1057_v14, %v1059_v44  ;;  %v1440_v55 = vmul.f32 %v2530_v18, %v2877_v29 }
  0x67   : > { %v1716_v17 = vadd.f32 %v1618_v62, %v1471_v12  ;;  %v393_v15 = vmul.f32 %v2495_v4, %v2787_v51  ;;  %v842_v41 = vadd.f32 %v745_v13, %v596_v28  ;;  %v1619_v19 = vrot.slane %v1514_v63, 1 }
  0x68   : > { %v319_v26 = vmul.f32 %v2490_v3, %v2787_v51  ;;  %v2936_v21 = vmul.f32 %v2495_v4, %v2791_v58  ;;  %v1305_v33 = vsel %vm720_vm1, %v1302_v39, %v1304_v16  ;;  %v639_v22 = vmul.f32 %v2500_v5, %v2787_v51 }
  0x69   : > { %v1961_v7 = vadd.f32 %v1863_v25, %v1716_v17  ;;  %v500_v14 = vrot.slane %v393_v15, 1  ;;  %v912_v50 = vadd.f32 %v880_v61, %v842_v41  ;;  %v1864_v32 = vrot.slane %v1759_v9, 2 }
  0x6a   : > { %v501_v57 = vrot.slane %v2936_v21, 1  ;;  %v640_v8 = vmul.f32 %v2500_v5, %v2791_v58  ;;  %v746_v35 = vrot.slane %v639_v22, 2  ;;  %v881_v34 = vmul.f32 %v2469_v0, %v2873_v27 }
  0x6b   : > { %v2333_v40 = vpack.c.bf16 %v1961_v7, %v1961_v7  ;;  %v955_v39 = vmul.f32 %v2475_v1, %v2873_v27  ;;  %v1157_v43 = vadd.f32 %v1060_v6, %v912_v50  ;;  %v956_v45 = vmul.f32 %v2475_v1, %v2877_v29 }
  0x6c   : > { %v502_v51 = vsel %vm474_vm0, %v500_v14, %v501_v57  ;;  %v747_v37 = vrot.slane %v640_v8, 2  ;;  %v1200_v10 = vmul.f32 %v2480_v2, %v2873_v27  ;;  %v1201_v20 = vmul.f32 %v2480_v2, %v2877_v29 }
  0x6d   : > { %2122 = vst.msk [vmem:[%s2623_s21 + $0x20] sm:$0xf] %vm2113_vm2, %v2333_v40  ;;  %v597_v38 = vadd.f32 %v502_v51, %v319_v26  ;;  %v1061_v42 = vrot.slane %v955_v39, 1  ;;  %v1402_v47 = vadd.f32 %v1305_v33, %v1157_v43  ;;  %v1620_v49 = vsel %vm474_vm0, %v1617_v46, %v1619_v19 }
  0x6e   : > { %v748_v60 = vsel %vm720_vm1, %v746_v35, %v747_v37  ;;  %v1062_v62 = vrot.slane %v956_v45, 1  ;;  %v1306_v30 = vrot.slane %v1200_v10, 2  ;;  %v1307_v61 = vrot.slane %v1201_v20, 2 }
  0x6f   : > { %v843_v53 = vadd.f32 %v748_v60, %v597_v38  ;;  %v1515_v44 = vmul.f32 %v2538_v23, %v2959_v54  ;;  %v1472_v11 = vadd.f32 %v1440_v55, %v1402_v47  ;;  %v2970_v31 = vmul.f32 %v2538_v23, %v2963_v56 }
  0x70   : > { %v1063_v12 = vsel %vm474_vm0, %v1061_v42, %v1062_v62  ;;  %v1760_v46 = vmul.f32 %v2543_v24, %v2959_v54  ;;  %v1865_v13 = vsel %vm720_vm1, %v1862_v48, %v1864_v32  ;;  %v2979_v28 = vmul.f32 %v2543_v24, %v2963_v56  ;;  %v2996_v32 = vld [vmem:[%s2485_s26 + $0xa0] sm:$0xff] }
  0x71   : > { %v913_v63 = vadd.f32 %v881_v34, %v843_v53  ;;  %v1621_v25 = vrot.slane %v1515_v44, 1  ;;  %v1717_v16 = vadd.f32 %v1620_v49, %v1472_v11  ;;  %v1308_v9 = vsel %vm720_vm1, %v1306_v30, %v1307_v61 }
  0x72   : > { %v1441_v17 = vmul.f32 %v2530_v18, %v2959_v54  ;;  %v1622_v6 = vrot.slane %v2970_v31, 1  ;;  %v1866_v15 = vrot.slane %v1760_v46, 2  ;;  %v395_v52 = vmul.f32 %v2495_v4, %v2824_v36 }
  0x73   : > { %v1158_v55 = vadd.f32 %v1063_v12, %v913_v63  ;;  %v641_v48 = vmul.f32 %v2500_v5, %v2824_v36  ;;  %v1962_v41 = vadd.f32 %v1865_v13, %v1717_v16  ;;  %v1867_v19 = vrot.slane %v2979_v28, 2  ;;  %v3083_v28 = vld [vmem:[%s3985_s2 + $0x1] ss:$0 sm:$0xff] }
  0x74   : > { %v320_v26 = vmul.f32 %v2490_v3, %v2791_v58  ;;  %v957_v21 = vmul.f32 %v2475_v1, %v2910_v59  ;;  %v1623_v33 = vsel %vm474_vm0, %v1621_v25, %v1622_v6  ;;  %v503_v14 = vrot.slane %v395_v52, 1  ;;  %v3052_v52 = vld [vmem:[%s2485_s26 + $0xa8] sm:$0xff] }
  0x75   : > { %v1403_v7 = vadd.f32 %v1308_v9, %v1158_v55  ;;  %v749_v22 = vrot.slane %v641_v48, 2  ;;  %v2334_v50 = vpack.c.bf16 %v1962_v41, %v1962_v41  ;;  %v882_v36 = vmul.f32 %v2469_v0, %v2877_v29  ;;  %v3057_v41 = vld [vmem:[%s2485_s26 + $0xb0] sm:$0xff] }
  0x76   : > { %v1064_v8 = vrot.slane %v957_v21, 1  ;;  %v1202_v40 = vmul.f32 %v2480_v2, %v2910_v59  ;;  %v504_v58 = vsel %vm474_vm0, %v501_v57, %v503_v14  ;;  %v1517_v39 = vmul.f32 %v2538_v23, %v2996_v32 }
  0x77   : > { %v1473_v35 = vadd.f32 %v1441_v17, %v1403_v7  ;;  %v750_v34 = vsel %vm720_vm1, %v747_v37, %v749_v22  ;;  %2123 = vst.msk [vmem:[%s2623_s21 + $0x24] sm:$0xf] %vm2113_vm2, %v2334_v50  ;;  %v1868_v43 = vsel %vm720_vm1, %v1866_v15, %v1867_v19  ;;  %v598_v51 = vadd.f32 %v504_v58, %v320_v26 }
  0x78   : > { %v1309_v45 = vrot.slane %v1202_v40, 2  ;;  %v1762_v38 = vmul.f32 %v2543_v24, %v2996_v32  ;;  %v1065_v10 = vsel %vm474_vm0, %v1062_v62, %v1064_v8  ;;  %v1442_v57 = vmul.f32 %v2530_v18, %v2963_v56 }
  0x79   : > { %v1718_v42 = vadd.f32 %v1623_v33, %v1473_v35  ;;  %v396_v37 = vmul.f32 %v2495_v4, %v2873_v27  ;;  %v844_v20 = vadd.f32 %v750_v34, %v598_v51  ;;  %v1624_v47 = vrot.slane %v1517_v39, 1 }
  0x7a   : > { %v321_v49 = vmul.f32 %v2490_v3, %v2873_v27  ;;  %v3022_v60 = vmul.f32 %v2495_v4, %v2877_v29  ;;  %v1310_v30 = vsel %vm720_vm1, %v1307_v61, %v1309_v45  ;;  %v642_v44 = vmul.f32 %v2500_v5, %v2873_v27 }
  0x7b   : > { %v1963_v53 = vadd.f32 %v1868_v43, %v1718_v42  ;;  %v505_v62 = vrot.slane %v396_v37, 1  ;;  %v914_v11 = vadd.f32 %v882_v36, %v844_v20  ;;  %v1869_v12 = vrot.slane %v1762_v38, 2  ;;  %v3098_v42 = vld [vmem:[%s3985_s2] ss:$0 sm:$0xff] }
  0x7c   : > { %v506_v31 = vrot.slane %v3022_v60, 1  ;;  %v3030_v46 = vmul.f32 %v2500_v5, %v2877_v29  ;;  %v751_v4 = vrot.slane %v642_v44, 2  ;;  %v883_v13 = vmul.f32 %v2469_v0, %v2959_v54  ;;  %v3125_v44 = vld [vmem:[%s3985_s2 + $0x6] ss:$0 sm:$0xff] }
  0x7d   : > { %v2335_v3 = vpack.c.bf16 %v1963_v53, %v1963_v53  ;;  %v958_v61 = vmul.f32 %v2475_v1, %v2959_v54  ;;  %v1159_v63 = vadd.f32 %v1065_v10, %v914_v11  ;;  %v3040_v16 = vmul.f32 %v2475_v1, %v2963_v56  ;;  %v3113_v53 = vld [vmem:[%s2485_s26 + $0xb8] sm:$0xff] }
  0x7e   : > { %v507_v27 = vsel %vm474_vm0, %v505_v62, %v506_v31  ;;  %v752_v25 = vrot.slane %v3030_v46, 2  ;;  %v1203_v0 = vmul.f32 %v2480_v2, %v2959_v54  ;;  %v3048_v17 = vmul.f32 %v2480_v2, %v2963_v56 }
  0x7f   : > { %2124 = vst.msk [vmem:[%s2623_s21 + $0x28] sm:$0xf] %vm2113_vm2, %v2335_v3  ;;  %v599_v5 = vadd.f32 %v507_v27, %v321_v49  ;;  %v1066_v9 = vrot.slane %v958_v61, 1  ;;  %v1404_v55 = vadd.f32 %v1310_v30, %v1159_v63  ;;  %v1625_v15 = vsel %vm474_vm0, %v1622_v6, %v1624_v47  ;;  %v3141_v27 = vld [vmem:[%s3985_s2 + $0xa] ss:$0 sm:$0xff] }
  0x80   : > { %v753_v48 = vsel %vm720_vm1, %v751_v4, %v752_v25  ;;  %v1067_v1 = vrot.slane %v3040_v16, 1  ;;  %v1311_v21 = vrot.slane %v1203_v0, 2  ;;  %v1312_v7 = vrot.slane %v3048_v17, 2 }
  0x81   : > { %v845_v26 = vadd.f32 %v753_v48, %v599_v5  ;;  %v1518_v33 = vmul.f32 %v2538_v23, %v3052_v52  ;;  %v1474_v2 = vadd.f32 %v1442_v57, %v1404_v55  ;;  %v3065_v6 = vmul.f32 %v2538_v23, %v3057_v41  ;;  %v3105_v57 = vld [vmem:[%s3985_s2 + $0x5] ss:$0 sm:$0xff] }
  0x82   : > { %v1068_v14 = vsel %vm474_vm0, %v1066_v9, %v1067_v1  ;;  %v1763_v22 = vmul.f32 %v2543_v24, %v3052_v52  ;;  %v1870_v50 = vsel %vm720_vm1, %v1867_v19, %v1869_v12  ;;  %v3074_v40 = vmul.f32 %v2543_v24, %v3057_v41  ;;  %v3090_v19 = vld [vmem:[%s3985_s2 + $0x2] ss:$0 sm:$0xff] }
  0x83   : > { %v915_v36 = vadd.f32 %v883_v13, %v845_v26  ;;  %v1626_v8 = vrot.slane %v1518_v33, 1  ;;  %v1719_v35 = vadd.f32 %v1625_v15, %v1474_v2  ;;  %v1313_v58 = vsel %vm720_vm1, %v1311_v21, %v1312_v7 }
  0x84   : > { %v1443_v34 = vmul.f32 %v2530_v18, %v3052_v52  ;;  %v1627_v39 = vrot.slane %v3065_v6, 1  ;;  %v1871_v51 = vrot.slane %v1763_v22, 2  ;;  %v398_v24 = vmul.f32 %v3083_v28, %v2910_v59 }
  0x85   : > { %v1160_v43 = vadd.f32 %v1068_v14, %v915_v36  ;;  %v644_v18 = vmul.f32 %v3090_v19, %v2910_v59  ;;  %v1964_v45 = vadd.f32 %v1870_v50, %v1719_v35  ;;  %v1872_v38 = vrot.slane %v3074_v40, 2 }
  0x86   : > { %v322_v10 = vmul.f32 %v3098_v42, %v2877_v29  ;;  %v960_v37 = vmul.f32 %v3105_v57, %v2996_v32  ;;  %v1628_v20 = vsel %vm474_vm0, %v1626_v8, %v1627_v39  ;;  %v508_v47 = vrot.slane %v398_v24, 1  ;;  %v3118_v29 = vld [vmem:[%s3985_s2 + $0x4] ss:$0 sm:$0xff] }
  0x87   : > { %v1405_v59 = vadd.f32 %v1313_v58, %v1160_v43  ;;  %v754_v49 = vrot.slane %v644_v18, 2  ;;  %v2336_v60 = vpack.c.bf16 %v1964_v45, %v1964_v45  ;;  %v884_v30 = vmul.f32 %v3118_v29, %v2963_v56 }
  0x88   : > { %v1069_v62 = vrot.slane %v960_v37, 1  ;;  %v1205_v11 = vmul.f32 %v3125_v44, %v2996_v32  ;;  %v509_v46 = vsel %vm474_vm0, %v506_v31, %v508_v47  ;;  %v1520_v4 = vmul.f32 %v2538_v23, %v3113_v53  ;;  %v3149_v23 = vld [vmem:[%s3985_s2 + $0x8] ss:$0 sm:$0xff]  ;;  %v3184_v37 = vld [vmem:[%s2485_s26 + $0xc0] sm:$0xff] }
  0x89   : > { %v1475_v12 = vadd.f32 %v1443_v34, %v1405_v59  ;;  %v755_v3 = vsel %vm720_vm1, %v752_v25, %v754_v49  ;;  %2125 = vst.msk [vmem:[%s2623_s21 + $0x2c] sm:$0xf] %vm2113_vm2, %v2336_v60  ;;  %v1873_v13 = vsel %vm720_vm1, %v1871_v51, %v1872_v38  ;;  %v600_v61 = vadd.f32 %v509_v46, %v322_v10  ;;  %v3188_v47 = vld [vmem:[%s2485_s26 + $0xc8] sm:$0xff] }
  0x8a   : > { %v1314_v63 = vrot.slane %v1205_v11, 2  ;;  %v1765_v31 = vmul.f32 %v3141_v27, %v3113_v53  ;;  %v1070_v16 = vsel %vm474_vm0, %v1067_v1, %v1069_v62  ;;  %v1444_v5 = vmul.f32 %v3149_v23, %v3057_v41  ;;  %v3193_v62 = vld [vmem:[%s3985_s2 + $0x9] ss:$0 sm:$0xff] }
  0x8b   : > { %v1720_v25 = vadd.f32 %v1628_v20, %v1475_v12  ;;  %v399_v9 = vmul.f32 %v3083_v28, %v2959_v54  ;;  %v846_v0 = vadd.f32 %v755_v3, %v600_v61  ;;  %v1629_v17 = vrot.slane %v1520_v4, 1 }
  0x8c   : > { %v323_v55 = vmul.f32 %v3098_v42, %v2959_v54  ;;  %v3159_v15 = vmul.f32 %v3083_v28, %v2963_v56  ;;  %v1315_v1 = vsel %vm720_vm1, %v1312_v7, %v1314_v63  ;;  %v645_v21 = vmul.f32 %v3090_v19, %v2959_v54 }
  0x8d   : > { %v1965_v48 = vadd.f32 %v1873_v13, %v1720_v25  ;;  %v510_v26 = vrot.slane %v399_v9, 1  ;;  %v916_v33 = vadd.f32 %v884_v30, %v846_v0  ;;  %v1874_v2 = vrot.slane %v1765_v31, 2 }
  0x8e   : > { %v511_v14 = vrot.slane %v3159_v15, 1  ;;  %v646_v22 = vmul.f32 %v3090_v19, %v2963_v56  ;;  %v756_v36 = vrot.slane %v645_v21, 2  ;;  %v885_v8 = vmul.f32 %v3118_v29, %v3052_v52 }
  0x8f   : > { %v2337_v50 = vpack.c.bf16 %v1965_v48, %v1965_v48  ;;  %v961_v7 = vmul.f32 %v3105_v57, %v3052_v52  ;;  %v1161_v35 = vadd.f32 %v1070_v16, %v916_v33  ;;  %v962_v34 = vmul.f32 %v3105_v57, %v3057_v41 }
  0x90   : > { %v512_v54 = vsel %vm474_vm0, %v510_v26, %v511_v14  ;;  %v757_v58 = vrot.slane %v646_v22, 2  ;;  %v1206_v24 = vmul.f32 %v3125_v44, %v3052_v52  ;;  %v1207_v18 = vmul.f32 %v3125_v44, %v3057_v41 }
  0x91   : > { %2126 = vst.msk [vmem:[%s2623_s21 + $0x30] sm:$0xf] %vm2113_vm2, %v2337_v50  ;;  %v601_v43 = vadd.f32 %v512_v54, %v323_v55  ;;  %v1071_v51 = vrot.slane %v961_v7, 1  ;;  %v1406_v45 = vadd.f32 %v1315_v1, %v1161_v35  ;;  %v1630_v10 = vsel %vm474_vm0, %v1627_v39, %v1629_v17 }
  0x92   : > { %v758_v59 = vsel %vm720_vm1, %v756_v36, %v757_v58  ;;  %v1072_v20 = vrot.slane %v962_v34, 1  ;;  %v1316_v60 = vrot.slane %v1206_v24, 2  ;;  %v1317_v30 = vrot.slane %v1207_v18, 2 }
  0x93   : > { %v847_v49 = vadd.f32 %v758_v59, %v601_v43  ;;  %v1521_v6 = vmul.f32 %v3193_v62, %v3184_v37  ;;  %v1476_v11 = vadd.f32 %v1444_v5, %v1406_v45  ;;  %v3200_v12 = vmul.f32 %v3193_v62, %v3188_v47 }
  0x94   : > { %v1073_v39 = vsel %vm474_vm0, %v1071_v51, %v1072_v20  ;;  %v1766_v46 = vmul.f32 %v3141_v27, %v3184_v37  ;;  %v1875_v3 = vsel %vm720_vm1, %v1872_v38, %v1874_v2  ;;  %v3209_v61 = vmul.f32 %v3141_v27, %v3188_v47  ;;  %v3226_v2 = vld [vmem:[%s2485_s26 + $0xd0] sm:$0xff] }
  0x95   : > { %v917_v4 = vadd.f32 %v885_v8, %v847_v49  ;;  %v1631_v13 = vrot.slane %v1521_v6, 1  ;;  %v1721_v63 = vadd.f32 %v1630_v10, %v1476_v11  ;;  %v1318_v31 = vsel %vm720_vm1, %v1316_v60, %v1317_v30 }
  0x96   : > { %v1445_v25 = vmul.f32 %v3149_v23, %v3184_v37  ;;  %v1632_v16 = vrot.slane %v3200_v12, 1  ;;  %v1876_v9 = vrot.slane %v1766_v46, 2  ;;  %v401_v40 = vmul.f32 %v3083_v28, %v2996_v32 }
  0x97   : > { %v1162_v5 = vadd.f32 %v1073_v39, %v917_v4  ;;  %v647_v38 = vmul.f32 %v3090_v19, %v2996_v32  ;;  %v1966_v0 = vadd.f32 %v1875_v3, %v1721_v63  ;;  %v1877_v17 = vrot.slane %v3209_v61, 2 }
  0x98   : > { %v324_v55 = vmul.f32 %v3098_v42, %v2963_v56  ;;  %v963_v15 = vmul.f32 %v3105_v57, %v3113_v53  ;;  %v1633_v1 = vsel %vm474_vm0, %v1631_v13, %v1632_v16  ;;  %v513_v26 = vrot.slane %v401_v40, 1 }
  0x99   : > { %v1407_v48 = vadd.f32 %v1318_v31, %v1162_v5  ;;  %v759_v21 = vrot.slane %v647_v38, 2  ;;  %v2338_v33 = vpack.c.bf16 %v1966_v0, %v1966_v0  ;;  %v886_v32 = vmul.f32 %v3118_v29, %v3057_v41 }
  0x9a   : > { %v1074_v22 = vrot.slane %v963_v15, 1  ;;  %v1208_v50 = vmul.f32 %v3125_v44, %v3113_v53  ;;  %v514_v56 = vsel %vm474_vm0, %v511_v14, %v513_v26  ;;  %v1523_v7 = vmul.f32 %v3193_v62, %v3226_v2  ;;  %v3275_v15 = vld [vmem:[%s2485_s26 + $0xd8] sm:$0xff]  ;;  %v3279_v26 = vld [vmem:[%s2485_s26 + $0xe0] sm:$0xff] }
  0x9b   : > { %v1477_v36 = vadd.f32 %v1445_v25, %v1407_v48  ;;  %v760_v8 = vsel %vm720_vm1, %v757_v58, %v759_v21  ;;  %2127 = vst.msk [vmem:[%s2623_s21 + $0x34] sm:$0xf] %vm2113_vm2, %v2338_v33  ;;  %v1878_v35 = vsel %vm720_vm1, %v1876_v9, %v1877_v17  ;;  %v602_v54 = vadd.f32 %v514_v56, %v324_v55 }
  0x9c   : > { %v1319_v34 = vrot.slane %v1208_v50, 2  ;;  %v1768_v43 = vmul.f32 %v3141_v27, %v3226_v2  ;;  %v1075_v24 = vsel %vm474_vm0, %v1072_v20, %v1074_v22  ;;  %v1446_v14 = vmul.f32 %v3149_v23, %v3188_v47 }
  0x9d   : > { %v1722_v51 = vadd.f32 %v1633_v1, %v1477_v36  ;;  %v402_v58 = vmul.f32 %v3083_v28, %v3052_v52  ;;  %v848_v18 = vadd.f32 %v760_v8, %v602_v54  ;;  %v1634_v45 = vrot.slane %v1523_v7, 1 }
  0x9e   : > { %v325_v10 = vmul.f32 %v3098_v42, %v3052_v52  ;;  %v3252_v59 = vmul.f32 %v3083_v28, %v3057_v41  ;;  %v1320_v60 = vsel %vm720_vm1, %v1317_v30, %v1319_v34  ;;  %v648_v6 = vmul.f32 %v3090_v19, %v3052_v52 }
  0x9f   : > { %v1967_v49 = vadd.f32 %v1878_v35, %v1722_v51  ;;  %v515_v20 = vrot.slane %v402_v58, 1  ;;  %v918_v11 = vadd.f32 %v886_v32, %v848_v18  ;;  %v1879_v39 = vrot.slane %v1768_v43, 2 }
  0xa0   : > { %v516_v12 = vrot.slane %v3252_v59, 1  ;;  %v649_v46 = vmul.f32 %v3090_v19, %v3057_v41  ;;  %v761_v4 = vrot.slane %v648_v6, 2  ;;  %v887_v13 = vmul.f32 %v3118_v29, %v3184_v37 }
  0xa1   : > { %v2339_v3 = vpack.c.bf16 %v1967_v49, %v1967_v49  ;;  %v964_v30 = vmul.f32 %v3105_v57, %v3184_v37  ;;  %v1163_v63 = vadd.f32 %v1075_v24, %v918_v11  ;;  %v965_v25 = vmul.f32 %v3105_v57, %v3188_v47 }
  0xa2   : > { %v517_v52 = vsel %vm474_vm0, %v515_v20, %v516_v12  ;;  %v762_v31 = vrot.slane %v649_v46, 2  ;;  %v1209_v40 = vmul.f32 %v3125_v44, %v3184_v37  ;;  %v1210_v38 = vmul.f32 %v3125_v44, %v3188_v47 }
  0xa3   : > { %2128 = vst.msk [vmem:[%s2623_s21 + $0x38] sm:$0xf] %vm2113_vm2, %v2339_v3  ;;  %v603_v5 = vadd.f32 %v517_v52, %v325_v10  ;;  %v1076_v9 = vrot.slane %v964_v30, 1  ;;  %v1408_v0 = vadd.f32 %v1320_v60, %v1163_v63  ;;  %v1635_v55 = vsel %vm474_vm0, %v1632_v16, %v1634_v45 }
  0xa4   : > { %v763_v48 = vsel %vm720_vm1, %v761_v4, %v762_v31  ;;  %v1077_v1 = vrot.slane %v965_v25, 1  ;;  %v1321_v33 = vrot.slane %v1209_v40, 2  ;;  %v1322_v32 = vrot.slane %v1210_v38, 2 }
  0xa5   : > { %v849_v21 = vadd.f32 %v763_v48, %v603_v5  ;;  %v1524_v22 = vmul.f32 %v3193_v62, %v3275_v15  ;;  %v1478_v50 = vadd.f32 %v1446_v14, %v1408_v0  ;;  %v3286_v56 = vmul.f32 %v3193_v62, %v3279_v26 }
  0xa6   : > { %v1078_v36 = vsel %vm474_vm0, %v1076_v9, %v1077_v1  ;;  %v1769_v16 = vmul.f32 %v3141_v27, %v3275_v15  ;;  %v1880_v8 = vsel %vm720_vm1, %v1877_v17, %v1879_v39  ;;  %v3295_v54 = vmul.f32 %v3141_v27, %v3279_v26  ;;  %v3312_v39 = vld [vmem:[%s2485_s26 + $0xe8] sm:$0xff] }
  0xa7   : > { %v919_v7 = vadd.f32 %v887_v13, %v849_v21  ;;  %v1636_v35 = vrot.slane %v1524_v22, 1  ;;  %v1723_v34 = vadd.f32 %v1635_v55, %v1478_v50  ;;  %v1323_v43 = vsel %vm720_vm1, %v1321_v33, %v1322_v32 }
  0xa8   : > { %v1447_v51 = vmul.f32 %v3149_v23, %v3275_v15  ;;  %v1637_v24 = vrot.slane %v3286_v56, 1  ;;  %v1881_v58 = vrot.slane %v1769_v16, 2  ;;  %v404_v61 = vmul.f32 %v3083_v28, %v3113_v53 }
  0xa9   : > { %v1164_v14 = vadd.f32 %v1078_v36, %v919_v7  ;;  %v650_v17 = vmul.f32 %v3090_v19, %v3113_v53  ;;  %v1968_v18 = vadd.f32 %v1880_v8, %v1723_v34  ;;  %v1882_v45 = vrot.slane %v3295_v54, 2 }
  0xaa   : > { %v326_v10 = vmul.f32 %v3098_v42, %v3057_v41  ;;  %v966_v59 = vmul.f32 %v3105_v57, %v3226_v2  ;;  %v1638_v60 = vsel %vm474_vm0, %v1636_v35, %v1637_v24  ;;  %v518_v20 = vrot.slane %v404_v61, 1 }
  0xab   : > { %v1409_v49 = vadd.f32 %v1323_v43, %v1164_v14  ;;  %v764_v6 = vrot.slane %v650_v17, 2  ;;  %v2340_v11 = vpack.c.bf16 %v1968_v18, %v1968_v18  ;;  %v888_v53 = vmul.f32 %v3118_v29, %v3188_v47 }
  0xac   : > { %v1079_v46 = vrot.slane %v966_v59, 1  ;;  %v1211_v3 = vmul.f32 %v3125_v44, %v3226_v2  ;;  %v519_v41 = vsel %vm474_vm0, %v516_v12, %v518_v20  ;;  %v1526_v30 = vmul.f32 %v3193_v62, %v3312_v39  ;;  %v3361_v59 = vld [vmem:[%s2485_s26 + $0xf0] sm:$0xff]  ;;  %v3365_v20 = vld [vmem:[%s2485_s26 + $0xf8] sm:$0xff] }
  0xad   : > { %v1479_v4 = vadd.f32 %v1447_v51, %v1409_v49  ;;  %v765_v13 = vsel %vm720_vm1, %v762_v31, %v764_v6  ;;  %2129 = vst.msk [vmem:[%s2623_s21 + $0x3c] sm:$0xf] %vm2113_vm2, %v2340_v11  ;;  %v1883_v63 = vsel %vm720_vm1, %v1881_v58, %v1882_v45  ;;  %v604_v52 = vadd.f32 %v519_v41, %v326_v10 }
  0xae   : > { %v1324_v25 = vrot.slane %v1211_v3, 2  ;;  %v1771_v5 = vmul.f32 %v3141_v27, %v3312_v39  ;;  %v1080_v40 = vsel %vm474_vm0, %v1077_v1, %v1079_v46  ;;  %v1448_v12 = vmul.f32 %v3149_v23, %v3279_v26 }
  0xaf   : > { %v1724_v9 = vadd.f32 %v1638_v60, %v1479_v4  ;;  %v405_v31 = vmul.f32 %v3083_v28, %v3184_v37  ;;  %v850_v38 = vadd.f32 %v765_v13, %v604_v52  ;;  %v1639_v0 = vrot.slane %v1526_v30, 1 }
  0xb0   : > { %v327_v55 = vmul.f32 %v3098_v42, %v3184_v37  ;;  %v3338_v48 = vmul.f32 %v3083_v28, %v3188_v47  ;;  %v1325_v33 = vsel %vm720_vm1, %v1322_v32, %v1324_v25  ;;  %v651_v22 = vmul.f32 %v3090_v19, %v3184_v37 }
  0xb1   : > { %v1969_v21 = vadd.f32 %v1883_v63, %v1724_v9  ;;  %v520_v1 = vrot.slane %v405_v31, 1  ;;  %v920_v50 = vadd.f32 %v888_v53, %v850_v38  ;;  %v1884_v36 = vrot.slane %v1771_v5, 2 }
  0xb2   : > { %v521_v56 = vrot.slane %v3338_v48, 1  ;;  %v652_v16 = vmul.f32 %v3090_v19, %v3188_v47  ;;  %v766_v7 = vrot.slane %v651_v22, 2  ;;  %v889_v35 = vmul.f32 %v3118_v29, %v3275_v15 }
  0xb3   : > { %v2341_v8 = vpack.c.bf16 %v1969_v21, %v1969_v21  ;;  %v967_v32 = vmul.f32 %v3105_v57, %v3275_v15  ;;  %v1165_v34 = vadd.f32 %v1080_v40, %v920_v50  ;;  %v968_v51 = vmul.f32 %v3105_v57, %v3279_v26 }
  0xb4   : > { %v522_v37 = vsel %vm474_vm0, %v520_v1, %v521_v56  ;;  %v767_v43 = vrot.slane %v652_v16, 2  ;;  %v1212_v61 = vmul.f32 %v3125_v44, %v3275_v15  ;;  %v1213_v17 = vmul.f32 %v3125_v44, %v3279_v26 }
  0xb5   : > { %2130 = vst.msk [vmem:[%s2623_s21 + $0x40] sm:$0xf] %vm2113_vm2, %v2341_v8  ;;  %v605_v14 = vadd.f32 %v522_v37, %v327_v55  ;;  %v1081_v58 = vrot.slane %v967_v32, 1  ;;  %v1410_v18 = vadd.f32 %v1325_v33, %v1165_v34  ;;  %v1640_v10 = vsel %vm474_vm0, %v1637_v24, %v1639_v0 }
  0xb6   : > { %v768_v49 = vsel %vm720_vm1, %v766_v7, %v767_v43  ;;  %v1082_v60 = vrot.slane %v968_v51, 1  ;;  %v1326_v11 = vrot.slane %v1212_v61, 2  ;;  %v1327_v53 = vrot.slane %v1213_v17, 2 }
  0xb7   : > { %v851_v6 = vadd.f32 %v768_v49, %v605_v14  ;;  %v1527_v46 = vmul.f32 %v3193_v62, %v3361_v59  ;;  %v1480_v3 = vadd.f32 %v1448_v12, %v1410_v18  ;;  %v3372_v41 = vmul.f32 %v3193_v62, %v3365_v20 }
  0xb8   : > { %v1083_v4 = vsel %vm474_vm0, %v1081_v58, %v1082_v60  ;;  %v1772_v24 = vmul.f32 %v3141_v27, %v3361_v59  ;;  %v1885_v13 = vsel %vm720_vm1, %v1882_v45, %v1884_v36  ;;  %v3381_v52 = vmul.f32 %v3141_v27, %v3365_v20  ;;  %v3398_v36 = vld [vmem:[%s2485_s26 + $0x100] sm:$0xff] }
  0xb9   : > { %v921_v30 = vadd.f32 %v889_v35, %v851_v6  ;;  %v1641_v63 = vrot.slane %v1527_v46, 1  ;;  %v1725_v25 = vadd.f32 %v1640_v10, %v1480_v3  ;;  %v1328_v5 = vsel %vm720_vm1, %v1326_v11, %v1327_v53 }
  0xba   : > { %v1449_v9 = vmul.f32 %v3149_v23, %v3361_v59  ;;  %v1642_v40 = vrot.slane %v3372_v41, 1  ;;  %v1886_v31 = vrot.slane %v1772_v24, 2  ;;  %v407_v54 = vmul.f32 %v3083_v28, %v3226_v2 }
  0xbb   : > { %v1166_v12 = vadd.f32 %v1083_v4, %v921_v30  ;;  %v653_v45 = vmul.f32 %v3090_v19, %v3226_v2  ;;  %v1970_v38 = vadd.f32 %v1885_v13, %v1725_v25  ;;  %v1887_v0 = vrot.slane %v3381_v52, 2 }
  0xbc   : > { %v328_v55 = vmul.f32 %v3098_v42, %v3188_v47  ;;  %v969_v48 = vmul.f32 %v3105_v57, %v3312_v39  ;;  %v1643_v33 = vsel %vm474_vm0, %v1641_v63, %v1642_v40  ;;  %v523_v1 = vrot.slane %v407_v54, 1 }
  0xbd   : > { %v1411_v21 = vadd.f32 %v1328_v5, %v1166_v12  ;;  %v769_v22 = vrot.slane %v653_v45, 2  ;;  %v2342_v50 = vpack.c.bf16 %v1970_v38, %v1970_v38  ;;  %v890_v2 = vmul.f32 %v3118_v29, %v3279_v26 }
  0xbe   : > { %v1084_v16 = vrot.slane %v969_v48, 1  ;;  %v1214_v8 = vmul.f32 %v3125_v44, %v3312_v39  ;;  %v524_v47 = vsel %vm474_vm0, %v521_v56, %v523_v1  ;;  %v1529_v32 = vmul.f32 %v3193_v62, %v3398_v36  ;;  %v3447_v48 = vld [vmem:[%s2485_s26 + $0x108] sm:$0xff]  ;;  %v3451_v1 = vld [vmem:[%s2485_s26 + $0x110] sm:$0xff] }
  0xbf   : > { %v1481_v7 = vadd.f32 %v1449_v9, %v1411_v21  ;;  %v770_v35 = vsel %vm720_vm1, %v767_v43, %v769_v22  ;;  %2131 = vst.msk [vmem:[%s2623_s21 + $0x44] sm:$0xf] %vm2113_vm2, %v2342_v50  ;;  %v1888_v34 = vsel %vm720_vm1, %v1886_v31, %v1887_v0  ;;  %v606_v37 = vadd.f32 %v524_v47, %v328_v55 }
  0xc0   : > { %v1329_v51 = vrot.slane %v1214_v8, 2  ;;  %v1774_v14 = vmul.f32 %v3141_v27, %v3398_v36  ;;  %v1085_v61 = vsel %vm474_vm0, %v1082_v60, %v1084_v16  ;;  %v1450_v56 = vmul.f32 %v3149_v23, %v3365_v20 }
  0xc1   : > { %v1726_v58 = vadd.f32 %v1643_v33, %v1481_v7  ;;  %v408_v43 = vmul.f32 %v3083_v28, %v3275_v15  ;;  %v852_v17 = vadd.f32 %v770_v35, %v606_v37  ;;  %v1644_v18 = vrot.slane %v1529_v32, 1 }
  0xc2   : > { %v329_v10 = vmul.f32 %v3098_v42, %v3275_v15  ;;  %v3424_v49 = vmul.f32 %v3083_v28, %v3279_v26  ;;  %v1330_v11 = vsel %vm720_vm1, %v1327_v53, %v1329_v51  ;;  %v654_v46 = vmul.f32 %v3090_v19, %v3275_v15 }
  0xc3   : > { %v1971_v6 = vadd.f32 %v1888_v34, %v1726_v58  ;;  %v525_v60 = vrot.slane %v408_v43, 1  ;;  %v922_v3 = vadd.f32 %v890_v2, %v852_v17  ;;  %v1889_v4 = vrot.slane %v1774_v14, 2 }
  0xc4   : > { %v526_v41 = vrot.slane %v3424_v49, 1  ;;  %v655_v24 = vmul.f32 %v3090_v19, %v3279_v26  ;;  %v771_v30 = vrot.slane %v654_v46, 2  ;;  %v891_v63 = vmul.f32 %v3118_v29, %v3361_v59 }
  0xc5   : > { %v2343_v13 = vpack.c.bf16 %v1971_v6, %v1971_v6  ;;  %v970_v53 = vmul.f32 %v3105_v57, %v3361_v59  ;;  %v1167_v25 = vadd.f32 %v1085_v61, %v922_v3  ;;  %v971_v9 = vmul.f32 %v3105_v57, %v3365_v20 }
  0xc6   : > { %v527_v15 = vsel %vm474_vm0, %v525_v60, %v526_v41  ;;  %v772_v5 = vrot.slane %v655_v24, 2  ;;  %v1215_v54 = vmul.f32 %v3125_v44, %v3361_v59  ;;  %v1216_v45 = vmul.f32 %v3125_v44, %v3365_v20 }
  0xc7   : > { %2132 = vst.msk [vmem:[%s2623_s21 + $0x48] sm:$0xf] %vm2113_vm2, %v2343_v13  ;;  %v607_v12 = vadd.f32 %v527_v15, %v329_v10  ;;  %v1086_v31 = vrot.slane %v970_v53, 1  ;;  %v1412_v38 = vadd.f32 %v1330_v11, %v1167_v25  ;;  %v1645_v55 = vsel %vm474_vm0, %v1642_v40, %v1644_v18 }
  0xc8   : > { %v773_v21 = vsel %vm720_vm1, %v771_v30, %v772_v5  ;;  %v1087_v33 = vrot.slane %v971_v9, 1  ;;  %v1331_v50 = vrot.slane %v1215_v54, 2  ;;  %v1332_v2 = vrot.slane %v1216_v45, 2 }
  0xc9   : > { %v853_v22 = vadd.f32 %v773_v21, %v607_v12  ;;  %v1530_v16 = vmul.f32 %v3193_v62, %v3447_v48  ;;  %v1482_v8 = vadd.f32 %v1450_v56, %v1412_v38  ;;  %v3458_v47 = vmul.f32 %v3193_v62, %v3451_v1 }
  0xca   : > { %v1088_v7 = vsel %vm474_vm0, %v1086_v31, %v1087_v33  ;;  %v1775_v40 = vmul.f32 %v3141_v27, %v3447_v48  ;;  %v1890_v35 = vsel %vm720_vm1, %v1887_v0, %v1889_v4  ;;  %v3467_v37 = vmul.f32 %v3141_v27, %v3451_v1  ;;  %v3484_v4 = vld [vmem:[%s2485_s26 + $0x118] sm:$0xff] }
  0xcb   : > { %v923_v32 = vadd.f32 %v891_v63, %v853_v22  ;;  %v1646_v34 = vrot.slane %v1530_v16, 1  ;;  %v1727_v51 = vadd.f32 %v1645_v55, %v1482_v8  ;;  %v1333_v14 = vsel %vm720_vm1, %v1331_v50, %v1332_v2 }
  0xcc   : > { %v1451_v58 = vmul.f32 %v3149_v23, %v3447_v48  ;;  %v1647_v61 = vrot.slane %v3458_v47, 1  ;;  %v1891_v43 = vrot.slane %v1775_v40, 2  ;;  %v410_v52 = vmul.f32 %v3083_v28, %v3312_v39 }
  0xcd   : > { %v1168_v56 = vadd.f32 %v1088_v7, %v923_v32  ;;  %v656_v0 = vmul.f32 %v3090_v19, %v3312_v39  ;;  %v1972_v17 = vadd.f32 %v1890_v35, %v1727_v51  ;;  %v1892_v18 = vrot.slane %v3467_v37, 2 }
  0xce   : > { %v330_v10 = vmul.f32 %v3098_v42, %v3279_v26  ;;  %v972_v49 = vmul.f32 %v3105_v57, %v3398_v36  ;;  %v1648_v11 = vsel %vm474_vm0, %v1646_v34, %v1647_v61  ;;  %v528_v60 = vrot.slane %v410_v52, 1 }
  0xcf   : > { %v1413_v6 = vadd.f32 %v1333_v14, %v1168_v56  ;;  %v774_v46 = vrot.slane %v656_v0, 2  ;;  %v2344_v3 = vpack.c.bf16 %v1972_v17, %v1972_v17  ;;  %v892_v39 = vmul.f32 %v3118_v29, %v3365_v20 }
  0xd0   : > { %v1089_v24 = vrot.slane %v972_v49, 1  ;;  %v1217_v13 = vmul.f32 %v3125_v44, %v3398_v36  ;;  %v529_v26 = vsel %vm474_vm0, %v526_v41, %v528_v60  ;;  %v1532_v53 = vmul.f32 %v3193_v62, %v3484_v4  ;;  %v3533_v49 = vld [vmem:[%s2485_s26 + $0x120] sm:$0xff]  ;;  %v3537_v60 = vld [vmem:[%s2485_s26 + $0x128] sm:$0xff] }
  0xd1   : > { %v1483_v30 = vadd.f32 %v1451_v58, %v1413_v6  ;;  %v775_v63 = vsel %vm720_vm1, %v772_v5, %v774_v46  ;;  %2133 = vst.msk [vmem:[%s2623_s21 + $0x4c] sm:$0xf] %vm2113_vm2, %v2344_v3  ;;  %v1893_v25 = vsel %vm720_vm1, %v1891_v43, %v1892_v18  ;;  %v608_v15 = vadd.f32 %v529_v26, %v330_v10 }
  0xd2   : > { %v1334_v9 = vrot.slane %v1217_v13, 2  ;;  %v1777_v12 = vmul.f32 %v3141_v27, %v3484_v4  ;;  %v1090_v54 = vsel %vm474_vm0, %v1087_v33, %v1089_v24  ;;  %v1452_v41 = vmul.f32 %v3149_v23, %v3451_v1 }
  0xd3   : > { %v1728_v31 = vadd.f32 %v1648_v11, %v1483_v30  ;;  %v411_v5 = vmul.f32 %v3083_v28, %v3361_v59  ;;  %v854_v45 = vadd.f32 %v775_v63, %v608_v15  ;;  %v1649_v38 = vrot.slane %v1532_v53, 1 }
  0xd4   : > { %v331_v55 = vmul.f32 %v3098_v42, %v3361_v59  ;;  %v3510_v21 = vmul.f32 %v3083_v28, %v3365_v20  ;;  %v1335_v50 = vsel %vm720_vm1, %v1332_v2, %v1334_v9  ;;  %v657_v16 = vmul.f32 %v3090_v19, %v3361_v59 }
  0xd5   : > { %v1973_v22 = vadd.f32 %v1893_v25, %v1728_v31  ;;  %v530_v33 = vrot.slane %v411_v5, 1  ;;  %v924_v8 = vadd.f32 %v892_v39, %v854_v45  ;;  %v1894_v7 = vrot.slane %v1777_v12, 2 }
  0xd6   : > { %v531_v47 = vrot.slane %v3510_v21, 1  ;;  %v658_v40 = vmul.f32 %v3090_v19, %v3365_v20  ;;  %v776_v32 = vrot.slane %v657_v16, 2  ;;  %v893_v34 = vmul.f32 %v3118_v29, %v3447_v48 }
  0xd7   : > { %v2345_v35 = vpack.c.bf16 %v1973_v22, %v1973_v22  ;;  %v973_v2 = vmul.f32 %v3105_v57, %v3447_v48  ;;  %v1169_v51 = vadd.f32 %v1090_v54, %v924_v8  ;;  %v974_v58 = vmul.f32 %v3105_v57, %v3451_v1 }
  0xd8   : > { %v532_v59 = vsel %vm474_vm0, %v530_v33, %v531_v47  ;;  %v777_v14 = vrot.slane %v658_v40, 2  ;;  %v1218_v52 = vmul.f32 %v3125_v44, %v3447_v48  ;;  %v1219_v0 = vmul.f32 %v3125_v44, %v3451_v1 }
  0xd9   : > { %2134 = vst.msk [vmem:[%s2623_s21 + $0x50] sm:$0xf] %vm2113_vm2, %v2345_v35  ;;  %v609_v56 = vadd.f32 %v532_v59, %v331_v55  ;;  %v1091_v43 = vrot.slane %v973_v2, 1  ;;  %v1414_v17 = vadd.f32 %v1335_v50, %v1169_v51  ;;  %v1650_v10 = vsel %vm474_vm0, %v1647_v61, %v1649_v38 }
  0xda   : > { %v778_v6 = vsel %vm720_vm1, %v776_v32, %v777_v14  ;;  %v1092_v11 = vrot.slane %v974_v58, 1  ;;  %v1336_v3 = vrot.slane %v1218_v52, 2  ;;  %v1337_v39 = vrot.slane %v1219_v0, 2 }
  0xdb   : > { %v855_v46 = vadd.f32 %v778_v6, %v609_v56  ;;  %v1533_v24 = vmul.f32 %v3193_v62, %v3533_v49  ;;  %v1484_v13 = vadd.f32 %v1452_v41, %v1414_v17  ;;  %v3544_v26 = vmul.f32 %v3193_v62, %v3537_v60 }
  0xdc   : > { %v1093_v30 = vsel %vm474_vm0, %v1091_v43, %v1092_v11  ;;  %v1778_v61 = vmul.f32 %v3141_v27, %v3533_v49  ;;  %v1895_v63 = vsel %vm720_vm1, %v1892_v18, %v1894_v7  ;;  %v3553_v15 = vmul.f32 %v3141_v27, %v3537_v60  ;;  %v3570_v7 = vld [vmem:[%s2485_s26 + $0x130] sm:$0xff] }
  0xdd   : > { %v925_v53 = vadd.f32 %v893_v34, %v855_v46  ;;  %v1651_v25 = vrot.slane %v1533_v24, 1  ;;  %v1729_v9 = vadd.f32 %v1650_v10, %v1484_v13  ;;  %v1338_v12 = vsel %vm720_vm1, %v1336_v3, %v1337_v39 }
  0xde   : > { %v1453_v31 = vmul.f32 %v3149_v23, %v3533_v49  ;;  %v1652_v54 = vrot.slane %v3544_v26, 1  ;;  %v1896_v5 = vrot.slane %v1778_v61, 2  ;;  %v413_v37 = vmul.f32 %v3083_v28, %v3398_v36 }
  0xdf   : > { %v1170_v41 = vadd.f32 %v1093_v30, %v925_v53  ;;  %v659_v18 = vmul.f32 %v3090_v19, %v3398_v36  ;;  %v1974_v45 = vadd.f32 %v1895_v63, %v1729_v9  ;;  %v1897_v38 = vrot.slane %v3553_v15, 2 }
  0xe0   : > { %v332_v55 = vmul.f32 %v3098_v42, %v3365_v20  ;;  %v975_v21 = vmul.f32 %v3105_v57, %v3484_v4  ;;  %v1653_v50 = vsel %vm474_vm0, %v1651_v25, %v1652_v54  ;;  %v533_v33 = vrot.slane %v413_v37, 1 }
  0xe1   : > { %v1415_v22 = vadd.f32 %v1338_v12, %v1170_v41  ;;  %v779_v16 = vrot.slane %v659_v18, 2  ;;  %v2346_v8 = vpack.c.bf16 %v1974_v45, %v1974_v45  ;;  %v894_v36 = vmul.f32 %v3118_v29, %v3451_v1 }
  0xe2   : > { %v1094_v40 = vrot.slane %v975_v21, 1  ;;  %v1220_v35 = vmul.f32 %v3125_v44, %v3484_v4  ;;  %v534_v20 = vsel %vm474_vm0, %v531_v47, %v533_v33  ;;  %v1535_v2 = vmul.f32 %v3193_v62, %v3570_v7  ;;  %v3619_v21 = vld [vmem:[%s2485_s26 + $0x138] sm:$0xff]  ;;  %v3623_v33 = vld [vmem:[%s2485_s26 + $0x140] sm:$0xff] }
  0xe3   : > { %v1485_v32 = vadd.f32 %v1453_v31, %v1415_v22  ;;  %v780_v34 = vsel %vm720_vm1, %v777_v14, %v779_v16  ;;  %2135 = vst.msk [vmem:[%s2623_s21 + $0x54] sm:$0xf] %vm2113_vm2, %v2346_v8  ;;  %v1898_v51 = vsel %vm720_vm1, %v1896_v5, %v1897_v38  ;;  %v610_v59 = vadd.f32 %v534_v20, %v332_v55 }
  0xe4   : > { %v1339_v58 = vrot.slane %v1220_v35, 2  ;;  %v1780_v56 = vmul.f32 %v3141_v27, %v3570_v7  ;;  %v1095_v52 = vsel %vm474_vm0, %v1092_v11, %v1094_v40  ;;  %v1454_v47 = vmul.f32 %v3149_v23, %v3537_v60 }
  0xe5   : > { %v1730_v43 = vadd.f32 %v1653_v50, %v1485_v32  ;;  %v414_v14 = vmul.f32 %v3083_v28, %v3447_v48  ;;  %v856_v0 = vadd.f32 %v780_v34, %v610_v59  ;;  %v1654_v17 = vrot.slane %v1535_v2, 1 }
  0xe6   : > { %v333_v10 = vmul.f32 %v3098_v42, %v3447_v48  ;;  %v3596_v6 = vmul.f32 %v3083_v28, %v3451_v1  ;;  %v1340_v3 = vsel %vm720_vm1, %v1337_v39, %v1339_v58  ;;  %v660_v24 = vmul.f32 %v3090_v19, %v3447_v48 }
  0xe7   : > { %v1975_v46 = vadd.f32 %v1898_v51, %v1730_v43  ;;  %v535_v11 = vrot.slane %v414_v14, 1  ;;  %v926_v13 = vadd.f32 %v894_v36, %v856_v0  ;;  %v1899_v30 = vrot.slane %v1780_v56, 2 }
  0xe8   : > { %v536_v26 = vrot.slane %v3596_v6, 1  ;;  %v661_v61 = vmul.f32 %v3090_v19, %v3451_v1  ;;  %v781_v53 = vrot.slane %v660_v24, 2  ;;  %v895_v25 = vmul.f32 %v3118_v29, %v3533_v49 }
  0xe9   : > { %v2347_v63 = vpack.c.bf16 %v1975_v46, %v1975_v46  ;;  %v976_v39 = vmul.f32 %v3105_v57, %v3533_v49  ;;  %v1171_v9 = vadd.f32 %v1095_v52, %v926_v13  ;;  %v977_v31 = vmul.f32 %v3105_v57, %v3537_v60 }
  0xea   : > { %v537_v48 = vsel %vm474_vm0, %v535_v11, %v536_v26  ;;  %v782_v12 = vrot.slane %v661_v61, 2  ;;  %v1221_v37 = vmul.f32 %v3125_v44, %v3533_v49  ;;  %v1222_v18 = vmul.f32 %v3125_v44, %v3537_v60 }
  0xeb   : > { %2136 = vst.msk [vmem:[%s2623_s21 + $0x58] sm:$0xf] %vm2113_vm2, %v2347_v63  ;;  %v611_v41 = vadd.f32 %v537_v48, %v333_v10  ;;  %v1096_v5 = vrot.slane %v976_v39, 1  ;;  %v1416_v45 = vadd.f32 %v1340_v3, %v1171_v9  ;;  %v1655_v55 = vsel %vm474_vm0, %v1652_v54, %v1654_v17 }
  0xec   : > { %v783_v22 = vsel %vm720_vm1, %v781_v53, %v782_v12  ;;  %v1097_v50 = vrot.slane %v977_v31, 1  ;;  %v1341_v8 = vrot.slane %v1221_v37, 2  ;;  %v1342_v36 = vrot.slane %v1222_v18, 2 }
  0xed   : > { %v857_v16 = vadd.f32 %v783_v22, %v611_v41  ;;  %v1536_v40 = vmul.f32 %v3193_v62, %v3619_v21  ;;  %v1486_v35 = vadd.f32 %v1454_v47, %v1416_v45  ;;  %v3630_v20 = vmul.f32 %v3193_v62, %v3623_v33 }
  0xee   : > { %v1098_v32 = vsel %vm474_vm0, %v1096_v5, %v1097_v50  ;;  %v1781_v54 = vmul.f32 %v3141_v27, %v3619_v21  ;;  %v1900_v34 = vsel %vm720_vm1, %v1897_v38, %v1899_v30  ;;  %v3639_v59 = vmul.f32 %v3141_v27, %v3623_v33  ;;  %v3656_v30 = vld [vmem:[%s2485_s26 + $0x148] sm:$0xff] }
  0xef   : > { %v927_v2 = vadd.f32 %v895_v25, %v857_v16  ;;  %v1656_v51 = vrot.slane %v1536_v40, 1  ;;  %v1731_v58 = vadd.f32 %v1655_v55, %v1486_v35  ;;  %v1343_v56 = vsel %vm720_vm1, %v1341_v8, %v1342_v36 }
  0xf0   : > { %v1455_v43 = vmul.f32 %v3149_v23, %v3619_v21  ;;  %v1657_v52 = vrot.slane %v3630_v20, 1  ;;  %v1901_v14 = vrot.slane %v1781_v54, 2  ;;  %v416_v15 = vmul.f32 %v3083_v28, %v3484_v4 }
  0xf1   : > { %v1172_v47 = vadd.f32 %v1098_v32, %v927_v2  ;;  %v662_v38 = vmul.f32 %v3090_v19, %v3484_v4  ;;  %v1976_v0 = vadd.f32 %v1900_v34, %v1731_v58  ;;  %v1902_v17 = vrot.slane %v3639_v59, 2  ;;  %v3743_v59 = vld [vmem:[%s3985_s2 + $0x1] ss:$0 sm:$0xff] }
  0xf2   : > { %v334_v10 = vmul.f32 %v3098_v42, %v3451_v1  ;;  %v978_v6 = vmul.f32 %v3105_v57, %v3570_v7  ;;  %v1658_v3 = vsel %vm474_vm0, %v1656_v51, %v1657_v52  ;;  %v538_v11 = vrot.slane %v416_v15, 1  ;;  %v3712_v15 = vld [vmem:[%s2485_s26 + $0x150] sm:$0xff] }
  0xf3   : > { %v1417_v46 = vadd.f32 %v1343_v56, %v1172_v47  ;;  %v784_v24 = vrot.slane %v662_v38, 2  ;;  %v2348_v13 = vpack.c.bf16 %v1976_v0, %v1976_v0  ;;  %v896_v4 = vmul.f32 %v3118_v29, %v3537_v60  ;;  %v3717_v0 = vld [vmem:[%s2485_s26 + $0x158] sm:$0xff] }
  0xf4   : > { %v1099_v61 = vrot.slane %v978_v6, 1  ;;  %v1223_v63 = vmul.f32 %v3125_v44, %v3570_v7  ;;  %v539_v1 = vsel %vm474_vm0, %v536_v26, %v538_v11  ;;  %v1538_v39 = vmul.f32 %v3193_v62, %v3656_v30 }
  0xf5   : > { %v1487_v53 = vadd.f32 %v1455_v43, %v1417_v46  ;;  %v785_v25 = vsel %vm720_vm1, %v782_v12, %v784_v24  ;;  %2137 = vst.msk [vmem:[%s2623_s21 + $0x5c] sm:$0xf] %vm2113_vm2, %v2348_v13  ;;  %v1903_v9 = vsel %vm720_vm1, %v1901_v14, %v1902_v17  ;;  %v612_v48 = vadd.f32 %v539_v1, %v334_v10 }
  0xf6   : > { %v1344_v31 = vrot.slane %v1223_v63, 2  ;;  %v1783_v41 = vmul.f32 %v3141_v27, %v3656_v30  ;;  %v1100_v37 = vsel %vm474_vm0, %v1097_v50, %v1099_v61  ;;  %v1456_v26 = vmul.f32 %v3149_v23, %v3623_v33 }
  0xf7   : > { %v1732_v5 = vadd.f32 %v1658_v3, %v1487_v53  ;;  %v417_v12 = vmul.f32 %v3083_v28, %v3533_v49  ;;  %v858_v18 = vadd.f32 %v785_v25, %v612_v48  ;;  %v1659_v45 = vrot.slane %v1538_v39, 1 }
  0xf8   : > { %v335_v55 = vmul.f32 %v3098_v42, %v3533_v49  ;;  %v3682_v22 = vmul.f32 %v3083_v28, %v3537_v60  ;;  %v1345_v8 = vsel %vm720_vm1, %v1342_v36, %v1344_v31  ;;  %v663_v40 = vmul.f32 %v3090_v19, %v3533_v49 }
  0xf9   : > { %v1977_v16 = vadd.f32 %v1903_v9, %v1732_v5  ;;  %v540_v50 = vrot.slane %v417_v12, 1  ;;  %v928_v35 = vadd.f32 %v896_v4, %v858_v18  ;;  %v1904_v32 = vrot.slane %v1783_v41, 2  ;;  %v3758_v5 = vld [vmem:[%s3985_s2] ss:$0 sm:$0xff] }
  0xfa   : > { %v541_v20 = vrot.slane %v3682_v22, 1  ;;  %v3690_v54 = vmul.f32 %v3090_v19, %v3537_v60  ;;  %v786_v28 = vrot.slane %v663_v40, 2  ;;  %v897_v34 = vmul.f32 %v3118_v29, %v3619_v21  ;;  %v3785_v40 = vld [vmem:[%s3985_s2 + $0x6] ss:$0 sm:$0xff] }
  0xfb   : > { %v2349_v42 = vpack.c.bf16 %v1977_v16, %v1977_v16  ;;  %v979_v36 = vmul.f32 %v3105_v57, %v3619_v21  ;;  %v1173_v2 = vadd.f32 %v1100_v37, %v928_v35  ;;  %v3700_v58 = vmul.f32 %v3105_v57, %v3623_v33  ;;  %v3773_v16 = vld [vmem:[%s2485_s26 + $0x160] sm:$0xff] }
  0xfc   : > { %v542_v49 = vsel %vm474_vm0, %v540_v50, %v541_v20  ;;  %v787_v51 = vrot.slane %v3690_v54, 2  ;;  %v1224_v29 = vmul.f32 %v3125_v44, %v3619_v21  ;;  %v3708_v43 = vmul.f32 %v3125_v44, %v3623_v33 }
  0xfd   : > { %2138 = vst.msk [vmem:[%s2623_s21 + $0x60] sm:$0xf] %vm2113_vm2, %v2349_v42  ;;  %v613_v19 = vadd.f32 %v542_v49, %v335_v55  ;;  %v1101_v56 = vrot.slane %v979_v36, 1  ;;  %v1418_v47 = vadd.f32 %v1345_v8, %v1173_v2  ;;  %v1660_v14 = vsel %vm474_vm0, %v1657_v52, %v1659_v45  ;;  %v3801_v49 = vld [vmem:[%s3985_s2 + $0xa] ss:$0 sm:$0xff] }
  0xfe   : > { %v788_v38 = vsel %vm720_vm1, %v786_v28, %v787_v51  ;;  %v1102_v57 = vrot.slane %v3700_v58, 1  ;;  %v1346_v6 = vrot.slane %v1224_v29, 2  ;;  %v1347_v46 = vrot.slane %v3708_v43, 2 }
  0xff   : > { %v859_v10 = vadd.f32 %v788_v38, %v613_v19  ;;  %v1539_v3 = vmul.f32 %v3193_v62, %v3712_v15  ;;  %v1488_v44 = vadd.f32 %v1456_v26, %v1418_v47  ;;  %v3725_v52 = vmul.f32 %v3193_v62, %v3717_v0  ;;  %v3765_v26 = vld [vmem:[%s3985_s2 + $0x5] ss:$0 sm:$0xff] }
 0x100   : > { %v1103_v11 = vsel %vm474_vm0, %v1101_v56, %v1102_v57  ;;  %v1784_v24 = vmul.f32 %v3141_v27, %v3712_v15  ;;  %v1905_v13 = vsel %vm720_vm1, %v1902_v17, %v1904_v32  ;;  %v3734_v63 = vmul.f32 %v3141_v27, %v3717_v0  ;;  %v3750_v17 = vld [vmem:[%s3985_s2 + $0x2] ss:$0 sm:$0xff] }
 0x101   : > { %v929_v4 = vadd.f32 %v897_v34, %v859_v10  ;;  %v1661_v61 = vrot.slane %v1539_v3, 1  ;;  %v1733_v53 = vadd.f32 %v1660_v14, %v1488_v44  ;;  %v1348_v1 = vsel %vm720_vm1, %v1346_v6, %v1347_v46 }
 0x102   : > { %v1457_v25 = vmul.f32 %v3149_v23, %v3712_v15  ;;  %v1662_v39 = vrot.slane %v3725_v52, 1  ;;  %v1906_v48 = vrot.slane %v1784_v24, 2  ;;  %v419_v27 = vmul.f32 %v3743_v59, %v3570_v7 }
 0x103   : > { %v1174_v9 = vadd.f32 %v1103_v11, %v929_v4  ;;  %v665_v23 = vmul.f32 %v3750_v17, %v3570_v7  ;;  %v1978_v31 = vadd.f32 %v1905_v13, %v1733_v53  ;;  %v1907_v41 = vrot.slane %v3734_v63, 2 }
 0x104   : > { %v336_v37 = vmul.f32 %v3758_v5, %v3537_v60  ;;  %v981_v12 = vmul.f32 %v3765_v26, %v3656_v30  ;;  %v1663_v18 = vsel %vm474_vm0, %v1661_v61, %v1662_v39  ;;  %v543_v45 = vrot.slane %v419_v27, 1  ;;  %v3778_v60 = vld [vmem:[%s3985_s2 + $0x4] ss:$0 sm:$0xff] }
 0x105   : > { %v1419_v7 = vadd.f32 %v1348_v1, %v1174_v9  ;;  %v789_v55 = vrot.slane %v665_v23, 2  ;;  %v2350_v22 = vpack.c.bf16 %v1978_v31, %v1978_v31  ;;  %v898_v8 = vmul.f32 %v3778_v60, %v3623_v33 }
 0x106   : > { %v1104_v50 = vrot.slane %v981_v12, 1  ;;  %v1226_v35 = vmul.f32 %v3785_v40, %v3656_v30  ;;  %v544_v54 = vsel %vm474_vm0, %v541_v20, %v543_v45  ;;  %v1541_v28 = vmul.f32 %v3193_v62, %v3773_v16  ;;  %v3809_v62 = vld [vmem:[%s3985_s2 + $0x8] ss:$0 sm:$0xff]  ;;  %v3848_v45 = vld [vmem:[%s2485_s26 + $0x170] sm:$0xff] }
 0x107   : > { %v1489_v32 = vadd.f32 %v1457_v25, %v1419_v7  ;;  %v790_v42 = vsel %vm720_vm1, %v787_v51, %v789_v55  ;;  %2139 = vst.msk [vmem:[%s2623_s21 + $0x64] sm:$0xf] %vm2113_vm2, %v2350_v22  ;;  %v1908_v34 = vsel %vm720_vm1, %v1906_v48, %v1907_v41  ;;  %v614_v36 = vadd.f32 %v544_v54, %v336_v37  ;;  %v3844_v12 = vld [vmem:[%s2485_s26 + $0x168] sm:$0xff] }
 0x108   : > { %v1349_v2 = vrot.slane %v1226_v35, 2  ;;  %v1786_v20 = vmul.f32 %v3801_v49, %v3773_v16  ;;  %v1105_v58 = vsel %vm474_vm0, %v1102_v57, %v1104_v50  ;;  %v1458_v19 = vmul.f32 %v3809_v62, %v3717_v0  ;;  %v3853_v50 = vld [vmem:[%s3985_s2 + $0x9] ss:$0 sm:$0xff] }
 0x109   : > { %v1734_v51 = vadd.f32 %v1663_v18, %v1489_v32  ;;  %v420_v56 = vmul.f32 %v3743_v59, %v3619_v21  ;;  %v860_v29 = vadd.f32 %v790_v42, %v614_v36  ;;  %v1664_v43 = vrot.slane %v1541_v28, 1 }
 0x10a   : > { %v337_v47 = vmul.f32 %v3758_v5, %v3619_v21  ;;  %v3819_v14 = vmul.f32 %v3743_v59, %v3623_v33  ;;  %v1350_v57 = vsel %vm720_vm1, %v1347_v46, %v1349_v2  ;;  %v666_v6 = vmul.f32 %v3750_v17, %v3619_v21 }
 0x10b   : > { %v1979_v38 = vadd.f32 %v1908_v34, %v1734_v51  ;;  %v545_v10 = vrot.slane %v420_v56, 1  ;;  %v930_v3 = vadd.f32 %v898_v8, %v860_v29  ;;  %v1909_v44 = vrot.slane %v1786_v20, 2 }
 0x10c   : > { %v546_v11 = vrot.slane %v3819_v14, 1  ;;  %v667_v24 = vmul.f32 %v3750_v17, %v3623_v33  ;;  %v791_v4 = vrot.slane %v666_v6, 2  ;;  %v899_v61 = vmul.f32 %v3778_v60, %v3712_v15 }
 0x10d   : > { %v2351_v13 = vpack.c.bf16 %v1979_v38, %v1979_v38  ;;  %v982_v46 = vmul.f32 %v3765_v26, %v3712_v15  ;;  %v1175_v53 = vadd.f32 %v1105_v58, %v930_v3  ;;  %v983_v25 = vmul.f32 %v3765_v26, %v3717_v0 }
 0x10e   : > { %v547_v21 = vsel %vm474_vm0, %v545_v10, %v546_v11  ;;  %v792_v1 = vrot.slane %v667_v24, 2  ;;  %v1227_v27 = vmul.f32 %v3785_v40, %v3712_v15  ;;  %v1228_v23 = vmul.f32 %v3785_v40, %v3717_v0 }
 0x10f   : > { %2140 = vst.msk [vmem:[%s2623_s21 + $0x68] sm:$0xf] %vm2113_vm2, %v2351_v13  ;;  %v615_v9 = vadd.f32 %v547_v21, %v337_v47  ;;  %v1106_v48 = vrot.slane %v982_v46, 1  ;;  %v1420_v31 = vadd.f32 %v1350_v57, %v1175_v53  ;;  %v1665_v37 = vsel %vm474_vm0, %v1662_v39, %v1664_v43 }
 0x110   : > { %v793_v7 = vsel %vm720_vm1, %v791_v4, %v792_v1  ;;  %v1107_v18 = vrot.slane %v983_v25, 1  ;;  %v1351_v22 = vrot.slane %v1227_v27, 2  ;;  %v1352_v8 = vrot.slane %v1228_v23, 2 }
 0x111   : > { %v861_v55 = vadd.f32 %v793_v7, %v615_v9  ;;  %v1542_v52 = vmul.f32 %v3853_v50, %v3844_v12  ;;  %v1490_v35 = vadd.f32 %v1458_v19, %v1420_v31  ;;  %v3860_v32 = vmul.f32 %v3853_v50, %v3848_v45 }
 0x112   : > { %v1108_v39 = vsel %vm474_vm0, %v1106_v48, %v1107_v18  ;;  %v1787_v54 = vmul.f32 %v3801_v49, %v3844_v12  ;;  %v1910_v42 = vsel %vm720_vm1, %v1907_v41, %v1909_v44  ;;  %v3869_v36 = vmul.f32 %v3801_v49, %v3848_v45  ;;  %v3886_v44 = vld [vmem:[%s2485_s26 + $0x178] sm:$0xff] }
 0x113   : > { %v931_v28 = vadd.f32 %v899_v61, %v861_v55  ;;  %v1666_v34 = vrot.slane %v1542_v52, 1  ;;  %v1735_v2 = vadd.f32 %v1665_v37, %v1490_v35  ;;  %v1353_v20 = vsel %vm720_vm1, %v1351_v22, %v1352_v8 }
 0x114   : > { %v1459_v51 = vmul.f32 %v3809_v62, %v3844_v12  ;;  %v1667_v58 = vrot.slane %v3860_v32, 1  ;;  %v1911_v56 = vrot.slane %v1787_v54, 2  ;;  %v422_v63 = vmul.f32 %v3743_v59, %v3656_v30 }
 0x115   : > { %v1176_v19 = vadd.f32 %v1108_v39, %v931_v28  ;;  %v668_v41 = vmul.f32 %v3750_v17, %v3656_v30  ;;  %v1980_v29 = vadd.f32 %v1910_v42, %v1735_v2  ;;  %v1912_v43 = vrot.slane %v3869_v36, 2 }
 0x116   : > { %v338_v47 = vmul.f32 %v3758_v5, %v3623_v33  ;;  %v984_v14 = vmul.f32 %v3765_v26, %v3773_v16  ;;  %v1668_v57 = vsel %vm474_vm0, %v1666_v34, %v1667_v58  ;;  %v548_v10 = vrot.slane %v422_v63, 1 }
 0x117   : > { %v1421_v38 = vadd.f32 %v1353_v20, %v1176_v19  ;;  %v794_v6 = vrot.slane %v668_v41, 2  ;;  %v2352_v3 = vpack.c.bf16 %v1980_v29, %v1980_v29  ;;  %v900_v30 = vmul.f32 %v3778_v60, %v3717_v0  ;;  %v2272_v20 = vld [vmem:[%s2505_s8 + $0x18] sm:$0xff] }
 0x118   : > { %v1109_v24 = vrot.slane %v984_v14, 1  ;;  %v1229_v13 = vmul.f32 %v3785_v40, %v3773_v16  ;;  %v549_v33 = vsel %vm474_vm0, %v546_v11, %v548_v10  ;;  %v1544_v46 = vmul.f32 %v3853_v50, %v3886_v44 }
 0x119   : > { %v1491_v4 = vadd.f32 %v1459_v51, %v1421_v38  ;;  %v795_v61 = vsel %vm720_vm1, %v792_v1, %v794_v6  ;;  %2141 = vst.msk [vmem:[%s2623_s21 + $0x6c] sm:$0xf] %vm2113_vm2, %v2352_v3  ;;  %v1913_v53 = vsel %vm720_vm1, %v1911_v56, %v1912_v43  ;;  %v616_v21 = vadd.f32 %v549_v33, %v338_v47  ;;  %v2273_v56 = vld [vmem:[%s2505_s8 + $0x20] sm:$0xff] }
 0x11a   : > { %v1354_v25 = vrot.slane %v1229_v13, 2  ;;  %v1789_v9 = vmul.f32 %v3801_v49, %v3886_v44  ;;  %v1110_v27 = vsel %vm474_vm0, %v1107_v18, %v1109_v24  ;;  %v1460_v11 = vmul.f32 %v3809_v62, %v3848_v45 }
 0x11b   : > { %v1736_v48 = vadd.f32 %v1668_v57, %v1491_v4  ;;  %v423_v1 = vmul.f32 %v3743_v59, %v3712_v15  ;;  %v862_v23 = vadd.f32 %v795_v61, %v616_v21  ;;  %v1669_v31 = vrot.slane %v1544_v46, 1 }
 0x11c   : > { %v339_v37 = vmul.f32 %v3758_v5, %v3712_v15  ;;  %v424_v7 = vmul.f32 %v3743_v59, %v3717_v0  ;;  %v1355_v22 = vsel %vm720_vm1, %v1352_v8, %v1354_v25  ;;  %v669_v52 = vmul.f32 %v3750_v17, %v3712_v15 }
 0x11d   : > { %v1981_v55 = vadd.f32 %v1913_v53, %v1736_v48  ;;  %v550_v18 = vrot.slane %v423_v1, 1  ;;  %v932_v35 = vadd.f32 %v900_v30, %v862_v23  ;;  %v1914_v39 = vrot.slane %v1789_v9, 2 }
 0x11e   : > { %v551_v32 = vrot.slane %v424_v7, 1  ;;  %v670_v54 = vmul.f32 %v3750_v17, %v3717_v0  ;;  %v796_v28 = vrot.slane %v669_v52, 2  ;;  %v901_v34 = vmul.f32 %v3778_v60, %v3844_v12 }
 0x11f   : > { %v2353_v42 = vpack.c.bf16 %v1981_v55, %v1981_v55  ;;  %v985_v8 = vmul.f32 %v3765_v26, %v3844_v12  ;;  %v1177_v2 = vadd.f32 %v1110_v27, %v932_v35  ;;  %v986_v15 = vmul.f32 %v3765_v26, %v3848_v45  ;;  %v2274_v35 = vld [vmem:[%s2505_s8 + $0x28] sm:$0xff] }
 0x120   : > { %v552_v51 = vsel %vm474_vm0, %v550_v18, %v551_v32  ;;  %v797_v19 = vrot.slane %v670_v54, 2  ;;  %v1230_v29 = vmul.f32 %v3785_v40, %v3844_v12  ;;  %v1231_v47 = vmul.f32 %v3785_v40, %v3848_v45 }
 0x121   : > { %2142 = vst.msk [vmem:[%s2623_s21 + $0x70] sm:$0xf] %vm2113_vm2, %v2353_v42  ;;  %v617_v63 = vadd.f32 %v552_v51, %v339_v37  ;;  %v1111_v41 = vrot.slane %v985_v8, 1  ;;  %v1422_v14 = vadd.f32 %v1355_v22, %v1177_v2  ;;  %v1670_v38 = vsel %vm474_vm0, %v1667_v58, %v1669_v31 }
 0x122   : > { %v798_v57 = vsel %vm720_vm1, %v796_v28, %v797_v19  ;;  %v1112_v10 = vrot.slane %v986_v15, 1  ;;  %v1356_v3 = vrot.slane %v1230_v29, 2  ;;  %v1357_v30 = vrot.slane %v1231_v47, 2 }
 0x123   : > { %v863_v6 = vadd.f32 %v798_v57, %v617_v63  ;;  %v1545_v24 = vmul.f32 %v3853_v50, %v2272_v20  ;;  %v1492_v13 = vadd.f32 %v1460_v11, %v1422_v14  ;;  %v1546_v33 = vmul.f32 %v3853_v50, %v2273_v56 }
 0x124   : > { %v1113_v4 = vsel %vm474_vm0, %v1111_v41, %v1112_v10  ;;  %v1790_v12 = vmul.f32 %v3801_v49, %v2272_v20  ;;  %v1915_v61 = vsel %vm720_vm1, %v1912_v43, %v1914_v39  ;;  %v1461_v46 = vmul.f32 %v3809_v62, %v2272_v20 }
 0x125   : > { %v933_v58 = vadd.f32 %v901_v34, %v863_v6  ;;  %v1791_v53 = vmul.f32 %v3801_v49, %v2273_v56  ;;  %v1737_v21 = vadd.f32 %v1670_v38, %v1492_v13  ;;  %v1358_v25 = vsel %vm720_vm1, %v1356_v3, %v1357_v30 }
 0x126   : > { %v1671_v9 = vrot.slane %v1545_v24, 1  ;;  %v1672_v48 = vrot.slane %v1546_v33, 1  ;;  %v1916_v11 = vrot.slane %v1790_v12, 2  ;;  %v425_v1 = vmul.f32 %v3743_v59, %v3773_v16 }
 0x127   : > { %v1178_v27 = vadd.f32 %v1113_v4, %v933_v58  ;;  %v671_v36 = vmul.f32 %v3750_v17, %v3773_v16  ;;  %v1982_v43 = vadd.f32 %v1915_v61, %v1737_v21  ;;  %v1917_v23 = vrot.slane %v1791_v53, 2 }
 0x128   : > { %v340_v31 = vmul.f32 %v3758_v5, %v3717_v0  ;;  %v987_v37 = vmul.f32 %v3765_v26, %v3886_v44  ;;  %v553_v55 = vrot.slane %v425_v1, 1  ;;  %v1673_v52 = vsel %vm474_vm0, %v1671_v9, %v1672_v48 }
 0x129   : > { %v1423_v7 = vadd.f32 %v1358_v25, %v1178_v27  ;;  %v799_v22 = vrot.slane %v671_v36, 2  ;;  %v2354_v18 = vpack.c.bf16 %v1982_v43, %v1982_v43  ;;  %v1232_v59 = vmul.f32 %v3785_v40, %v3886_v44 }
 0x12a   : > { %v554_v16 = vsel %vm474_vm0, %v551_v32, %v553_v55  ;;  %v1114_v54 = vrot.slane %v987_v37, 1  ;;  %v1918_v0 = vsel %vm720_vm1, %v1916_v11, %v1917_v23  ;;  %v902_v26 = vmul.f32 %v3778_v60, %v3848_v45 }
 0x12b   : > { %v1493_v17 = vadd.f32 %v1461_v46, %v1423_v7  ;;  %v800_v39 = vsel %vm720_vm1, %v797_v19, %v799_v22  ;;  %2143 = vst.msk [vmem:[%s2623_s21 + $0x74] sm:$0xf] %vm2113_vm2, %v2354_v18  ;;  %v618_v5 = vadd.f32 %v554_v16, %v340_v31  ;;  %v1359_v28 = vrot.slane %v1232_v59, 2 }
 0x12c   : > { %v1547_v34 = vmul.f32 %v3853_v50, %v2274_v35  ;;  %v1115_v32 = vsel %vm474_vm0, %v1112_v10, %v1114_v54  ;;  %v1792_v8 = vmul.f32 %v3801_v49, %v2274_v35  ;;  %v1462_v63 = vmul.f32 %v3809_v62, %v2273_v56 }
 0x12d   : > { %v1738_v42 = vadd.f32 %v1673_v52, %v1493_v17  ;;  %v864_v40 = vadd.f32 %v800_v39, %v618_v5  ;;  %v1360_v51 = vsel %vm720_vm1, %v1357_v30, %v1359_v28 }
 0x12e   : > { %v1674_v19 = vrot.slane %v1547_v34, 1  ;;  %v1919_v60 = vrot.slane %v1792_v8, 2 }
 0x12f   : > { %v1983_v44 = vadd.f32 %v1918_v0, %v1738_v42  ;;  %v934_v2 = vadd.f32 %v902_v26, %v864_v40 }
 0x130   : > { %v1675_v50 = vsel %vm474_vm0, %v1672_v48, %v1674_v19  ;;  %v1920_v29 = vsel %vm720_vm1, %v1917_v23, %v1919_v60 }
 0x131   : > { %v2355_v20 = vpack.c.bf16 %v1983_v44, %v1983_v44  ;;  %v1179_v15 = vadd.f32 %v1115_v32, %v934_v2 }
 0x133   : > { %2144 = vst.msk [vmem:[%s2623_s21 + $0x78] sm:$0xf] %vm2113_vm2, %v2355_v20  ;;  %v1424_v45 = vadd.f32 %v1360_v51, %v1179_v15 }
 0x135   : > { %v1494_v41 = vadd.f32 %v1462_v63, %v1424_v45 }
 0x137   : > { %v1739_v47 = vadd.f32 %v1675_v50, %v1494_v41 }
 0x139   : > { %v1984_v49 = vadd.f32 %v1920_v29, %v1739_v47 }
 0x13b   : > { %v2356_v14 = vpack.c.bf16 %v1984_v49, %v1984_v49 }
 0x13d   : > { %2145 = vst.msk [vmem:[%s2623_s21 + $0x7c] sm:$0xf] %vm2113_vm2, %v2356_v14 }
 0x13e PF: > { %s13_s14 = sadd.s32 1, %s2423_s14   ;;  %s3987_s12 = smov %s2419_s13 }
 0x13f   : > { %p10_p5 = scmp.ge.s32.totalorder %s13_s14, 4   ;;  %s3988_s13 = smov %s3990_s15 }
 0x141   :  { %12 = sbr.rel (!%p10_p5) target bundleno = 2 (0x2), region = 68 }

// kernel: att_block_forward.9
= control target key start
LH: loop header
LB: loop body
LE: loop exit
PB: predicated region body
PF: predicated region fallthrough
CT: control target
= control target key end

     0   :  { %s4344_s24 = smov 0   ;;  %s4346_s25 = smov 0   ;;  %s6094_s0 = inlined_call_operand.vmem [shape: bf16[2,16,24,4], index: 0, kind: input, shape index: {}]   ;;  %s6095_s1 = inlined_call_operand.vmem [shape: bf16[2,1,2,24,4], index: 1, kind: input, shape index: {}]   ;;  %s6096_s2 = inlined_call_operand.vmem [shape: f32[2,16,24,4], index: 2, kind: input, shape index: {}]   ;;  %s6097_s3 = inlined_call_operand.vmem [shape: f32[2,1,2,24,4], index: 3, kind: input, shape index: {}]   ;;  %s6098_s4 = inlined_call_operand.vmem [shape: bf16[4,4], index: 4, kind: input, shape index: {}]   ;;  %s6099_s5 = inlined_call_operand.vmem [shape: bf16[3,12,8], index: 5, kind: input, shape index: {}]   ;;  %s6100_s6 = inlined_call_operand.vmem [shape: bf16[8,4], index: 6, kind: input, shape index: {}]   ;;  %s6101_s7 = inlined_call_operand.vmem [shape: f32[2,16,16,4], index: 7, kind: output, shape index: {}]  }
   0x1   :  { %s4348_s26 = smov 0  }
   0x2 LB: > { %s29_s27 = sadd.s32 1, %s4294_s25  ;;  %p3554_p0 = scmp.ge.s32.totalorder %s4298_s26, 1  ;;  %s4298_s26 = sphi %s4348_s26, %s17_s26   ;;  %s4294_s25 = sphi %s4346_s25, %s6236_s25   ;;  %s4290_s24 = sphi %s4344_s24, %s6235_s24  }
   0x3   : > { %p31_p1 = scmp.ge.s32.totalorder %s29_s27, 2  ;;  %p309_p2 = scmp.lt.s32.totalorder %s4298_s26, 3 }
   0x5   : > { %s6238_s27 = smov (%p31_p1, %s29_s27), 0  ;;  %p310_p3 = pnand %p3554_p0, %p309_p2 }
   0x7   : > { %313 = sbr.rel (%p310_p3) target bundleno = 1150 (0x47e), region = 48 }
   0xc   : > { %v541_v0 = vld [vmem:[%s6098_s4] sm:$0x3]  ;;  %vm759_vm0 = vcmask 1041408   ;;  %p380_p4 = scmp.lt.s32.totalorder %s4290_s24, 1  ;;  %v4300_v1 = vmov 0.0   ;;  %vm4301_vm1 = vmmov 0  }
   0xd   : > { %3791 = vmatprep.subr.bf16.mxu0 %v4300_v1  ;;  %v761_v2 = vsel %vm759_vm0, %v541_v0, 0  ;;  %3793 = vmatprep.mubr.msk.bf16.mxu0 %vm4301_vm1, %v4300_v1  ;;  %vm677_vm2 = vcmask 31744   ;;  %vm1654_vm3 = vcmask 1046528   ;;  %vm1803_vm4 = vsmask.f32 7424  ;;  %s4302_s23 = smov 8  }
   0xe   : > { %3792 = vmatpush3.bf16.msra.mxu0 %v761_v2  ;;  %s6240_s24 = smov (!%p380_p4, %s4290_s24), 1  ;;  %vm2299_vm5 = vcmask 1045504   ;;  %vm2219_vm6 = vcmask 64512   ;;  %vm2266_vm7 = vcmask 97280   ;;  %vm3194_vm8 = vcmask 1043456  }
   0xf   : > { %s4044_s30 = smul.u32 192, %s6240_s24 }
  0x10   : > { %s4045_s8 = smul.u32 24, %s6240_s24 }
  0x11   : > { %s4375_s11 = scalar_lea.vmem %s6094_s0, %s4044_s30  ;;  %s4047_s15 = smul.u32 48, %s6240_s24 }
  0x12   : > { %s4380_s14 = scalar_lea.vmem %s6095_s1, %s4045_s8  ;;  %v434_v4 = vld [vmem:[%s4375_s11] sm:$0xf]  ;;  %v4077_v7 = vld [vmem:[%s4375_s11 + $0x4] sm:$0xff]   ;;  %v4078_v8 = vld [vmem:[%s4375_s11 + $0xc] sm:$0xff]   ;;  %s4046_s19 = smul.u32 384, %s6240_s24 }
  0x13   : > { %v4076_v3 = vld [vmem:[%s4380_s14] sm:$0xff]   ;;  %v433_v5 = vld [vmem:[%s4380_s14 + $0x8] sm:$0xf]  ;;  %v4079_v9 = vld [vmem:[%s4375_s11 + $0x14] sm:$0xff]   ;;  %s4514_s18 = scalar_lea.vmem %s6097_s3, %s4047_s15  ;;  %s4303_s30 = smov 4  }
  0x14   : > { %3794 = vmatmul.mubr.msk.bf16.vlgmr.msra.gmra.mxu0 %vm677_vm2, %v4076_v3  ;;  %v3568_v6 = vcombine.low %v433_v5, %v434_v4  ;;  %v4080_v10 = vld [vmem:[%s4375_s11 + $0x1c] sm:$0xff]   ;;  %v4081_v11 = vld [vmem:[%s4375_s11 + $0x24] sm:$0xff]   ;;  %v4082_v12 = vld [vmem:[%s4375_s11 + $0x2c] sm:$0xff]   ;;  %s4546_s22 = scalar_lea.vmem %s6096_s2, %s4046_s19 }
  0x15   : > { %3797 = vmatprep.mubr.msk.bf16.mxu0 %vm4301_vm1, %v4300_v1  ;;  %v4083_v13 = vld [vmem:[%s4375_s11 + $0x34] sm:$0xff]   ;;  %v4084_v14 = vld [vmem:[%s4375_s11 + $0x3c] sm:$0xff]   ;;  %v4085_v15 = vld [vmem:[%s4375_s11 + $0x44] sm:$0xff]  }
  0x16   : > { %v4086_v16 = vld [vmem:[%s4375_s11 + $0x4c] sm:$0xff]   ;;  %v4087_v17 = vld [vmem:[%s4375_s11 + $0x54] sm:$0xff]   ;;  %v4088_v18 = vld [vmem:[%s4375_s11 + $0x5c] sm:$0xff]  }
  0x17   : > { %v4089_v19 = vld [vmem:[%s4375_s11 + $0x64] sm:$0xff]   ;;  %v4090_v20 = vld [vmem:[%s4375_s11 + $0x6c] sm:$0xff]   ;;  %v4091_v21 = vld [vmem:[%s4375_s11 + $0x74] sm:$0xff]  }
  0x18   : > { %v4092_v22 = vld [vmem:[%s4375_s11 + $0x7c] sm:$0xff]   ;;  %v4093_v23 = vld [vmem:[%s4375_s11 + $0x84] sm:$0xff]   ;;  %v4094_v24 = vld [vmem:[%s4375_s11 + $0x8c] sm:$0xff]  }
  0x19   : > { %v4095_v25 = vld [vmem:[%s4375_s11 + $0x94] sm:$0xff]   ;;  %v4096_v26 = vld [vmem:[%s4375_s11 + $0x9c] sm:$0xff]   ;;  %v4097_v27 = vld [vmem:[%s4375_s11 + $0xa4] sm:$0xff]  }
  0x1a   : > { %v4098_v28 = vld [vmem:[%s4375_s11 + $0xac] sm:$0xff]   ;;  %v4099_v29 = vld [vmem:[%s4375_s11 + $0xb4] sm:$0xff]   ;;  %v481_v32 = vld [vmem:[%s4375_s11 + $0xbc] sm:$0xf] }
  0x1b   : > { %v3561_v33 = vld [vmem:[%s4380_s14 + $0xc] sm:$0xf]  ;;  %v4100_v51 = vld [vmem:[%s4380_s14 + $0x10] sm:$0xff]   ;;  %s3694_s14 = sshll.u32 %s6240_s24, 8 }
  0x1c   : > { %3798 = vmatmul.mubr.msk.bf16.gmra.mxu0 %vm677_vm2, %v3568_v6  ;;  %v3592_v37 = vcombine.low %v481_v32, %v3561_v33  ;;  %s5975_s17 = scalar_lea.vmem %s6101_s7, %s3694_s14 }
  0x1d   : > { %3801 = vmatprep.mubr.msk.bf16.mxu0 %vm4301_vm1, %v4300_v1 }
  0x24   : > { %3802 = vmatmul.mubr.msk.bf16.gmra.mxu0 %vm677_vm2, %v4077_v7 }
  0x25   : > { %3805 = vmatprep.mubr.msk.bf16.mxu0 %vm4301_vm1, %v4300_v1 }
  0x2c   : > { %3806 = vmatmul.mubr.msk.bf16.gmra.mxu0 %vm677_vm2, %v4078_v8 }
  0x2d   : > { %3809 = vmatprep.mubr.msk.bf16.mxu0 %vm4301_vm1, %v4300_v1 }
  0x34   : > { %3810 = vmatmul.mubr.msk.bf16.gmra.mxu0 %vm677_vm2, %v4079_v9 }
  0x35   : > { %3813 = vmatprep.mubr.msk.bf16.mxu0 %vm4301_vm1, %v4300_v1 }
  0x3c   : > { %3814 = vmatmul.mubr.msk.bf16.gmra.mxu0 %vm677_vm2, %v4080_v10 }
  0x3d   : > { %3817 = vmatprep.mubr.msk.bf16.mxu0 %vm4301_vm1, %v4300_v1 }
  0x44   : > { %3818 = vmatmul.mubr.msk.bf16.gmra.mxu0 %vm677_vm2, %v4081_v11 }
  0x45   : > { %3821 = vmatprep.mubr.msk.bf16.mxu0 %vm4301_vm1, %v4300_v1 }
  0x4c   : > { %3822 = vmatmul.mubr.msk.bf16.gmra.mxu0 %vm677_vm2, %v4082_v12 }
  0x4d   : > { %3825 = vmatprep.mubr.msk.bf16.mxu0 %vm4301_vm1, %v4300_v1 }
  0x54   : > { %3826 = vmatmul.mubr.msk.bf16.gmra.mxu0 %vm677_vm2, %v4083_v13  ;;  %v486_v13 = vld [vmem:[%s4514_s18] sm:$0xff] }
  0x55   : > { %3829 = vmatprep.mubr.msk.bf16.mxu0 %vm4301_vm1, %v4300_v1 }
  0x5c   : > { %3830 = vmatmul.mubr.msk.bf16.gmra.mxu0 %vm677_vm2, %v4084_v14 }
  0x5d   : > { %3833 = vmatprep.mubr.msk.bf16.mxu0 %vm4301_vm1, %v4300_v1 }
  0x64   : > { %3834 = vmatmul.mubr.msk.bf16.gmra.mxu0 %vm677_vm2, %v4085_v15 }
  0x65   : > { %3837 = vmatprep.mubr.msk.bf16.mxu0 %vm4301_vm1, %v4300_v1 }
  0x6c   : > { %3838 = vmatmul.mubr.msk.bf16.gmra.mxu0 %vm677_vm2, %v4086_v16 }
  0x6d   : > { %3841 = vmatprep.mubr.msk.bf16.mxu0 %vm4301_vm1, %v4300_v1 }
  0x74   : > { %3842 = vmatmul.mubr.msk.bf16.gmra.mxu0 %vm677_vm2, %v4087_v17 }
  0x75   : > { %3845 = vmatprep.mubr.msk.bf16.mxu0 %vm4301_vm1, %v4300_v1 }
  0x7c   : > { %3846 = vmatmul.mubr.msk.bf16.gmra.mxu0 %vm677_vm2, %v4088_v18 }
  0x7d   : > { %3849 = vmatprep.mubr.msk.bf16.mxu0 %vm4301_vm1, %v4300_v1 }
  0x84   : > { %3850 = vmatmul.mubr.msk.bf16.gmra.mxu0 %vm677_vm2, %v4089_v19 }
  0x85   : > { %3853 = vmatprep.mubr.msk.bf16.mxu0 %vm4301_vm1, %v4300_v1 }
  0x8c   : > { %3854 = vmatmul.mubr.msk.bf16.gmra.mxu0 %vm677_vm2, %v4090_v20 }
  0x8d   : > { %3857 = vmatprep.mubr.msk.bf16.mxu0 %vm4301_vm1, %v4300_v1 }
  0x94   : > { %3858 = vmatmul.mubr.msk.bf16.gmra.mxu0 %vm677_vm2, %v4091_v21 }
  0x95   : > { %3861 = vmatprep.mubr.msk.bf16.mxu0 %vm4301_vm1, %v4300_v1 }
  0x9c   : > { %3862 = vmatmul.mubr.msk.bf16.gmra.mxu0 %vm677_vm2, %v4092_v22 }
  0x9d   : > { %3865 = vmatprep.mubr.msk.bf16.mxu0 %vm4301_vm1, %v4300_v1 }
  0xa4   : > { %3866 = vmatmul.mubr.msk.bf16.gmra.mxu0 %vm677_vm2, %v4093_v23 }
  0xa5   : > { %3869 = vmatprep.mubr.msk.bf16.mxu0 %vm4301_vm1, %v4300_v1 }
  0xac   : > { %3870 = vmatmul.mubr.msk.bf16.gmra.mxu0 %vm677_vm2, %v4094_v24  ;;  %v487_v24 = vld [vmem:[%s4514_s18 + $0x8] sm:$0xff] }
  0xad   : > { %3873 = vmatprep.mubr.msk.bf16.mxu0 %vm4301_vm1, %v4300_v1 }
  0xb4   : > { %3874 = vmatmul.mubr.msk.bf16.gmra.mxu0 %vm677_vm2, %v4095_v25 }
  0xb5   : > { %3877 = vmatprep.mubr.msk.bf16.mxu0 %vm4301_vm1, %v4300_v1 }
  0xbc   : > { %3878 = vmatmul.mubr.msk.bf16.gmra.mxu0 %vm677_vm2, %v4096_v26 }
  0xbd   : > { %3881 = vmatprep.mubr.msk.bf16.mxu0 %vm4301_vm1, %v4300_v1 }
  0xc4   : > { %3882 = vmatmul.mubr.msk.bf16.gmra.mxu0 %vm677_vm2, %v4097_v27 }
  0xc5   : > { %3885 = vmatprep.mubr.msk.bf16.mxu0 %vm4301_vm1, %v4300_v1 }
  0xcc   : > { %3886 = vmatmul.mubr.msk.bf16.gmra.mxu0 %vm677_vm2, %v4098_v28 }
  0xcd   : > { %3889 = vmatprep.mubr.msk.bf16.mxu0 %vm4301_vm1, %v4300_v1 }
  0xd4   : > { %v797_v30 = vpop.f32.mrf.mxu0  ;;  %3890 = vmatmul.mubr.msk.bf16.gmra.mxu0 %vm677_vm2, %v4099_v29 }
  0xd5   : > { %v1066_v31 = vmul.f32 0.044715, %v797_v30  ;;  %3893 = vmatprep.mubr.msk.bf16.mxu0 %vm4301_vm1, %v4300_v1  ;;  %v1012_v10 = vmul.f32 0.5, %v797_v30 }
  0xd6   : > { %v3795_v34 = vpop.f32.mrf.mxu0 }
  0xd7   : > { %v1120_v35 = vmul.f32 %v1066_v31, %v797_v30 }
  0xd8   : > { %v800_v36 = vpop.f32.mrf.mxu0 }
  0xd9   : > { %v1174_v38 = vmul.f32 %v1120_v35, %v797_v30  ;;  %v1067_v39 = vmul.f32 0.044715, %v800_v36  ;;  %v1013_v22 = vmul.f32 0.5, %v800_v36 }
  0xda   : > { %v3796_v40 = vpop.f32.mrf.mxu0 }
  0xdb   : > { %v1228_v41 = vadd.f32 %v1174_v38, %v797_v30  ;;  %v1121_v42 = vmul.f32 %v1067_v39, %v800_v36 }
  0xdc   : > { %v4485_v43 = vpop.f32.mrf.mxu0  ;;  %3894 = vmatmul.mubr.msk.bf16.gmra.mxu0 %vm677_vm2, %v3592_v37 }
  0xdd   : > { %v1282_v44 = vmul.f32 0.7978846, %v1228_v41  ;;  %v1175_v45 = vmul.f32 %v1121_v42, %v800_v36  ;;  %v1068_v46 = vmul.f32 0.044715, %v4485_v43  ;;  %3897 = vmatprep.mubr.msk.bf16.mxu0 %vm4301_vm1, %v4300_v1 }
  0xde   : > { %v3799_v47 = vpop.f32.mrf.mxu0 }
  0xdf   : > { %4104 = vtanh.f32 %v1282_v44  ;;  %v1229_v48 = vadd.f32 %v1175_v45, %v800_v36  ;;  %v1122_v49 = vmul.f32 %v1068_v46, %v4485_v43  ;;  %v1014_v36 = vmul.f32 0.5, %v4485_v43  ;;  %v488_v47 = vld [vmem:[%s4514_s18 + $0x10] sm:$0xff] }
  0xe0   : > { %v4492_v50 = vpop.f32.mrf.mxu0 }
  0xe1   : > { %v1283_v52 = vmul.f32 0.7978846, %v1229_v48  ;;  %v1176_v53 = vmul.f32 %v1122_v49, %v4485_v43  ;;  %v1069_v54 = vmul.f32 0.044715, %v4492_v50 }
  0xe2   : > { %v3800_v55 = vpop.f32.mrf.mxu0 }
  0xe3   : > { %4106 = vtanh.f32 %v1283_v52  ;;  %v1230_v56 = vadd.f32 %v1176_v53, %v4485_v43  ;;  %v1123_v57 = vmul.f32 %v1069_v54, %v4492_v50  ;;  %v1015_v43 = vmul.f32 0.5, %v4492_v50 }
  0xe4   : > { %v4499_v58 = vpop.f32.mrf.mxu0  ;;  %3898 = vmatmul.mubr.msk.bf16.gmra.mxu0 %vm677_vm2, %v4100_v51 }
  0xe5   : > { %v1284_v59 = vmul.f32 0.7978846, %v1230_v56  ;;  %v1177_v60 = vmul.f32 %v1123_v57, %v4492_v50  ;;  %v1070_v61 = vmul.f32 0.044715, %v4499_v58 }
  0xe6   : > { %v3803_v62 = vpop.f32.mrf.mxu0 }
  0xe7   : > { %4108 = vtanh.f32 %v1284_v59  ;;  %v1231_v63 = vadd.f32 %v1177_v60, %v4492_v50  ;;  %v1124_v0 = vmul.f32 %v1070_v61, %v4499_v58 }
  0xe8   : > { %v4507_v1 = vpop.f32.mrf.mxu0 }
  0xe9   : > { %v1285_v2 = vmul.f32 0.7978846, %v1231_v63  ;;  %v1178_v3 = vmul.f32 %v1124_v0, %v4499_v58  ;;  %v1071_v4 = vmul.f32 0.044715, %v4507_v1  ;;  %v489_v0 = vld [vmem:[%s4546_s22] sm:$0xff] }
  0xea   : > { %v3804_v5 = vpop.f32.mrf.mxu0 }
  0xeb   : > { %4110 = vtanh.f32 %v1285_v2  ;;  %v1232_v6 = vadd.f32 %v1178_v3, %v4499_v58  ;;  %v1125_v7 = vmul.f32 %v1071_v4, %v4507_v1  ;;  %v1016_v3 = vmul.f32 0.5, %v4499_v58 }
  0xec   : > { %v4105_v8 = vpop.eup %4104  ;;  %v4518_v9 = vpop.f32.mrf.mxu0 }
  0xed   : > { %v1390_v11 = vadd.f32 1.0, %v4105_v8  ;;  %v1286_v12 = vmul.f32 0.7978846, %v1232_v6  ;;  %v1179_v14 = vmul.f32 %v1125_v7, %v4507_v1  ;;  %v1072_v15 = vmul.f32 0.044715, %v4518_v9  ;;  %v490_v6 = vld [vmem:[%s4546_s22 + $0x8] sm:$0xff] }
  0xee   : > { %v3807_v16 = vpop.f32.mrf.mxu0 }
  0xef   : > { %v1444_v17 = vmul.f32 %v1390_v11, %v1012_v10  ;;  %4112 = vtanh.f32 %v1286_v12  ;;  %v1126_v19 = vmul.f32 %v1072_v15, %v4518_v9  ;;  %v1233_v25 = vadd.f32 %v1179_v14, %v4507_v1 }
  0xf0   : > { %v4107_v18 = vpop.eup %4106  ;;  %v4524_v20 = vpop.f32.mrf.mxu0 }
  0xf1   : > { %v1498_v21 = vmul.f32 %v1444_v17, %v486_v13  ;;  %v1391_v23 = vadd.f32 1.0, %v4107_v18  ;;  %v1180_v26 = vmul.f32 %v1126_v19, %v4518_v9  ;;  %v1073_v27 = vmul.f32 0.044715, %v4524_v20 }
  0xf2   : > { %v3808_v28 = vpop.f32.mrf.mxu0  ;;  %v1287_v39 = vmul.f32 0.7978846, %v1233_v25 }
  0xf3   : > { %v1552_v29 = vadd.f32 %v1498_v21, %v486_v13  ;;  %v1445_v30 = vmul.f32 %v1391_v23, %v1013_v22  ;;  %v1234_v32 = vadd.f32 %v1180_v26, %v4518_v9  ;;  %v1127_v33 = vmul.f32 %v1073_v27, %v4524_v20 }
  0xf4   : > { %v4109_v31 = vpop.eup %4108  ;;  %v4532_v34 = vpop.f32.mrf.mxu0  ;;  %v1018_v28 = vmul.f32 0.5, %v4518_v9 }
  0xf5   : > { %v1499_v35 = vmul.f32 %v1445_v30, %v487_v24  ;;  %v1392_v37 = vadd.f32 1.0, %v4109_v31  ;;  %v1074_v38 = vmul.f32 0.044715, %v4532_v34  ;;  %v1288_v40 = vmul.f32 0.7978846, %v1234_v32 }
  0xf6   : > { %v1181_v41 = vmul.f32 %v1127_v33, %v4524_v20  ;;  %v3811_v42 = vpop.f32.mrf.mxu0 }
  0xf7   : > { %v1553_v44 = vadd.f32 %v1499_v35, %v487_v24  ;;  %v1446_v45 = vmul.f32 %v1392_v37, %v1014_v36  ;;  %v1128_v46 = vmul.f32 %v1074_v38, %v4532_v34  ;;  %4114 = vtanh.f32 %v1288_v40 }
  0xf8   : > { %v4111_v48 = vpop.eup %4110  ;;  %v1235_v49 = vadd.f32 %v1181_v41, %v4524_v20  ;;  %v4541_v51 = vpop.f32.mrf.mxu0  ;;  %4116 = vtanh.f32 %v1287_v39  ;;  %v492_v39 = vld [vmem:[%s4546_s22 + $0x18] sm:$0xff]  ;;  %v1019_v42 = vmul.f32 0.5, %v4524_v20 }
  0xf9   : > { %v1393_v52 = vadd.f32 1.0, %v4111_v48  ;;  %v1182_v53 = vmul.f32 %v1128_v46, %v4532_v34  ;;  %v1075_v54 = vmul.f32 0.044715, %v4541_v51  ;;  %v1500_v57 = vmul.f32 %v1446_v45, %v488_v47 }
  0xfa   : > { %v1289_v55 = vmul.f32 0.7978846, %v1235_v49  ;;  %v3812_v56 = vpop.f32.mrf.mxu0  ;;  %v4551_v59 = vpack.c.bf16 %v1553_v44, %v1552_v29  ;;  %v1017_v46 = vmul.f32 0.5, %v4507_v1 }
  0xfb   : > { %v1447_v60 = vmul.f32 %v1393_v52, %v1015_v43  ;;  %v1236_v61 = vadd.f32 %v1182_v53, %v4532_v34  ;;  %v1129_v62 = vmul.f32 %v1075_v54, %v4541_v51  ;;  %v4558_v2 = vadd.f32 %v1500_v57, %v488_v47  ;;  %v493_v47 = vld [vmem:[%s4546_s22 + $0x20] sm:$0xff] }
  0xfc   : > { %6119 = vst [vmem:[#allocation2_spill] sm:$0xff] %v4551_v59  ;;  %v4113_v63 = vpop.eup %4112  ;;  %4118 = vtanh.f32 %v1289_v55  ;;  %v4556_v50 = vpop.f32.mrf.mxu0 }
  0xfd   : > { %v1394_v4 = vadd.f32 1.0, %v4113_v63  ;;  %v1183_v5 = vmul.f32 %v1129_v62, %v4541_v51  ;;  %v1290_v7 = vmul.f32 0.7978846, %v1236_v61  ;;  %v1076_v8 = vmul.f32 0.044715, %v4556_v50 }
  0xfe   : > { %v3815_v10 = vpop.f32.mrf.mxu0  ;;  %v1501_v11 = vmul.f32 %v1447_v60, %v489_v0 }
  0xff   : > { %v1448_v12 = vmul.f32 %v1394_v4, %v1016_v3  ;;  %v1237_v13 = vadd.f32 %v1183_v5, %v4541_v51  ;;  %v1130_v14 = vmul.f32 %v1076_v8, %v4556_v50  ;;  %4120 = vtanh.f32 %v1290_v7  ;;  %v491_v3 = vld [vmem:[%s4546_s22 + $0x10] sm:$0xff] }
 0x100   : > { %v4566_v15 = vpop.f32.mrf.mxu0  ;;  %v1555_v19 = vadd.f32 %v1501_v11, %v489_v0  ;;  %v1021_v11 = vmul.f32 0.5, %v4541_v51 }
 0x101   : > { %v1502_v16 = vmul.f32 %v1448_v12, %v490_v6  ;;  %v1291_v17 = vmul.f32 0.7978846, %v1237_v13  ;;  %v1184_v58 = vmul.f32 %v1130_v14, %v4556_v50  ;;  %v1077_v23 = vmul.f32 0.044715, %v4566_v15 }
 0x102   : > { %v3816_v18 = vpop.f32.mrf.mxu0  ;;  %v1655_v62 = vrot.slane %v1555_v19, 1 }
 0x103   : > { %v4569_v21 = vadd.f32 %v1502_v16, %v490_v6  ;;  %4122 = vtanh.f32 %v1291_v17  ;;  %v1238_v22 = vadd.f32 %v1184_v58, %v4556_v50  ;;  %v1131_v36 = vmul.f32 %v1077_v23, %v4566_v15 }
 0x104   : > { %v4573_v24 = vpop.f32.mrf.mxu0  ;;  %v4115_v25 = vpop.eup %4114  ;;  %v1020_v23 = vmul.f32 0.5, %v4532_v34  ;;  %v496_v34 = vld [vmem:[%s4546_s22 + $0x38] sm:$0xff] }
 0x105   : > { %v1078_v26 = vmul.f32 0.044715, %v4573_v24  ;;  %v4577_v27 = vpack.c.bf16 %v4569_v21, %v1555_v19  ;;  %v1396_v29 = vadd.f32 1.0, %v4115_v25  ;;  %v1292_v30 = vmul.f32 0.7978846, %v1238_v22  ;;  %v4117_v32 = vpop.eup %4116 }
 0x106   : > { %v3819_v31 = vpop.f32.mrf.mxu0  ;;  %v1395_v9 = vadd.f32 1.0, %v4117_v32  ;;  %v1185_v53 = vmul.f32 %v1131_v36, %v4566_v15  ;;  %v1656_v55 = vrot.slane %v4569_v21, 1 }
 0x107   : > { %v1132_v33 = vmul.f32 %v1078_v26, %v4573_v24  ;;  %v1450_v35 = vmul.f32 %v1396_v29, %v1018_v28  ;;  %4124 = vtanh.f32 %v1292_v30  ;;  %v495_v29 = vld [vmem:[%s4546_s22 + $0x30] sm:$0xff]  ;;  %v1022_v30 = vmul.f32 0.5, %v4556_v50 }
 0x108   : > { %v4582_v37 = vpop.f32.mrf.mxu0  ;;  %v1449_v57 = vmul.f32 %v1395_v9, %v1017_v46  ;;  %v1239_v7 = vadd.f32 %v1185_v53, %v4566_v15  ;;  %v4608_v10 = vsel %vm1654_vm3, %v1655_v62, %v1656_v55  ;;  %v494_v9 = vld [vmem:[%s4546_s22 + $0x28] sm:$0xff] }
 0x109   : > { %v4119_v38 = vpop.eup %4118  ;;  %v1186_v40 = vmul.f32 %v1132_v33, %v4573_v24  ;;  %v1079_v41 = vmul.f32 0.044715, %v4582_v37  ;;  %v1504_v43 = vmul.f32 %v1450_v35, %v492_v39  ;;  %6120 = vst [vmem:[#allocation3_spill] sm:$0xff] %v4608_v10 }
 0x10a   : > { %v1397_v44 = vadd.f32 1.0, %v4119_v38  ;;  %v3820_v45 = vpop.f32.mrf.mxu0  ;;  %v1503_v19 = vmul.f32 %v1449_v57, %v491_v3  ;;  %v1293_v25 = vmul.f32 0.7978846, %v1239_v7  ;;  %v1024_v7 = vmul.f32 0.5, %v4573_v24 }
 0x10b   : > { %v1240_v48 = vadd.f32 %v1186_v40, %v4573_v24  ;;  %v1133_v49 = vmul.f32 %v1079_v41, %v4582_v37  ;;  %v1558_v5 = vadd.f32 %v1504_v43, %v492_v39 }
 0x10c   : > { %v1451_v52 = vmul.f32 %v1397_v44, %v1019_v42  ;;  %v4593_v54 = vpop.f32.mrf.mxu0  ;;  %v4121_v63 = vpop.eup %4120  ;;  %v4625_v39 = vadd.f32 %v1503_v19, %v491_v3 }
 0x10d   : > { %v1294_v56 = vmul.f32 0.7978846, %v1240_v48  ;;  %v1187_v20 = vmul.f32 %v1133_v49, %v4582_v37  ;;  %v1080_v1 = vmul.f32 0.044715, %v4593_v54  ;;  %v1398_v16 = vadd.f32 1.0, %v4121_v63 }
 0x10e   : > { %v1505_v60 = vmul.f32 %v1451_v52, %v493_v47  ;;  %v3823_v61 = vpop.f32.mrf.mxu0  ;;  %v1660_v49 = vrot.slane %v1558_v5, 1 }
 0x10f   : > { %4126 = vtanh.f32 %v1294_v56  ;;  %v1241_v0 = vadd.f32 %v1187_v20, %v4582_v37  ;;  %v1134_v17 = vmul.f32 %v1080_v1, %v4593_v54  ;;  %v1452_v33 = vmul.f32 %v1398_v16, %v1020_v23 }
 0x110   : > { %v4123_v4 = vpop.eup %4122  ;;  %v4600_v6 = vadd.f32 %v1505_v60, %v493_v47  ;;  %v4603_v8 = vpop.f32.mrf.mxu0  ;;  %v1658_v20 = vrot.slane %v4625_v39, 1 }
 0x111   : > { %v1399_v12 = vadd.f32 1.0, %v4123_v4  ;;  %v1295_v13 = vmul.f32 0.7978846, %v1241_v0  ;;  %v1081_v14 = vmul.f32 0.044715, %v4603_v8  ;;  %v1188_v36 = vmul.f32 %v1134_v17, %v4593_v54 }
 0x112   : > { %v3824_v58 = vpop.f32.mrf.mxu0  ;;  %v4614_v18 = vpack.c.bf16 %v4600_v6, %v1558_v5  ;;  %v1661_v42 = vrot.slane %v4600_v6, 1  ;;  %v1506_v56 = vmul.f32 %v1452_v33, %v494_v9  ;;  %v1768_v33 = vpack.c.bf16 %v4558_v2, %v4558_v2 }
 0x113   : > { %4128 = vtanh.f32 %v1295_v13  ;;  %v1135_v22 = vmul.f32 %v1081_v14, %v4603_v8  ;;  %v1453_v51 = vmul.f32 %v1399_v12, %v1021_v11  ;;  %v1242_v52 = vadd.f32 %v1188_v36, %v4593_v54 }
 0x114   : > { %v4618_v26 = vpop.f32.mrf.mxu0  ;;  %v4125_v28 = vpop.eup %4124  ;;  %4130 = vtanh.f32 %v1293_v25  ;;  %v4643_v1 = vsel %vm1654_vm3, %v1660_v49, %v1661_v42  ;;  %v4659_v17 = vadd.f32 %v1506_v56, %v494_v9  ;;  %v4664_v58 = vsel %vm1654_vm3, %v1656_v55, %v1658_v20 }
 0x115   : > { %v1189_v31 = vmul.f32 %v1135_v22, %v4603_v8  ;;  %v1082_v32 = vmul.f32 0.044715, %v4618_v26  ;;  %v1400_v35 = vadd.f32 1.0, %v4125_v28  ;;  %v1507_v50 = vmul.f32 %v1453_v51, %v495_v29  ;;  %6121 = vst [vmem:[#allocation4_spill] sm:$0xff] %v4643_v1  ;;  %6122 = vst [vmem:[#allocation5_spill] sm:$0xff] %v4664_v58  ;;  %v498_v51 = vld [vmem:[%s4546_s22 + $0x48] sm:$0xff] }
 0x116   : > { %v3827_v38 = vpop.f32.mrf.mxu0  ;;  %v1296_v11 = vmul.f32 0.7978846, %v1242_v52  ;;  %v1025_v25 = vmul.f32 0.5, %v4582_v37  ;;  %v1663_v36 = vrot.slane %v4659_v17, 1  ;;  %v1812_v49 = vshll.u32 %v1768_v33, 16 }
 0x117   : > { %v1243_v40 = vadd.f32 %v1189_v31, %v4603_v8  ;;  %v1136_v41 = vmul.f32 %v1082_v32, %v4618_v26  ;;  %v1454_v44 = vmul.f32 %v1400_v35, %v1022_v30  ;;  %v4645_v62 = vadd.f32 %v1507_v50, %v495_v29  ;;  %v499_v31 = vld [vmem:[%s4546_s22 + $0x50] sm:$0xff] }
 0x118   : > { %v4632_v45 = vpop.f32.mrf.mxu0  ;;  %v1807_v30 = vshll.u32 %v4551_v59, 16  ;;  %v4692_v56 = vsel %vm1654_vm3, %v1661_v42, %v1663_v36  ;;  %v1814_v42 = vrot.slane %v1812_v49, 1 }
 0x119   : > { %v1297_v46 = vmul.f32 0.7978846, %v1243_v40  ;;  %v1190_v47 = vmul.f32 %v1136_v41, %v4618_v26  ;;  %v1083_v48 = vmul.f32 0.044715, %v4632_v45  ;;  %v1508_v43 = vmul.f32 %v1454_v44, %v496_v34  ;;  %6123 = vst [vmem:[#allocation6_spill] sm:$0xff] %v4692_v56 }
 0x11a   : > { %v3828_v53 = vpop.f32.mrf.mxu0  ;;  %v1805_v44 = vshrl.u32 %v4551_v59, 16 }
 0x11b   : > { %4132 = vtanh.f32 %v1297_v46  ;;  %v1244_v57 = vadd.f32 %v1190_v47, %v4618_v26  ;;  %v1137_v60 = vmul.f32 %v1083_v48, %v4632_v45  ;;  %v4647_v63 = vadd.f32 %v1508_v43, %v496_v34 }
 0x11c   : > { %v4127_v61 = vpop.eup %4126  ;;  %v4649_v0 = vpop.f32.mrf.mxu0  ;;  %v1809_v48 = vrot.slane %v1807_v30, 1  ;;  %v1023_v43 = vmul.f32 0.5, %v4566_v15  ;;  %v1027_v15 = vmul.f32 0.5, %v4603_v8  ;;  %v1028_v30 = vmul.f32 0.5, %v4618_v26 }
 0x11d   : > { %v1402_v3 = vadd.f32 1.0, %v4127_v61  ;;  %v1298_v4 = vmul.f32 0.7978846, %v1244_v57  ;;  %v1191_v5 = vmul.f32 %v1137_v60, %v4632_v45  ;;  %v1084_v12 = vmul.f32 0.044715, %v4649_v0 }
 0x11e   : > { %v3831_v13 = vpop.f32.mrf.mxu0  ;;  %v4656_v14 = vpack.c.bf16 %v4647_v63, %v4645_v62 }
 0x11f   : > { %4134 = vtanh.f32 %v1298_v4  ;;  %v1245_v16 = vadd.f32 %v1191_v5, %v4632_v45  ;;  %v1456_v19 = vmul.f32 %v1402_v3, %v1024_v7  ;;  %v1138_v22 = vmul.f32 %v1084_v12, %v4649_v0 }
 0x120   : > { %v4129_v24 = vpop.eup %4128  ;;  %v4667_v23 = vpop.f32.mrf.mxu0  ;;  %4136 = vtanh.f32 %v1296_v11  ;;  %v2094_v12 = vrot.slane %v1768_v33, 1 }
 0x121   : > { %v1403_v28 = vadd.f32 1.0, %v4129_v24  ;;  %v1299_v29 = vmul.f32 0.7978846, %v1245_v16  ;;  %v1192_v21 = vmul.f32 %v1138_v22, %v4649_v0  ;;  %v1085_v55 = vmul.f32 0.044715, %v4667_v23  ;;  %v4131_v41 = vpop.eup %4130  ;;  %v501_v16 = vld [vmem:[%s4546_s22 + $0x60] sm:$0xff] }
 0x122   : > { %v3832_v32 = vpop.f32.mrf.mxu0  ;;  %v1510_v38 = vmul.f32 %v1456_v19, %v498_v51  ;;  %v1401_v57 = vadd.f32 1.0, %v4131_v41 }
 0x123   : > { %v1457_v35 = vmul.f32 %v1403_v28, %v1025_v25  ;;  %4138 = vtanh.f32 %v1299_v29  ;;  %v1246_v37 = vadd.f32 %v1192_v21, %v4649_v0  ;;  %v1139_v34 = vmul.f32 %v1085_v55, %v4667_v23  ;;  %v497_v32 = vld [vmem:[%s4546_s22 + $0x40] sm:$0xff] }
 0x124   : > { %v4680_v40 = vpop.f32.mrf.mxu0  ;;  %v1564_v60 = vadd.f32 %v1510_v38, %v498_v51  ;;  %v1455_v51 = vmul.f32 %v1401_v57, %v1023_v43  ;;  %v1810_v28 = vor.u32 %v1809_v48, %v1805_v44  ;;  %v2093_v29 = vrot.slane %v4551_v59, 1 }
 0x125   : > { %v1511_v9 = vmul.f32 %v1457_v35, %v499_v31  ;;  %v1086_v50 = vmul.f32 0.044715, %v4680_v40  ;;  %v1300_v46 = vmul.f32 0.7978846, %v1246_v37  ;;  %v1193_v2 = vmul.f32 %v1139_v34, %v4667_v23  ;;  %v502_v35 = vld [vmem:[%s4546_s22 + $0x68] sm:$0xff] }
 0x126   : > { %v3835_v47 = vpop.f32.mrf.mxu0  ;;  %v4715_v37 = vsel %vm1803_vm4, %v1810_v28, %v1814_v42  ;;  %v4718_v34 = vsel %vm1654_vm3, %v2093_v29, %v2094_v12  ;;  %v4728_v48 = vpack.c.bf16 %v4625_v39, %v4625_v39  ;;  %v1509_v49 = vmul.f32 %v1455_v51, %v497_v32 }
 0x127   : > { %v4686_v52 = vadd.f32 %v1511_v9, %v499_v31  ;;  %v1140_v53 = vmul.f32 %v1086_v50, %v4680_v40  ;;  %4140 = vtanh.f32 %v1300_v46  ;;  %v1247_v61 = vadd.f32 %v1193_v2, %v4667_v23 }
 0x128   : > { %v4133_v20 = vpop.eup %4132  ;;  %v4695_v3 = vpop.f32.mrf.mxu0  ;;  %v1029_v46 = vmul.f32 0.5, %v4632_v45  ;;  %v1670_v57 = vrot.slane %v1564_v60, 1  ;;  %v1030_v42 = vmul.f32 0.5, %v4649_v0  ;;  %v4753_v28 = vadd.f32 %v1509_v49, %v497_v32 }
 0x129   : > { %v1405_v4 = vadd.f32 1.0, %v4133_v20  ;;  %v1194_v5 = vmul.f32 %v1140_v53, %v4680_v40  ;;  %v1087_v7 = vmul.f32 0.044715, %v4695_v3  ;;  %v1301_v6 = vmul.f32 0.7978846, %v1247_v61 }
 0x12a   : > { %v3836_v11 = vpop.f32.mrf.mxu0  ;;  %v4701_v13 = vpack.c.bf16 %v4686_v52, %v1564_v60  ;;  %v1671_v50 = vrot.slane %v4686_v52, 1  ;;  %v1026_v60 = vmul.f32 0.5, %v4593_v54  ;;  %v1031_v0 = vmul.f32 0.5, %v4667_v23 }
 0x12b   : > { %v1459_v24 = vmul.f32 %v1405_v4, %v1027_v15  ;;  %v1248_v19 = vadd.f32 %v1194_v5, %v4680_v40  ;;  %v1141_v8 = vmul.f32 %v1087_v7, %v4695_v3  ;;  %4142 = vtanh.f32 %v1301_v6  ;;  %v503_v7 = vld [vmem:[%s4546_s22 + $0x70] sm:$0xff] }
 0x12c   : > { %v4135_v22 = vpop.eup %4134  ;;  %v4706_v25 = vpop.f32.mrf.mxu0  ;;  %v4740_v39 = vsel %vm1654_vm3, %v1670_v57, %v1671_v50  ;;  %v505_v57 = vld [vmem:[%s4546_s22 + $0x80] sm:$0xff] }
 0x12d   : > { %v1406_v31 = vadd.f32 1.0, %v4135_v22  ;;  %v1302_v21 = vmul.f32 0.7978846, %v1248_v19  ;;  %v1195_v55 = vmul.f32 %v1141_v8, %v4695_v3  ;;  %v1513_v33 = vmul.f32 %v1459_v24, %v501_v16  ;;  %v4137_v41 = vpop.eup %4136  ;;  %6125 = vst [vmem:[#allocation8_spill] sm:$0xff] %v4740_v39 }
 0x12e   : > { %v1088_v36 = vmul.f32 0.044715, %v4706_v25  ;;  %v3839_v38 = vpop.f32.mrf.mxu0  ;;  %v1404_v61 = vadd.f32 1.0, %v4137_v41 }
 0x12f   : > { %v1460_v9 = vmul.f32 %v1406_v31, %v1028_v30  ;;  %4144 = vtanh.f32 %v1302_v21  ;;  %v1249_v26 = vadd.f32 %v1195_v55, %v4695_v3  ;;  %v4730_v15 = vadd.f32 %v1513_v33, %v501_v16 }
 0x130   : > { %v4139_v44 = vpop.eup %4138  ;;  %v1142_v2 = vmul.f32 %v1088_v36, %v4706_v25  ;;  %v4724_v47 = vpop.f32.mrf.mxu0  ;;  %v1458_v21 = vmul.f32 %v1404_v61, %v1026_v60  ;;  %v1032_v55 = vmul.f32 0.5, %v4680_v40 }
 0x131   : > { %v1514_v43 = vmul.f32 %v1460_v9, %v502_v35  ;;  %v1407_v53 = vadd.f32 1.0, %v4139_v44  ;;  %v1303_v20 = vmul.f32 0.7978846, %v1249_v26  ;;  %v1089_v45 = vmul.f32 0.044715, %v4724_v47  ;;  %v504_v9 = vld [vmem:[%s4546_s22 + $0x78] sm:$0xff] }
 0x132   : > { %v1196_v4 = vmul.f32 %v1142_v2, %v4706_v25  ;;  %v3840_v5 = vpop.f32.mrf.mxu0  ;;  %v1033_v26 = vmul.f32 0.5, %v4695_v3 }
 0x133   : > { %v4735_v6 = vadd.f32 %v1514_v43, %v502_v35  ;;  %v1461_v11 = vmul.f32 %v1407_v53, %v1029_v46  ;;  %4146 = vtanh.f32 %v1303_v20  ;;  %v1143_v16 = vmul.f32 %v1089_v45, %v4724_v47 }
 0x134   : > { %v1250_v12 = vadd.f32 %v1196_v4, %v4706_v25  ;;  %v4746_v24 = vpop.f32.mrf.mxu0  ;;  %v4141_v19 = vpop.eup %4140 }
 0x135   : > { %6124 = vst [vmem:[#allocation7_spill] sm:$0xff] %v4735_v6  ;;  %v1090_v8 = vmul.f32 0.044715, %v4746_v24  ;;  %v1515_v22 = vmul.f32 %v1461_v11, %v503_v7  ;;  %v4751_v51 = vpack.c.bf16 %v4735_v6, %v4730_v15  ;;  %v1408_v54 = vadd.f32 1.0, %v4141_v19 }
 0x136   : > { %v1304_v29 = vmul.f32 0.7978846, %v1250_v12  ;;  %v1197_v30 = vmul.f32 %v1143_v16, %v4724_v47  ;;  %v3843_v31 = vpop.f32.mrf.mxu0  ;;  %v4779_v12 = vld [vmem:[%s4546_s22 + $0x58] sm:$0xff] }
 0x137   : > { %v1144_v33 = vmul.f32 %v1090_v8, %v4746_v24  ;;  %v4759_v35 = vadd.f32 %v1515_v22, %v503_v7  ;;  %v1462_v36 = vmul.f32 %v1408_v54, %v1030_v42  ;;  %v1867_v23 = vshll.u32 %v4751_v51, 16 }
 0x138   : > { %4148 = vtanh.f32 %v1304_v29  ;;  %v1251_v32 = vadd.f32 %v1197_v30, %v4724_v47  ;;  %v4762_v38 = vpop.f32.mrf.mxu0  ;;  %v4143_v41 = vpop.eup %4142  ;;  %v1865_v53 = vshrl.u32 %v4751_v51, 16  ;;  %v2108_v42 = vrot.slane %v4751_v51, 1 }
 0x139   : > { %6126 = vst [vmem:[#allocation9_spill] sm:$0xff] %v4759_v35  ;;  %v1198_v44 = vmul.f32 %v1144_v33, %v4746_v24  ;;  %v1091_v40 = vmul.f32 0.044715, %v4762_v38  ;;  %v1778_v46 = vpack.c.bf16 %v4759_v35, %v4759_v35  ;;  %v1409_v2 = vadd.f32 1.0, %v4143_v41 }
 0x13a   : > { %v1305_v49 = vmul.f32 0.7978846, %v1251_v32  ;;  %v3844_v43 = vpop.f32.mrf.mxu0  ;;  %v1869_v20 = vrot.slane %v1867_v23, 1  ;;  %v1516_v7 = vmul.f32 %v1462_v36, %v504_v9  ;;  %v506_v32 = vld [vmem:[%s4546_s22 + $0x88] sm:$0xff]  ;;  %v4788_v23 = vmul.f32 %v1458_v21, %v4779_v12 }
 0x13b   : > { %v1252_v61 = vadd.f32 %v1198_v44, %v4746_v24  ;;  %v1145_v4 = vmul.f32 %v1091_v40, %v4762_v38  ;;  %v2109_v3 = vrot.slane %v1778_v46, 1  ;;  %v1872_v45 = vshll.u32 %v1778_v46, 16 }
 0x13c   : > { %v4145_v5 = vpop.eup %4144  ;;  %v1463_v11 = vmul.f32 %v1409_v2, %v1031_v0  ;;  %4150 = vtanh.f32 %v1305_v49  ;;  %v4775_v60 = vpop.f32.mrf.mxu0  ;;  %v1870_v22 = vor.u32 %v1869_v20, %v1865_v53  ;;  %v4790_v44 = vadd.f32 %v1516_v7, %v504_v9  ;;  %v4101_v49 = vld [vmem:[%s6099_s5 + $0x8] sm:$0x3f]   ;;  %v507_v20 = vld [vmem:[%s4546_s22 + $0x90] sm:$0xff] }
 0x13d   : > { %v1410_v16 = vadd.f32 1.0, %v4145_v5  ;;  %v1306_v19 = vmul.f32 0.7978846, %v1252_v61  ;;  %v1199_v8 = vmul.f32 %v1145_v4, %v4762_v38  ;;  %v1092_v29 = vmul.f32 0.044715, %v4775_v60  ;;  %4039 = vmatprep.subr.msk.bf16.mxu0 %vm2299_vm5, %v4101_v49  ;;  %4040 = vmatprep.subr.msk.bf16.mxu1 %vm2299_vm5, %v4101_v49 }
 0x13e   : > { %v1517_v54 = vmul.f32 %v1463_v11, %v505_v57  ;;  %v2110_v30 = vsel %vm1654_vm3, %v2108_v42, %v2109_v3  ;;  %v3847_v31 = vpop.f32.mrf.mxu0  ;;  %v1874_v0 = vrot.slane %v1872_v45, 1  ;;  %v1034_v53 = vmul.f32 0.5, %v4706_v25 }
 0x13f   : > { %v1464_v33 = vmul.f32 %v1410_v16, %v1032_v55  ;;  %4152 = vtanh.f32 %v1306_v19  ;;  %v1253_v36 = vadd.f32 %v1199_v8, %v4762_v38  ;;  %2157 = vrot.lane.b32.xlu1 %v2110_v30, %s4302_s23  ;;  %v1146_v46 = vmul.f32 %v1092_v29, %v4775_v60 }
 0x140   : > { %v4147_v41 = vpop.eup %4146  ;;  %v4792_v40 = vadd.f32 %v1517_v54, %v505_v57  ;;  %v1875_v55 = vsel %vm1803_vm4, %v1870_v22, %v1874_v0  ;;  %v4796_v2 = vpop.f32.mrf.mxu0  ;;  %v2301_v5 = vsel %vm2299_vm5, %v4101_v49, 0  ;;  %v1035_v7 = vmul.f32 0.5, %v4724_v47 }
 0x141   : > { %v1411_v43 = vadd.f32 1.0, %v4147_v41  ;;  %v1307_v21 = vmul.f32 0.7978846, %v1253_v36  ;;  %2030 = vrot.lane.b32.xlu0 %v1875_v55, %s4303_s30  ;;  %v1093_v9 = vmul.f32 0.044715, %v4796_v2  ;;  %v1200_v57 = vmul.f32 %v1146_v46, %v4775_v60  ;;  %3902 = vmatpush3.bf16.msra.mxu0 %v2301_v5 }
 0x142   : > { %v3848_v61 = vpop.f32.mrf.mxu0  ;;  %v1518_v4 = vmul.f32 %v1464_v33, %v506_v32  ;;  %v4808_v3 = vpack.c.bf16 %v4792_v40, %v4790_v44  ;;  %v1036_v11 = vmul.f32 0.5, %v4746_v24  ;;  %4038 = vmatpush3.bf16.msra.mxu1 %v2301_v5  ;;  %v1665_v29 = vrot.slane %v4645_v62, 1  ;;  %v508_v33 = vld [vmem:[%s4546_s22 + $0x98] sm:$0xff] }
 0x143   : > { %v1465_v45 = vmul.f32 %v1411_v43, %v1033_v26  ;;  %4154 = vtanh.f32 %v1307_v21  ;;  %v1147_v25 = vmul.f32 %v1093_v9, %v4796_v2  ;;  %v1254_v42 = vadd.f32 %v1200_v57, %v4775_v60 }
 0x144   : > { %v4817_v16 = vpop.f32.mrf.mxu0  ;;  %v4819_v19 = vadd.f32 %v1518_v4, %v506_v32  ;;  %v1879_v0 = vshll.u32 %v4808_v3, 16  ;;  %v2111_v41 = vrot.slane %v4808_v3, 1  ;;  %v6102_v46 = vrot.slane %v4647_v63, 1 }
 0x145   : > { %v4149_v26 = vpop.eup %4148  ;;  %v1519_v8 = vmul.f32 %v1465_v45, %v507_v20  ;;  %v1201_v22 = vmul.f32 %v1147_v25, %v4796_v2  ;;  %v1094_v54 = vmul.f32 0.044715, %v4817_v16  ;;  %v1308_v30 = vmul.f32 0.7978846, %v1254_v42 }
 0x146   : > { %v1412_v47 = vadd.f32 1.0, %v4149_v26  ;;  %v3851_v24 = vpop.f32.mrf.mxu0  ;;  %v1780_v31 = vpack.c.bf16 %v4819_v19, %v4819_v19  ;;  %v1881_v43 = vrot.slane %v1879_v0, 1  ;;  %v1877_v4 = vshrl.u32 %v4808_v3, 16 }
 0x147   : > { %v1255_v36 = vadd.f32 %v1201_v22, %v4796_v2  ;;  %v1148_v32 = vmul.f32 %v1094_v54, %v4817_v16  ;;  %4156 = vtanh.f32 %v1308_v30  ;;  %v4837_v45 = vadd.f32 %v1519_v8, %v507_v20 }
 0x148   : > { %v1466_v55 = vmul.f32 %v1412_v47, %v1034_v53  ;;  %v4832_v62 = vpop.f32.mrf.mxu0  ;;  %v2112_v49 = vrot.slane %v1780_v31, 1  ;;  %v1884_v54 = vshll.u32 %v1780_v31, 16  ;;  %v509_v47 = vld [vmem:[%s4546_s22 + $0xa0] sm:$0xff]  ;;  %v1882_v8 = vor.u32 %v1881_v43, %v1877_v4 }
 0x149   : > { %v4151_v21 = vpop.eup %4150  ;;  %v1309_v9 = vmul.f32 0.7978846, %v1255_v36  ;;  %v1202_v57 = vmul.f32 %v1148_v32, %v4817_v16  ;;  %v1095_v61 = vmul.f32 0.044715, %v4832_v62  ;;  %6127 = vst [vmem:[#allocation10_spill] sm:$0xff] %v4837_v45  ;;  %v4851_v36 = vsel %vm1654_vm3, %v1665_v29, %v6102_v46  ;;  %v512_v46 = vld [vmem:[%s4546_s22 + $0xb8] sm:$0xff] }
 0x14a   : > { %v1520_v25 = vmul.f32 %v1466_v55, %v508_v33  ;;  %v1413_v5 = vadd.f32 1.0, %v4151_v21  ;;  %v2113_v53 = vsel %vm1654_vm3, %v2111_v41, %v2112_v49  ;;  %v3852_v42 = vpop.f32.mrf.mxu0  ;;  %6129 = vst [vmem:[#allocation12_spill] sm:$0xff] %v4851_v36  ;;  %v1886_v49 = vrot.slane %v1884_v54, 1  ;;  %v510_v21 = vld [vmem:[%s4546_s22 + $0xa8] sm:$0xff]  ;;  %v511_v54 = vld [vmem:[%s4546_s22 + $0xb0] sm:$0xff] }
 0x14b   : > { %4158 = vtanh.f32 %v1309_v9  ;;  %v1256_v26 = vadd.f32 %v1202_v57, %v4817_v16  ;;  %v1149_v22 = vmul.f32 %v1095_v61, %v4832_v62  ;;  %2159 = vrot.lane.b32.xlu1 %v2113_v53, %s4302_s23  ;;  %v4862_v43 = vadd.f32 %v4788_v23, %v4779_v12 }
 0x14c   : > { %v4153_v30 = vpop.eup %4152  ;;  %v4844_v24 = vadd.f32 %v1520_v25, %v508_v33  ;;  %v1467_v20 = vmul.f32 %v1413_v5, %v1035_v7  ;;  %v4846_v0 = vpop.f32.mrf.mxu0  ;;  %v1887_v61 = vsel %vm1803_vm4, %v1882_v8, %v1886_v49  ;;  %v1037_v25 = vmul.f32 0.5, %v4762_v38 }
 0x14d   : > { %v1414_v32 = vadd.f32 1.0, %v4153_v30  ;;  %v1310_v41 = vmul.f32 0.7978846, %v1256_v26  ;;  %v1203_v55 = vmul.f32 %v1149_v22, %v4832_v62  ;;  %v1096_v31 = vmul.f32 0.044715, %v4846_v0  ;;  %2032 = vrot.lane.b32.xlu0 %v1887_v61, %s4303_s30 }
 0x14e   : > { %6128 = vst [vmem:[#allocation11_spill] sm:$0xff] %v4844_v24  ;;  %v3855_v9 = vpop.f32.mrf.mxu0  ;;  %v1521_v33 = vmul.f32 %v1467_v20, %v509_v47  ;;  %v4858_v7 = vpack.c.bf16 %v4844_v24, %v4837_v45  ;;  %v1038_v26 = vmul.f32 0.5, %v4775_v60  ;;  %v1039_v49 = vmul.f32 0.5, %v4796_v2 }
 0x14f   : > { %v1468_v29 = vmul.f32 %v1414_v32, %v1036_v11  ;;  %4160 = vtanh.f32 %v1310_v41  ;;  %v1257_v57 = vadd.f32 %v1203_v55, %v4832_v62  ;;  %v1150_v5 = vmul.f32 %v1096_v31, %v4846_v0 }
 0x150   : > { %v4155_v4 = vpop.eup %4154  ;;  %v4869_v53 = vpop.f32.mrf.mxu0  ;;  %v4871_v42 = vadd.f32 %v1521_v33, %v509_v47  ;;  %v1891_v12 = vshll.u32 %v4858_v7, 16  ;;  %v1889_v47 = vshrl.u32 %v4858_v7, 16  ;;  %v1673_v55 = vrot.slane %v4862_v43, 1 }
 0x151   : > { %v1522_v23 = vmul.f32 %v1468_v29, %v510_v21  ;;  %v1415_v11 = vadd.f32 1.0, %v4155_v4  ;;  %v1311_v22 = vmul.f32 0.7978846, %v1257_v57  ;;  %v1204_v30 = vmul.f32 %v1150_v5, %v4846_v0 }
 0x152   : > { %6130 = vst [vmem:[#allocation13_spill] sm:$0xff] %v4871_v42  ;;  %v1097_v38 = vmul.f32 0.044715, %v4869_v53  ;;  %v3856_v20 = vpop.f32.mrf.mxu0  ;;  %v1782_v8 = vpack.c.bf16 %v4871_v42, %v4871_v42  ;;  %v1893_v32 = vrot.slane %v1891_v12, 1  ;;  %v515_v42 = vld [vmem:[%s4546_s22 + $0xd0] sm:$0xff]  ;;  %v6136_v45 = vrot.slane %v4647_v63, 1 }
 0x153   : > { %v1469_v41 = vmul.f32 %v1415_v11, %v1037_v25  ;;  %4162 = vtanh.f32 %v1311_v22  ;;  %v1258_v60 = vadd.f32 %v1204_v30, %v4846_v0  ;;  %v4887_v57 = vadd.f32 %v1522_v23, %v510_v21 }
 0x154   : > { %v1151_v31 = vmul.f32 %v1097_v38, %v4869_v53  ;;  %v4885_v9 = vpop.f32.mrf.mxu0  ;;  %v1896_v33 = vshll.u32 %v1782_v8, 16  ;;  %v4157_v29 = vpop.eup %4156  ;;  %v1894_v25 = vor.u32 %v1893_v32, %v1889_v47  ;;  %v2115_v20 = vrot.slane %v1782_v8, 1 }
 0x155   : > { %v1523_v61 = vmul.f32 %v1469_v41, %v511_v54  ;;  %v1098_v4 = vmul.f32 0.044715, %v4885_v9  ;;  %v1416_v5 = vadd.f32 1.0, %v4157_v29  ;;  %v1312_v12 = vmul.f32 0.7978846, %v1258_v60 }
 0x156   : > { %v1205_v11 = vmul.f32 %v1151_v31, %v4869_v53  ;;  %v3859_v2 = vpop.f32.mrf.mxu0  ;;  %v1898_v22 = vrot.slane %v1896_v33, 1  ;;  %v4898_v21 = vsel %vm1654_vm3, %v1671_v50, %v1673_v55  ;;  %v1040_v31 = vmul.f32 0.5, %v4817_v16  ;;  %v513_v50 = vld [vmem:[%s4546_s22 + $0xc0] sm:$0xff] }
 0x157   : > { %v4891_v30 = vadd.f32 %v1523_v61, %v511_v54  ;;  %v1152_v38 = vmul.f32 %v1098_v4, %v4885_v9  ;;  %6132 = vst [vmem:[#allocation15_spill] sm:$0xff] %v4898_v21  ;;  %v1470_v32 = vmul.f32 %v1416_v5, %v1038_v26  ;;  %4164 = vtanh.f32 %v1312_v12 }
 0x158   : > { %v4159_v23 = vpop.eup %4158  ;;  %v1259_v41 = vadd.f32 %v1205_v11, %v4869_v53  ;;  %v1899_v47 = vsel %vm1803_vm4, %v1894_v25, %v1898_v22  ;;  %v4902_v60 = vpop.f32.mrf.mxu0  ;;  %v2114_v26 = vrot.slane %v4858_v7, 1  ;;  %v1041_v16 = vmul.f32 0.5, %v4832_v62  ;;  %v514_v62 = vld [vmem:[%s4546_s22 + $0xc8] sm:$0xff] }
 0x159   : > { %6131 = vst [vmem:[#allocation14_spill] sm:$0xff] %v4891_v30  ;;  %v1417_v54 = vadd.f32 1.0, %v4159_v23  ;;  %v1206_v8 = vmul.f32 %v1152_v38, %v4885_v9  ;;  %2034 = vrot.lane.b32.xlu0 %v1899_v47, %s4303_s30  ;;  %v1099_v52 = vmul.f32 0.044715, %v4902_v60  ;;  %v1524_v29 = vmul.f32 %v1470_v32, %v512_v46 }
 0x15a   : > { %v1313_v55 = vmul.f32 0.7978846, %v1259_v41  ;;  %v3860_v33 = vpop.f32.mrf.mxu0  ;;  %v4912_v61 = vpack.c.bf16 %v4891_v30, %v4887_v57  ;;  %v2116_v11 = vsel %vm1654_vm3, %v2114_v26, %v2115_v20  ;;  %v1042_v47 = vmul.f32 0.5, %v4846_v0 }
 0x15b   : > { %v1471_v4 = vmul.f32 %v1417_v54, %v1039_v49  ;;  %v1260_v25 = vadd.f32 %v1206_v8, %v4885_v9  ;;  %v1153_v5 = vmul.f32 %v1099_v52, %v4902_v60  ;;  %v4920_v22 = vadd.f32 %v1524_v29, %v512_v46 }
 0x15c   : > { %v4161_v12 = vpop.eup %4160  ;;  %4166 = vtanh.f32 %v1313_v55  ;;  %v4918_v2 = vpop.f32.mrf.mxu0  ;;  %v1903_v38 = vshll.u32 %v4912_v61, 16  ;;  %v1668_v33 = vrot.slane %v4753_v28, 1  ;;  %v4933_v29 = vmul.f32 0.5, %v4869_v53 }
 0x15d   : > { %6133 = vst [vmem:[#allocation16_spill] sm:$0xff] %v4920_v22  ;;  %v1525_v23 = vmul.f32 %v1471_v4, %v513_v50  ;;  %v1418_v32 = vadd.f32 1.0, %v4161_v12  ;;  %v1314_v41 = vmul.f32 0.7978846, %v1260_v25  ;;  %v1207_v49 = vmul.f32 %v1153_v5, %v4902_v60  ;;  %2161 = vrot.lane.b32.xlu0 %v2116_v11, %s4302_s23 }
 0x15e   : > { %v1100_v54 = vmul.f32 0.044715, %v4918_v2  ;;  %v3863_v8 = vpop.f32.mrf.mxu0  ;;  %v1784_v20 = vpack.c.bf16 %v4920_v22, %v4920_v22  ;;  %v1905_v46 = vrot.slane %v1903_v38, 1  ;;  %v1901_v25 = vshrl.u32 %v4912_v61, 16 }
 0x15f   : > { %v1472_v52 = vmul.f32 %v1418_v32, %v1040_v31  ;;  %4168 = vtanh.f32 %v1314_v41  ;;  %v1261_v55 = vadd.f32 %v1207_v49, %v4902_v60  ;;  %v4939_v12 = vadd.f32 %v1525_v23, %v513_v50 }
 0x160   : > { %v4163_v26 = vpop.eup %4162  ;;  %v1154_v0 = vmul.f32 %v1100_v54, %v4918_v2  ;;  %v4936_v4 = vpop.f32.mrf.mxu0  ;;  %v1908_v5 = vshll.u32 %v1784_v20, 16  ;;  %v1906_v8 = vor.u32 %v1905_v46, %v1901_v25  ;;  %v4949_v50 = vsel %vm1654_vm3, %v6136_v45, %v1668_v33 }
 0x161   : > { %6134 = vst [vmem:[#allocation17_spill] sm:$0xff] %v4939_v12  ;;  %v1526_v31 = vmul.f32 %v1472_v52, %v514_v62  ;;  %v1419_v11 = vadd.f32 1.0, %v4163_v26  ;;  %v1315_v38 = vmul.f32 0.7978846, %v1261_v55  ;;  %v1101_v41 = vmul.f32 0.044715, %v4936_v4 }
 0x162   : > { %v1208_v32 = vmul.f32 %v1154_v0, %v4918_v2  ;;  %v3864_v49 = vpop.f32.mrf.mxu0  ;;  %v1910_v53 = vrot.slane %v1908_v5, 1  ;;  %6137 = vst [vmem:[#allocation19_spill] sm:$0xff] %v4949_v50  ;;  %v2118_v46 = vrot.slane %v1784_v20, 1  ;;  %v2117_v20 = vrot.slane %v4912_v61, 1 }
 0x163   : > { %v4944_v22 = vadd.f32 %v1526_v31, %v514_v62  ;;  %v1473_v54 = vmul.f32 %v1419_v11, %v1041_v16  ;;  %4170 = vtanh.f32 %v1315_v38  ;;  %v1155_v52 = vmul.f32 %v1101_v41, %v4936_v4 }
 0x164   : > { %v1262_v23 = vadd.f32 %v1208_v32, %v4918_v2  ;;  %v1911_v55 = vsel %vm1803_vm4, %v1906_v8, %v1910_v53  ;;  %v4954_v26 = vpop.f32.mrf.mxu0  ;;  %v4165_v0 = vpop.eup %4164  ;;  %v1044_v62 = vmul.f32 0.5, %v4885_v9  ;;  %v4966_v11 = vmul.f32 0.5, %v4902_v60 }
 0x165   : > { %6135 = vst [vmem:[#allocation18_spill] sm:$0xff] %v4944_v22  ;;  %2036 = vrot.lane.b32.xlu1 %v1911_v55, %s4303_s30  ;;  %v1102_v16 = vmul.f32 0.044715, %v4954_v26  ;;  %v1527_v63 = vmul.f32 %v1473_v54, %v515_v42  ;;  %v4961_v45 = vpack.c.bf16 %v4944_v22, %v4939_v12  ;;  %v1420_v33 = vadd.f32 1.0, %v4165_v0 }
 0x166   : > { %v1316_v25 = vmul.f32 0.7978846, %v1262_v23  ;;  %v1209_v5 = vmul.f32 %v1155_v52, %v4936_v4  ;;  %v3867_v31 = vpop.f32.mrf.mxu0  ;;  %v2119_v8 = vsel %vm1654_vm3, %v2117_v20, %v2118_v46  ;;  %v516_v23 = vld [vmem:[%s4546_s22 + $0xd8] sm:$0xff]  ;;  %v4984_v0 = vmul.f32 0.5, %v4918_v2 }
 0x167   : > { %6138 = vst [vmem:[#allocation20_spill] sm:$0xff] %v4961_v45  ;;  %v1156_v9 = vmul.f32 %v1102_v16, %v4954_v26  ;;  %v4969_v38 = vadd.f32 %v1527_v63, %v515_v42  ;;  %v1915_v32 = vshll.u32 %v4961_v45, 16  ;;  %v1474_v41 = vmul.f32 %v1420_v33, %v1042_v47  ;;  %v517_v33 = vld [vmem:[%s4546_s22 + $0xe0] sm:$0xff] }
 0x168   : > { %4172 = vtanh.f32 %v1316_v25  ;;  %v1263_v49 = vadd.f32 %v1209_v5, %v4936_v4  ;;  %v4974_v53 = vpop.f32.mrf.mxu0  ;;  %v1680_v47 = vrot.slane %v4790_v44, 1  ;;  %v1913_v2 = vshrl.u32 %v4961_v45, 16 }
 0x169   : > { %6139 = vst [vmem:[#allocation21_spill] sm:$0xff] %v4969_v38  ;;  %v4167_v54 = vpop.eup %4166  ;;  %v1210_v60 = vmul.f32 %v1156_v9, %v4954_v26  ;;  %2163 = vrot.lane.b32.xlu1 %v2119_v8, %s4302_s23  ;;  %v1103_v42 = vmul.f32 0.044715, %v4974_v53  ;;  %v1786_v52 = vpack.c.bf16 %v4969_v38, %v4969_v38  ;;  %v1917_v63 = vrot.slane %v1915_v32, 1 }
 0x16a   : > { %v1421_v55 = vadd.f32 1.0, %v4167_v54  ;;  %v1317_v46 = vmul.f32 0.7978846, %v1263_v49  ;;  %v3868_v16 = vpop.f32.mrf.mxu0  ;;  %v1528_v8 = vmul.f32 %v1474_v41, %v516_v23  ;;  %v6143_v50 = vrot.slane %v4735_v6, 1 }
 0x16b   : > { %v1264_v25 = vadd.f32 %v1210_v60, %v4954_v26  ;;  %v1157_v5 = vmul.f32 %v1103_v42, %v4974_v53  ;;  %v1920_v31 = vshll.u32 %v1786_v52, 16  ;;  %v2121_v60 = vrot.slane %v1786_v52, 1 }
 0x16c   : > { %v4169_v9 = vpop.eup %4168  ;;  %v1475_v38 = vmul.f32 %v1421_v55, %v4933_v29  ;;  %4174 = vtanh.f32 %v1317_v46  ;;  %v4991_v44 = vpop.f32.mrf.mxu0  ;;  %v1918_v20 = vor.u32 %v1917_v63, %v1913_v2  ;;  %v518_v55 = vld [vmem:[%s4546_s22 + $0xe8] sm:$0xff]  ;;  %v6140_v46 = vrot.slane %v4792_v40, 1 }
 0x16d   : > { %v1422_v49 = vadd.f32 1.0, %v4169_v9  ;;  %v1318_v32 = vmul.f32 0.7978846, %v1264_v25  ;;  %v1211_v54 = vmul.f32 %v1157_v5, %v4974_v53  ;;  %v1104_v42 = vmul.f32 0.044715, %v4991_v44 }
 0x16e   : > { %v1529_v16 = vmul.f32 %v1475_v38, %v517_v33  ;;  %v3871_v12 = vpop.f32.mrf.mxu0  ;;  %v1922_v22 = vrot.slane %v1920_v31, 1  ;;  %v5001_v9 = vsel %vm1654_vm3, %v1680_v47, %v6140_v46  ;;  %v5003_v5 = vadd.f32 %v1528_v8, %v516_v23 }
 0x16f   : > { %v1476_v41 = vmul.f32 %v1422_v49, %v1044_v62  ;;  %4176 = vtanh.f32 %v1318_v32  ;;  %v1265_v29 = vadd.f32 %v1211_v54, %v4974_v53  ;;  %6141 = vst [vmem:[#allocation22_spill] sm:$0xff] %v5001_v9  ;;  %v1158_v12 = vmul.f32 %v1104_v42, %v4991_v44  ;;  %v519_v49 = vld [vmem:[%s4546_s22 + $0xf0] sm:$0xff]  ;;  %v521_v9 = vld [vmem:[%s4546_s22 + $0x100] sm:$0xff] }
 0x170   : > { %v4171_v25 = vpop.eup %4170  ;;  %v5005_v38 = vadd.f32 %v1529_v16, %v517_v33  ;;  %v1923_v52 = vsel %vm1803_vm4, %v1918_v20, %v1922_v22  ;;  %v5009_v62 = vpop.f32.mrf.mxu0  ;;  %v1047_v31 = vmul.f32 0.5, %v4936_v4  ;;  %v2120_v33 = vrot.slane %v4961_v45, 1 }
 0x171   : > { %v1423_v63 = vadd.f32 1.0, %v4171_v25  ;;  %v1319_v2 = vmul.f32 0.7978846, %v1265_v29  ;;  %2038 = vrot.lane.b32.xlu0 %v1923_v52, %s4303_s30  ;;  %v1105_v47 = vmul.f32 0.044715, %v5009_v62  ;;  %v1212_v23 = vmul.f32 %v1158_v12, %v4991_v44 }
 0x172   : > { %v3872_v8 = vpop.f32.mrf.mxu0  ;;  %v1530_v32 = vmul.f32 %v1476_v41, %v518_v55  ;;  %v5019_v22 = vpack.c.bf16 %v5005_v38, %v5003_v5  ;;  %v1048_v4 = vmul.f32 0.5, %v4954_v26  ;;  %v2122_v42 = vsel %vm1654_vm3, %v2120_v33, %v2121_v60 }
 0x173   : > { %v1477_v20 = vmul.f32 %v1423_v63, %v4966_v11  ;;  %4178 = vtanh.f32 %v1319_v2  ;;  %v1159_v54 = vmul.f32 %v1105_v47, %v5009_v62  ;;  %v1266_v16 = vadd.f32 %v1212_v23, %v4991_v44  ;;  %v520_v23 = vld [vmem:[%s4546_s22 + $0xf8] sm:$0xff] }
 0x174   : > { %6142 = vst [vmem:[#allocation23_spill] sm:$0xff] %v5019_v22  ;;  %v5026_v29 = vpop.f32.mrf.mxu0  ;;  %v5028_v46 = vadd.f32 %v1530_v32, %v518_v55  ;;  %v1927_v41 = vshll.u32 %v5019_v22, 16  ;;  %v1675_v52 = vrot.slane %v4730_v15, 1  ;;  %v6149_v56 = vrot.slane %v4891_v30, 1 }
 0x175   : > { %v4173_v25 = vpop.eup %4172  ;;  %v1531_v12 = vmul.f32 %v1477_v20, %v519_v49  ;;  %v1213_v11 = vmul.f32 %v1159_v54, %v5009_v62  ;;  %2165 = vrot.lane.b32.xlu0 %v2122_v42, %s4302_s23  ;;  %v1106_v26 = vmul.f32 0.044715, %v5026_v29  ;;  %v1320_v2 = vmul.f32 0.7978846, %v1266_v16 }
 0x176   : > { %v1424_v63 = vadd.f32 1.0, %v4173_v25  ;;  %v3875_v47 = vpop.f32.mrf.mxu0  ;;  %v1788_v60 = vpack.c.bf16 %v5028_v46, %v5028_v46  ;;  %v1929_v55 = vrot.slane %v1927_v41, 1  ;;  %v1683_v20 = vrot.slane %v4819_v19, 1 }
 0x177   : > { %v1267_v8 = vadd.f32 %v1213_v11, %v5009_v62  ;;  %v1160_v33 = vmul.f32 %v1106_v26, %v5026_v29  ;;  %4180 = vtanh.f32 %v1320_v2  ;;  %v1925_v16 = vshrl.u32 %v5019_v22, 16 }
 0x178   : > { %v1478_v54 = vmul.f32 %v1424_v63, %v4984_v0  ;;  %v5043_v15 = vpop.f32.mrf.mxu0  ;;  %v1932_v42 = vshll.u32 %v1788_v60, 16  ;;  %v5046_v41 = vadd.f32 %v1531_v12, %v519_v49  ;;  %v5056_v49 = vsel %vm1654_vm3, %v1675_v52, %v6143_v50 }
 0x179   : > { %v4175_v25 = vpop.eup %4174  ;;  %v1321_v47 = vmul.f32 0.7978846, %v1267_v8  ;;  %v1214_v11 = vmul.f32 %v1160_v33, %v5026_v29  ;;  %v1107_v26 = vmul.f32 0.044715, %v5043_v15  ;;  %v1930_v35 = vor.u32 %v1929_v55, %v1925_v16  ;;  %6144 = vst [vmem:[#allocation24_spill] sm:$0xff] %v5056_v49 }
 0x17a   : > { %v1532_v32 = vmul.f32 %v1478_v54, %v520_v23  ;;  %v1425_v24 = vadd.f32 1.0, %v4175_v25  ;;  %v3876_v19 = vpop.f32.mrf.mxu0  ;;  %v1934_v0 = vrot.slane %v1932_v42, 1  ;;  %v2124_v55 = vrot.slane %v1788_v60, 1 }
 0x17b   : > { %4182 = vtanh.f32 %v1321_v47  ;;  %v1268_v63 = vadd.f32 %v1214_v11, %v5026_v29  ;;  %v1161_v2 = vmul.f32 %v1107_v26, %v5043_v15  ;;  %v2123_v11 = vrot.slane %v5019_v22, 1 }
 0x17c   : > { %v4177_v12 = vpop.eup %4176  ;;  %v5058_v8 = vadd.f32 %v1532_v32, %v520_v23  ;;  %v1479_v33 = vmul.f32 %v1425_v24, %v1047_v31  ;;  %v1935_v54 = vsel %vm1803_vm4, %v1930_v35, %v1934_v0  ;;  %v5061_v25 = vpop.f32.mrf.mxu0  ;;  %v6146_v35 = vrot.slane %v4792_v40, 1  ;;  %v522_v0 = vld [vmem:[%s4546_s22 + $0x108] sm:$0xff] }
 0x17d   : > { %v1426_v16 = vadd.f32 1.0, %v4177_v12  ;;  %v1322_v42 = vmul.f32 0.7978846, %v1268_v63  ;;  %v1215_v47 = vmul.f32 %v1161_v2, %v5043_v15  ;;  %2040 = vrot.lane.b32.xlu1 %v1935_v54, %s4303_s30  ;;  %v1108_v50 = vmul.f32 0.044715, %v5061_v25 }
 0x17e   : > { %v3879_v52 = vpop.f32.mrf.mxu0  ;;  %v1533_v23 = vmul.f32 %v1479_v33, %v521_v9  ;;  %v5069_v24 = vpack.c.bf16 %v5058_v8, %v5046_v41  ;;  %v5074_v31 = vsel %vm1654_vm3, %v6146_v35, %v1683_v20  ;;  %v2125_v2 = vsel %vm1654_vm3, %v2123_v11, %v2124_v55 }
 0x17f   : > { %6147 = vst [vmem:[#allocation26_spill] sm:$0xff] %v5074_v31  ;;  %v1480_v60 = vmul.f32 %v1426_v16, %v1048_v4  ;;  %4184 = vtanh.f32 %v1322_v42  ;;  %v1269_v32 = vadd.f32 %v1215_v47, %v5043_v15  ;;  %v1162_v63 = vmul.f32 %v1108_v50, %v5061_v25  ;;  %v523_v42 = vld [vmem:[%s4546_s22 + $0x110] sm:$0xff] }
 0x180   : > { %6145 = vst [vmem:[#allocation25_spill] sm:$0xff] %v5069_v24  ;;  %v4179_v19 = vpop.eup %4178  ;;  %v5081_v12 = vpop.f32.mrf.mxu0  ;;  %v5083_v33 = vadd.f32 %v1533_v23, %v521_v9  ;;  %v1939_v40 = vshll.u32 %v5069_v24, 16  ;;  %v1049_v4 = vmul.f32 0.5, %v4974_v53  ;;  %v1937_v53 = vshrl.u32 %v5069_v24, 16 }
 0x181   : > { %v1427_v20 = vadd.f32 1.0, %v4179_v19  ;;  %v1323_v54 = vmul.f32 0.7978846, %v1269_v32  ;;  %2167 = vrot.lane.b32.xlu1 %v2125_v2, %s4302_s23  ;;  %v1216_v47 = vmul.f32 %v1162_v63, %v5061_v25  ;;  %v1109_v50 = vmul.f32 0.044715, %v5081_v12 }
 0x182   : > { %v3880_v55 = vpop.f32.mrf.mxu0  ;;  %v1790_v9 = vpack.c.bf16 %v5083_v33, %v5083_v33  ;;  %v1941_v11 = vrot.slane %v1939_v40, 1  ;;  %v1534_v52 = vmul.f32 %v1480_v60, %v522_v0  ;;  %v1050_v26 = vmul.f32 0.5, %v4991_v44 }
 0x183   : > { %v1481_v23 = vmul.f32 %v1427_v20, %v1049_v4  ;;  %4186 = vtanh.f32 %v1323_v54  ;;  %v1270_v35 = vadd.f32 %v1216_v47, %v5061_v25  ;;  %v1163_v32 = vmul.f32 %v1109_v50, %v5081_v12 }
 0x184   : > { %v5097_v19 = vpop.f32.mrf.mxu0  ;;  %v1944_v2 = vshll.u32 %v1790_v9, 16  ;;  %v4181_v55 = vpop.eup %4180  ;;  %v1942_v40 = vor.u32 %v1941_v11, %v1937_v53  ;;  %v5103_v50 = vadd.f32 %v1534_v52, %v522_v0  ;;  %v2127_v49 = vrot.slane %v1790_v9, 1 }
 0x185   : > { %v1535_v16 = vmul.f32 %v1481_v23, %v523_v42  ;;  %v1110_v60 = vmul.f32 0.044715, %v5097_v19  ;;  %v1428_v4 = vadd.f32 1.0, %v4181_v55  ;;  %v1324_v20 = vmul.f32 0.7978846, %v1270_v35  ;;  %v524_v23 = vld [vmem:[%s4546_s22 + $0x118] sm:$0xff] }
 0x186   : > { %v1217_v54 = vmul.f32 %v1163_v32, %v5081_v12  ;;  %v3883_v47 = vpop.f32.mrf.mxu0  ;;  %v1946_v6 = vrot.slane %v1944_v2, 1  ;;  %v1051_v32 = vmul.f32 0.5, %v5009_v62 }
 0x187   : > { %v5105_v31 = vadd.f32 %v1535_v16, %v523_v42  ;;  %v1164_v63 = vmul.f32 %v1110_v60, %v5097_v19  ;;  %v1482_v44 = vmul.f32 %v1428_v4, %v1050_v26  ;;  %4188 = vtanh.f32 %v1324_v20  ;;  %v525_v42 = vld [vmem:[%s4546_s22 + $0x120] sm:$0xff] }
 0x188   : > { %v4183_v21 = vpop.eup %4182  ;;  %v1271_v11 = vadd.f32 %v1217_v54, %v5081_v12  ;;  %v1947_v53 = vsel %vm1803_vm4, %v1942_v40, %v1946_v6  ;;  %v5111_v35 = vpop.f32.mrf.mxu0  ;;  %v2126_v26 = vrot.slane %v5069_v24, 1 }
 0x189   : > { %v1429_v0 = vadd.f32 1.0, %v4183_v21  ;;  %v1218_v52 = vmul.f32 %v1164_v63, %v5097_v19  ;;  %2042 = vrot.lane.b32.xlu0 %v1947_v53, %s4303_s30  ;;  %v1111_v16 = vmul.f32 0.044715, %v5111_v35  ;;  %v1536_v55 = vmul.f32 %v1482_v44, %v524_v23 }
 0x18a   : > { %v1325_v9 = vmul.f32 0.7978846, %v1271_v11  ;;  %v3884_v2 = vpop.f32.mrf.mxu0  ;;  %v5121_v6 = vpack.c.bf16 %v5105_v31, %v5103_v50  ;;  %v1052_v21 = vmul.f32 0.5, %v5026_v29  ;;  %v2128_v4 = vsel %vm1654_vm3, %v2126_v26, %v2127_v49  ;;  %v526_v29 = vld [vmem:[%s4546_s22 + $0x128] sm:$0xff] }
 0x18b   : > { %v1483_v60 = vmul.f32 %v1429_v0, %v1051_v32  ;;  %v1272_v62 = vadd.f32 %v1218_v52, %v5097_v19  ;;  %v1165_v63 = vmul.f32 %v1111_v16, %v5111_v35  ;;  %v5129_v54 = vadd.f32 %v1536_v55, %v524_v23 }
 0x18c   : > { %6148 = vst [vmem:[#allocation27_spill] sm:$0xff] %v5121_v6  ;;  %v4185_v40 = vpop.eup %4184  ;;  %4190 = vtanh.f32 %v1325_v9  ;;  %v5127_v20 = vpop.f32.mrf.mxu0  ;;  %v1951_v47 = vshll.u32 %v5121_v6, 16  ;;  %v1053_v0 = vmul.f32 0.5, %v5043_v15  ;;  %v1949_v15 = vshrl.u32 %v5121_v6, 16 }
 0x18d   : > { %v1537_v44 = vmul.f32 %v1483_v60, %v525_v42  ;;  %v1430_v11 = vadd.f32 1.0, %v4185_v40  ;;  %v1326_v53 = vmul.f32 0.7978846, %v1272_v62  ;;  %v1219_v32 = vmul.f32 %v1165_v63, %v5111_v35  ;;  %2169 = vrot.lane.b32.xlu0 %v2128_v4, %s4302_s23 }
 0x18e   : > { %v1112_v52 = vmul.f32 0.044715, %v5127_v20  ;;  %v3887_v16 = vpop.f32.mrf.mxu0  ;;  %v1792_v49 = vpack.c.bf16 %v5129_v54, %v5129_v54  ;;  %v1953_v23 = vrot.slane %v1951_v47, 1  ;;  %v1690_v40 = vrot.slane %v4887_v57, 1 }
 0x18f   : > { %v1484_v9 = vmul.f32 %v1430_v11, %v1052_v21  ;;  %4192 = vtanh.f32 %v1326_v53  ;;  %v1273_v2 = vadd.f32 %v1219_v32, %v5111_v35  ;;  %v5146_v4 = vadd.f32 %v1537_v44, %v525_v42 }
 0x190   : > { %v4187_v55 = vpop.eup %4186  ;;  %v1166_v60 = vmul.f32 %v1112_v52, %v5127_v20  ;;  %v5142_v62 = vpop.f32.mrf.mxu0  ;;  %v1956_v63 = vshll.u32 %v1792_v49, 16  ;;  %v1954_v26 = vor.u32 %v1953_v23, %v1949_v15  ;;  %v527_v52 = vld [vmem:[%s4546_s22 + $0x130] sm:$0xff]  ;;  %v5156_v57 = vsel %vm1654_vm3, %v1690_v40, %v6149_v56 }
 0x191   : > { %v1538_v47 = vmul.f32 %v1484_v9, %v526_v29  ;;  %v1431_v21 = vadd.f32 1.0, %v4187_v55  ;;  %v1327_v11 = vmul.f32 0.7978846, %v1273_v2  ;;  %v1113_v32 = vmul.f32 0.044715, %v5142_v62  ;;  %6150 = vst [vmem:[#allocation28_spill] sm:$0xff] %v5156_v57 }
 0x192   : > { %v1220_v53 = vmul.f32 %v1166_v60, %v5127_v20  ;;  %v3888_v16 = vpop.f32.mrf.mxu0  ;;  %v1958_v36 = vrot.slane %v1956_v63, 1  ;;  %v2130_v23 = vrot.slane %v1792_v49, 1  ;;  %v1054_v55 = vmul.f32 0.5, %v5061_v25 }
 0x193   : > { %v5151_v39 = vadd.f32 %v1538_v47, %v526_v29  ;;  %v1485_v58 = vmul.f32 %v1431_v21, %v1053_v0  ;;  %4194 = vtanh.f32 %v1327_v11  ;;  %v1167_v44 = vmul.f32 %v1113_v32, %v5142_v62  ;;  %v5166_v29 = vld [vmem:[%s6099_s5] sm:$0x3f]  }
 0x194   : > { %v1274_v42 = vadd.f32 %v1220_v53, %v5127_v20  ;;  %v1959_v9 = vsel %vm1803_vm4, %v1954_v26, %v1958_v36  ;;  %v5161_v2 = vpop.f32.mrf.mxu0  ;;  %v4189_v0 = vpop.eup %4188  ;;  %v2129_v40 = vrot.slane %v5121_v6, 1  ;;  %4041 = vmatprep.subr.msk.bf16.mxu1 %vm2299_vm5, %v5166_v29  ;;  %v5185_v21 = vpack.c.bf16 %v4659_v17, %v4659_v17 }
 0x195   : > { %2044 = vrot.lane.b32.xlu1 %v1959_v9, %s4303_s30  ;;  %v1114_v56 = vmul.f32 0.044715, %v5161_v2  ;;  %v1539_v60 = vmul.f32 %v1485_v58, %v527_v52  ;;  %v5173_v15 = vpack.c.bf16 %v5151_v39, %v5146_v4  ;;  %v1432_v36 = vadd.f32 1.0, %v4189_v0 }
 0x196   : > { %v1328_v49 = vmul.f32 0.7978846, %v1274_v42  ;;  %v1221_v26 = vmul.f32 %v1167_v44, %v5142_v62  ;;  %v3891_v63 = vpop.f32.mrf.mxu0  ;;  %v2131_v32 = vsel %vm1654_vm3, %v2129_v40, %v2130_v23  ;;  %v528_v44 = vld [vmem:[%s4546_s22 + $0x138] sm:$0xff]  ;;  %v1831_v0 = vshll.u32 %v4614_v18, 16 }
 0x197   : > { %6151 = vst [vmem:[#allocation29_spill] sm:$0xff] %v5173_v15  ;;  %v1168_v25 = vmul.f32 %v1114_v56, %v5161_v2  ;;  %v5180_v47 = vadd.f32 %v1539_v60, %v527_v52  ;;  %v1963_v58 = vshll.u32 %v5173_v15, 16  ;;  %v1486_v11 = vmul.f32 %v1432_v36, %v1054_v55 }
 0x198   : > { %4196 = vtanh.f32 %v1328_v49  ;;  %v1275_v53 = vadd.f32 %v1221_v26, %v5142_v62  ;;  %v5189_v16 = vpop.f32.mrf.mxu0  ;;  %v1055_v55 = vmul.f32 0.5, %v5081_v12  ;;  %v529_v49 = vld [vmem:[%s4546_s22 + $0x140] sm:$0xff]  ;;  %v1961_v12 = vshrl.u32 %v5173_v15, 16 }
 0x199   : > { %v4191_v42 = vpop.eup %4190  ;;  %v1222_v52 = vmul.f32 %v1168_v25, %v5161_v2  ;;  %2171 = vrot.lane.b32.xlu1 %v2131_v32, %s4302_s23  ;;  %v1115_v9 = vmul.f32 0.044715, %v5189_v16  ;;  %v1794_v17 = vpack.c.bf16 %v5180_v47, %v5180_v47  ;;  %v1965_v36 = vrot.slane %v1963_v58, 1 }
 0x19a   : > { %v1433_v56 = vadd.f32 1.0, %v4191_v42  ;;  %v1329_v60 = vmul.f32 0.7978846, %v1275_v53  ;;  %v3892_v23 = vpop.f32.mrf.mxu0  ;;  %v1836_v25 = vshll.u32 %v5185_v21, 16  ;;  %v1540_v30 = vmul.f32 %v1486_v11, %v528_v44 }
 0x19b   : > { %v1276_v26 = vadd.f32 %v1222_v52, %v5161_v2  ;;  %v1169_v63 = vmul.f32 %v1115_v9, %v5189_v16  ;;  %v1968_v40 = vshll.u32 %v1794_v17, 16  ;;  %v1056_v53 = vmul.f32 0.5, %v5097_v19 }
 0x19c   : > { %v4193_v32 = vpop.eup %4192  ;;  %v1487_v57 = vmul.f32 %v1433_v56, %v1055_v55  ;;  %4198 = vtanh.f32 %v1329_v60  ;;  %v5203_v10 = vpop.f32.mrf.mxu0  ;;  %v1966_v59 = vor.u32 %v1965_v36, %v1961_v12  ;;  %v2133_v56 = vrot.slane %v1794_v17, 1  ;;  %v530_v60 = vld [vmem:[%s4546_s22 + $0x148] sm:$0xff]  ;;  %v531_v12 = vld [vmem:[%s4546_s22 + $0x150] sm:$0xff] }
 0x19d   : > { %v1434_v58 = vadd.f32 1.0, %v4193_v32  ;;  %v1330_v42 = vmul.f32 0.7978846, %v1276_v26  ;;  %v1223_v52 = vmul.f32 %v1169_v63, %v5189_v16  ;;  %v1116_v9 = vmul.f32 0.044715, %v5203_v10 }
 0x19e   : > { %v1541_v23 = vmul.f32 %v1487_v57, %v529_v49  ;;  %v3895_v1 = vpop.f32.mrf.mxu0  ;;  %v1970_v6 = vrot.slane %v1968_v40, 1  ;;  %v5211_v22 = vadd.f32 %v1540_v30, %v528_v44 }
 0x19f   : > { %v1488_v11 = vmul.f32 %v1434_v58, %v1056_v53  ;;  %4200 = vtanh.f32 %v1330_v42  ;;  %v1277_v55 = vadd.f32 %v1223_v52, %v5189_v16  ;;  %v1170_v26 = vmul.f32 %v1116_v9, %v5203_v10 }
 0x1a0   : > { %v4195_v24 = vpop.eup %4194  ;;  %v5213_v19 = vadd.f32 %v1541_v23, %v529_v49  ;;  %v1971_v57 = vsel %vm1803_vm4, %v1966_v59, %v1970_v6  ;;  %v5217_v63 = vpop.f32.mrf.mxu0  ;;  %v1057_v1 = vmul.f32 0.5, %v5111_v35  ;;  %v2132_v49 = vrot.slane %v5173_v15, 1 }
 0x1a1   : > { %v1435_v36 = vadd.f32 1.0, %v4195_v24  ;;  %v1331_v40 = vmul.f32 0.7978846, %v1277_v55  ;;  %2046 = vrot.lane.b32.xlu0 %v1971_v57, %s4303_s30  ;;  %v1117_v17 = vmul.f32 0.044715, %v5217_v63  ;;  %v1224_v30 = vmul.f32 %v1170_v26, %v5203_v10 }
 0x1a2   : > { %v3896_v44 = vpop.f32.mrf.mxu0  ;;  %v1542_v32 = vmul.f32 %v1488_v11, %v530_v60  ;;  %v5226_v59 = vpack.c.bf16 %v5213_v19, %v5211_v22  ;;  %v5229_v24 = vrot.slane %v1831_v0, 1  ;;  %v2134_v58 = vsel %vm1654_vm3, %v2132_v49, %v2133_v56 }
 0x1a3   : > { %v1489_v6 = vmul.f32 %v1435_v36, %v1057_v1  ;;  %4202 = vtanh.f32 %v1331_v40  ;;  %v1171_v35 = vmul.f32 %v1117_v17, %v5217_v63  ;;  %v1278_v53 = vadd.f32 %v1224_v30, %v5203_v10  ;;  %v532_v17 = vld [vmem:[%s4546_s22 + $0x158] sm:$0xff] }
 0x1a4   : > { %v5234_v42 = vpop.f32.mrf.mxu0  ;;  %v5236_v52 = vadd.f32 %v1542_v32, %v530_v60  ;;  %v1975_v23 = vshll.u32 %v5226_v59, 16  ;;  %v1058_v11 = vmul.f32 0.5, %v5127_v20  ;;  %v5243_v26 = vrot.slane %v1836_v25, 1 }
 0x1a5   : > { %v4197_v9 = vpop.eup %4196  ;;  %v1225_v55 = vmul.f32 %v1171_v35, %v5217_v63  ;;  %2173 = vrot.lane.b32.xlu0 %v2134_v58, %s4302_s23  ;;  %v1118_v0 = vmul.f32 0.044715, %v5234_v42  ;;  %v1332_v56 = vmul.f32 0.7978846, %v1278_v53  ;;  %v1543_v40 = vmul.f32 %v1489_v6, %v531_v12 }
 0x1a6   : > { %v1436_v57 = vadd.f32 1.0, %v4197_v9  ;;  %v3899_v1 = vpop.f32.mrf.mxu0  ;;  %v1796_v60 = vpack.c.bf16 %v5236_v52, %v5236_v52  ;;  %v1977_v36 = vrot.slane %v1975_v23, 1  ;;  %v5252_v44 = vpack.c.bf16 %v4862_v43, %v4862_v43 }
 0x1a7   : > { %v1279_v30 = vadd.f32 %v1225_v55, %v5217_v63  ;;  %v1172_v20 = vmul.f32 %v1118_v0, %v5234_v42  ;;  %4204 = vtanh.f32 %v1332_v56  ;;  %v1973_v32 = vshrl.u32 %v5226_v59, 16 }
 0x1a8   : > { %v1490_v49 = vmul.f32 %v1436_v57, %v1058_v11  ;;  %v5254_v25 = vpop.f32.mrf.mxu0  ;;  %v1980_v35 = vshll.u32 %v1796_v60, 16  ;;  %v1059_v6 = vmul.f32 0.5, %v5142_v62  ;;  %v5260_v57 = vadd.f32 %v1543_v40, %v531_v12  ;;  %v533_v62 = vld [vmem:[%s4546_s22 + $0x160] sm:$0xff] }
 0x1a9   : > { %v4199_v53 = vpop.eup %4198  ;;  %v1333_v58 = vmul.f32 0.7978846, %v1279_v30  ;;  %v1226_v23 = vmul.f32 %v1172_v20, %v5234_v42  ;;  %v1119_v9 = vmul.f32 0.044715, %v5254_v25  ;;  %v1978_v43 = vor.u32 %v1977_v36, %v1973_v32 }
 0x1aa   : > { %v1544_v55 = vmul.f32 %v1490_v49, %v532_v17  ;;  %v1437_v0 = vadd.f32 1.0, %v4199_v53  ;;  %v1982_v1 = vrot.slane %v1980_v35, 1  ;;  %v3900_v11 = vpop.f32.mrf.mxu0  ;;  %v2136_v53 = vrot.slane %v1796_v60, 1 }
 0x1ab   : > { %4206 = vtanh.f32 %v1333_v58  ;;  %v1280_v56 = vadd.f32 %v1226_v23, %v5234_v42  ;;  %v1173_v15 = vmul.f32 %v1119_v9, %v5254_v25  ;;  %v1060_v36 = vmul.f32 0.5, %v5161_v2 }
 0x1ac   : > { %v4201_v30 = vpop.eup %4200  ;;  %v5265_v45 = vadd.f32 %v1544_v55, %v532_v17  ;;  %v1491_v20 = vmul.f32 %v1437_v0, %v1059_v6  ;;  %v1983_v49 = vsel %vm1803_vm4, %v1978_v43, %v1982_v1  ;;  %v2135_v40 = vrot.slane %v5226_v59, 1  ;;  %v534_v6 = vld [vmem:[%s4546_s22 + $0x168] sm:$0xff] }
 0x1ad   : > { %v1438_v32 = vadd.f32 1.0, %v4201_v30  ;;  %v1334_v35 = vmul.f32 0.7978846, %v1280_v56  ;;  %v1227_v12 = vmul.f32 %v1173_v15, %v5254_v25  ;;  %2048 = vrot.lane.b32.xlu1 %v1983_v49, %s4303_s30  ;;  %v1701_v17 = vrot.slane %v5005_v38, 1 }
 0x1ae   : > { %v1545_v58 = vmul.f32 %v1491_v20, %v533_v62  ;;  %v5274_v23 = vpack.c.bf16 %v5265_v45, %v5260_v57  ;;  %v1700_v9 = vrot.slane %v5003_v5, 1  ;;  %v2137_v55 = vsel %vm1654_vm3, %v2135_v40, %v2136_v53  ;;  %v535_v20 = vld [vmem:[%s4546_s22 + $0x170] sm:$0xff] }
 0x1af   : > { %v1492_v60 = vmul.f32 %v1438_v32, %v1060_v36  ;;  %4208 = vtanh.f32 %v1334_v35  ;;  %v1281_v2 = vadd.f32 %v1227_v12, %v5254_v25  ;;  %v1061_v1 = vmul.f32 0.5, %v5189_v16 }
 0x1b0   : > { %v4203_v15 = vpop.eup %4202  ;;  %v5281_v0 = vadd.f32 %v1545_v58, %v533_v62  ;;  %v1987_v43 = vshll.u32 %v5274_v23, 16  ;;  %v5287_v56 = vsel %vm1654_vm3, %v1700_v9, %v1701_v17  ;;  %v5294_v62 = vsel %vm2299_vm5, %v5166_v29, 0 }
 0x1b1   : > { %v1439_v11 = vadd.f32 1.0, %v4203_v15  ;;  %v1335_v38 = vmul.f32 0.7978846, %v1281_v2  ;;  %2175 = vrot.lane.b32.xlu1 %v2137_v55, %s4302_s23  ;;  %6152 = vst [vmem:[#allocation30_spill] sm:$0xff] %v5287_v56  ;;  %v1546_v30 = vmul.f32 %v1492_v60, %v534_v6  ;;  %v1062_v16 = vmul.f32 0.5, %v5203_v10  ;;  %v2158_v12 = vpop.permute.xlu1 %2157 }
 0x1b2   : > { %v1798_v5 = vpack.c.bf16 %v5281_v0, %v5281_v0  ;;  %v1989_v49 = vrot.slane %v1987_v43, 1  ;;  %v1703_v32 = vrot.slane %v5028_v46, 1  ;;  %v1063_v35 = vmul.f32 0.5, %v5217_v63 }
 0x1b3   : > { %v1493_v53 = vmul.f32 %v1439_v11, %v1061_v1  ;;  %4210 = vtanh.f32 %v1335_v38  ;;  %v2031_v36 = vpop.permute.xlu0 %2030  ;;  %v1985_v58 = vshrl.u32 %v5274_v23, 16  ;;  %v2138_v10 = vrot.slane %v5274_v23, 1  ;;  %v536_v11 = vld [vmem:[%s4546_s22 + $0x178] sm:$0xff] }
 0x1b4   : > { %v2194_v40 = vsel %vm677_vm2, %v4751_v51, %v2031_v36  ;;  %v1992_v60 = vshll.u32 %v1798_v5, 16  ;;  %v4205_v2 = vpop.eup %4204  ;;  %v5307_v15 = vsel %vm1654_vm3, %v1701_v17, %v1703_v32  ;;  %v5309_v46 = vadd.f32 %v1546_v30, %v534_v6 }
 0x1b5   : > { %v1547_v29 = vmul.f32 %v1493_v53, %v535_v20  ;;  %v5303_v9 = vsel %vm2219_vm6, %v2194_v40, %v2158_v12  ;;  %6153 = vst [vmem:[#allocation31_spill] sm:$0xff] %v5307_v15  ;;  %v1440_v63 = vadd.f32 1.0, %v4205_v2  ;;  %v1990_v51 = vor.u32 %v1989_v49, %v1985_v58 }
 0x1b6   : > { %3911 = vmatprep.mubr.msk.bf16.mxu1 %vm2266_vm7, %v5303_v9  ;;  %v1994_v55 = vrot.slane %v1992_v60, 1  ;;  %v2139_v1 = vrot.slane %v1798_v5, 1  ;;  %v1710_v38 = vrot.slane %v5103_v50, 1  ;;  %v1711_v53 = vrot.slane %v5105_v31, 1  ;;  %v3564_v50 = vld [vmem:[%s4514_s18 + $0x18] sm:$0xff] }
 0x1b7   : > { %v5313_v43 = vadd.f32 %v1547_v29, %v535_v20  ;;  %v1494_v17 = vmul.f32 %v1440_v63, %v1062_v16  ;;  %v1705_v30 = vrot.slane %v5046_v41, 1  ;;  %v1706_v32 = vrot.slane %v5058_v8, 1 }
 0x1b8   : > { %v4207_v36 = vpop.eup %4206  ;;  %v1995_v6 = vsel %vm1803_vm4, %v1990_v51, %v1994_v55  ;;  %v5327_v5 = vsel %vm1654_vm3, %v1710_v38, %v1711_v53  ;;  %v1713_v31 = vrot.slane %v5129_v54, 1  ;;  %v1064_v49 = vmul.f32 0.5, %v5234_v42 }
 0x1b9   : > { %v1441_v12 = vadd.f32 1.0, %v4207_v36  ;;  %2050 = vrot.lane.b32.xlu0 %v1995_v6, %s4303_s30  ;;  %v5324_v20 = vpack.c.bf16 %v5313_v43, %v5309_v46  ;;  %6154 = vst [vmem:[#allocation32_spill] sm:$0xff] %v5327_v5  ;;  %v1548_v16 = vmul.f32 %v1494_v17, %v536_v11  ;;  %v5333_v41 = vsel %vm1654_vm3, %v1705_v30, %v1706_v32 }
 0x1ba   : > { %6155 = vst [vmem:[#allocation33_spill] sm:$0xff] %v5333_v41  ;;  %v1708_v8 = vrot.slane %v5083_v33, 1  ;;  %v2140_v58 = vsel %vm1654_vm3, %v2138_v10, %v2139_v1  ;;  %v1720_v2 = vrot.slane %v5211_v22, 1  ;;  %v5340_v54 = vsel %vm1654_vm3, %v1711_v53, %v1713_v31  ;;  %v3565_v10 = vld [vmem:[%s4514_s18 + $0x20] sm:$0xff] }
 0x1bb   : > { %v1495_v40 = vmul.f32 %v1441_v12, %v1063_v35  ;;  %v1999_v60 = vshll.u32 %v5324_v20, 16  ;;  %v1602_v63 = vadd.f32 %v1548_v16, %v536_v11  ;;  %6156 = vst [vmem:[#allocation34_spill] sm:$0xff] %v5340_v54  ;;  %v1721_v51 = vrot.slane %v5213_v19, 1 }
 0x1bc   : > { %v4209_v29 = vpop.eup %4208  ;;  %v5343_v42 = vsel %vm1654_vm3, %v1706_v32, %v1708_v8  ;;  %v1715_v35 = vrot.slane %v5146_v4, 1  ;;  %v1716_v11 = vrot.slane %v5151_v39, 1  ;;  %v1723_v53 = vrot.slane %v5236_v52, 1  ;;  %v3566_v8 = vld [vmem:[%s4514_s18 + $0x28] sm:$0xff] }
 0x1bd   : > { %6157 = vst [vmem:[#allocation35_spill] sm:$0xff] %v5343_v42  ;;  %v1549_v55 = vmul.f32 %v3564_v50, %v1495_v40  ;;  %v1442_v38 = vadd.f32 1.0, %v4209_v29  ;;  %2177 = vrot.lane.b32.xlu0 %v2140_v58, %s4302_s23  ;;  %v2001_v33 = vrot.slane %v1999_v60, 1  ;;  %v1800_v1 = vpack.c.bf16 %v1602_v63, %v1602_v63  ;;  %v2160_v29 = vpop.permute.xlu1 %2159 }
 0x1be   : > { %v5350_v22 = vsel %vm1654_vm3, %v1720_v2, %v1721_v51  ;;  %v1065_v19 = vmul.f32 0.5, %v5254_v25  ;;  %v1997_v17 = vshrl.u32 %v5324_v20, 16  ;;  %v1718_v6 = vrot.slane %v5180_v47, 1 }
 0x1bf   : > { %6158 = vst [vmem:[#allocation36_spill] sm:$0xff] %v5350_v22  ;;  %v1496_v36 = vmul.f32 %v1442_v38, %v1064_v49  ;;  %v1603_v32 = vadd.f32 %v3564_v50, %v1549_v55  ;;  %v2004_v4 = vshll.u32 %v1800_v1, 16  ;;  %v5358_v12 = vsel %vm1654_vm3, %v1715_v35, %v1716_v11  ;;  %v2033_v49 = vpop.permute.xlu0 %2032 }
 0x1c0   : > { %v4211_v30 = vpop.eup %4210  ;;  %6159 = vst [vmem:[#allocation37_spill] sm:$0xff] %v5358_v12  ;;  %v5361_v31 = vsel %vm1654_vm3, %v1721_v51, %v1723_v53  ;;  %v2002_v52 = vor.u32 %v2001_v33, %v1997_v17  ;;  %v5366_v25 = vsel %vm1654_vm3, %v1716_v11, %v1718_v6  ;;  %v1730_v50 = vrot.slane %v5309_v46, 1 }
 0x1c1   : > { %6160 = vst [vmem:[#allocation38_spill] sm:$0xff] %v5361_v31  ;;  %v1550_v39 = vmul.f32 %v3565_v10, %v1496_v36  ;;  %v1443_v16 = vadd.f32 1.0, %v4211_v30  ;;  %2020 = vrot.lane.b32.xlu0 %v4715_v37, %s4303_s30  ;;  %6161 = vst [vmem:[#allocation39_spill] sm:$0xff] %v5366_v25  ;;  %v2006_v47 = vrot.slane %v2004_v4, 1  ;;  %v1731_v40 = vrot.slane %v5313_v43, 1 }
 0x1c2   : > { %v1725_v58 = vrot.slane %v5260_v57, 1  ;;  %v2196_v51 = vsel %vm677_vm2, %v4808_v3, %v2033_v49  ;;  %v1726_v37 = vrot.slane %v5265_v45, 1  ;;  %v1733_v46 = vrot.slane %v1602_v63, 1  ;;  %v5389_v3 = vld [vmem:[%s6099_s5 + $0x10] sm:$0x3f]  }
 0x1c3   : > { %v1604_v60 = vadd.f32 %v3565_v10, %v1550_v39  ;;  %v1497_v2 = vmul.f32 %v1443_v16, %v1065_v19  ;;  %v5376_v55 = vsel %vm2219_vm6, %v2196_v51, %v2160_v29  ;;  %v2007_v38 = vsel %vm1803_vm4, %v2002_v52, %v2006_v47 }
 0x1c4   : > { %v5380_v33 = vsel %vm1654_vm3, %v1730_v50, %v1731_v40  ;;  %3912 = vmatmul.mubr.msk.bf16.vlgmr.msra.gmra.mxu1 %vm2266_vm7, %v5376_v55  ;;  %v2142_v57 = vrot.slane %v1800_v1, 1  ;;  %v5392_v45 = vsel %vm1654_vm3, %v1725_v58, %v1726_v37  ;;  %v1728_v35 = vrot.slane %v5281_v0, 1  ;;  %2052 = vrot.lane.b32.xlu1 %v2007_v38, %s4303_s30 }
 0x1c5   : > { %6162 = vst [vmem:[#allocation40_spill] sm:$0xff] %v5380_v33  ;;  %2147 = vrot.lane.b32.xlu0 %v4718_v34, %s4302_s23  ;;  %v1551_v43 = vmul.f32 %v3566_v8, %v1497_v2  ;;  %6163 = vst [vmem:[#allocation41_spill] sm:$0xff] %v5392_v45  ;;  %v6164_v63 = vshrl.u32 %v4614_v18, 16  ;;  %v1855_v34 = vshll.u32 %v4701_v13, 16  ;;  %v5400_v1 = vpack.c.bf16 %v1604_v60, %v1603_v32 }
 0x1c6   : > { %3936 = vmatpush3.bf16.msra.mxu1 %v5294_v62  ;;  %v5404_v11 = vsel %vm1654_vm3, %v1731_v40, %v1733_v46  ;;  %v2141_v53 = vrot.slane %v5324_v20, 1  ;;  %v1817_v36 = vshrl.u32 %v4577_v27, 16  ;;  %v6166_v0 = vshll.u32 %v4577_v27, 16 }
 0x1c7   : > { %v1834_v10 = vor.u32 %v5229_v24, %v6164_v63  ;;  %6165 = vst [vmem:[#allocation42_spill] sm:$0xff] %v5404_v11  ;;  %v1605_v17 = vadd.f32 %v3566_v8, %v1551_v43  ;;  %4042 = vmatprep.subr.msk.bf16.mxu1 %vm2299_vm5, %v5389_v3  ;;  %v2100_v6 = vrot.slane %v5185_v21, 1  ;;  %v1860_v62 = vshll.u32 %v5252_v44, 16 }
 0x1c8   : > { %v1821_v19 = vrot.slane %v6166_v0, 1  ;;  %v5417_v30 = vsel %vm1654_vm3, %v1726_v37, %v1728_v35  ;;  %v2143_v32 = vsel %vm1654_vm3, %v2141_v53, %v2142_v57  ;;  %v6168_v4 = vshll.u32 %v4728_v48, 16 }
 0x1c9   : > { %v1839_v24 = vsel %vm1803_vm4, %v1834_v10, %v5243_v26  ;;  %6167 = vst [vmem:[#allocation43_spill] sm:$0xff] %v5417_v30  ;;  %v1774_v16 = vpack.c.bf16 %v4753_v28, %v4753_v28  ;;  %v1802_v52 = vpack.c.bf16 %v1605_v17, %v1605_v17  ;;  %2179 = vrot.lane.b32.xlu1 %v2143_v32, %s4302_s23  ;;  %v2099_v21 = vrot.slane %v4614_v18, 1 }
 0x1ca   : > { %2024 = vrot.lane.b32.xlu0 %v1839_v24, %s4303_s30  ;;  %v1826_v39 = vrot.slane %v6168_v4, 1  ;;  %v1857_v26 = vrot.slane %v1855_v34, 1  ;;  %v2011_v49 = vshll.u32 %v5400_v1, 16  ;;  %v1822_v8 = vor.u32 %v1821_v19, %v1817_v36 }
 0x1cb   : > { %v2035_v47 = vpop.permute.xlu0 %2034  ;;  %v1843_v50 = vshll.u32 %v4656_v14, 16  ;;  %v2101_v40 = vsel %vm1654_vm3, %v2099_v21, %v2100_v6  ;;  %v1853_v58 = vshrl.u32 %v4701_v13, 16  ;;  %v1862_v60 = vrot.slane %v1860_v62, 1 }
 0x1cc   : > { %v2016_v2 = vshll.u32 %v1802_v52, 16  ;;  %v1827_v28 = vsel %vm1803_vm4, %v1822_v8, %v1826_v39  ;;  %v2097_v29 = vrot.slane %v4728_v48, 1  ;;  %v1848_v51 = vshll.u32 %v1774_v16, 16 }
 0x1cd   : > { %2022 = vrot.lane.b32.xlu1 %v1827_v28, %s4303_s30  ;;  %v1858_v37 = vor.u32 %v1857_v26, %v1853_v58  ;;  %v2013_v38 = vrot.slane %v2011_v49, 1  ;;  %v2198_v46 = vsel %vm677_vm2, %v4858_v7, %v2035_v47  ;;  %v2096_v43 = vrot.slane %v4577_v27, 1  ;;  %v6170_v28 = vld [vmem:[#allocation23_spill] sm:$0xff] }
 0x1ce   : > { %2151 = vrot.lane.b32.xlu0 %v2101_v40, %s4302_s23  ;;  %v1845_v35 = vrot.slane %v1843_v50, 1  ;;  %v2009_v34 = vshrl.u32 %v5400_v1, 16  ;;  %v2018_v48 = vrot.slane %v2016_v2, 1  ;;  %v1841_v7 = vshrl.u32 %v4656_v14, 16  ;;  %v6169_v40 = vld [vmem:[#allocation20_spill] sm:$0xff] }
 0x1cf   : > { %v2162_v57 = vpop.permute.xlu0 %2161  ;;  %v1863_v10 = vsel %vm1803_vm4, %v1858_v37, %v1862_v60  ;;  %v2098_v53 = vsel %vm1654_vm3, %v2096_v43, %v2097_v29  ;;  %v1850_v36 = vrot.slane %v1848_v51, 1  ;;  %v2103_v6 = vrot.slane %v1774_v16, 1 }
 0x1d0   : > { %v5439_v63 = vsel %vm2219_vm6, %v2198_v46, %v2162_v57  ;;  %v2014_v0 = vor.u32 %v2013_v38, %v2009_v34  ;;  %v1846_v19 = vor.u32 %v1845_v35, %v1841_v7  ;;  %v2102_v32 = vrot.slane %v4656_v14, 1  ;;  %v6171_v46 = vld [vmem:[#allocation25_spill] sm:$0xff]  ;;  %v6172_v34 = vld [vmem:[#allocation27_spill] sm:$0xff] }
 0x1d1   : > { %3915 = vmatprep.mubr.msk.bf16.mxu1 %vm2266_vm7, %v5439_v63  ;;  %2149 = vrot.lane.b32.xlu1 %v2098_v53, %s4302_s23  ;;  %v2106_v39 = vrot.slane %v5252_v44, 1  ;;  %v2105_v49 = vrot.slane %v4701_v13, 1  ;;  %v2145_v8 = vrot.slane %v1802_v52, 1  ;;  %v2144_v44 = vrot.slane %v5400_v1, 1 }
 0x1d2   : > { %2028 = vrot.lane.b32.xlu0 %v1863_v10, %s4303_s30  ;;  %v2019_v17 = vsel %vm1803_vm4, %v2014_v0, %v2018_v48  ;;  %v1851_v24 = vsel %vm1803_vm4, %v1846_v19, %v1850_v36  ;;  %v2104_v4 = vsel %vm1654_vm3, %v2102_v32, %v2103_v6  ;;  %v6173_v0 = vld [vmem:[#allocation29_spill] sm:$0xff] }
 0x1d3   : > { %v2107_v16 = vsel %vm1654_vm3, %v2105_v49, %v2106_v39  ;;  %v2146_v50 = vsel %vm1654_vm3, %v2144_v44, %v2145_v8 }
 0x1d5   : > { %2026 = vrot.lane.b32.xlu1 %v1851_v24, %s4303_s30 }
 0x1d6   : > { %2054 = vrot.lane.b32.xlu0 %v2019_v17, %s4303_s30 }
 0x1d7   : > { %v2037_v62 = vpop.permute.xlu1 %2036 }
 0x1d8   : > { %v2200_v21 = vsel %vm677_vm2, %v4912_v61, %v2037_v62 }
 0x1d9   : > { %2153 = vrot.lane.b32.xlu1 %v2104_v4, %s4302_s23 }
 0x1db   : > { %v2164_v26 = vpop.permute.xlu1 %2163 }
 0x1dc   : > { %v5461_v47 = vsel %vm2219_vm6, %v2200_v21, %v2164_v26 }
 0x1dd   : > { %3916 = vmatmul.mubr.msk.bf16.gmra.mxu1 %vm2266_vm7, %v5461_v47  ;;  %2155 = vrot.lane.b32.xlu1 %v2107_v16, %s4302_s23 }
 0x1e1   : > { %2181 = vrot.lane.b32.xlu1 %v2146_v50, %s4302_s23 }
 0x1e3   : > { %v2039_v61 = vpop.permute.xlu0 %2038 }
 0x1e4   : > { %v2202_v58 = vsel %vm677_vm2, %v6169_v40, %v2039_v61  ;;  %v6174_v61 = vld [vmem:[#allocation2_spill] sm:$0xff] }
 0x1e7   : > { %v2166_v60 = vpop.permute.xlu0 %2165 }
 0x1e8   : > { %v5473_v2 = vsel %vm2219_vm6, %v2202_v58, %v2166_v60 }
 0x1e9   : > { %3919 = vmatprep.mubr.msk.bf16.mxu1 %vm2266_vm7, %v5473_v2 }
 0x1ef   : > { %v2041_v52 = vpop.permute.xlu1 %2040 }
 0x1f0   : > { %v2204_v29 = vsel %vm677_vm2, %v6170_v28, %v2041_v52 }
 0x1f3   : > { %v2168_v51 = vpop.permute.xlu1 %2167 }
 0x1f4   : > { %v5480_v37 = vsel %vm2219_vm6, %v2204_v29, %v2168_v51 }
 0x1f5   : > { %3920 = vmatmul.mubr.msk.bf16.gmra.mxu1 %vm2266_vm7, %v5480_v37 }
 0x1fb   : > { %v2043_v38 = vpop.permute.xlu0 %2042 }
 0x1fc   : > { %v2206_v57 = vsel %vm677_vm2, %v6171_v46, %v2043_v38 }
 0x1ff   : > { %v2170_v43 = vpop.permute.xlu0 %2169 }
 0x200   : > { %v5487_v35 = vsel %vm2219_vm6, %v2206_v57, %v2170_v43 }
 0x201   : > { %3923 = vmatprep.mubr.msk.bf16.mxu1 %vm2266_vm7, %v5487_v35 }
 0x207   : > { %v2045_v10 = vpop.permute.xlu1 %2044 }
 0x208   : > { %v2208_v48 = vsel %vm677_vm2, %v6172_v34, %v2045_v10 }
 0x20b   : > { %v2172_v53 = vpop.permute.xlu1 %2171 }
 0x20c   : > { %v5494_v7 = vsel %vm2219_vm6, %v2208_v48, %v2172_v53 }
 0x20d   : > { %3924 = vmatmul.mubr.msk.bf16.gmra.mxu1 %vm2266_vm7, %v5494_v7 }
 0x213   : > { %v2047_v36 = vpop.permute.xlu0 %2046 }
 0x214   : > { %v2210_v19 = vsel %vm677_vm2, %v6173_v0, %v2047_v36 }
 0x217   : > { %v2174_v17 = vpop.permute.xlu0 %2173 }
 0x218   : > { %v5501_v24 = vsel %vm2219_vm6, %v2210_v19, %v2174_v17 }
 0x219   : > { %3927 = vmatprep.mubr.msk.bf16.mxu1 %vm2266_vm7, %v5501_v24 }
 0x21f   : > { %v2049_v6 = vpop.permute.xlu1 %2048 }
 0x220   : > { %v2212_v62 = vsel %vm677_vm2, %v5226_v59, %v2049_v6 }
 0x223   : > { %v2176_v32 = vpop.permute.xlu1 %2175 }
 0x224   : > { %v5508_v4 = vsel %vm2219_vm6, %v2212_v62, %v2176_v32 }
 0x225   : > { %3928 = vmatmul.mubr.msk.bf16.gmra.mxu1 %vm2266_vm7, %v5508_v4 }
 0x22b   : > { %v2051_v39 = vpop.permute.xlu0 %2050 }
 0x22c   : > { %v2214_v21 = vsel %vm677_vm2, %v5274_v23, %v2051_v39 }
 0x22f   : > { %v2178_v26 = vpop.permute.xlu0 %2177 }
 0x230   : > { %v5515_v49 = vsel %vm2219_vm6, %v2214_v21, %v2178_v26 }
 0x231   : > { %3931 = vmatprep.mubr.msk.bf16.mxu1 %vm2266_vm7, %v5515_v49 }
 0x233   : > { %v2021_v16 = vpop.permute.xlu0 %2020 }
 0x234   : > { %v2184_v40 = vsel %vm677_vm2, %v6174_v61, %v2021_v16 }
 0x236   : > { %v2053_v8 = vpop.permute.xlu1 %2052 }
 0x237   : > { %v2148_v59 = vpop.permute.xlu0 %2147  ;;  %v2216_v44 = vsel %vm677_vm2, %v5324_v20, %v2053_v8  ;;  %v2646_v20 = vsel %vm2299_vm5, %v5389_v3, 0 }
 0x238   : > { %v2221_v60 = vsel %vm2219_vm6, %v2184_v40, %v2148_v59 }
 0x23b   : > { %v2180_v50 = vpop.permute.xlu1 %2179 }
 0x23c   : > { %v2025_v58 = vpop.permute.xlu0 %2024  ;;  %v2253_v23 = vsel %vm2219_vm6, %v2216_v44, %v2180_v50 }
 0x23d   : > { %3932 = vmatmul.mubr.msk.bf16.gmra.mxu1 %vm2266_vm7, %v2253_v23  ;;  %v2188_v38 = vsel %vm677_vm2, %v4614_v18, %v2025_v58 }
 0x23e   : > { %3937 = vmatprep.mubr.msk.bf16.mxu1 %vm2266_vm7, %v2221_v60 }
 0x23f   : > { %v2023_v52 = vpop.permute.xlu1 %2022 }
 0x240   : > { %v2152_v28 = vpop.permute.xlu0 %2151  ;;  %v2186_v29 = vsel %vm677_vm2, %v4577_v27, %v2023_v52 }
 0x241   : > { %v2225_v57 = vsel %vm2219_vm6, %v2188_v38, %v2152_v28 }
 0x243   : > { %v2150_v51 = vpop.permute.xlu1 %2149 }
 0x244   : > { %v2223_v46 = vsel %vm2219_vm6, %v2186_v29, %v2150_v51  ;;  %v2029_v10 = vpop.permute.xlu0 %2028 }
 0x245   : > { %3903 = vmatprep.mubr.msk.bf16.mxu0 %vm2266_vm7, %v2223_v46  ;;  %3938 = vmatmul.mubr.msk.bf16.vlgmr.msra.gmra.mxu1 %vm2266_vm7, %v2223_v46  ;;  %v2192_v34 = vsel %vm677_vm2, %v4701_v13, %v2029_v10 }
 0x246   : > { %3970 = vmatpush3.bf16.msra.mxu1 %v2646_v20  ;;  %3904 = vmatmul.mubr.msk.bf16.vlgmr.msra.gmra.mxu0 %vm2266_vm7, %v2225_v57 }
 0x247   : > { %3941 = vmatprep.mubr.msk.bf16.mxu1 %vm2266_vm7, %v2225_v57  ;;  %v2027_v27 = vpop.permute.xlu1 %2026 }
 0x248   : > { %v2190_v3 = vsel %vm677_vm2, %v4656_v14, %v2027_v27  ;;  %v3145_v14 = vld [vmem:[%s6100_s6] sm:$0xf] }
 0x249   : > { %4043 = vmatprep.subr.msk.bf16.mxu1 %vm3194_vm8, %v3145_v14  ;;  %v3196_v13 = vsel %vm3194_vm8, %v3145_v14, 0 }
 0x24b   : > { %v2154_v43 = vpop.permute.xlu1 %2153 }
 0x24c   : > { %v2227_v18 = vsel %vm2219_vm6, %v2190_v3, %v2154_v43 }
 0x24d   : > { %3907 = vmatprep.mubr.msk.bf16.mxu0 %vm2266_vm7, %v2227_v18  ;;  %3942 = vmatmul.mubr.msk.bf16.gmra.mxu1 %vm2266_vm7, %v2227_v18 }
 0x24f   : > { %v2156_v48 = vpop.permute.xlu1 %2155 }
 0x250   : > { %v2229_v53 = vsel %vm2219_vm6, %v2192_v34, %v2156_v48 }
 0x251   : > { %3908 = vmatmul.mubr.msk.bf16.gmra.mxu0 %vm2266_vm7, %v2229_v53  ;;  %3945 = vmatprep.mubr.msk.bf16.mxu1 %vm2266_vm7, %v2229_v53 }
 0x255   : > { %3946 = vmatmul.mubr.msk.bf16.gmra.mxu1 %vm2266_vm7, %v5303_v9 }
 0x256   : > { %3949 = vmatprep.mubr.msk.bf16.mxu1 %vm2266_vm7, %v5376_v55 }
 0x25d   : > { %3950 = vmatmul.mubr.msk.bf16.gmra.mxu1 %vm2266_vm7, %v5439_v63 }
 0x25e   : > { %3953 = vmatprep.mubr.msk.bf16.mxu1 %vm2266_vm7, %v5461_v47 }
 0x265   : > { %3954 = vmatmul.mubr.msk.bf16.gmra.mxu1 %vm2266_vm7, %v5473_v2 }
 0x266   : > { %3957 = vmatprep.mubr.msk.bf16.mxu1 %vm2266_vm7, %v5480_v37 }
 0x26d   : > { %3958 = vmatmul.mubr.msk.bf16.gmra.mxu1 %vm2266_vm7, %v5487_v35 }
 0x26e   : > { %3961 = vmatprep.mubr.msk.bf16.mxu1 %vm2266_vm7, %v5494_v7 }
 0x275   : > { %3962 = vmatmul.mubr.msk.bf16.gmra.mxu1 %vm2266_vm7, %v5501_v24 }
 0x276   : > { %3965 = vmatprep.mubr.msk.bf16.mxu1 %vm2266_vm7, %v5508_v4 }
 0x27d   : > { %3966 = vmatmul.mubr.msk.bf16.gmra.mxu1 %vm2266_vm7, %v5515_v49 }
 0x27e   : > { %3971 = vmatprep.mubr.msk.bf16.mxu1 %vm2266_vm7, %v2225_v57 }
 0x285   : > { %3972 = vmatmul.mubr.msk.bf16.vlgmr.msra.gmra.mxu1 %vm2266_vm7, %v2227_v18 }
 0x286   : > { %3975 = vmatprep.mubr.msk.bf16.mxu1 %vm2266_vm7, %v2229_v53  ;;  %4004 = vmatpush3.bf16.msra.mxu1 %v3196_v13 }
 0x28d   : > { %3976 = vmatmul.mubr.msk.bf16.gmra.mxu1 %vm2266_vm7, %v5303_v9  ;;  %v5600_v9 = vpop.f32.mrf.mxu1 }
 0x28e   : > { %3979 = vmatprep.mubr.msk.bf16.mxu1 %vm2266_vm7, %v5376_v55  ;;  %v2055_v55 = vpop.permute.xlu0 %2054 }
 0x295   : > { %3980 = vmatmul.mubr.msk.bf16.gmra.mxu1 %vm2266_vm7, %v5439_v63  ;;  %v2182_v63 = vpop.permute.xlu1 %2181 }
 0x296   : > { %3983 = vmatprep.mubr.msk.bf16.mxu1 %vm2266_vm7, %v5461_v47  ;;  %v2218_v47 = vsel %vm677_vm2, %v5400_v1, %v2055_v55 }
 0x29d   : > { %3984 = vmatmul.mubr.msk.bf16.gmra.mxu1 %vm2266_vm7, %v5473_v2  ;;  %v5604_v2 = vpop.f32.mrf.mxu1 }
 0x29e   : > { %3987 = vmatprep.mubr.msk.bf16.mxu1 %vm2266_vm7, %v5480_v37  ;;  %v2255_v37 = vsel %vm2219_vm6, %v2218_v47, %v2182_v63 }
 0x2a5   : > { %3988 = vmatmul.mubr.msk.bf16.gmra.mxu1 %vm2266_vm7, %v5487_v35  ;;  %v5608_v35 = vpop.f32.mrf.mxu1 }
 0x2a6   : > { %3991 = vmatprep.mubr.msk.bf16.mxu1 %vm2266_vm7, %v5494_v7 }
 0x2a7   : > { %v5610_v7 = vpop.f32.mrf.mxu1 }
 0x2a9   : > { %v5612_v36 = vpop.f32.mrf.mxu1 }
 0x2ab   : > { %v5614_v0 = vpop.f32.mrf.mxu1 }
 0x2ad   : > { %3992 = vmatmul.mubr.msk.bf16.gmra.mxu1 %vm2266_vm7, %v5501_v24  ;;  %v5616_v19 = vpop.f32.mrf.mxu1 }
 0x2ae   : > { %3995 = vmatprep.mubr.msk.bf16.mxu1 %vm2266_vm7, %v5508_v4 }
 0x2af   : > { %v5618_v17 = vpop.f32.mrf.mxu1 }
 0x2b5   : > { %3996 = vmatmul.mubr.msk.bf16.gmra.mxu1 %vm2266_vm7, %v5515_v49  ;;  %v5620_v24 = vpop.f32.mrf.mxu1 }
 0x2b6   : > { %3999 = vmatprep.mubr.msk.bf16.mxu1 %vm2266_vm7, %v2253_v23 }
 0x2b7   : > { %v5622_v1 = vpop.f32.mrf.mxu1 }
 0x2b9   : > { %v5624_v6 = vpop.f32.mrf.mxu1 }
 0x2ba   : > { %6175 = vst [vmem:[#allocation20_spill] sm:$0xff] %v5624_v6 }
 0x2bb   : > { %v5626_v62 = vpop.f32.mrf.mxu1 }
 0x2bc   : > { %6176 = vst [vmem:[#allocation23_spill] sm:$0xff] %v5626_v62 }
 0x2bd   : > { %4000 = vmatmul.mubr.msk.bf16.gmra.mxu1 %vm2266_vm7, %v2255_v37 }
 0x2cd   : > { %v5628_v32 = vpop.f32.mrf.mxu1 }
 0x2ce   : > { %6177 = vst [vmem:[#allocation25_spill] sm:$0xff] %v5628_v32 }
 0x2cf   : > { %v5630_v4 = vpop.f32.mrf.mxu1 }
 0x2d0   : > { %6178 = vst [vmem:[#allocation27_spill] sm:$0xff] %v5630_v4 }
 0x2d1   : > { %v5632_v39 = vpop.f32.mrf.mxu1 }
 0x2d2   : > { %6179 = vst [vmem:[#allocation29_spill] sm:$0xff] %v5632_v39 }
 0x2d3   : > { %v5634_v21 = vpop.f32.mrf.mxu1 }
 0x2d4   : > { %6180 = vst [vmem:[#allocation2_spill] sm:$0xff] %v5634_v21 }
 0x2e5   : > { %v5636_v26 = vpop.f32.mrf.mxu1 }
 0x2e6   : > { %6181 = vst [vmem:[#allocation44_spill] sm:$0xff] %v5636_v26 }
 0x2e7   : > { %v5638_v49 = vpop.f32.mrf.mxu1 }
 0x2e8   : > { %6182 = vst [vmem:[#allocation45_spill] sm:$0xff] %v5638_v49 }
 0x2e9   : > { %v5640_v16 = vpop.f32.mrf.mxu1 }
 0x2ea   : > { %6183 = vst [vmem:[#allocation46_spill] sm:$0xff] %v5640_v16 }
 0x2eb   : > { %v2436_v59 = vpop.f32.mrf.mxu1 }
 0x2fd   : > { %v3933_v8 = vpop.f32.mrf.mxu1 }
 0x2ff   : > { %v2449_v44 = vpop.f32.mrf.mxu1 }
 0x301   : > { %v3934_v50 = vpop.f32.mrf.mxu1 }
 0x303   : > { %v2452_v61 = vpop.f32.mrf.mxu1 }
 0x305   : > { %v3939_v40 = vpop.f32.mrf.mxu1 }
 0x306   : > { %v3905_v53 = vpop.f32.mrf.mxu0 }
 0x307   : > { %v2508_v58 = vpop.f32.mrf.mxu1  ;;  %v2517_v21 = vadd.f32 %v3939_v40, %v3905_v53 }
 0x308   : > { %v2337_v55 = vpop.f32.mrf.mxu0 }
 0x309   : > { %v3940_v23 = vpop.f32.mrf.mxu1  ;;  %v2509_v32 = vadd.f32 %v2508_v58, %v2337_v55  ;;  %v6188_v58 = vld [vmem:[#allocation25_spill] sm:$0xff] }
 0x30a   : > { %v3906_v37 = vpop.f32.mrf.mxu0 }
 0x30b   : > { %v2511_v60 = vpop.f32.mrf.mxu1  ;;  %v2520_v6 = vadd.f32 %v3940_v23, %v3906_v37 }
 0x30c   : > { %v2340_v45 = vpop.f32.mrf.mxu0 }
 0x30d   : > { %v3943_v52 = vpop.f32.mrf.mxu1 }
 0x30f   : > { %v2524_v28 = vpop.f32.mrf.mxu1 }
 0x311   : > { %v3944_v29 = vpop.f32.mrf.mxu1  ;;  %v3909_v25 = vpop.f32.mrf.mxu0 }
 0x313   : > { %v2527_v51 = vpop.f32.mrf.mxu1  ;;  %v2353_v22 = vpop.f32.mrf.mxu0 }
 0x315   : > { %v3947_v20 = vpop.f32.mrf.mxu1  ;;  %v3910_v15 = vpop.f32.mrf.mxu0 }
 0x317   : > { %v2540_v38 = vpop.f32.mrf.mxu1  ;;  %v2356_v39 = vpop.f32.mrf.mxu0 }
 0x319   : > { %v3948_v46 = vpop.f32.mrf.mxu1 }
 0x31b   : > { %v2543_v57 = vpop.f32.mrf.mxu1 }
 0x31c   : > { %v5662_v40 = vadd.f32 %v2543_v57, %v5610_v7 }
 0x31d   : > { %v3951_v27 = vpop.f32.mrf.mxu1 }
 0x31f   : > { %v2556_v3 = vpop.f32.mrf.mxu1 }
 0x321   : > { %v3952_v43 = vpop.f32.mrf.mxu1 }
 0x323   : > { %v2559_v10 = vpop.f32.mrf.mxu1 }
 0x325   : > { %v3955_v18 = vpop.f32.mrf.mxu1 }
 0x327   : > { %v2572_v34 = vpop.f32.mrf.mxu1 }
 0x328   : > { %v5680_v7 = vadd.f32 %v2572_v34, %v5622_v1  ;;  %v6191_v1 = vld [vmem:[#allocation2_spill] sm:$0xff] }
 0x329   : > { %v3956_v48 = vpop.f32.mrf.mxu1 }
 0x32b   : > { %v2575_v14 = vpop.f32.mrf.mxu1 }
 0x32d   : > { %v3959_v13 = vpop.f32.mrf.mxu1 }
 0x32e   : > { %v5689_v23 = vadd.f32 %v3959_v13, %v6188_v58 }
 0x32f   : > { %v2588_v63 = vpop.f32.mrf.mxu1 }
 0x331   : > { %v3960_v47 = vpop.f32.mrf.mxu1 }
 0x333   : > { %v2591_v30 = vpop.f32.mrf.mxu1 }
 0x335   : > { %v3963_v11 = vpop.f32.mrf.mxu1 }
 0x337   : > { %v2604_v33 = vpop.f32.mrf.mxu1 }
 0x339   : > { %v3964_v31 = vpop.f32.mrf.mxu1 }
 0x33b   : > { %v2607_v12 = vpop.f32.mrf.mxu1 }
 0x33c   : > { %v5642_v42 = vadd.f32 %v2607_v12, %v2436_v59  ;;  %v2512_v12 = vadd.f32 %v2511_v60, %v2340_v45  ;;  %v2533_v59 = vadd.f32 %v3943_v52, %v3909_v25  ;;  %v5665_v25 = vadd.f32 %v3951_v27, %v5612_v36  ;;  %v6186_v36 = vld [vmem:[#allocation20_spill] sm:$0xff] }
 0x33d   : > { %v3967_v54 = vpop.f32.mrf.mxu1 }
 0x33e   : > { %6184 = vst [vmem:[#allocation47_spill] sm:$0xff] %v5642_v42  ;;  %v5644_v41 = vadd.f32 %v3967_v54, %v3933_v8  ;;  %v2525_v54 = vadd.f32 %v2524_v28, %v2353_v22  ;;  %v2536_v8 = vadd.f32 %v3944_v29, %v3910_v15  ;;  %v5668_v15 = vadd.f32 %v2556_v3, %v5614_v0  ;;  %v6187_v0 = vld [vmem:[#allocation23_spill] sm:$0xff] }
 0x33f   : > { %v2620_v5 = vpop.f32.mrf.mxu1  ;;  %v5671_v22 = vadd.f32 %v3952_v43, %v5616_v19  ;;  %v6192_v43 = vld [vmem:[#allocation44_spill] sm:$0xff] }
 0x340   : > { %6185 = vst [vmem:[#allocation48_spill] sm:$0xff] %v5644_v41  ;;  %v5646_v56 = vadd.f32 %v2620_v5, %v2449_v44  ;;  %v5653_v41 = vadd.f32 %v3947_v20, %v5600_v9  ;;  %v2528_v5 = vadd.f32 %v2527_v51, %v2356_v39  ;;  %v5674_v9 = vadd.f32 %v2559_v10, %v5618_v17 }
 0x341   : > { %v3968_v16 = vpop.f32.mrf.mxu1  ;;  %v5683_v39 = vadd.f32 %v3956_v48, %v6186_v36  ;;  %v5698_v51 = vadd.f32 %v2591_v30, %v6191_v1  ;;  %v5701_v10 = vadd.f32 %v3963_v11, %v6192_v43  ;;  %v6194_v48 = vld [vmem:[#allocation46_spill] sm:$0xff] }
 0x342   : > { %v5648_v49 = vadd.f32 %v3968_v16, %v3934_v50  ;;  %v5656_v16 = vadd.f32 %v2540_v38, %v5604_v2  ;;  %v5659_v50 = vadd.f32 %v3948_v46, %v5608_v35  ;;  %v5707_v53 = vadd.f32 %v3964_v31, %v6194_v48 }
 0x343   : > { %v2623_v26 = vpop.f32.mrf.mxu1 }
 0x344   : > { %v5650_v4 = vadd.f32 %v2623_v26, %v2452_v61 }
 0x345   : > { %v3973_v62 = vpop.f32.mrf.mxu1 }
 0x346   : > { %v2811_v42 = vadd.f32 %v3973_v62, %v2517_v21  ;;  %v5686_v21 = vadd.f32 %v2575_v14, %v6187_v0 }
 0x347   : > { %v2682_v44 = vpop.f32.mrf.mxu1 }
 0x348   : > { %v2875_v26 = vmul.f32 0.044715, %v2811_v42  ;;  %v2809_v61 = vadd.f32 %v2682_v44, %v2509_v32  ;;  %v5677_v32 = vadd.f32 %v3955_v18, %v5620_v24  ;;  %v6190_v24 = vld [vmem:[#allocation29_spill] sm:$0xff]  ;;  %v5709_v37 = vmul.f32 0.5, %v2811_v42 }
 0x349   : > { %v3974_v45 = vpop.f32.mrf.mxu1  ;;  %v5695_v29 = vadd.f32 %v3960_v47, %v6190_v24  ;;  %v6193_v18 = vld [vmem:[#allocation45_spill] sm:$0xff] }
 0x34a   : > { %v2907_v2 = vmul.f32 %v2875_v26, %v2811_v42  ;;  %v2873_v35 = vmul.f32 0.044715, %v2809_v61  ;;  %v2812_v62 = vadd.f32 %v3974_v45, %v2520_v6  ;;  %v6189_v6 = vld [vmem:[#allocation27_spill] sm:$0xff]  ;;  %v5704_v34 = vadd.f32 %v2604_v33, %v6193_v18 }
 0x34b   : > { %v2685_v19 = vpop.f32.mrf.mxu1  ;;  %v5692_v28 = vadd.f32 %v2588_v63, %v6189_v6  ;;  %v5711_v26 = vmul.f32 0.5, %v2809_v61 }
 0x34c   : > { %v2939_v17 = vmul.f32 %v2907_v2, %v2811_v42  ;;  %v2905_v60 = vmul.f32 %v2873_v35, %v2809_v61  ;;  %v2876_v52 = vmul.f32 0.044715, %v2812_v62  ;;  %v2810_v20 = vadd.f32 %v2685_v19, %v2512_v12 }
 0x34d   : > { %v3977_v38 = vpop.f32.mrf.mxu1  ;;  %v5713_v11 = vmul.f32 0.5, %v2812_v62 }
 0x34e   : > { %v2971_v46 = vadd.f32 %v2939_v17, %v2811_v42  ;;  %v2937_v57 = vmul.f32 %v2905_v60, %v2809_v61  ;;  %v2908_v27 = vmul.f32 %v2876_v52, %v2812_v62  ;;  %v2815_v3 = vadd.f32 %v3977_v38, %v2533_v59 }
 0x34f   : > { %v2874_v14 = vmul.f32 0.044715, %v2810_v20  ;;  %v2698_v13 = vpop.f32.mrf.mxu1  ;;  %v5715_v0 = vmul.f32 0.5, %v2810_v20 }
 0x350   : > { %v3003_v55 = vmul.f32 0.7978846, %v2971_v46  ;;  %v2969_v30 = vadd.f32 %v2937_v57, %v2809_v61  ;;  %v2940_v63 = vmul.f32 %v2908_v27, %v2812_v62  ;;  %v2879_v47 = vmul.f32 0.044715, %v2815_v3 }
 0x351   : > { %v2906_v12 = vmul.f32 %v2874_v14, %v2810_v20  ;;  %v2813_v44 = vadd.f32 %v2698_v13, %v2525_v54  ;;  %v3978_v59 = vpop.f32.mrf.mxu1  ;;  %v5717_v6 = vmul.f32 0.5, %v2815_v3 }
 0x352   : > { %4212 = vtanh.f32 %v3003_v55  ;;  %v2972_v33 = vadd.f32 %v2940_v63, %v2812_v62  ;;  %v2911_v45 = vmul.f32 %v2879_v47, %v2815_v3  ;;  %v2816_v35 = vadd.f32 %v3978_v59, %v2536_v8 }
 0x353   : > { %v2938_v31 = vmul.f32 %v2906_v12, %v2810_v20  ;;  %v2877_v2 = vmul.f32 0.044715, %v2813_v44  ;;  %v2701_v36 = vpop.f32.mrf.mxu1  ;;  %v3001_v19 = vmul.f32 0.7978846, %v2969_v30  ;;  %v5720_v27 = vmul.f32 0.5, %v2813_v44 }
 0x354   : > { %v3004_v58 = vmul.f32 0.7978846, %v2972_v33  ;;  %v2943_v42 = vmul.f32 %v2911_v45, %v2815_v3  ;;  %v2814_v17 = vadd.f32 %v2701_v36, %v2528_v5  ;;  %v2880_v52 = vmul.f32 0.044715, %v2816_v35 }
 0x355   : > { %v2970_v60 = vadd.f32 %v2938_v31, %v2810_v20  ;;  %v2909_v54 = vmul.f32 %v2877_v2, %v2813_v44  ;;  %v3981_v61 = vpop.f32.mrf.mxu1  ;;  %v5723_v55 = vmul.f32 0.5, %v2816_v35 }
 0x356   : > { %4214 = vtanh.f32 %v3004_v58  ;;  %v2975_v24 = vadd.f32 %v2943_v42, %v2815_v3  ;;  %v2878_v62 = vmul.f32 0.044715, %v2814_v17  ;;  %v2819_v1 = vadd.f32 %v3981_v61, %v5653_v41 }
 0x357   : > { %v3002_v38 = vmul.f32 0.7978846, %v2970_v60  ;;  %v2941_v8 = vmul.f32 %v2909_v54, %v2813_v44  ;;  %v2912_v46 = vmul.f32 %v2880_v52, %v2816_v35  ;;  %v2714_v57 = vpop.f32.mrf.mxu1  ;;  %4216 = vtanh.f32 %v3001_v19 }
 0x358   : > { %v2910_v43 = vmul.f32 %v2878_v62, %v2814_v17  ;;  %v2883_v5 = vmul.f32 0.044715, %v2819_v1  ;;  %v2817_v20 = vadd.f32 %v2714_v57, %v5656_v16  ;;  %v3007_v18 = vmul.f32 0.7978846, %v2975_v24 }
 0x359   : > { %v2973_v48 = vadd.f32 %v2941_v8, %v2813_v44  ;;  %v2944_v14 = vmul.f32 %v2912_v46, %v2816_v35  ;;  %v3982_v13 = vpop.f32.mrf.mxu1  ;;  %v5725_v63 = vmul.f32 0.5, %v2814_v17  ;;  %4218 = vtanh.f32 %v3002_v38 }
 0x35a   : > { %v2942_v3 = vmul.f32 %v2910_v43, %v2814_v17  ;;  %v2915_v30 = vmul.f32 %v2883_v5, %v2819_v1  ;;  %v2881_v41 = vmul.f32 0.044715, %v2817_v20  ;;  %v2820_v59 = vadd.f32 %v3982_v13, %v5659_v50 }
 0x35b   : > { %v3005_v47 = vmul.f32 0.7978846, %v2973_v48  ;;  %v2976_v12 = vadd.f32 %v2944_v14, %v2816_v35  ;;  %v2717_v33 = vpop.f32.mrf.mxu1  ;;  %4220 = vtanh.f32 %v3007_v18  ;;  %v5731_v58 = vmul.f32 0.5, %v2819_v1 }
 0x35c   : > { %v2974_v45 = vadd.f32 %v2942_v3, %v2814_v17  ;;  %v2947_v31 = vmul.f32 %v2915_v30, %v2819_v1  ;;  %v2913_v16 = vmul.f32 %v2881_v41, %v2817_v20  ;;  %v5729_v44 = vadd.f32 %v2717_v33, %v5662_v40 }
 0x35d   : > { %v3008_v2 = vmul.f32 0.7978846, %v2976_v12  ;;  %v2884_v36 = vmul.f32 0.044715, %v2820_v59  ;;  %v3985_v19 = vpop.f32.mrf.mxu1  ;;  %4222 = vtanh.f32 %v3005_v47  ;;  %v5737_v40 = vmul.f32 0.5, %v2817_v20 }
 0x35e   : > { %v3006_v42 = vmul.f32 0.7978846, %v2974_v45  ;;  %v2979_v60 = vadd.f32 %v2947_v31, %v2819_v1  ;;  %v2945_v54 = vmul.f32 %v2913_v16, %v2817_v20  ;;  %v2882_v35 = vmul.f32 0.044715, %v5729_v44 }
 0x35f   : > { %v4213_v52 = vpop.eup %4212  ;;  %v2916_v50 = vmul.f32 %v2884_v36, %v2820_v59  ;;  %v5735_v17 = vadd.f32 %v3985_v19, %v5665_v25  ;;  %v2730_v61 = vpop.f32.mrf.mxu1  ;;  %4224 = vtanh.f32 %v3008_v2  ;;  %v5747_v18 = vmul.f32 0.5, %v2820_v59 }
 0x360   : > { %v3067_v24 = vadd.f32 1.0, %v4213_v52  ;;  %v3011_v62 = vmul.f32 0.7978846, %v2979_v60  ;;  %v2977_v38 = vadd.f32 %v2945_v54, %v2817_v20  ;;  %v2914_v46 = vmul.f32 %v2882_v35, %v5729_v44 }
 0x361   : > { %v2948_v8 = vmul.f32 %v2916_v50, %v2820_v59  ;;  %v2887_v1 = vmul.f32 0.044715, %v5735_v17  ;;  %v5742_v57 = vadd.f32 %v2730_v61, %v5668_v15  ;;  %v3986_v43 = vpop.f32.mrf.mxu1  ;;  %4226 = vtanh.f32 %v3006_v42 }
 0x362   : > { %v3009_v5 = vmul.f32 0.7978846, %v2977_v38  ;;  %v5745_v25 = vadd.f32 %v3986_v43, %v5671_v22  ;;  %v2946_v20 = vmul.f32 %v2914_v46, %v5729_v44  ;;  %v5753_v15 = vmul.f32 %v3067_v24, %v5709_v37 }
 0x363   : > { %v4215_v48 = vpop.eup %4214  ;;  %v2980_v14 = vadd.f32 %v2948_v8, %v2820_v59  ;;  %v2919_v13 = vmul.f32 %v2887_v1, %v5735_v17  ;;  %v2885_v3 = vmul.f32 0.044715, %v5742_v57  ;;  %v2733_v30 = vpop.f32.mrf.mxu1  ;;  %4228 = vtanh.f32 %v3011_v62 }
 0x364   : > { %v3068_v41 = vadd.f32 1.0, %v4215_v48  ;;  %v2888_v47 = vmul.f32 0.044715, %v5745_v25  ;;  %v5757_v22 = vadd.f32 %v2733_v30, %v5674_v9  ;;  %v4217_v12 = vpop.eup %4216  ;;  %v2978_v59 = vadd.f32 %v2946_v20, %v5729_v44 }
 0x365   : > { %v2951_v33 = vmul.f32 %v2919_v13, %v5735_v17  ;;  %v2917_v45 = vmul.f32 %v2885_v3, %v5742_v57  ;;  %v3989_v31 = vpop.f32.mrf.mxu1  ;;  %4230 = vtanh.f32 %v3009_v5  ;;  %v3012_v9 = vmul.f32 0.7978846, %v2980_v14 }
 0x366   : > { %v5763_v16 = vmul.f32 %v3068_v41, %v5713_v11  ;;  %v2920_v37 = vmul.f32 %v2888_v47, %v5745_v25  ;;  %v2886_v2 = vmul.f32 0.044715, %v5757_v22  ;;  %v5768_v36 = vadd.f32 %v3989_v31, %v5677_v32  ;;  %v4219_v54 = vpop.eup %4218 }
 0x367   : > { %v2983_v19 = vadd.f32 %v2951_v33, %v5735_v17  ;;  %v2949_v42 = vmul.f32 %v2917_v45, %v5742_v57  ;;  %v2746_v60 = vpop.f32.mrf.mxu1  ;;  %v3010_v61 = vmul.f32 0.7978846, %v2978_v59  ;;  %4232 = vtanh.f32 %v3012_v9 }
 0x368   : > { %v3130_v35 = vpack.c.bf16 %v5763_v16, %v5753_v15  ;;  %v2952_v11 = vmul.f32 %v2920_v37, %v5745_v25  ;;  %v2918_v52 = vmul.f32 %v2886_v2, %v5757_v22  ;;  %v2891_v50 = vmul.f32 0.044715, %v5768_v36  ;;  %v5781_v8 = vpop.eup %4220 }
 0x369   : > { %v3015_v32 = vmul.f32 0.7978846, %v2983_v19  ;;  %v2981_v24 = vadd.f32 %v2949_v42, %v5742_v57  ;;  %v5779_v62 = vadd.f32 %v2746_v60, %v5680_v7  ;;  %v3990_v38 = vpop.f32.mrf.mxu1  ;;  %v3065_v20 = vadd.f32 1.0, %v4217_v12 }
 0x36a   : > { %v2984_v46 = vadd.f32 %v2952_v11, %v5745_v25  ;;  %v2950_v1 = vmul.f32 %v2918_v52, %v5757_v22  ;;  %v2923_v43 = vmul.f32 %v2891_v50, %v5768_v36  ;;  %v5787_v5 = vadd.f32 %v3990_v38, %v5683_v39  ;;  %v4223_v13 = vpop.eup %4222 }
 0x36b   : > { %v2889_v48 = vmul.f32 0.044715, %v5779_v62  ;;  %v2749_v14 = vpop.f32.mrf.mxu1  ;;  %v5791_v7 = vmul.f32 0.5, %v5729_v44  ;;  %v3013_v3 = vmul.f32 0.7978846, %v2981_v24  ;;  %4234 = vtanh.f32 %v3010_v61 }
 0x36c   : > { %v2982_v30 = vadd.f32 %v2950_v1, %v5757_v22  ;;  %v2955_v41 = vmul.f32 %v2923_v43, %v5768_v36  ;;  %v2892_v47 = vmul.f32 0.044715, %v5787_v5  ;;  %v5796_v59 = vpop.eup %4224  ;;  %v5800_v33 = vadd.f32 %v2749_v14, %v5686_v21 }
 0x36d   : > { %v2921_v39 = vmul.f32 %v2889_v48, %v5779_v62  ;;  %v3066_v12 = vadd.f32 1.0, %v4219_v54  ;;  %v3993_v45 = vpop.f32.mrf.mxu1  ;;  %4236 = vtanh.f32 %v3015_v32  ;;  %v3016_v44 = vmul.f32 0.7978846, %v2984_v46 }
 0x36e   : > { %v3014_v31 = vmul.f32 0.7978846, %v2982_v30  ;;  %v2924_v37 = vmul.f32 %v2892_v47, %v5787_v5  ;;  %v4227_v2 = vpop.eup %4226  ;;  %v2890_v19 = vmul.f32 0.044715, %v5800_v33  ;;  %v3097_v42 = vmul.f32 %v3065_v20, %v5711_v26 }
 0x36f   : > { %v2953_v9 = vmul.f32 %v2921_v39, %v5779_v62  ;;  %v3098_v60 = vmul.f32 %v3066_v12, %v5715_v0  ;;  %v2762_v11 = vpop.f32.mrf.mxu1  ;;  %4238 = vtanh.f32 %v3013_v3  ;;  %v2987_v21 = vadd.f32 %v2955_v41, %v5768_v36 }
 0x370   : > { %v2956_v54 = vmul.f32 %v2924_v37, %v5787_v5  ;;  %v5810_v52 = vadd.f32 %v3993_v45, %v5689_v23  ;;  %v2922_v61 = vmul.f32 %v2890_v19, %v5800_v33  ;;  %v5815_v24 = vadd.f32 %v2762_v11, %v5692_v28  ;;  %v5817_v38 = vpop.eup %4228 }
 0x371   : > { %v2985_v50 = vadd.f32 %v2953_v9, %v5779_v62  ;;  %v3129_v32 = vpack.c.bf16 %v3098_v60, %v3097_v42  ;;  %v3994_v26 = vpop.f32.mrf.mxu1  ;;  %4240 = vtanh.f32 %v3016_v44  ;;  %v3069_v48 = vadd.f32 1.0, %v4223_v13 }
 0x372   : > { %v2988_v0 = vadd.f32 %v2956_v54, %v5787_v5  ;;  %v2895_v46 = vmul.f32 0.044715, %v5810_v52  ;;  %v5822_v1 = vadd.f32 %v3994_v26, %v5695_v29  ;;  %4242 = vtanh.f32 %v3014_v31  ;;  %v5827_v14 = vpop.eup %4230 }
 0x373   : > { %v2954_v23 = vmul.f32 %v2922_v61, %v5800_v33  ;;  %4005 = vmatprep.mubr.msk.bf16.mxu1 %vm2219_vm6, %v3129_v32  ;;  %v2893_v43 = vmul.f32 0.044715, %v5815_v24  ;;  %v2765_v28 = vpop.f32.mrf.mxu1  ;;  %v3019_v20 = vmul.f32 0.7978846, %v2987_v21  ;;  %v3017_v41 = vmul.f32 0.7978846, %v2985_v50 }
 0x374   : > { %v2927_v3 = vmul.f32 %v2895_v46, %v5810_v52  ;;  %4006 = vmatmul.mubr.msk.bf16.vlgmr.msra.gmra.mxu1 %vm2219_vm6, %v3130_v35  ;;  %v2896_v29 = vmul.f32 0.044715, %v5822_v1  ;;  %v5836_v30 = vadd.f32 %v2765_v28, %v5698_v51  ;;  %v3070_v39 = vadd.f32 1.0, %v4227_v2  ;;  %v5846_v19 = vpop.eup %4232 }
 0x375   : > { %v2986_v47 = vadd.f32 %v2954_v23, %v5800_v33  ;;  %v2925_v13 = vmul.f32 %v2893_v43, %v5815_v24  ;;  %v3997_v12 = vpop.f32.mrf.mxu1  ;;  %v3020_v45 = vmul.f32 0.7978846, %v2988_v0  ;;  %v3101_v51 = vmul.f32 %v3069_v48, %v5720_v27 }
 0x376   : > { %v2959_v44 = vmul.f32 %v2927_v3, %v5810_v52  ;;  %v2928_v31 = vmul.f32 %v2896_v29, %v5822_v1  ;;  %v2894_v15 = vmul.f32 0.044715, %v5836_v30  ;;  %v3102_v37 = vmul.f32 %v3070_v39, %v5725_v63 }
 0x377   : > { %v3018_v16 = vmul.f32 0.7978846, %v2986_v47  ;;  %v2957_v35 = vmul.f32 %v2925_v13, %v5815_v24  ;;  %v2778_v9 = vpop.f32.mrf.mxu1  ;;  %v5852_v11 = vadd.f32 %v3997_v12, %v5701_v10  ;;  %4244 = vtanh.f32 %v3019_v20  ;;  %v6195_v12 = vld [vmem:[#allocation47_spill] sm:$0xff] }
 0x378   : > { %v2991_v2 = vadd.f32 %v2959_v44, %v5810_v52  ;;  %v2960_v42 = vmul.f32 %v2928_v31, %v5822_v1  ;;  %v2926_v60 = vmul.f32 %v2894_v15, %v5836_v30  ;;  %v3131_v54 = vpack.c.bf16 %v3102_v37, %v3101_v51  ;;  %v4235_v63 = vpop.eup %4234 }
 0x379   : > { %v2989_v21 = vadd.f32 %v2957_v35, %v5815_v24  ;;  %v3071_v27 = vadd.f32 1.0, %v5781_v8  ;;  %v3998_v50 = vpop.f32.mrf.mxu1  ;;  %4246 = vtanh.f32 %v3017_v41  ;;  %v2899_v10 = vmul.f32 0.044715, %v5852_v11 }
 0x37a   : > { %v3023_v61 = vmul.f32 0.7978846, %v2991_v2  ;;  %v2992_v32 = vadd.f32 %v2960_v42, %v5822_v1  ;;  %v2958_v26 = vmul.f32 %v2926_v60, %v5836_v30  ;;  %v5858_v0 = vpop.eup %4236  ;;  %4248 = vtanh.f32 %v3020_v45  ;;  %4009 = vmatprep.mubr.msk.bf16.mxu1 %vm2219_vm6, %v3131_v54  ;;  %v6196_v2 = vld [vmem:[#allocation48_spill] sm:$0xff] }
 0x37b   : > { %v3021_v46 = vmul.f32 0.7978846, %v2989_v21  ;;  %v3072_v23 = vadd.f32 1.0, %v5796_v59  ;;  %v2781_v43 = vpop.f32.mrf.mxu1  ;;  %4250 = vtanh.f32 %v3018_v16  ;;  %v5865_v48 = vadd.f32 %v2778_v9, %v5704_v34 }
 0x37c   : > { %v3024_v8 = vmul.f32 0.7978846, %v2992_v32  ;;  %v2990_v28 = vadd.f32 %v2958_v26, %v5836_v30  ;;  %v5867_v20 = vpop.eup %4238  ;;  %v2931_v3 = vmul.f32 %v2899_v10, %v5852_v11  ;;  %v3103_v29 = vmul.f32 %v3071_v27, %v5717_v6 }
 0x37d   : > { %v3104_v41 = vmul.f32 %v3072_v23, %v5723_v55  ;;  %v5873_v47 = vadd.f32 %v3998_v50, %v5707_v53  ;;  %v4001_v59 = vpop.f32.mrf.mxu1  ;;  %4252 = vtanh.f32 %v3023_v61  ;;  %v2897_v39 = vmul.f32 0.044715, %v5865_v48 }
 0x37e   : > { %v3022_v13 = vmul.f32 0.7978846, %v2990_v28  ;;  %v5877_v45 = vadd.f32 %v2781_v43, %v6195_v12  ;;  %v5879_v34 = vpop.eup %4240  ;;  %4254 = vtanh.f32 %v3021_v46  ;;  %v2963_v44 = vmul.f32 %v2931_v3, %v5852_v11 }
 0x37f   : > { %v3132_v31 = vpack.c.bf16 %v3104_v41, %v3103_v29  ;;  %v2900_v6 = vmul.f32 0.044715, %v5873_v47  ;;  %v2794_v55 = vpop.f32.mrf.mxu1  ;;  %v4243_v15 = vpop.eup %4242  ;;  %4256 = vtanh.f32 %v3024_v8  ;;  %v2929_v53 = vmul.f32 %v2897_v39, %v5865_v48 }
 0x380   : > { %v2898_v16 = vmul.f32 0.044715, %v5877_v45  ;;  %v3073_v35 = vadd.f32 1.0, %v5827_v14  ;;  %v2995_v51 = vadd.f32 %v2963_v44, %v5852_v11  ;;  %v3074_v9 = vadd.f32 1.0, %v4235_v63 }
 0x381   : > { %4010 = vmatmul.mubr.msk.bf16.gmra.mxu1 %vm2219_vm6, %v3132_v31  ;;  %v2932_v37 = vmul.f32 %v2900_v6, %v5873_v47  ;;  %v5890_v42 = vadd.f32 %v4001_v59, %v6196_v2  ;;  %v4002_v60 = vpop.f32.mrf.mxu1  ;;  %4258 = vtanh.f32 %v3022_v13  ;;  %v2961_v21 = vmul.f32 %v2929_v53, %v5865_v48 }
 0x382   : > { %v2930_v54 = vmul.f32 %v2898_v16, %v5877_v45  ;;  %v3075_v27 = vadd.f32 1.0, %v5817_v38  ;;  %v3027_v50 = vmul.f32 0.7978846, %v2995_v51  ;;  %v3105_v61 = vmul.f32 %v3073_v35, %v5737_v40 }
 0x383   : > { %v2964_v14 = vmul.f32 %v2932_v37, %v5873_v47  ;;  %v3106_v32 = vmul.f32 %v3074_v9, %v5791_v7  ;;  %v2993_v63 = vadd.f32 %v2961_v21, %v5865_v48  ;;  %v2903_v46 = vmul.f32 0.044715, %v5890_v42  ;;  %v2797_v23 = vpop.f32.mrf.mxu1 }
 0x384   : > { %v2962_v26 = vmul.f32 %v2930_v54, %v5877_v45  ;;  %v3076_v10 = vadd.f32 1.0, %v5846_v19  ;;  %4260 = vtanh.f32 %v3027_v50  ;;  %v3107_v8 = vmul.f32 %v3075_v27, %v5731_v58  ;;  %v5904_v28 = vpop.eup %4244 }
 0x385   : > { %v2996_v43 = vadd.f32 %v2964_v14, %v5873_v47  ;;  %v3133_v38 = vpack.c.bf16 %v3106_v32, %v3105_v61  ;;  %v3025_v40 = vmul.f32 0.7978846, %v2993_v63  ;;  %v2935_v3 = vmul.f32 %v2903_v46, %v5890_v42 }
 0x386   : > { %v2994_v7 = vadd.f32 %v2962_v26, %v5877_v45  ;;  %v3108_v29 = vmul.f32 %v3076_v10, %v5747_v18  ;;  %v4247_v41 = vpop.eup %4246  ;;  %v5911_v19 = vadd.f32 %v2794_v55, %v5646_v56  ;;  %v5914_v13 = vadd.f32 %v4002_v60, %v5648_v49 }
 0x387   : > { %v3028_v59 = vmul.f32 0.7978846, %v2996_v43  ;;  %4013 = vmatprep.mubr.msk.bf16.mxu1 %vm2219_vm6, %v3133_v38  ;;  %v5917_v58 = vadd.f32 %v2797_v23, %v5650_v4  ;;  %v4249_v39 = vpop.eup %4248  ;;  %4262 = vtanh.f32 %v3025_v40  ;;  %v2967_v44 = vmul.f32 %v2935_v3, %v5890_v42 }
 0x388   : > { %v3026_v12 = vmul.f32 0.7978846, %v2994_v7  ;;  %v3134_v31 = vpack.c.bf16 %v3108_v29, %v3107_v8  ;;  %v4251_v18 = vpop.eup %4250  ;;  %v5921_v6 = vmul.f32 0.5, %v5852_v11  ;;  %v2901_v56 = vmul.f32 0.044715, %v5911_v19 }
 0x389   : > { %4264 = vtanh.f32 %v3028_v59  ;;  %v2904_v55 = vmul.f32 0.044715, %v5914_v13  ;;  %v2999_v49 = vadd.f32 %v2967_v44, %v5890_v42  ;;  %v2902_v4 = vmul.f32 0.044715, %v5917_v58 }
 0x38a   : > { %4266 = vtanh.f32 %v3026_v12  ;;  %4014 = vmatmul.mubr.msk.bf16.gmra.mxu1 %vm2219_vm6, %v3134_v31  ;;  %v2853_v53 = vmul.f32 0.5, %v5742_v57  ;;  %v4253_v16 = vpop.eup %4252  ;;  %v2933_v35 = vmul.f32 %v2901_v56, %v5911_v19  ;;  %v2854_v51 = vmul.f32 0.5, %v5757_v22 }
 0x38b   : > { %v2936_v11 = vmul.f32 %v2904_v55, %v5914_v13  ;;  %v3077_v37 = vadd.f32 1.0, %v5867_v20  ;;  %v4255_v9 = vpop.eup %4254  ;;  %v3031_v2 = vmul.f32 0.7978846, %v2999_v49  ;;  %v2934_v60 = vmul.f32 %v2902_v4, %v5917_v58 }
 0x38c   : > { %v3078_v21 = vadd.f32 1.0, %v4243_v15  ;;  %v2855_v54 = vmul.f32 0.5, %v5735_v17  ;;  %v4257_v27 = vpop.eup %4256  ;;  %v2965_v50 = vmul.f32 %v2933_v35, %v5911_v19  ;;  %v2856_v61 = vmul.f32 0.5, %v5745_v25 }
 0x38d   : > { %v2968_v57 = vmul.f32 %v2936_v11, %v5914_v13  ;;  %v3109_v14 = vmul.f32 %v3077_v37, %v2853_v53  ;;  %4268 = vtanh.f32 %v3031_v2  ;;  %v2966_v22 = vmul.f32 %v2934_v60, %v5917_v58 }
 0x38e   : > { %v3110_v32 = vmul.f32 %v3078_v21, %v2854_v51  ;;  %v3079_v20 = vadd.f32 1.0, %v5858_v0  ;;  %v4259_v63 = vpop.eup %4258  ;;  %v2997_v26 = vadd.f32 %v2965_v50, %v5911_v19  ;;  %v3080_v17 = vadd.f32 1.0, %v5879_v34 }
 0x38f   : > { %v3000_v15 = vadd.f32 %v2968_v57, %v5914_v13  ;;  %v2857_v46 = vmul.f32 0.5, %v5779_v62  ;;  %v2998_v10 = vadd.f32 %v2966_v22, %v5917_v58  ;;  %v2858_v25 = vmul.f32 0.5, %v5800_v33 }
 0x390   : > { %v3135_v23 = vpack.c.bf16 %v3110_v32, %v3109_v14  ;;  %v3111_v43 = vmul.f32 %v3079_v20, %v2855_v54  ;;  %v3029_v38 = vmul.f32 0.7978846, %v2997_v26  ;;  %v3112_v40 = vmul.f32 %v3080_v17, %v2856_v61 }
 0x391   : > { %v3032_v8 = vmul.f32 0.7978846, %v3000_v15  ;;  %v3081_v7 = vadd.f32 1.0, %v4247_v41  ;;  %v4261_v0 = vpop.eup %4260  ;;  %v3030_v3 = vmul.f32 0.7978846, %v2998_v10  ;;  %v3082_v29 = vadd.f32 1.0, %v4251_v18 }
 0x392   : > { %4017 = vmatprep.mubr.msk.bf16.mxu1 %vm2219_vm6, %v3135_v23  ;;  %v2859_v59 = vmul.f32 0.5, %v5768_v36  ;;  %v2860_v34 = vmul.f32 0.5, %v5787_v5  ;;  %4270 = vtanh.f32 %v3029_v38  ;;  %v3136_v62 = vpack.c.bf16 %v3112_v40, %v3111_v43 }
 0x393   : > { %v3113_v12 = vmul.f32 %v3081_v7, %v2857_v46  ;;  %v3083_v44 = vadd.f32 1.0, %v5904_v28  ;;  %4272 = vtanh.f32 %v3032_v8  ;;  %v3114_v33 = vmul.f32 %v3082_v29, %v2858_v25  ;;  %v6198_v29 = vld [vmem:[#allocation3_spill] sm:$0xff] }
 0x394   : > { %v3084_v31 = vadd.f32 1.0, %v4249_v39  ;;  %v2861_v56 = vmul.f32 0.5, %v5815_v24  ;;  %v4263_v41 = vpop.eup %4262  ;;  %4274 = vtanh.f32 %v3030_v3  ;;  %4018 = vmatmul.mubr.msk.bf16.gmra.mxu1 %vm2219_vm6, %v3136_v62  ;;  %v2862_v18 = vmul.f32 0.5, %v5836_v30  ;;  %v6199_v62 = vld [vmem:[#allocation6_spill] sm:$0xff] }
 0x395   : > { %v3115_v55 = vmul.f32 %v3083_v44, %v2859_v59  ;;  %v3085_v36 = vadd.f32 1.0, %v4255_v9  ;;  %v3137_v5 = vpack.c.bf16 %v3114_v33, %v3113_v12  ;;  %v3086_v53 = vadd.f32 1.0, %v4259_v63  ;;  %v6200_v33 = vld [vmem:[#allocation5_spill] sm:$0xff] }
 0x396   : > { %v4265_v49 = vpop.eup %4264  ;;  %v3116_v4 = vmul.f32 %v3084_v31, %v2860_v34  ;;  %v2863_v35 = vmul.f32 0.5, %v5810_v52  ;;  %v2864_v39 = vmul.f32 0.5, %v5822_v1  ;;  %v3087_v51 = vadd.f32 1.0, %v4253_v16 }
 0x397   : > { %v4267_v28 = vpop.eup %4266  ;;  %v3117_v11 = vmul.f32 %v3085_v36, %v2861_v56  ;;  %v3088_v24 = vadd.f32 1.0, %v4257_v27  ;;  %4021 = vmatprep.mubr.msk.bf16.mxu1 %vm2219_vm6, %v3137_v5  ;;  %v3118_v2 = vmul.f32 %v3086_v53, %v2862_v18  ;;  %v2865_v60 = vmul.f32 0.5, %v5865_v48  ;;  %v6202_v36 = vld [vmem:[#allocation12_spill] sm:$0xff] }
 0x398   : > { %v3138_v37 = vpack.c.bf16 %v3116_v4, %v3115_v55  ;;  %v2866_v30 = vmul.f32 0.5, %v5877_v45  ;;  %v3119_v9 = vmul.f32 %v3087_v51, %v2863_v35  ;;  %v3089_v54 = vadd.f32 1.0, %v4263_v41  ;;  %v6201_v41 = vld [vmem:[#allocation8_spill] sm:$0xff]  ;;  %v6203_v4 = vld [vmem:[#allocation15_spill] sm:$0xff]  ;;  %v6205_v51 = vld [vmem:[#allocation22_spill] sm:$0xff] }
 0x399   : > { %v3120_v21 = vmul.f32 %v3088_v24, %v2864_v39  ;;  %v3090_v50 = vadd.f32 1.0, %v4267_v28  ;;  %v2868_v52 = vmul.f32 0.5, %v5873_v47  ;;  %v3139_v57 = vpack.c.bf16 %v3118_v2, %v3117_v11  ;;  %v6204_v28 = vld [vmem:[#allocation19_spill] sm:$0xff]  ;;  %v6206_v2 = vld [vmem:[#allocation9_spill] sm:$0xff] }
 0x39a   : > { %v3091_v14 = vadd.f32 1.0, %v4261_v0  ;;  %v3092_v61 = vadd.f32 1.0, %v4265_v49  ;;  %v4269_v1 = vpop.eup %4268  ;;  %v3121_v27 = vmul.f32 %v3089_v54, %v2865_v60  ;;  %v2871_v46 = vmul.f32 0.5, %v5890_v42  ;;  %v6208_v54 = vld [vmem:[#allocation26_spill] sm:$0xff] }
 0x39b   : > { %v3140_v16 = vpack.c.bf16 %v3120_v21, %v3119_v9  ;;  %v3122_v22 = vmul.f32 %v3090_v50, %v2866_v30  ;;  %v3095_v26 = vadd.f32 1.0, %v4269_v1  ;;  %v2872_v10 = vmul.f32 0.5, %v5914_v13  ;;  %v6207_v30 = vld [vmem:[#allocation24_spill] sm:$0xff] }
 0x39c   : > { %v3123_v32 = vmul.f32 %v3091_v14, %v5921_v6  ;;  %v3124_v20 = vmul.f32 %v3092_v61, %v2868_v52  ;;  %4022 = vmatmul.mubr.msk.bf16.gmra.mxu1 %vm2219_vm6, %v3138_v37  ;;  %v2869_v6 = vmul.f32 0.5, %v5911_v19  ;;  %v2870_v43 = vmul.f32 0.5, %v5917_v58  ;;  %v6197_v19 = vld [vmem:[#allocation4_spill] sm:$0xff]  ;;  %v6209_v52 = vld [vmem:[#allocation7_spill] sm:$0xff] }
 0x39d   : > { %v3141_v48 = vpack.c.bf16 %v3122_v22, %v3121_v27  ;;  %4025 = vmatprep.mubr.msk.bf16.mxu1 %vm2219_vm6, %v3139_v57  ;;  %v3127_v38 = vmul.f32 %v3095_v26, %v2871_v46  ;;  %v1678_v60 = vrot.slane %v6206_v2, 1  ;;  %v6210_v57 = vrot.slane %v6209_v52, 1  ;;  %v6229_v52 = vld [vmem:[#allocation38_spill] sm:$0xff] }
 0x39e   : > { %v3142_v45 = vpack.c.bf16 %v3124_v20, %v3123_v32  ;;  %v6212_v32 = vld [vmem:[#allocation10_spill] sm:$0xff] }
 0x39f   : > { %v4271_v63 = vpop.eup %4270  ;;  %v1679_v14 = vsel %vm1654_vm3, %v6210_v57, %v1678_v60  ;;  %v1685_v20 = vrot.slane %v6212_v32, 1  ;;  %v6227_v60 = vld [vmem:[#allocation36_spill] sm:$0xff] }
 0x3a0   : > { %v4273_v15 = vpop.eup %4272  ;;  %v3093_v47 = vadd.f32 1.0, %v4271_v63  ;;  %v6214_v63 = vld [vmem:[#allocation28_spill] sm:$0xff] }
 0x3a1   : > { %v4275_v17 = vpop.eup %4274  ;;  %v3096_v23 = vadd.f32 1.0, %v4273_v15 }
 0x3a2   : > { %v3094_v25 = vadd.f32 1.0, %v4275_v17  ;;  %v3125_v40 = vmul.f32 %v3093_v47, %v2869_v6  ;;  %v6215_v17 = vld [vmem:[#allocation13_spill] sm:$0xff] }
 0x3a3   : > { %v3128_v8 = vmul.f32 %v3096_v23, %v2872_v10  ;;  %v1688_v46 = vrot.slane %v6215_v17, 1  ;;  %v6216_v23 = vld [vmem:[#allocation14_spill] sm:$0xff] }
 0x3a4   : > { %4026 = vmatmul.mubr.msk.bf16.gmra.mxu1 %vm2219_vm6, %v3140_v16  ;;  %v3126_v7 = vmul.f32 %v3094_v25, %v2870_v43  ;;  %v6211_v16 = vld [vmem:[#allocation11_spill] sm:$0xff]  ;;  %v6217_v6 = vrot.slane %v6216_v23, 1 }
 0x3a5   : > { %4029 = vmatprep.mubr.msk.bf16.mxu1 %vm2219_vm6, %v3141_v48  ;;  %v3144_v0 = vpack.c.bf16 %v3128_v8, %v3127_v38  ;;  %v1686_v27 = vrot.slane %v6211_v16, 1  ;;  %v6213_v48 = vld [vmem:[#allocation16_spill] sm:$0xff] }
 0x3a6   : > { %v3143_v3 = vpack.c.bf16 %v3126_v7, %v3125_v40  ;;  %v6218_v7 = vld [vmem:[#allocation18_spill] sm:$0xff] }
 0x3a7   : > { %v1687_v15 = vsel %vm1654_vm3, %v1685_v20, %v1686_v27  ;;  %v1689_v8 = vsel %vm1654_vm3, %v1686_v27, %v1688_v46  ;;  %v6231_v27 = vld [vmem:[#allocation40_spill] sm:$0xff]  ;;  %v6232_v20 = vld [vmem:[#allocation41_spill] sm:$0xff] }
 0x3ac   : > { %4030 = vmatmul.mubr.msk.bf16.gmra.mxu1 %vm2219_vm6, %v3142_v45  ;;  %v1693_v45 = vrot.slane %v6213_v48, 1 }
 0x3ad   : > { %4033 = vmatprep.mubr.msk.bf16.mxu1 %vm2219_vm6, %v3143_v3 }
 0x3ae   : > { %v1694_v43 = vsel %vm1654_vm3, %v6217_v6, %v1693_v45 }
 0x3b4   : > { %4034 = vmatmul.mubr.msk.bf16.gmra.mxu1 %vm2219_vm6, %v3144_v0  ;;  %v1696_v0 = vrot.slane %v6218_v7, 1 }
 0x434   : > { %v4007_v42 = vpop.f32.mrf.mxu1 }
 0x435   : > { %v3241_v13 = vadd.f32 %v4007_v42, %v6197_v19  ;;  %v6219_v19 = vld [vmem:[#allocation17_spill] sm:$0xff] }
 0x436   : > { %v3232_v58 = vpop.f32.mrf.mxu1 }
 0x437   : > { %3361 = vst.msk [vmem:[%s5975_s17 + $0x10] sm:$0xff] %vm677_vm2, %v3241_v13  ;;  %v3233_v59 = vadd.f32 %v3232_v58, %v6198_v29  ;;  %v1695_v13 = vrot.slane %v6219_v19, 1  ;;  %v6220_v58 = vld [vmem:[#allocation30_spill] sm:$0xff] }
 0x438   : > { %v4008_v34 = vpop.f32.mrf.mxu1 }
 0x439   : > { %3359 = vst.msk [vmem:[%s5975_s17] sm:$0xff] %vm677_vm2, %v3233_v59  ;;  %v3244_v12 = vadd.f32 %v4008_v34, %v6199_v62  ;;  %v1697_v59 = vsel %vm1654_vm3, %v1695_v13, %v1696_v0  ;;  %v6221_v62 = vld [vmem:[#allocation21_spill] sm:$0xff] }
 0x43a   : > { %v3235_v44 = vpop.f32.mrf.mxu1 }
 0x43b   : > { %3362 = vst.msk [vmem:[%s5975_s17 + $0x18] sm:$0xff] %vm677_vm2, %v3244_v12  ;;  %v3236_v31 = vadd.f32 %v3235_v44, %v6200_v33  ;;  %v1698_v12 = vrot.slane %v6221_v62, 1 }
 0x43d   : > { %3360 = vst.msk [vmem:[%s5975_s17 + $0x8] sm:$0xff] %vm677_vm2, %v3236_v31  ;;  %v6222_v31 = vld [vmem:[#allocation31_spill] sm:$0xff] }
 0x441   : > { %v4011_v56 = vpop.f32.mrf.mxu1 }
 0x442   : > { %v3257_v55 = vadd.f32 %v4011_v56, %v6201_v41  ;;  %v1699_v41 = vsel %vm1654_vm3, %v1696_v0, %v1698_v12 }
 0x443   : > { %v3248_v18 = vpop.f32.mrf.mxu1 }
 0x444   : > { %3365 = vst.msk [vmem:[%s5975_s17 + $0x30] sm:$0xff] %vm677_vm2, %v3257_v55  ;;  %v3249_v49 = vadd.f32 %v3248_v18, %v6202_v36 }
 0x445   : > { %v4012_v5 = vpop.f32.mrf.mxu1 }
 0x446   : > { %3363 = vst.msk [vmem:[%s5975_s17 + $0x20] sm:$0xff] %vm677_vm2, %v3249_v49  ;;  %v3260_v53 = vadd.f32 %v4012_v5, %v6203_v4  ;;  %v6223_v49 = vld [vmem:[#allocation32_spill] sm:$0xff] }
 0x447   : > { %v3251_v35 = vpop.f32.mrf.mxu1 }
 0x448   : > { %3366 = vst.msk [vmem:[%s5975_s17 + $0x38] sm:$0xff] %vm677_vm2, %v3260_v53  ;;  %v3252_v11 = vadd.f32 %v3251_v35, %v6204_v28  ;;  %v6224_v53 = vld [vmem:[#allocation33_spill] sm:$0xff] }
 0x44a   : > { %3364 = vst.msk [vmem:[%s5975_s17 + $0x28] sm:$0xff] %vm677_vm2, %v3252_v11  ;;  %v4015_v39 = vpop.f32.mrf.mxu1  ;;  %v6225_v11 = vld [vmem:[#allocation34_spill] sm:$0xff] }
 0x44b   : > { %v3273_v24 = vadd.f32 %v4015_v39, %v6205_v51 }
 0x44c   : > { %v3264_v37 = vpop.f32.mrf.mxu1 }
 0x44d   : > { %3369 = vst.msk [vmem:[%s5975_s17 + $0x50] sm:$0xff] %vm677_vm2, %v3273_v24  ;;  %v3265_v9 = vadd.f32 %v3264_v37, %v6207_v30  ;;  %v6226_v24 = vld [vmem:[#allocation35_spill] sm:$0xff] }
 0x44e   : > { %v4016_v21 = vpop.f32.mrf.mxu1 }
 0x44f   : > { %3367 = vst.msk [vmem:[%s5975_s17 + $0x40] sm:$0xff] %vm677_vm2, %v3265_v9  ;;  %v3276_v50 = vadd.f32 %v4016_v21, %v6208_v54  ;;  %v6228_v21 = vld [vmem:[#allocation37_spill] sm:$0xff] }
 0x450   : > { %v3267_v61 = vpop.f32.mrf.mxu1 }
 0x451   : > { %3370 = vst.msk [vmem:[%s5975_s17 + $0x58] sm:$0xff] %vm677_vm2, %v3276_v50  ;;  %v3268_v1 = vadd.f32 %v3267_v61, %v1679_v14  ;;  %v6230_v61 = vld [vmem:[#allocation39_spill] sm:$0xff] }
 0x453   : > { %3368 = vst.msk [vmem:[%s5975_s17 + $0x48] sm:$0xff] %vm677_vm2, %v3268_v1 }
 0x454   : > { %v4019_v22 = vpop.f32.mrf.mxu1 }
 0x455   : > { %v3289_v26 = vadd.f32 %v4019_v22, %v6214_v63  ;;  %v6233_v63 = vld [vmem:[#allocation42_spill] sm:$0xff] }
 0x456   : > { %v3280_v47 = vpop.f32.mrf.mxu1 }
 0x457   : > { %3373 = vst.msk [vmem:[%s5975_s17 + $0x70] sm:$0xff] %vm677_vm2, %v3289_v26  ;;  %v3281_v10 = vadd.f32 %v3280_v47, %v1687_v15  ;;  %v6234_v47 = vld [vmem:[#allocation43_spill] sm:$0xff] }
 0x458   : > { %v4020_v25 = vpop.f32.mrf.mxu1 }
 0x459   : > { %3371 = vst.msk [vmem:[%s5975_s17 + $0x60] sm:$0xff] %vm677_vm2, %v3281_v10  ;;  %v3292_v38 = vadd.f32 %v4020_v25, %v1694_v43 }
 0x45a   : > { %v3283_v40 = vpop.f32.mrf.mxu1 }
 0x45b   : > { %3374 = vst.msk [vmem:[%s5975_s17 + $0x78] sm:$0xff] %vm677_vm2, %v3292_v38  ;;  %v3284_v3 = vadd.f32 %v3283_v40, %v1689_v8 }
 0x45c   : > { %v4023_v42 = vpop.f32.mrf.mxu1 }
 0x45d   : > { %3372 = vst.msk [vmem:[%s5975_s17 + $0x68] sm:$0xff] %vm677_vm2, %v3284_v3  ;;  %v3305_v29 = vadd.f32 %v4023_v42, %v6220_v58 }
 0x45e   : > { %v3296_v34 = vpop.f32.mrf.mxu1 }
 0x45f   : > { %3377 = vst.msk [vmem:[%s5975_s17 + $0x90] sm:$0xff] %vm677_vm2, %v3305_v29  ;;  %v3297_v44 = vadd.f32 %v3296_v34, %v1697_v59 }
 0x460   : > { %v4024_v33 = vpop.f32.mrf.mxu1 }
 0x461   : > { %3375 = vst.msk [vmem:[%s5975_s17 + $0x80] sm:$0xff] %vm677_vm2, %v3297_v44  ;;  %v3308_v56 = vadd.f32 %v4024_v33, %v6222_v31 }
 0x462   : > { %v3299_v55 = vpop.f32.mrf.mxu1 }
 0x463   : > { %3378 = vst.msk [vmem:[%s5975_s17 + $0x98] sm:$0xff] %vm677_vm2, %v3308_v56  ;;  %v3300_v18 = vadd.f32 %v3299_v55, %v1699_v41 }
 0x464   : > { %v4027_v36 = vpop.f32.mrf.mxu1 }
 0x465   : > { %3376 = vst.msk [vmem:[%s5975_s17 + $0x88] sm:$0xff] %vm677_vm2, %v3300_v18  ;;  %v3321_v5 = vadd.f32 %v4027_v36, %v6223_v49 }
 0x466   : > { %v3312_v4 = vpop.f32.mrf.mxu1 }
 0x467   : > { %3381 = vst.msk [vmem:[%s5975_s17 + $0xb0] sm:$0xff] %vm677_vm2, %v3321_v5  ;;  %v3313_v35 = vadd.f32 %v3312_v4, %v6224_v53 }
 0x468   : > { %v4028_v28 = vpop.f32.mrf.mxu1 }
 0x469   : > { %3379 = vst.msk [vmem:[%s5975_s17 + $0xa0] sm:$0xff] %vm677_vm2, %v3313_v35  ;;  %v3324_v39 = vadd.f32 %v4028_v28, %v6225_v11 }
 0x46a   : > { %v3315_v51 = vpop.f32.mrf.mxu1 }
 0x46b   : > { %3382 = vst.msk [vmem:[%s5975_s17 + $0xb8] sm:$0xff] %vm677_vm2, %v3324_v39  ;;  %v3316_v37 = vadd.f32 %v3315_v51, %v6226_v24 }
 0x46c   : > { %v4031_v2 = vpop.f32.mrf.mxu1 }
 0x46d   : > { %3380 = vst.msk [vmem:[%s5975_s17 + $0xa8] sm:$0xff] %vm677_vm2, %v3316_v37  ;;  %v3337_v30 = vadd.f32 %v4031_v2, %v6227_v60 }
 0x46e   : > { %v3328_v9 = vpop.f32.mrf.mxu1 }
 0x46f   : > { %3385 = vst.msk [vmem:[%s5975_s17 + $0xd0] sm:$0xff] %vm677_vm2, %v3337_v30  ;;  %v3329_v54 = vadd.f32 %v3328_v9, %v6228_v21 }
 0x470   : > { %v4032_v50 = vpop.f32.mrf.mxu1 }
 0x471   : > { %3383 = vst.msk [vmem:[%s5975_s17 + $0xc0] sm:$0xff] %vm677_vm2, %v3329_v54  ;;  %v3340_v57 = vadd.f32 %v4032_v50, %v6229_v52 }
 0x472   : > { %v3331_v14 = vpop.f32.mrf.mxu1 }
 0x473   : > { %3386 = vst.msk [vmem:[%s5975_s17 + $0xd8] sm:$0xff] %vm677_vm2, %v3340_v57  ;;  %v3332_v1 = vadd.f32 %v3331_v14, %v6230_v61 }
 0x474   : > { %v4035_v16 = vpop.f32.mrf.mxu1 }
 0x475   : > { %3384 = vst.msk [vmem:[%s5975_s17 + $0xc8] sm:$0xff] %vm677_vm2, %v3332_v1  ;;  %v3353_v22 = vadd.f32 %v4035_v16, %v6231_v27 }
 0x476   : > { %v3344_v32 = vpop.f32.mrf.mxu1 }
 0x477   : > { %3389 = vst.msk [vmem:[%s5975_s17 + $0xf0] sm:$0xff] %vm677_vm2, %v3353_v22  ;;  %v3345_v48 = vadd.f32 %v3344_v32, %v6232_v20 }
 0x478   : > { %v4036_v45 = vpop.f32.mrf.mxu1 }
 0x479   : > { %3387 = vst.msk [vmem:[%s5975_s17 + $0xe0] sm:$0xff] %vm677_vm2, %v3345_v48  ;;  %v3356_v26 = vadd.f32 %v4036_v45, %v6233_v63 }
 0x47a   : > { %v3347_v15 = vpop.f32.mrf.mxu1 }
 0x47b   : > { %3390 = vst.msk [vmem:[%s5975_s17 + $0xf8] sm:$0xff] %vm677_vm2, %v3356_v26  ;;  %v3348_v17 = vadd.f32 %v3347_v15, %v6234_v47 }
 0x47d   : > { %3388 = vst.msk [vmem:[%s5975_s17 + $0xe8] sm:$0xff] %vm677_vm2, %v3348_v17 }
 0x47e PF: > { %s17_s26 = sadd.s32 1, %s4298_s26   ;;  %s6235_s24 = smov %s4294_s25 }
 0x47f   : > { %p14_p5 = scmp.ge.s32.totalorder %s17_s26, 4   ;;  %s6236_s25 = smov %s6238_s27 }
 0x481   :  { %16 = sbr.rel (!%p14_p5) target bundleno = 2 (0x2), region = 91 }

</bundles_post_ra>
